<compile_context>
chip_gen: v6e
topology: v6e:2x2x1
jax: 0.10.0
libtpu: 0.0.40
codegen_flags: <defaults>
</compile_context>

<pallas_src>
import numpy as np

import jax
import jax.numpy as jnp
from jax import lax
from jax.experimental import pallas as pl
from jax.experimental.pallas import tpu as pltpu


# ----------------------------------------------------------------------------
# Host-side construction of the structured 0/1 matrices (trace-time constants)
# ----------------------------------------------------------------------------
def _make_shift_matrices(H, W):
    """T[k] @ x_flat == x shifted by (dh-1, dw-1) with zero padding, k = dh*3+dw."""
    HW = H * W
    T = np.zeros((9, HW, HW), np.float64)
    for dh in range(3):
        for dw in range(3):
            k = dh * 3 + dw
            for h in range(H):
                hi = h + dh - 1
                if hi < 0 or hi >= H:
                    continue
                for w in range(W):
                    wi = w + dw - 1
                    if 0 <= wi < W:
                        T[k, h * W + w, hi * W + wi] = 1.0
    return T


def _make_pool_matrices(H, W):
    """P[i] @ y_flat selects corner i of every 2x2 window (for 2x2/2 max-pool)."""
    Ho, Wo = H // 2, W // 2
    P = np.zeros((4, Ho * Wo, H * W), np.float64)
    for di in range(2):
        for dj in range(2):
            i = di * 2 + dj
            for ho in range(Ho):
                for wo in range(Wo):
                    P[i, ho * Wo + wo, (2 * ho + di) * W + (2 * wo + dj)] = 1.0
    return P


# ----------------------------------------------------------------------------
# Parameter preparation (one-time, hoisted out of the hot path)
# ----------------------------------------------------------------------------
def prepare_kernel_params(params, x_range, y_range):
    H, W = x_range, y_range
    hidden = []
    for w, b in params["convs"]:
        cin, cout = int(w.shape[2]), int(w.shape[3])
        HW = H * W
        T = _make_shift_matrices(H, W)           # (9, HW, HW)
        P = _make_pool_matrices(H, W)            # (4, HW//4, HW)
        # Fused "shift then pool-select": tp[k, i*Q + r, :] == (P_i @ T_k)[r, :]
        tp = np.einsum("iqh,khp->kiqp", P, T).reshape(9, HW, HW)
        hidden.append((jnp.asarray(tp, jnp.float32),
                       jnp.asarray(w).reshape(9, cin, cout),
                       jnp.asarray(b).reshape(1, cout)))
        H, W = H // 2, W // 2

    # conv_out -> flatten(1) (NCHW order) -> final Linear is one affine map of
    # the last pooled activation A (HW, C_last):
    #     out[n] = const[n] + sum_{p,j} A[p, j] * D[p, j, n]
    w_o, b_o = params["conv_out"]                # (3,3,C_last,C_conv), (C_conv,)
    wf, bf = params["final"]                     # (n_out, C_conv*HW), (n_out,)
    HW = H * W
    c_last, c_conv = int(w_o.shape[2]), int(w_o.shape[3])
    n_out = int(wf.shape[0])
    T = _make_shift_matrices(H, W)                               # (9, HW, HW)
    w9 = np.asarray(w_o, np.float64).reshape(9, c_last, c_conv)
    wf_r = np.asarray(wf, np.float64).reshape(n_out, c_conv, HW)
    D = np.einsum("khp,kjc,nch->pjn", T, w9, wf_r)               # (HW, C_last, n_out)
    const = np.asarray(bf, np.float64) + np.einsum("nch,c->n", wf_r,
                                                   np.asarray(b_o, np.float64))
    final = (jnp.asarray(D, jnp.float32),
             jnp.asarray(const.reshape(1, n_out), jnp.float32))
    return {"hidden": hidden, "final": final}


# ----------------------------------------------------------------------------
# Fused Pallas kernel (whole network, one sample per grid step, VMEM resident)
# ----------------------------------------------------------------------------
def _make_fused_kernel(n_hidden):
    def kernel(*refs):
        x_ref = refs[0]
        o_ref = refs[-1]
        act = x_ref[0]                                  # (HW, C_in) for this sample
        idx = 1
        for _ in range(n_hidden):                       # conv + ReLU + 2x2 max-pool
            tp_ref, w_ref, b_ref = refs[idx:idx + 3]
            idx += 3
            hw_in = tp_ref.shape[1]                     # 4 * pooled spatial size
            q = hw_in // 4
            cout = w_ref.shape[2]
            acc = jnp.zeros((hw_in, cout), jnp.float32)
            for k in range(9):                          # static unroll over taps
                sel = jnp.dot(tp_ref[k], act, preferred_element_type=jnp.float32)
                acc = acc + jnp.dot(sel, w_ref[k], preferred_element_type=jnp.float32)
            m = jnp.maximum(jnp.maximum(acc[0:q], acc[q:2 * q]),
                            jnp.maximum(acc[2 * q:3 * q], acc[3 * q:4 * q]))
            act = jnp.maximum(m + b_ref[...], 0.0)      # bias + ReLU after the max

        # Folded conv_out + flatten(NCHW) + final Linear epilogue.
        d_ref, c_ref = refs[idx], refs[idx + 1]
        out = c_ref[...]                                # (1, n_out)
        for p in range(d_ref.shape[0]):                 # static unroll, tiny dots
            out = out + jnp.dot(act[p:p + 1, :], d_ref[p],
                                preferred_element_type=jnp.float32)
        o_ref[0] = out.astype(o_ref.dtype)

    return kernel


def _const_index_map(ndim):
    return lambda *_: (0,) * ndim


# ----------------------------------------------------------------------------
# Forward (single fused pallas_call)
# ----------------------------------------------------------------------------
def spectral_unmixer_forward(x_nchw, kparams):
    N, C, H, W = x_nchw.shape
    # Only remaining XLA glue: channels-last + flatten of the raw input (tiny).
    x_flat = jnp.transpose(x_nchw, (0, 2, 3, 1)).reshape(N, H * W, C)

    operands = [x_flat]
    in_specs = [pl.BlockSpec((1, H * W, C), lambda b: (b, 0, 0))]

    def add_const(arr):
        operands.append(arr)
        in_specs.append(pl.BlockSpec(arr.shape, _const_index_map(arr.ndim)))

    for tp, w, b in kparams["hidden"]:
        add_const(tp); add_const(w); add_const(b)
    d, const = kparams["final"]
    add_const(d); add_const(const)

    n_out = int(const.shape[-1])
    kernel = _make_fused_kernel(len(kparams["hidden"]))
    out = pl.pallas_call(
        kernel,
        out_shape=jax.ShapeDtypeStruct((N, 1, n_out), jnp.float32),
        grid=(N,),
        in_specs=in_specs,
        out_specs=pl.BlockSpec((1, 1, n_out), lambda b: (b, 0, 0)),
        compiler_params=pltpu.CompilerParams(
            dimension_semantics=("parallel",),        # one sample per TensorCore
            vmem_limit_bytes=32 * 1024 * 1024),       # ~6 MiB actually used
    )(*operands)
    return out.reshape(N, n_out)


# ----------------------------------------------------------------------------
# Pure-JAX reference (semantics of the PyTorch module, NCHW)
# ----------------------------------------------------------------------------
def reference_forward(x_nchw, params):
    x = x_nchw
    for w, b in params["convs"]:
        x = lax.conv_general_dilated(
            x, w, (1, 1), ((1, 1), (1, 1)),
            dimension_numbers=("NCHW", "HWIO", "NCHW")) + b[None, :, None, None]
        x = jnp.maximum(x, 0.0)
        x = lax.reduce_window(x, -jnp.inf, lax.max, (1, 1, 2, 2), (1, 1, 2, 2), "VALID")
    w, b = params["conv_out"]
    x = lax.conv_general_dilated(
        x, w, (1, 1), ((1, 1), (1, 1)),
        dimension_numbers=("NCHW", "HWIO", "NCHW")) + b[None, :, None, None]
    x = x.reshape(x.shape[0], -1)
    wf, bf = params["final"]
    return x @ wf.T + bf


# ----------------------------------------------------------------------------
# Deterministic parameter construction (synthetic, not a checkpoint load)
# ----------------------------------------------------------------------------
def init_params(key, x_range, y_range, size, latent_dim, num_classes):
    dims = [size] + list(latent_dim)
    keys = jax.random.split(key, 2 * (len(latent_dim) + 2))
    it = iter(keys)
    convs = []
    for i in range(len(latent_dim)):
        w = jax.random.normal(next(it), (3, 3, dims[i], dims[i + 1]), jnp.float32) * 0.1
        b = jax.random.normal(next(it), (dims[i + 1],), jnp.float32) * 0.1
        convs.append((w, b))
    c_out = size * num_classes
    w = jax.random.normal(next(it), (3, 3, latent_dim[-1], c_out), jnp.float32) * 0.1
    b = jax.random.normal(next(it), (c_out,), jnp.float32) * 0.1
    conv_out = (w, b)
    f_in = c_out * (x_range // 2 ** len(latent_dim)) * (y_range // 2 ** len(latent_dim))
    wf = jax.random.normal(next(it), (c_out, f_in), jnp.float32) * 0.05
    bf = jax.random.normal(next(it), (c_out,), jnp.float32) * 0.05
    return {"convs": convs, "conv_out": conv_out, "final": (wf, bf)}


if __name__ == "__main__":
    # Small config consistent with the module.
    x_range, y_range = 16, 16
    size = 4
    latent_dim = (8, 16)
    num_classes = 3
    batch = 2

    root = jax.random.PRNGKey(0)
    k_x, k_p = jax.random.split(root)
    x = jax.random.normal(k_x, (batch, size, x_range, y_range), jnp.float32)  # NCHW
    params = init_params(k_p, x_range, y_range, size, latent_dim, num_classes)
    kparams = prepare_kernel_params(params, x_range, y_range)

    fwd = jax.jit(spectral_unmixer_forward)
    out = jax.block_until_ready(fwd(x, kparams))
    assert out.shape == (batch, size * num_classes), out.shape

    ref = jax.block_until_ready(reference_forward(x, params))
    assert jnp.allclose(out, ref, atol=5e-4, rtol=1e-3), float(jnp.max(jnp.abs(out - ref)))

    print("KERNEL_OK")
</pallas_src>

<mosaic_0001>
module attributes {stable_mosaic.version = 11 : i64} {
  func.func @kernel(%arg0: i32, %arg1: memref<1x256x4xf32, #tpu.memory_space<vmem>>, %arg2: memref<9x256x256xf32, #tpu.memory_space<vmem>>, %arg3: memref<9x4x8xf32, #tpu.memory_space<vmem>>, %arg4: memref<1x8xf32, #tpu.memory_space<vmem>>, %arg5: memref<9x64x64xf32, #tpu.memory_space<vmem>>, %arg6: memref<9x8x16xf32, #tpu.memory_space<vmem>>, %arg7: memref<1x16xf32, #tpu.memory_space<vmem>>, %arg8: memref<16x16x12xf32, #tpu.memory_space<vmem>>, %arg9: memref<1x12xf32, #tpu.memory_space<vmem>>, %arg10: memref<1x1x12xf32, #tpu.memory_space<vmem>>) attributes {dimension_semantics = [#tpu.dimension_semantics<parallel>], iteration_bounds = array<i64: 2>, scalar_prefetch = 0 : i64, scratch_operands = 0 : i64, tpu.core_type = #tpu.core_type<tc>, window_params = [{transform_indices = @transform_0, window_bounds = array<i64: 1, 256, 4>}, {pipeline_mode = #tpu.pipeline_mode<synchronous>, transform_indices = @transform_1, window_bounds = array<i64: 9, 256, 256>}, {pipeline_mode = #tpu.pipeline_mode<synchronous>, transform_indices = @transform_2, window_bounds = array<i64: 9, 4, 8>}, {pipeline_mode = #tpu.pipeline_mode<synchronous>, transform_indices = @transform_3, window_bounds = array<i64: 1, 8>}, {pipeline_mode = #tpu.pipeline_mode<synchronous>, transform_indices = @transform_4, window_bounds = array<i64: 9, 64, 64>}, {pipeline_mode = #tpu.pipeline_mode<synchronous>, transform_indices = @transform_5, window_bounds = array<i64: 9, 8, 16>}, {pipeline_mode = #tpu.pipeline_mode<synchronous>, transform_indices = @transform_6, window_bounds = array<i64: 1, 16>}, {pipeline_mode = #tpu.pipeline_mode<synchronous>, transform_indices = @transform_7, window_bounds = array<i64: 16, 16, 12>}, {pipeline_mode = #tpu.pipeline_mode<synchronous>, transform_indices = @transform_8, window_bounds = array<i64: 1, 12>}, {transform_indices = @transform_9, window_bounds = array<i64: 1, 1, 12>}]} {
    %c0 = arith.constant 0 : index
    %c0_0 = arith.constant 0 : index
    %c0_1 = arith.constant 0 : index
    %0 = vector.load %arg1[%c0, %c0_0, %c0_1] : memref<1x256x4xf32, #tpu.memory_space<vmem>>, vector<1x256x4xf32>
    %1 = vector.shape_cast %0 : vector<1x256x4xf32> to vector<256x4xf32>
    %cst = arith.constant 0.000000e+00 : f32
    %2 = vector.broadcast %cst : f32 to vector<256x8xf32>
    %c0_2 = arith.constant 0 : index
    %c0_3 = arith.constant 0 : index
    %c0_4 = arith.constant 0 : index
    %3 = vector.load %arg2[%c0_2, %c0_3, %c0_4] : memref<9x256x256xf32, #tpu.memory_space<vmem>>, vector<1x256x256xf32>
    %4 = vector.shape_cast %3 : vector<1x256x256xf32> to vector<256x256xf32>
    %cst_5 = arith.constant dense<0.000000e+00> : vector<256x4xf32>
    %5 = tpu.matmul %4, %1, %cst_5 {dimension_numbers = #tpu.dot_dimension_numbers<[1], [0], [0], [1], [0, 0, 1, 1], [], []>} : vector<256x256xf32>, vector<256x4xf32>, vector<256x4xf32> -> vector<256x4xf32>
    %c0_6 = arith.constant 0 : index
    %c0_7 = arith.constant 0 : index
    %c0_8 = arith.constant 0 : index
    %6 = vector.load %arg3[%c0_6, %c0_7, %c0_8] : memref<9x4x8xf32, #tpu.memory_space<vmem>>, vector<1x4x8xf32>
    %7 = vector.shape_cast %6 : vector<1x4x8xf32> to vector<4x8xf32>
    %cst_9 = arith.constant dense<0.000000e+00> : vector<256x8xf32>
    %8 = tpu.matmul %5, %7, %cst_9 {dimension_numbers = #tpu.dot_dimension_numbers<[1], [0], [0], [1], [0, 0, 1, 1], [], []>} : vector<256x4xf32>, vector<4x8xf32>, vector<256x8xf32> -> vector<256x8xf32>
    %9 = arith.addf %2, %8 : vector<256x8xf32>
    %c1 = arith.constant 1 : index
    %c0_10 = arith.constant 0 : index
    %c0_11 = arith.constant 0 : index
    %10 = vector.load %arg2[%c1, %c0_10, %c0_11] : memref<9x256x256xf32, #tpu.memory_space<vmem>>, vector<1x256x256xf32>
    %11 = vector.shape_cast %10 : vector<1x256x256xf32> to vector<256x256xf32>
    %cst_12 = arith.constant dense<0.000000e+00> : vector<256x4xf32>
    %12 = tpu.matmul %11, %1, %cst_12 {dimension_numbers = #tpu.dot_dimension_numbers<[1], [0], [0], [1], [0, 0, 1, 1], [], []>} : vector<256x256xf32>, vector<256x4xf32>, vector<256x4xf32> -> vector<256x4xf32>
    %c1_13 = arith.constant 1 : index
    %c0_14 = arith.constant 0 : index
    %c0_15 = arith.constant 0 : index
    %13 = vector.load %arg3[%c1_13, %c0_14, %c0_15] : memref<9x4x8xf32, #tpu.memory_space<vmem>>, vector<1x4x8xf32>
    %14 = vector.shape_cast %13 : vector<1x4x8xf32> to vector<4x8xf32>
    %cst_16 = arith.constant dense<0.000000e+00> : vector<256x8xf32>
    %15 = tpu.matmul %12, %14, %cst_16 {dimension_numbers = #tpu.dot_dimension_numbers<[1], [0], [0], [1], [0, 0, 1, 1], [], []>} : vector<256x4xf32>, vector<4x8xf32>, vector<256x8xf32> -> vector<256x8xf32>
    %16 = arith.addf %9, %15 : vector<256x8xf32>
    %c2 = arith.constant 2 : index
    %c0_17 = arith.constant 0 : index
    %c0_18 = arith.constant 0 : index
    %17 = vector.load %arg2[%c2, %c0_17, %c0_18] : memref<9x256x256xf32, #tpu.memory_space<vmem>>, vector<1x256x256xf32>
    %18 = vector.shape_cast %17 : vector<1x256x256xf32> to vector<256x256xf32>
    %cst_19 = arith.constant dense<0.000000e+00> : vector<256x4xf32>
    %19 = tpu.matmul %18, %1, %cst_19 {dimension_numbers = #tpu.dot_dimension_numbers<[1], [0], [0], [1], [0, 0, 1, 1], [], []>} : vector<256x256xf32>, vector<256x4xf32>, vector<256x4xf32> -> vector<256x4xf32>
    %c2_20 = arith.constant 2 : index
    %c0_21 = arith.constant 0 : index
    %c0_22 = arith.constant 0 : index
    %20 = vector.load %arg3[%c2_20, %c0_21, %c0_22] : memref<9x4x8xf32, #tpu.memory_space<vmem>>, vector<1x4x8xf32>
    %21 = vector.shape_cast %20 : vector<1x4x8xf32> to vector<4x8xf32>
    %cst_23 = arith.constant dense<0.000000e+00> : vector<256x8xf32>
    %22 = tpu.matmul %19, %21, %cst_23 {dimension_numbers = #tpu.dot_dimension_numbers<[1], [0], [0], [1], [0, 0, 1, 1], [], []>} : vector<256x4xf32>, vector<4x8xf32>, vector<256x8xf32> -> vector<256x8xf32>
    %23 = arith.addf %16, %22 : vector<256x8xf32>
    %c3 = arith.constant 3 : index
    %c0_24 = arith.constant 0 : index
    %c0_25 = arith.constant 0 : index
    %24 = vector.load %arg2[%c3, %c0_24, %c0_25] : memref<9x256x256xf32, #tpu.memory_space<vmem>>, vector<1x256x256xf32>
    %25 = vector.shape_cast %24 : vector<1x256x256xf32> to vector<256x256xf32>
    %cst_26 = arith.constant dense<0.000000e+00> : vector<256x4xf32>
    %26 = tpu.matmul %25, %1, %cst_26 {dimension_numbers = #tpu.dot_dimension_numbers<[1], [0], [0], [1], [0, 0, 1, 1], [], []>} : vector<256x256xf32>, vector<256x4xf32>, vector<256x4xf32> -> vector<256x4xf32>
    %c3_27 = arith.constant 3 : index
    %c0_28 = arith.constant 0 : index
    %c0_29 = arith.constant 0 : index
    %27 = vector.load %arg3[%c3_27, %c0_28, %c0_29] : memref<9x4x8xf32, #tpu.memory_space<vmem>>, vector<1x4x8xf32>
    %28 = vector.shape_cast %27 : vector<1x4x8xf32> to vector<4x8xf32>
    %cst_30 = arith.constant dense<0.000000e+00> : vector<256x8xf32>
    %29 = tpu.matmul %26, %28, %cst_30 {dimension_numbers = #tpu.dot_dimension_numbers<[1], [0], [0], [1], [0, 0, 1, 1], [], []>} : vector<256x4xf32>, vector<4x8xf32>, vector<256x8xf32> -> vector<256x8xf32>
    %30 = arith.addf %23, %29 : vector<256x8xf32>
    %c4 = arith.constant 4 : index
    %c0_31 = arith.constant 0 : index
    %c0_32 = arith.constant 0 : index
    %31 = vector.load %arg2[%c4, %c0_31, %c0_32] : memref<9x256x256xf32, #tpu.memory_space<vmem>>, vector<1x256x256xf32>
    %32 = vector.shape_cast %31 : vector<1x256x256xf32> to vector<256x256xf32>
    %cst_33 = arith.constant dense<0.000000e+00> : vector<256x4xf32>
    %33 = tpu.matmul %32, %1, %cst_33 {dimension_numbers = #tpu.dot_dimension_numbers<[1], [0], [0], [1], [0, 0, 1, 1], [], []>} : vector<256x256xf32>, vector<256x4xf32>, vector<256x4xf32> -> vector<256x4xf32>
    %c4_34 = arith.constant 4 : index
    %c0_35 = arith.constant 0 : index
    %c0_36 = arith.constant 0 : index
    %34 = vector.load %arg3[%c4_34, %c0_35, %c0_36] : memref<9x4x8xf32, #tpu.memory_space<vmem>>, vector<1x4x8xf32>
    %35 = vector.shape_cast %34 : vector<1x4x8xf32> to vector<4x8xf32>
    %cst_37 = arith.constant dense<0.000000e+00> : vector<256x8xf32>
    %36 = tpu.matmul %33, %35, %cst_37 {dimension_numbers = #tpu.dot_dimension_numbers<[1], [0], [0], [1], [0, 0, 1, 1], [], []>} : vector<256x4xf32>, vector<4x8xf32>, vector<256x8xf32> -> vector<256x8xf32>
    %37 = arith.addf %30, %36 : vector<256x8xf32>
    %c5 = arith.constant 5 : index
    %c0_38 = arith.constant 0 : index
    %c0_39 = arith.constant 0 : index
    %38 = vector.load %arg2[%c5, %c0_38, %c0_39] : memref<9x256x256xf32, #tpu.memory_space<vmem>>, vector<1x256x256xf32>
    %39 = vector.shape_cast %38 : vector<1x256x256xf32> to vector<256x256xf32>
    %cst_40 = arith.constant dense<0.000000e+00> : vector<256x4xf32>
    %40 = tpu.matmul %39, %1, %cst_40 {dimension_numbers = #tpu.dot_dimension_numbers<[1], [0], [0], [1], [0, 0, 1, 1], [], []>} : vector<256x256xf32>, vector<256x4xf32>, vector<256x4xf32> -> vector<256x4xf32>
    %c5_41 = arith.constant 5 : index
    %c0_42 = arith.constant 0 : index
    %c0_43 = arith.constant 0 : index
    %41 = vector.load %arg3[%c5_41, %c0_42, %c0_43] : memref<9x4x8xf32, #tpu.memory_space<vmem>>, vector<1x4x8xf32>
    %42 = vector.shape_cast %41 : vector<1x4x8xf32> to vector<4x8xf32>
    %cst_44 = arith.constant dense<0.000000e+00> : vector<256x8xf32>
    %43 = tpu.matmul %40, %42, %cst_44 {dimension_numbers = #tpu.dot_dimension_numbers<[1], [0], [0], [1], [0, 0, 1, 1], [], []>} : vector<256x4xf32>, vector<4x8xf32>, vector<256x8xf32> -> vector<256x8xf32>
    %44 = arith.addf %37, %43 : vector<256x8xf32>
    %c6 = arith.constant 6 : index
    %c0_45 = arith.constant 0 : index
    %c0_46 = arith.constant 0 : index
    %45 = vector.load %arg2[%c6, %c0_45, %c0_46] : memref<9x256x256xf32, #tpu.memory_space<vmem>>, vector<1x256x256xf32>
    %46 = vector.shape_cast %45 : vector<1x256x256xf32> to vector<256x256xf32>
    %cst_47 = arith.constant dense<0.000000e+00> : vector<256x4xf32>
    %47 = tpu.matmul %46, %1, %cst_47 {dimension_numbers = #tpu.dot_dimension_numbers<[1], [0], [0], [1], [0, 0, 1, 1], [], []>} : vector<256x256xf32>, vector<256x4xf32>, vector<256x4xf32> -> vector<256x4xf32>
    %c6_48 = arith.constant 6 : index
    %c0_49 = arith.constant 0 : index
    %c0_50 = arith.constant 0 : index
    %48 = vector.load %arg3[%c6_48, %c0_49, %c0_50] : memref<9x4x8xf32, #tpu.memory_space<vmem>>, vector<1x4x8xf32>
    %49 = vector.shape_cast %48 : vector<1x4x8xf32> to vector<4x8xf32>
    %cst_51 = arith.constant dense<0.000000e+00> : vector<256x8xf32>
    %50 = tpu.matmul %47, %49, %cst_51 {dimension_numbers = #tpu.dot_dimension_numbers<[1], [0], [0], [1], [0, 0, 1, 1], [], []>} : vector<256x4xf32>, vector<4x8xf32>, vector<256x8xf32> -> vector<256x8xf32>
    %51 = arith.addf %44, %50 : vector<256x8xf32>
    %c7 = arith.constant 7 : index
    %c0_52 = arith.constant 0 : index
    %c0_53 = arith.constant 0 : index
    %52 = vector.load %arg2[%c7, %c0_52, %c0_53] : memref<9x256x256xf32, #tpu.memory_space<vmem>>, vector<1x256x256xf32>
    %53 = vector.shape_cast %52 : vector<1x256x256xf32> to vector<256x256xf32>
    %cst_54 = arith.constant dense<0.000000e+00> : vector<256x4xf32>
    %54 = tpu.matmul %53, %1, %cst_54 {dimension_numbers = #tpu.dot_dimension_numbers<[1], [0], [0], [1], [0, 0, 1, 1], [], []>} : vector<256x256xf32>, vector<256x4xf32>, vector<256x4xf32> -> vector<256x4xf32>
    %c7_55 = arith.constant 7 : index
    %c0_56 = arith.constant 0 : index
    %c0_57 = arith.constant 0 : index
    %55 = vector.load %arg3[%c7_55, %c0_56, %c0_57] : memref<9x4x8xf32, #tpu.memory_space<vmem>>, vector<1x4x8xf32>
    %56 = vector.shape_cast %55 : vector<1x4x8xf32> to vector<4x8xf32>
    %cst_58 = arith.constant dense<0.000000e+00> : vector<256x8xf32>
    %57 = tpu.matmul %54, %56, %cst_58 {dimension_numbers = #tpu.dot_dimension_numbers<[1], [0], [0], [1], [0, 0, 1, 1], [], []>} : vector<256x4xf32>, vector<4x8xf32>, vector<256x8xf32> -> vector<256x8xf32>
    %58 = arith.addf %51, %57 : vector<256x8xf32>
    %c8 = arith.constant 8 : index
    %c0_59 = arith.constant 0 : index
    %c0_60 = arith.constant 0 : index
    %59 = vector.load %arg2[%c8, %c0_59, %c0_60] : memref<9x256x256xf32, #tpu.memory_space<vmem>>, vector<1x256x256xf32>
    %60 = vector.shape_cast %59 : vector<1x256x256xf32> to vector<256x256xf32>
    %cst_61 = arith.constant dense<0.000000e+00> : vector<256x4xf32>
    %61 = tpu.matmul %60, %1, %cst_61 {dimension_numbers = #tpu.dot_dimension_numbers<[1], [0], [0], [1], [0, 0, 1, 1], [], []>} : vector<256x256xf32>, vector<256x4xf32>, vector<256x4xf32> -> vector<256x4xf32>
    %c8_62 = arith.constant 8 : index
    %c0_63 = arith.constant 0 : index
    %c0_64 = arith.constant 0 : index
    %62 = vector.load %arg3[%c8_62, %c0_63, %c0_64] : memref<9x4x8xf32, #tpu.memory_space<vmem>>, vector<1x4x8xf32>
    %63 = vector.shape_cast %62 : vector<1x4x8xf32> to vector<4x8xf32>
    %cst_65 = arith.constant dense<0.000000e+00> : vector<256x8xf32>
    %64 = tpu.matmul %61, %63, %cst_65 {dimension_numbers = #tpu.dot_dimension_numbers<[1], [0], [0], [1], [0, 0, 1, 1], [], []>} : vector<256x4xf32>, vector<4x8xf32>, vector<256x8xf32> -> vector<256x8xf32>
    %65 = arith.addf %58, %64 : vector<256x8xf32>
    %66 = vector.extract_strided_slice %65 {offsets = [0, 0], sizes = [64, 8], strides = [1, 1]} : vector<256x8xf32> to vector<64x8xf32>
    %67 = vector.extract_strided_slice %65 {offsets = [64, 0], sizes = [64, 8], strides = [1, 1]} : vector<256x8xf32> to vector<64x8xf32>
    %68 = arith.maximumf %66, %67 : vector<64x8xf32>
    %69 = vector.extract_strided_slice %65 {offsets = [128, 0], sizes = [64, 8], strides = [1, 1]} : vector<256x8xf32> to vector<64x8xf32>
    %70 = vector.extract_strided_slice %65 {offsets = [192, 0], sizes = [64, 8], strides = [1, 1]} : vector<256x8xf32> to vector<64x8xf32>
    %71 = arith.maximumf %69, %70 : vector<64x8xf32>
    %72 = arith.maximumf %68, %71 : vector<64x8xf32>
    %c0_66 = arith.constant 0 : index
    %c0_67 = arith.constant 0 : index
    %73 = vector.load %arg4[%c0_66, %c0_67] : memref<1x8xf32, #tpu.memory_space<vmem>>, vector<1x8xf32>
    %74 = vector.broadcast %73 : vector<1x8xf32> to vector<64x8xf32>
    %75 = arith.addf %72, %74 : vector<64x8xf32>
    %cst_68 = arith.constant 0.000000e+00 : f32
    %76 = vector.broadcast %cst_68 : f32 to vector<64x8xf32>
    %77 = arith.maximumf %75, %76 : vector<64x8xf32>
    %cst_69 = arith.constant 0.000000e+00 : f32
    %78 = vector.broadcast %cst_69 : f32 to vector<64x16xf32>
    %c0_70 = arith.constant 0 : index
    %c0_71 = arith.constant 0 : index
    %c0_72 = arith.constant 0 : index
    %79 = vector.load %arg5[%c0_70, %c0_71, %c0_72] : memref<9x64x64xf32, #tpu.memory_space<vmem>>, vector<1x64x64xf32>
    %80 = vector.shape_cast %79 : vector<1x64x64xf32> to vector<64x64xf32>
    %cst_73 = arith.constant dense<0.000000e+00> : vector<64x8xf32>
    %81 = tpu.matmul %80, %77, %cst_73 {dimension_numbers = #tpu.dot_dimension_numbers<[1], [0], [0], [1], [0, 0, 1, 1], [], []>} : vector<64x64xf32>, vector<64x8xf32>, vector<64x8xf32> -> vector<64x8xf32>
    %c0_74 = arith.constant 0 : index
    %c0_75 = arith.constant 0 : index
    %c0_76 = arith.constant 0 : index
    %82 = vector.load %arg6[%c0_74, %c0_75, %c0_76] : memref<9x8x16xf32, #tpu.memory_space<vmem>>, vector<1x8x16xf32>
    %83 = vector.shape_cast %82 : vector<1x8x16xf32> to vector<8x16xf32>
    %cst_77 = arith.constant dense<0.000000e+00> : vector<64x16xf32>
    %84 = tpu.matmul %81, %83, %cst_77 {dimension_numbers = #tpu.dot_dimension_numbers<[1], [0], [0], [1], [0, 0, 1, 1], [], []>} : vector<64x8xf32>, vector<8x16xf32>, vector<64x16xf32> -> vector<64x16xf32>
    %85 = arith.addf %78, %84 : vector<64x16xf32>
    %c1_78 = arith.constant 1 : index
    %c0_79 = arith.constant 0 : index
    %c0_80 = arith.constant 0 : index
    %86 = vector.load %arg5[%c1_78, %c0_79, %c0_80] : memref<9x64x64xf32, #tpu.memory_space<vmem>>, vector<1x64x64xf32>
    %87 = vector.shape_cast %86 : vector<1x64x64xf32> to vector<64x64xf32>
    %cst_81 = arith.constant dense<0.000000e+00> : vector<64x8xf32>
    %88 = tpu.matmul %87, %77, %cst_81 {dimension_numbers = #tpu.dot_dimension_numbers<[1], [0], [0], [1], [0, 0, 1, 1], [], []>} : vector<64x64xf32>, vector<64x8xf32>, vector<64x8xf32> -> vector<64x8xf32>
    %c1_82 = arith.constant 1 : index
    %c0_83 = arith.constant 0 : index
    %c0_84 = arith.constant 0 : index
    %89 = vector.load %arg6[%c1_82, %c0_83, %c0_84] : memref<9x8x16xf32, #tpu.memory_space<vmem>>, vector<1x8x16xf32>
    %90 = vector.shape_cast %89 : vector<1x8x16xf32> to vector<8x16xf32>
    %cst_85 = arith.constant dense<0.000000e+00> : vector<64x16xf32>
    %91 = tpu.matmul %88, %90, %cst_85 {dimension_numbers = #tpu.dot_dimension_numbers<[1], [0], [0], [1], [0, 0, 1, 1], [], []>} : vector<64x8xf32>, vector<8x16xf32>, vector<64x16xf32> -> vector<64x16xf32>
    %92 = arith.addf %85, %91 : vector<64x16xf32>
    %c2_86 = arith.constant 2 : index
    %c0_87 = arith.constant 0 : index
    %c0_88 = arith.constant 0 : index
    %93 = vector.load %arg5[%c2_86, %c0_87, %c0_88] : memref<9x64x64xf32, #tpu.memory_space<vmem>>, vector<1x64x64xf32>
    %94 = vector.shape_cast %93 : vector<1x64x64xf32> to vector<64x64xf32>
    %cst_89 = arith.constant dense<0.000000e+00> : vector<64x8xf32>
    %95 = tpu.matmul %94, %77, %cst_89 {dimension_numbers = #tpu.dot_dimension_numbers<[1], [0], [0], [1], [0, 0, 1, 1], [], []>} : vector<64x64xf32>, vector<64x8xf32>, vector<64x8xf32> -> vector<64x8xf32>
    %c2_90 = arith.constant 2 : index
    %c0_91 = arith.constant 0 : index
    %c0_92 = arith.constant 0 : index
    %96 = vector.load %arg6[%c2_90, %c0_91, %c0_92] : memref<9x8x16xf32, #tpu.memory_space<vmem>>, vector<1x8x16xf32>
    %97 = vector.shape_cast %96 : vector<1x8x16xf32> to vector<8x16xf32>
    %cst_93 = arith.constant dense<0.000000e+00> : vector<64x16xf32>
    %98 = tpu.matmul %95, %97, %cst_93 {dimension_numbers = #tpu.dot_dimension_numbers<[1], [0], [0], [1], [0, 0, 1, 1], [], []>} : vector<64x8xf32>, vector<8x16xf32>, vector<64x16xf32> -> vector<64x16xf32>
    %99 = arith.addf %92, %98 : vector<64x16xf32>
    %c3_94 = arith.constant 3 : index
    %c0_95 = arith.constant 0 : index
    %c0_96 = arith.constant 0 : index
    %100 = vector.load %arg5[%c3_94, %c0_95, %c0_96] : memref<9x64x64xf32, #tpu.memory_space<vmem>>, vector<1x64x64xf32>
    %101 = vector.shape_cast %100 : vector<1x64x64xf32> to vector<64x64xf32>
    %cst_97 = arith.constant dense<0.000000e+00> : vector<64x8xf32>
    %102 = tpu.matmul %101, %77, %cst_97 {dimension_numbers = #tpu.dot_dimension_numbers<[1], [0], [0], [1], [0, 0, 1, 1], [], []>} : vector<64x64xf32>, vector<64x8xf32>, vector<64x8xf32> -> vector<64x8xf32>
    %c3_98 = arith.constant 3 : index
    %c0_99 = arith.constant 0 : index
    %c0_100 = arith.constant 0 : index
    %103 = vector.load %arg6[%c3_98, %c0_99, %c0_100] : memref<9x8x16xf32, #tpu.memory_space<vmem>>, vector<1x8x16xf32>
    %104 = vector.shape_cast %103 : vector<1x8x16xf32> to vector<8x16xf32>
    %cst_101 = arith.constant dense<0.000000e+00> : vector<64x16xf32>
    %105 = tpu.matmul %102, %104, %cst_101 {dimension_numbers = #tpu.dot_dimension_numbers<[1], [0], [0], [1], [0, 0, 1, 1], [], []>} : vector<64x8xf32>, vector<8x16xf32>, vector<64x16xf32> -> vector<64x16xf32>
    %106 = arith.addf %99, %105 : vector<64x16xf32>
    %c4_102 = arith.constant 4 : index
    %c0_103 = arith.constant 0 : index
    %c0_104 = arith.constant 0 : index
    %107 = vector.load %arg5[%c4_102, %c0_103, %c0_104] : memref<9x64x64xf32, #tpu.memory_space<vmem>>, vector<1x64x64xf32>
    %108 = vector.shape_cast %107 : vector<1x64x64xf32> to vector<64x64xf32>
    %cst_105 = arith.constant dense<0.000000e+00> : vector<64x8xf32>
    %109 = tpu.matmul %108, %77, %cst_105 {dimension_numbers = #tpu.dot_dimension_numbers<[1], [0], [0], [1], [0, 0, 1, 1], [], []>} : vector<64x64xf32>, vector<64x8xf32>, vector<64x8xf32> -> vector<64x8xf32>
    %c4_106 = arith.constant 4 : index
    %c0_107 = arith.constant 0 : index
    %c0_108 = arith.constant 0 : index
    %110 = vector.load %arg6[%c4_106, %c0_107, %c0_108] : memref<9x8x16xf32, #tpu.memory_space<vmem>>, vector<1x8x16xf32>
    %111 = vector.shape_cast %110 : vector<1x8x16xf32> to vector<8x16xf32>
    %cst_109 = arith.constant dense<0.000000e+00> : vector<64x16xf32>
    %112 = tpu.matmul %109, %111, %cst_109 {dimension_numbers = #tpu.dot_dimension_numbers<[1], [0], [0], [1], [0, 0, 1, 1], [], []>} : vector<64x8xf32>, vector<8x16xf32>, vector<64x16xf32> -> vector<64x16xf32>
    %113 = arith.addf %106, %112 : vector<64x16xf32>
    %c5_110 = arith.constant 5 : index
    %c0_111 = arith.constant 0 : index
    %c0_112 = arith.constant 0 : index
    %114 = vector.load %arg5[%c5_110, %c0_111, %c0_112] : memref<9x64x64xf32, #tpu.memory_space<vmem>>, vector<1x64x64xf32>
    %115 = vector.shape_cast %114 : vector<1x64x64xf32> to vector<64x64xf32>
    %cst_113 = arith.constant dense<0.000000e+00> : vector<64x8xf32>
    %116 = tpu.matmul %115, %77, %cst_113 {dimension_numbers = #tpu.dot_dimension_numbers<[1], [0], [0], [1], [0, 0, 1, 1], [], []>} : vector<64x64xf32>, vector<64x8xf32>, vector<64x8xf32> -> vector<64x8xf32>
    %c5_114 = arith.constant 5 : index
    %c0_115 = arith.constant 0 : index
    %c0_116 = arith.constant 0 : index
    %117 = vector.load %arg6[%c5_114, %c0_115, %c0_116] : memref<9x8x16xf32, #tpu.memory_space<vmem>>, vector<1x8x16xf32>
    %118 = vector.shape_cast %117 : vector<1x8x16xf32> to vector<8x16xf32>
    %cst_117 = arith.constant dense<0.000000e+00> : vector<64x16xf32>
    %119 = tpu.matmul %116, %118, %cst_117 {dimension_numbers = #tpu.dot_dimension_numbers<[1], [0], [0], [1], [0, 0, 1, 1], [], []>} : vector<64x8xf32>, vector<8x16xf32>, vector<64x16xf32> -> vector<64x16xf32>
    %120 = arith.addf %113, %119 : vector<64x16xf32>
    %c6_118 = arith.constant 6 : index
    %c0_119 = arith.constant 0 : index
    %c0_120 = arith.constant 0 : index
    %121 = vector.load %arg5[%c6_118, %c0_119, %c0_120] : memref<9x64x64xf32, #tpu.memory_space<vmem>>, vector<1x64x64xf32>
    %122 = vector.shape_cast %121 : vector<1x64x64xf32> to vector<64x64xf32>
    %cst_121 = arith.constant dense<0.000000e+00> : vector<64x8xf32>
    %123 = tpu.matmul %122, %77, %cst_121 {dimension_numbers = #tpu.dot_dimension_numbers<[1], [0], [0], [1], [0, 0, 1, 1], [], []>} : vector<64x64xf32>, vector<64x8xf32>, vector<64x8xf32> -> vector<64x8xf32>
    %c6_122 = arith.constant 6 : index
    %c0_123 = arith.constant 0 : index
    %c0_124 = arith.constant 0 : index
    %124 = vector.load %arg6[%c6_122, %c0_123, %c0_124] : memref<9x8x16xf32, #tpu.memory_space<vmem>>, vector<1x8x16xf32>
    %125 = vector.shape_cast %124 : vector<1x8x16xf32> to vector<8x16xf32>
    %cst_125 = arith.constant dense<0.000000e+00> : vector<64x16xf32>
    %126 = tpu.matmul %123, %125, %cst_125 {dimension_numbers = #tpu.dot_dimension_numbers<[1], [0], [0], [1], [0, 0, 1, 1], [], []>} : vector<64x8xf32>, vector<8x16xf32>, vector<64x16xf32> -> vector<64x16xf32>
    %127 = arith.addf %120, %126 : vector<64x16xf32>
    %c7_126 = arith.constant 7 : index
    %c0_127 = arith.constant 0 : index
    %c0_128 = arith.constant 0 : index
    %128 = vector.load %arg5[%c7_126, %c0_127, %c0_128] : memref<9x64x64xf32, #tpu.memory_space<vmem>>, vector<1x64x64xf32>
    %129 = vector.shape_cast %128 : vector<1x64x64xf32> to vector<64x64xf32>
    %cst_129 = arith.constant dense<0.000000e+00> : vector<64x8xf32>
    %130 = tpu.matmul %129, %77, %cst_129 {dimension_numbers = #tpu.dot_dimension_numbers<[1], [0], [0], [1], [0, 0, 1, 1], [], []>} : vector<64x64xf32>, vector<64x8xf32>, vector<64x8xf32> -> vector<64x8xf32>
    %c7_130 = arith.constant 7 : index
    %c0_131 = arith.constant 0 : index
    %c0_132 = arith.constant 0 : index
    %131 = vector.load %arg6[%c7_130, %c0_131, %c0_132] : memref<9x8x16xf32, #tpu.memory_space<vmem>>, vector<1x8x16xf32>
    %132 = vector.shape_cast %131 : vector<1x8x16xf32> to vector<8x16xf32>
    %cst_133 = arith.constant dense<0.000000e+00> : vector<64x16xf32>
    %133 = tpu.matmul %130, %132, %cst_133 {dimension_numbers = #tpu.dot_dimension_numbers<[1], [0], [0], [1], [0, 0, 1, 1], [], []>} : vector<64x8xf32>, vector<8x16xf32>, vector<64x16xf32> -> vector<64x16xf32>
    %134 = arith.addf %127, %133 : vector<64x16xf32>
    %c8_134 = arith.constant 8 : index
    %c0_135 = arith.constant 0 : index
    %c0_136 = arith.constant 0 : index
    %135 = vector.load %arg5[%c8_134, %c0_135, %c0_136] : memref<9x64x64xf32, #tpu.memory_space<vmem>>, vector<1x64x64xf32>
    %136 = vector.shape_cast %135 : vector<1x64x64xf32> to vector<64x64xf32>
    %cst_137 = arith.constant dense<0.000000e+00> : vector<64x8xf32>
    %137 = tpu.matmul %136, %77, %cst_137 {dimension_numbers = #tpu.dot_dimension_numbers<[1], [0], [0], [1], [0, 0, 1, 1], [], []>} : vector<64x64xf32>, vector<64x8xf32>, vector<64x8xf32> -> vector<64x8xf32>
    %c8_138 = arith.constant 8 : index
    %c0_139 = arith.constant 0 : index
    %c0_140 = arith.constant 0 : index
    %138 = vector.load %arg6[%c8_138, %c0_139, %c0_140] : memref<9x8x16xf32, #tpu.memory_space<vmem>>, vector<1x8x16xf32>
    %139 = vector.shape_cast %138 : vector<1x8x16xf32> to vector<8x16xf32>
    %cst_141 = arith.constant dense<0.000000e+00> : vector<64x16xf32>
    %140 = tpu.matmul %137, %139, %cst_141 {dimension_numbers = #tpu.dot_dimension_numbers<[1], [0], [0], [1], [0, 0, 1, 1], [], []>} : vector<64x8xf32>, vector<8x16xf32>, vector<64x16xf32> -> vector<64x16xf32>
    %141 = arith.addf %134, %140 : vector<64x16xf32>
    %142 = vector.extract_strided_slice %141 {offsets = [0, 0], sizes = [16, 16], strides = [1, 1]} : vector<64x16xf32> to vector<16x16xf32>
    %143 = vector.extract_strided_slice %141 {offsets = [16, 0], sizes = [16, 16], strides = [1, 1]} : vector<64x16xf32> to vector<16x16xf32>
    %144 = arith.maximumf %142, %143 : vector<16x16xf32>
    %145 = vector.extract_strided_slice %141 {offsets = [32, 0], sizes = [16, 16], strides = [1, 1]} : vector<64x16xf32> to vector<16x16xf32>
    %146 = vector.extract_strided_slice %141 {offsets = [48, 0], sizes = [16, 16], strides = [1, 1]} : vector<64x16xf32> to vector<16x16xf32>
    %147 = arith.maximumf %145, %146 : vector<16x16xf32>
    %148 = arith.maximumf %144, %147 : vector<16x16xf32>
    %c0_142 = arith.constant 0 : index
    %c0_143 = arith.constant 0 : index
    %149 = vector.load %arg7[%c0_142, %c0_143] : memref<1x16xf32, #tpu.memory_space<vmem>>, vector<1x16xf32>
    %150 = vector.broadcast %149 : vector<1x16xf32> to vector<16x16xf32>
    %151 = arith.addf %148, %150 : vector<16x16xf32>
    %cst_144 = arith.constant 0.000000e+00 : f32
    %152 = vector.broadcast %cst_144 : f32 to vector<16x16xf32>
    %153 = arith.maximumf %151, %152 : vector<16x16xf32>
    %c0_145 = arith.constant 0 : index
    %c0_146 = arith.constant 0 : index
    %154 = vector.load %arg9[%c0_145, %c0_146] : memref<1x12xf32, #tpu.memory_space<vmem>>, vector<1x12xf32>
    %155 = vector.extract_strided_slice %153 {offsets = [0, 0], sizes = [1, 16], strides = [1, 1]} : vector<16x16xf32> to vector<1x16xf32>
    %c0_147 = arith.constant 0 : index
    %c0_148 = arith.constant 0 : index
    %c0_149 = arith.constant 0 : index
    %156 = vector.load %arg8[%c0_147, %c0_148, %c0_149] : memref<16x16x12xf32, #tpu.memory_space<vmem>>, vector<1x16x12xf32>
    %157 = vector.shape_cast %156 : vector<1x16x12xf32> to vector<16x12xf32>
    %cst_150 = arith.constant dense<0.000000e+00> : vector<1x12xf32>
    %158 = tpu.matmul %155, %157, %cst_150 {dimension_numbers = #tpu.dot_dimension_numbers<[1], [0], [0], [1], [0, 0, 1, 1], [], []>} : vector<1x16xf32>, vector<16x12xf32>, vector<1x12xf32> -> vector<1x12xf32>
    %159 = arith.addf %154, %158 : vector<1x12xf32>
    %160 = vector.extract_strided_slice %153 {offsets = [1, 0], sizes = [1, 16], strides = [1, 1]} : vector<16x16xf32> to vector<1x16xf32>
    %c1_151 = arith.constant 1 : index
    %c0_152 = arith.constant 0 : index
    %c0_153 = arith.constant 0 : index
    %161 = vector.load %arg8[%c1_151, %c0_152, %c0_153] : memref<16x16x12xf32, #tpu.memory_space<vmem>>, vector<1x16x12xf32>
    %162 = vector.shape_cast %161 : vector<1x16x12xf32> to vector<16x12xf32>
    %cst_154 = arith.constant dense<0.000000e+00> : vector<1x12xf32>
    %163 = tpu.matmul %160, %162, %cst_154 {dimension_numbers = #tpu.dot_dimension_numbers<[1], [0], [0], [1], [0, 0, 1, 1], [], []>} : vector<1x16xf32>, vector<16x12xf32>, vector<1x12xf32> -> vector<1x12xf32>
    %164 = arith.addf %159, %163 : vector<1x12xf32>
    %165 = vector.extract_strided_slice %153 {offsets = [2, 0], sizes = [1, 16], strides = [1, 1]} : vector<16x16xf32> to vector<1x16xf32>
    %c2_155 = arith.constant 2 : index
    %c0_156 = arith.constant 0 : index
    %c0_157 = arith.constant 0 : index
    %166 = vector.load %arg8[%c2_155, %c0_156, %c0_157] : memref<16x16x12xf32, #tpu.memory_space<vmem>>, vector<1x16x12xf32>
    %167 = vector.shape_cast %166 : vector<1x16x12xf32> to vector<16x12xf32>
    %cst_158 = arith.constant dense<0.000000e+00> : vector<1x12xf32>
    %168 = tpu.matmul %165, %167, %cst_158 {dimension_numbers = #tpu.dot_dimension_numbers<[1], [0], [0], [1], [0, 0, 1, 1], [], []>} : vector<1x16xf32>, vector<16x12xf32>, vector<1x12xf32> -> vector<1x12xf32>
    %169 = arith.addf %164, %168 : vector<1x12xf32>
    %170 = vector.extract_strided_slice %153 {offsets = [3, 0], sizes = [1, 16], strides = [1, 1]} : vector<16x16xf32> to vector<1x16xf32>
    %c3_159 = arith.constant 3 : index
    %c0_160 = arith.constant 0 : index
    %c0_161 = arith.constant 0 : index
    %171 = vector.load %arg8[%c3_159, %c0_160, %c0_161] : memref<16x16x12xf32, #tpu.memory_space<vmem>>, vector<1x16x12xf32>
    %172 = vector.shape_cast %171 : vector<1x16x12xf32> to vector<16x12xf32>
    %cst_162 = arith.constant dense<0.000000e+00> : vector<1x12xf32>
    %173 = tpu.matmul %170, %172, %cst_162 {dimension_numbers = #tpu.dot_dimension_numbers<[1], [0], [0], [1], [0, 0, 1, 1], [], []>} : vector<1x16xf32>, vector<16x12xf32>, vector<1x12xf32> -> vector<1x12xf32>
    %174 = arith.addf %169, %173 : vector<1x12xf32>
    %175 = vector.extract_strided_slice %153 {offsets = [4, 0], sizes = [1, 16], strides = [1, 1]} : vector<16x16xf32> to vector<1x16xf32>
    %c4_163 = arith.constant 4 : index
    %c0_164 = arith.constant 0 : index
    %c0_165 = arith.constant 0 : index
    %176 = vector.load %arg8[%c4_163, %c0_164, %c0_165] : memref<16x16x12xf32, #tpu.memory_space<vmem>>, vector<1x16x12xf32>
    %177 = vector.shape_cast %176 : vector<1x16x12xf32> to vector<16x12xf32>
    %cst_166 = arith.constant dense<0.000000e+00> : vector<1x12xf32>
    %178 = tpu.matmul %175, %177, %cst_166 {dimension_numbers = #tpu.dot_dimension_numbers<[1], [0], [0], [1], [0, 0, 1, 1], [], []>} : vector<1x16xf32>, vector<16x12xf32>, vector<1x12xf32> -> vector<1x12xf32>
    %179 = arith.addf %174, %178 : vector<1x12xf32>
    %180 = vector.extract_strided_slice %153 {offsets = [5, 0], sizes = [1, 16], strides = [1, 1]} : vector<16x16xf32> to vector<1x16xf32>
    %c5_167 = arith.constant 5 : index
    %c0_168 = arith.constant 0 : index
    %c0_169 = arith.constant 0 : index
    %181 = vector.load %arg8[%c5_167, %c0_168, %c0_169] : memref<16x16x12xf32, #tpu.memory_space<vmem>>, vector<1x16x12xf32>
    %182 = vector.shape_cast %181 : vector<1x16x12xf32> to vector<16x12xf32>
    %cst_170 = arith.constant dense<0.000000e+00> : vector<1x12xf32>
    %183 = tpu.matmul %180, %182, %cst_170 {dimension_numbers = #tpu.dot_dimension_numbers<[1], [0], [0], [1], [0, 0, 1, 1], [], []>} : vector<1x16xf32>, vector<16x12xf32>, vector<1x12xf32> -> vector<1x12xf32>
    %184 = arith.addf %179, %183 : vector<1x12xf32>
    %185 = vector.extract_strided_slice %153 {offsets = [6, 0], sizes = [1, 16], strides = [1, 1]} : vector<16x16xf32> to vector<1x16xf32>
    %c6_171 = arith.constant 6 : index
    %c0_172 = arith.constant 0 : index
    %c0_173 = arith.constant 0 : index
    %186 = vector.load %arg8[%c6_171, %c0_172, %c0_173] : memref<16x16x12xf32, #tpu.memory_space<vmem>>, vector<1x16x12xf32>
    %187 = vector.shape_cast %186 : vector<1x16x12xf32> to vector<16x12xf32>
    %cst_174 = arith.constant dense<0.000000e+00> : vector<1x12xf32>
    %188 = tpu.matmul %185, %187, %cst_174 {dimension_numbers = #tpu.dot_dimension_numbers<[1], [0], [0], [1], [0, 0, 1, 1], [], []>} : vector<1x16xf32>, vector<16x12xf32>, vector<1x12xf32> -> vector<1x12xf32>
    %189 = arith.addf %184, %188 : vector<1x12xf32>
    %190 = vector.extract_strided_slice %153 {offsets = [7, 0], sizes = [1, 16], strides = [1, 1]} : vector<16x16xf32> to vector<1x16xf32>
    %c7_175 = arith.constant 7 : index
    %c0_176 = arith.constant 0 : index
    %c0_177 = arith.constant 0 : index
    %191 = vector.load %arg8[%c7_175, %c0_176, %c0_177] : memref<16x16x12xf32, #tpu.memory_space<vmem>>, vector<1x16x12xf32>
    %192 = vector.shape_cast %191 : vector<1x16x12xf32> to vector<16x12xf32>
    %cst_178 = arith.constant dense<0.000000e+00> : vector<1x12xf32>
    %193 = tpu.matmul %190, %192, %cst_178 {dimension_numbers = #tpu.dot_dimension_numbers<[1], [0], [0], [1], [0, 0, 1, 1], [], []>} : vector<1x16xf32>, vector<16x12xf32>, vector<1x12xf32> -> vector<1x12xf32>
    %194 = arith.addf %189, %193 : vector<1x12xf32>
    %195 = vector.extract_strided_slice %153 {offsets = [8, 0], sizes = [1, 16], strides = [1, 1]} : vector<16x16xf32> to vector<1x16xf32>
    %c8_179 = arith.constant 8 : index
    %c0_180 = arith.constant 0 : index
    %c0_181 = arith.constant 0 : index
    %196 = vector.load %arg8[%c8_179, %c0_180, %c0_181] : memref<16x16x12xf32, #tpu.memory_space<vmem>>, vector<1x16x12xf32>
    %197 = vector.shape_cast %196 : vector<1x16x12xf32> to vector<16x12xf32>
    %cst_182 = arith.constant dense<0.000000e+00> : vector<1x12xf32>
    %198 = tpu.matmul %195, %197, %cst_182 {dimension_numbers = #tpu.dot_dimension_numbers<[1], [0], [0], [1], [0, 0, 1, 1], [], []>} : vector<1x16xf32>, vector<16x12xf32>, vector<1x12xf32> -> vector<1x12xf32>
    %199 = arith.addf %194, %198 : vector<1x12xf32>
    %200 = vector.extract_strided_slice %153 {offsets = [9, 0], sizes = [1, 16], strides = [1, 1]} : vector<16x16xf32> to vector<1x16xf32>
    %c9 = arith.constant 9 : index
    %c0_183 = arith.constant 0 : index
    %c0_184 = arith.constant 0 : index
    %201 = vector.load %arg8[%c9, %c0_183, %c0_184] : memref<16x16x12xf32, #tpu.memory_space<vmem>>, vector<1x16x12xf32>
    %202 = vector.shape_cast %201 : vector<1x16x12xf32> to vector<16x12xf32>
    %cst_185 = arith.constant dense<0.000000e+00> : vector<1x12xf32>
    %203 = tpu.matmul %200, %202, %cst_185 {dimension_numbers = #tpu.dot_dimension_numbers<[1], [0], [0], [1], [0, 0, 1, 1], [], []>} : vector<1x16xf32>, vector<16x12xf32>, vector<1x12xf32> -> vector<1x12xf32>
    %204 = arith.addf %199, %203 : vector<1x12xf32>
    %205 = vector.extract_strided_slice %153 {offsets = [10, 0], sizes = [1, 16], strides = [1, 1]} : vector<16x16xf32> to vector<1x16xf32>
    %c10 = arith.constant 10 : index
    %c0_186 = arith.constant 0 : index
    %c0_187 = arith.constant 0 : index
    %206 = vector.load %arg8[%c10, %c0_186, %c0_187] : memref<16x16x12xf32, #tpu.memory_space<vmem>>, vector<1x16x12xf32>
    %207 = vector.shape_cast %206 : vector<1x16x12xf32> to vector<16x12xf32>
    %cst_188 = arith.constant dense<0.000000e+00> : vector<1x12xf32>
    %208 = tpu.matmul %205, %207, %cst_188 {dimension_numbers = #tpu.dot_dimension_numbers<[1], [0], [0], [1], [0, 0, 1, 1], [], []>} : vector<1x16xf32>, vector<16x12xf32>, vector<1x12xf32> -> vector<1x12xf32>
    %209 = arith.addf %204, %208 : vector<1x12xf32>
    %210 = vector.extract_strided_slice %153 {offsets = [11, 0], sizes = [1, 16], strides = [1, 1]} : vector<16x16xf32> to vector<1x16xf32>
    %c11 = arith.constant 11 : index
    %c0_189 = arith.constant 0 : index
    %c0_190 = arith.constant 0 : index
    %211 = vector.load %arg8[%c11, %c0_189, %c0_190] : memref<16x16x12xf32, #tpu.memory_space<vmem>>, vector<1x16x12xf32>
    %212 = vector.shape_cast %211 : vector<1x16x12xf32> to vector<16x12xf32>
    %cst_191 = arith.constant dense<0.000000e+00> : vector<1x12xf32>
    %213 = tpu.matmul %210, %212, %cst_191 {dimension_numbers = #tpu.dot_dimension_numbers<[1], [0], [0], [1], [0, 0, 1, 1], [], []>} : vector<1x16xf32>, vector<16x12xf32>, vector<1x12xf32> -> vector<1x12xf32>
    %214 = arith.addf %209, %213 : vector<1x12xf32>
    %215 = vector.extract_strided_slice %153 {offsets = [12, 0], sizes = [1, 16], strides = [1, 1]} : vector<16x16xf32> to vector<1x16xf32>
    %c12 = arith.constant 12 : index
    %c0_192 = arith.constant 0 : index
    %c0_193 = arith.constant 0 : index
    %216 = vector.load %arg8[%c12, %c0_192, %c0_193] : memref<16x16x12xf32, #tpu.memory_space<vmem>>, vector<1x16x12xf32>
    %217 = vector.shape_cast %216 : vector<1x16x12xf32> to vector<16x12xf32>
    %cst_194 = arith.constant dense<0.000000e+00> : vector<1x12xf32>
    %218 = tpu.matmul %215, %217, %cst_194 {dimension_numbers = #tpu.dot_dimension_numbers<[1], [0], [0], [1], [0, 0, 1, 1], [], []>} : vector<1x16xf32>, vector<16x12xf32>, vector<1x12xf32> -> vector<1x12xf32>
    %219 = arith.addf %214, %218 : vector<1x12xf32>
    %220 = vector.extract_strided_slice %153 {offsets = [13, 0], sizes = [1, 16], strides = [1, 1]} : vector<16x16xf32> to vector<1x16xf32>
    %c13 = arith.constant 13 : index
    %c0_195 = arith.constant 0 : index
    %c0_196 = arith.constant 0 : index
    %221 = vector.load %arg8[%c13, %c0_195, %c0_196] : memref<16x16x12xf32, #tpu.memory_space<vmem>>, vector<1x16x12xf32>
    %222 = vector.shape_cast %221 : vector<1x16x12xf32> to vector<16x12xf32>
    %cst_197 = arith.constant dense<0.000000e+00> : vector<1x12xf32>
    %223 = tpu.matmul %220, %222, %cst_197 {dimension_numbers = #tpu.dot_dimension_numbers<[1], [0], [0], [1], [0, 0, 1, 1], [], []>} : vector<1x16xf32>, vector<16x12xf32>, vector<1x12xf32> -> vector<1x12xf32>
    %224 = arith.addf %219, %223 : vector<1x12xf32>
    %225 = vector.extract_strided_slice %153 {offsets = [14, 0], sizes = [1, 16], strides = [1, 1]} : vector<16x16xf32> to vector<1x16xf32>
    %c14 = arith.constant 14 : index
    %c0_198 = arith.constant 0 : index
    %c0_199 = arith.constant 0 : index
    %226 = vector.load %arg8[%c14, %c0_198, %c0_199] : memref<16x16x12xf32, #tpu.memory_space<vmem>>, vector<1x16x12xf32>
    %227 = vector.shape_cast %226 : vector<1x16x12xf32> to vector<16x12xf32>
    %cst_200 = arith.constant dense<0.000000e+00> : vector<1x12xf32>
    %228 = tpu.matmul %225, %227, %cst_200 {dimension_numbers = #tpu.dot_dimension_numbers<[1], [0], [0], [1], [0, 0, 1, 1], [], []>} : vector<1x16xf32>, vector<16x12xf32>, vector<1x12xf32> -> vector<1x12xf32>
    %229 = arith.addf %224, %228 : vector<1x12xf32>
    %230 = vector.extract_strided_slice %153 {offsets = [15, 0], sizes = [1, 16], strides = [1, 1]} : vector<16x16xf32> to vector<1x16xf32>
    %c15 = arith.constant 15 : index
    %c0_201 = arith.constant 0 : index
    %c0_202 = arith.constant 0 : index
    %231 = vector.load %arg8[%c15, %c0_201, %c0_202] : memref<16x16x12xf32, #tpu.memory_space<vmem>>, vector<1x16x12xf32>
    %232 = vector.shape_cast %231 : vector<1x16x12xf32> to vector<16x12xf32>
    %cst_203 = arith.constant dense<0.000000e+00> : vector<1x12xf32>
    %233 = tpu.matmul %230, %232, %cst_203 {dimension_numbers = #tpu.dot_dimension_numbers<[1], [0], [0], [1], [0, 0, 1, 1], [], []>} : vector<1x16xf32>, vector<16x12xf32>, vector<1x12xf32> -> vector<1x12xf32>
    %234 = arith.addf %229, %233 : vector<1x12xf32>
    %c0_204 = arith.constant 0 : index
    %c0_205 = arith.constant 0 : index
    %c0_206 = arith.constant 0 : index
    %235 = vector.load %arg10[%c0_204, %c0_205, %c0_206] : memref<1x1x12xf32, #tpu.memory_space<vmem>>, vector<1x1x12xf32>
    %236 = vector.shape_cast %235 : vector<1x1x12xf32> to vector<1x12xf32>
    %237 = vector.shape_cast %234 : vector<1x12xf32> to vector<1x1x12xf32>
    tpu.vector_store %arg10[%c0_204, %c0_205, %c0_206], %237 {strides = array<i32>} : memref<1x1x12xf32, #tpu.memory_space<vmem>>, vector<1x1x12xf32>,
    return
  }
  func.func @transform_0(%arg0: i32) -> (i32, i32, i32) {
    %c0_i32 = arith.constant 0 : i32
    %c0_i32_0 = arith.constant 0 : i32
    %c0_i32_1 = arith.constant 0 : i32
    return %arg0, %c0_i32, %c0_i32_0 : i32, i32, i32
  }
  func.func @transform_1(%arg0: i32) -> (i32, i32, i32) {
    %c0_i32 = arith.constant 0 : i32
    %c0_i32_0 = arith.constant 0 : i32
    %c0_i32_1 = arith.constant 0 : i32
    %c0_i32_2 = arith.constant 0 : i32
    return %c0_i32, %c0_i32_0, %c0_i32_1 : i32, i32, i32
  }
  func.func @transform_2(%arg0: i32) -> (i32, i32, i32) {
    %c0_i32 = arith.constant 0 : i32
    %c0_i32_0 = arith.constant 0 : i32
    %c0_i32_1 = arith.constant 0 : i32
    %c0_i32_2 = arith.constant 0 : i32
    return %c0_i32, %c0_i32_0, %c0_i32_1 : i32, i32, i32
  }
  func.func @transform_3(%arg0: i32) -> (i32, i32) {
    %c0_i32 = arith.constant 0 : i32
    %c0_i32_0 = arith.constant 0 : i32
    %c0_i32_1 = arith.constant 0 : i32
    return %c0_i32, %c0_i32_0 : i32, i32
  }
  func.func @transform_4(%arg0: i32) -> (i32, i32, i32) {
    %c0_i32 = arith.constant 0 : i32
    %c0_i32_0 = arith.constant 0 : i32
    %c0_i32_1 = arith.constant 0 : i32
    %c0_i32_2 = arith.constant 0 : i32
    return %c0_i32, %c0_i32_0, %c0_i32_1 : i32, i32, i32
  }
  func.func @transform_5(%arg0: i32) -> (i32, i32, i32) {
    %c0_i32 = arith.constant 0 : i32
    %c0_i32_0 = arith.constant 0 : i32
    %c0_i32_1 = arith.constant 0 : i32
    %c0_i32_2 = arith.constant 0 : i32
    return %c0_i32, %c0_i32_0, %c0_i32_1 : i32, i32, i32
  }
  func.func @transform_6(%arg0: i32) -> (i32, i32) {
    %c0_i32 = arith.constant 0 : i32
    %c0_i32_0 = arith.constant 0 : i32
    %c0_i32_1 = arith.constant 0 : i32
    return %c0_i32, %c0_i32_0 : i32, i32
  }
  func.func @transform_7(%arg0: i32) -> (i32, i32, i32) {
    %c0_i32 = arith.constant 0 : i32
    %c0_i32_0 = arith.constant 0 : i32
    %c0_i32_1 = arith.constant 0 : i32
    %c0_i32_2 = arith.constant 0 : i32
    return %c0_i32, %c0_i32_0, %c0_i32_1 : i32, i32, i32
  }
  func.func @transform_8(%arg0: i32) -> (i32, i32) {
    %c0_i32 = arith.constant 0 : i32
    %c0_i32_0 = arith.constant 0 : i32
    %c0_i32_1 = arith.constant 0 : i32
    return %c0_i32, %c0_i32_0 : i32, i32
  }
  func.func @transform_9(%arg0: i32) -> (i32, i32, i32) {
    %c0_i32 = arith.constant 0 : i32
    %c0_i32_0 = arith.constant 0 : i32
    %c0_i32_1 = arith.constant 0 : i32
    return %arg0, %c0_i32, %c0_i32_0 : i32, i32, i32
  }
}

</mosaic_0001>

<bundles_post_ra>
// kernel: spectral_unmixer_forward.1
= control target key start
LH: loop header
LB: loop body
LE: loop exit
PB: predicated region body
PF: predicated region fallthrough
CT: control target
= control target key end

     0   :  { %s15461_s0 = inlined_call_operand.vmem [shape: f32[2,256,4], index: 0, kind: input, shape index: {}]   ;;  %s15462_s1 = inlined_call_operand.hbm [shape: f32[9,256,256], index: 1, kind: input, shape index: {}]   ;;  %s15463_s2 = inlined_call_operand.vmem [shape: f32[9,4,8], index: 2, kind: input, shape index: {}]   ;;  %s15464_s3 = inlined_call_operand.hbm [shape: f32[1,8], index: 3, kind: input, shape index: {}]   ;;  %s15465_s4 = inlined_call_operand.hbm [shape: f32[9,64,64], index: 4, kind: input, shape index: {}]   ;;  %s15466_s5 = inlined_call_operand.hbm [shape: f32[9,8,16], index: 5, kind: input, shape index: {}]   ;;  %s15467_s6 = inlined_call_operand.hbm [shape: f32[1,16], index: 6, kind: input, shape index: {}]   ;;  %s15468_s7 = inlined_call_operand.vmem [shape: f32[16,16,12], index: 7, kind: input, shape index: {}]   ;;  %s15469_s8 = inlined_call_operand.hbm [shape: f32[1,12], index: 8, kind: input, shape index: {}]   ;;  %s15470_s9 = inlined_call_operand.hbm [shape: f32[2,1,12], index: 9, kind: output, shape index: {}]  }
   0x1   :  { %15479 = sst [smem:[#allocation149_spill]] %s15464_s3 }
   0x2   :  { %14 = vsyncpa [#allocation3], 0 }
   0x3   :  { %15 = vsyncpa [#allocation6], 0 }
   0x4   :  { %16 = vsyncpa [#allocation9], 0 }
   0x5   :  { %17 = vsyncpa [#allocation12], 0 }
   0x6   :  { %18 = vsyncpa [#allocation4], 0 }
   0x7   :  { %20 = vsyncpa [#allocation4 + $0x1], 0  ;;  %s12644_s30 = smov 0   ;;  %s12646_s10 = smov 0  }
   0x8   :  { %s12648_s11 = smov 0   ;;  %s12650_s12 = smov 0  }
   0x9 LB: > { %s12665_s13 = sadd.s32 4294967295, %s12579_s12   ;;  %s10116_s14 = sadd.s32 4294967294, %s12579_s12   ;;  %s12579_s12 = sphi %s12650_s12, %s15767_s12   ;;  %s12575_s11 = sphi %s12648_s11, %s15766_s11   ;;  %s12571_s10 = sphi %s12646_s10, %s15765_s10   ;;  %s12567_s30 = sphi %s12644_s30, %s15764_s30  }
   0xa   : > { %s12669_s15 = sadd.s32 1, %s12579_s12   ;;  %s227_s16 = sadd.s32 1, %s12575_s11 }
   0xb   : > { %s224_s17 = ssub.s32 %s12579_s12, %s12669_s15  ;;  %p237_p0 = scmp.ne.s32.totalorder %s12575_s11, %s12571_s10 }
   0xc   : > { %p225_p1 = scmp.eq.s32.totalorder %s224_s17, 0  ;;  %p238_p2 = scmp.eq.s32.totalorder %s12665_s13, 1 }
   0xd   : > { %p243_p3 = scmp.ne.s32.totalorder %s12571_s10, %s12567_s30  ;;  %p244_p4 = scmp.eq.s32.totalorder %s10116_s14, 1 }
   0xe   : > { %s12680_s18 = scalar_select %p225_p1, %s12575_s11, %s227_s16  }
   0xf   : > { %p12682_p5 = por %p238_p2, %p237_p0  ;;  %p12686_p6 = por %p244_p4, %p243_p3 }
  0x10   : > { %15480 = sst [smem:[#allocation19_spill]] %s12680_s18  ;;  %p10117_p7 = scmp.ge.s32.totalorder %s12579_s12, 1 }
  0x11   : > { %p251_p8 = scmp.lt.s32.totalorder %s12579_s12, 3  ;;  %p15471_p9 = scmp.eq.s32.totalorder %s12665_s13, 0 }
  0x12   : > { %s12581_s22 = smov [#allocation5]   ;;  %s12582_s25 = smov [#allocation8]  }
  0x13   : > { %p12693_p10 = pnand %p10117_p7, %p251_p8  ;;  %s280_s23 = sshll.u32 %s12581_s22, 4  ;;  %s281_s23 = int_to_ptr.vmem [resolvable:$true] %s280_s23 }
  0x14   : > { %s303_s26 = sshll.u32 %s12582_s25, 4  ;;  %s12583_s27 = smov [#allocation2]   ;;  %s12705_s26 = int_to_ptr.vmem [resolvable:$true] %s303_s26 }
  0x15   : > { %p12171_p11 = pneg %p12693_p10  ;;  %s263_s28 = sshll.u32 %s12583_s27, 4  ;;  %s264_s28 = int_to_ptr.vmem [resolvable:$true] %s263_s28 }
  0x16   : > { %s12358_s14 = scalar_lea.vmem %s281_s23, 16  ;;  %s12365_s16 = scalar_lea.vmem %s281_s23, 32 }
  0x17   : > { %p12701_p12 = pnand %p15471_p9, %p12171_p11  ;;  %p12359_p0 = scmp.ne.s32.totalorder %s281_s23, %s12358_s14 }
  0x18   : > { %p12366_p3 = scmp.lt.s32.totalorder %s281_s23, %s281_s23  ;;  %p12367_p4 = scmp.lt.s32.totalorder %s12365_s16, %s12358_s14 }
  0x19   : > { %p12709_p13 = pneg %p12701_p12 }
  0x1a   : > { %p12368_p7 = por %p12367_p4, %p12366_p3 }
  0x1b   : > { %p12361_p1 = pnand %p12359_p0, %p12709_p13 }
  0x1d   : > { %p12362_p2 = pneg %p12361_p1 }
  0x1f   : > { %p12369_p8 = pnand %p12368_p7, %p12362_p2 }
  0x21   : > { %12372 = shalt.err (!%p12369_p8)
}
  0x22   : > { %s15486_s3 = sld [smem:[#allocation149_spill]]  ;;  %s12384_s25 = scalar_lea.vmem %s12705_s26, 1152 }
  0x23   : > { %p12385_p11 = scmp.ne.s32.totalorder %s12705_s26, %s12384_s25  ;;  %p12392_p9 = scmp.lt.s32.totalorder %s12705_s26, %s12705_s26 }
  0x24   : > { %p12393_p3 = scmp.lt.s32.totalorder %s12384_s25, %s12384_s25 }
  0x25   : > { %p12387_p0 = pnand %p12385_p11, %p12709_p13 }
  0x26   : > { %p12394_p2 = por %p12393_p3, %p12392_p9 }
  0x27   : > { %p12388_p1 = pneg %p12387_p0 }
  0x28   : > { %12177 = dma.hbm_to_vmem [thread:$0]  (!%p12701_p12), %s15486_s3, 16, %s281_s23, [#allocation6]  }
  0x29   : > { %p12395_p4 = pnand %p12394_p2, %p12388_p1 }
  0x2b   : > { %12398 = shalt.err (!%p12395_p4)
}
  0x2c   : > { %s15472_s27 = smov 128   ;;  %s15473_s14 = smov 8  }
  0x2d   : > { %12183 = dma.hbm_to_vmem [thread:$0]  (!%p12701_p12), %s15466_s5, 1152, %s12705_s26, [#allocation9], %s15472_s27, %s15472_s27, %s15473_s14  }
  0x2e   : > { %s12410_s17 = scalar_lea.vmem %s264_s28, 73728  ;;  %p12418_p11 = scmp.lt.s32.totalorder %s264_s28, %s264_s28 }
  0x2f   : > { %p12411_p7 = scmp.ne.s32.totalorder %s264_s28, %s12410_s17  ;;  %p12419_p0 = scmp.lt.s32.totalorder %s12410_s17, %s12410_s17 }
  0x31   : > { %p12413_p9 = pnand %p12411_p7, %p12709_p13  ;;  %p12420_p1 = por %p12419_p0, %p12418_p11 }
  0x33   : > { %p12414_p8 = pneg %p12413_p9 }
  0x35   : > { %p12421_p3 = pnand %p12420_p1, %p12414_p8 }
  0x37   : > { %12424 = shalt.err (!%p12421_p3)
}
  0x38   : > { %s12586_s22 = smov 256   ;;  %s12587_s25 = smov 16  }
  0x39   : > { %12174 = dma.hbm_to_vmem [thread:$0]  (!%p12701_p12), %s15462_s1, 73728, %s264_s28, [#allocation3], %s12586_s22, %s12586_s22, %s12587_s25  }
  0x3a   : > { %s12588_s26 = smov [#allocation7]   ;;  %s12589_s16 = smov [#allocation10]  }
  0x3b   : > { %s290_s23 = sshll.u32 %s12588_s26, 4  ;;  %s317_s27 = sshll.u32 %s12589_s16, 4  ;;  %s291_s23 = int_to_ptr.vmem [resolvable:$true] %s290_s23  ;;  %s318_s27 = int_to_ptr.vmem [resolvable:$true] %s317_s27 }
  0x3c   : > { %s12436_s14 = scalar_lea.vmem %s291_s23, 9216  ;;  %p12444_p9 = scmp.lt.s32.totalorder %s291_s23, %s291_s23 }
  0x3d   : > { %p12437_p2 = scmp.ne.s32.totalorder %s291_s23, %s12436_s14  ;;  %p12445_p8 = scmp.lt.s32.totalorder %s12436_s14, %s12436_s14 }
  0x3f   : > { %p12439_p4 = pnand %p12437_p2, %p12709_p13  ;;  %p12446_p11 = por %p12445_p8, %p12444_p9 }
  0x41   : > { %p12440_p7 = pneg %p12439_p4 }
  0x43   : > { %p12447_p0 = pnand %p12446_p11, %p12440_p7 }
  0x45   : > { %12450 = shalt.err (!%p12447_p0)
}
  0x46   : > { %s15487_s17 = smov 8   ;;  %s15488_s3 = smov 128  }
  0x47   : > { %12180 = dma.hbm_to_vmem [thread:$0]  (!%p12701_p12), %s15465_s4, 9216, %s291_s23, [#allocation6], %s15488_s3, %s15488_s3, %s15487_s17  }
  0x48   : > { %s12462_s22 = scalar_lea.vmem %s318_s27, 16  ;;  %s12469_s14 = scalar_lea.vmem %s318_s27, 32 }
  0x49   : > { %p12463_p1 = scmp.ne.s32.totalorder %s318_s27, %s12462_s22  ;;  %p12470_p4 = scmp.lt.s32.totalorder %s318_s27, %s318_s27 }
  0x4a   : > { %p12471_p7 = scmp.lt.s32.totalorder %s12469_s14, %s12462_s22 }
  0x4b   : > { %p12465_p3 = pnand %p12463_p1, %p12709_p13 }
  0x4c   : > { %p12472_p9 = por %p12471_p7, %p12470_p4 }
  0x4d   : > { %p12466_p2 = pneg %p12465_p3 }
  0x4f   : > { %p12473_p8 = pnand %p12472_p9, %p12466_p2 }
  0x51   : > { %12476 = shalt.err (!%p12473_p8)
}
  0x52   : > { %12186 = dma.hbm_to_vmem [thread:$0]  (!%p12701_p12), %s15467_s6, 16, %s318_s27, [#allocation9]  }
  0x53   : > { %s12590_s23 = smov [#allocation11]  }
  0x54   : > { %s331_s16 = sshll.u32 %s12590_s23, 4  ;;  %s332_s16 = int_to_ptr.vmem [resolvable:$true] %s331_s16 }
  0x55   : > { %s12488_s17 = scalar_lea.vmem %s332_s16, 16  ;;  %s12495_s3 = scalar_lea.vmem %s332_s16, 32 }
  0x56   : > { %p12489_p11 = scmp.ne.s32.totalorder %s332_s16, %s12488_s17  ;;  %p12496_p3 = scmp.lt.s32.totalorder %s332_s16, %s332_s16 }
  0x57   : > { %p12497_p4 = scmp.lt.s32.totalorder %s12495_s3, %s12488_s17 }
  0x58   : > { %p12491_p0 = pnand %p12489_p11, %p12709_p13 }
  0x59   : > { %p12498_p2 = por %p12497_p4, %p12496_p3 }
  0x5a   : > { %p12492_p1 = pneg %p12491_p0 }
  0x5c   : > { %p12499_p7 = pnand %p12498_p2, %p12492_p1 }
  0x5e   : > { %12502 = shalt.err (!%p12499_p7)
}
  0x5f   : > { %12189 = dma.hbm_to_vmem [thread:$0]  (!%p12701_p12), %s15469_s8, 16, %s332_s16, [#allocation12]  }
  0x60   : > { %352 = sbr.rel (%p12693_p10) target bundleno = 3780 (0xec4), region = 56 }
  0x65   : > { %p15489_p9 = scmp.eq.s32.totalorder %s12665_s13, 0 }
  0x67   : > { %12546 = dma.done.wait (%p15489_p9), [#allocation3], 73728   ;;  %p15490_p13 = pmov %p15489_p9 }
  0x68   : > { %p15491_p8 = pmov %p15489_p9 }
  0x69   : > { %12548 = vsyncadd (%p15490_p13), [#allocation3], 4294893568 }
  0x6a   : > { %12550 = dma.done.wait (%p15491_p8), [#allocation6], 9232   ;;  %p15492_p11 = pmov %p15491_p8 }
  0x6b   : > { %p15493_p0 = pmov %p15491_p8 }
  0x6c   : > { %12552 = vsyncadd (%p15492_p11), [#allocation6], 4294958064 }
  0x6d   : > { %12554 = dma.done.wait (%p15493_p0), [#allocation9], 1168   ;;  %p15494_p12 = pmov %p15493_p0 }
  0x6e   : > { %p15495_p10 = pmov %p15493_p0 }
  0x6f   : > { %12556 = vsyncadd (%p15494_p12), [#allocation9], 4294966128 }
  0x70   : > { %12558 = dma.done.wait (%p15495_p10), [#allocation12], 16   ;;  %p15496_p1 = pmov %p15493_p0 }
  0x71   : > { %p407_p3 = scmp.lt.s32.totalorder %s12665_s13, 1  ;;  %v15474_v0 = vmov 0.0   ;;  %v445_v33 = vld [vmem:[#allocation2 + $0x8] sm:$0xff]  ;;  %v444_v35 = vld [vmem:[#allocation2] sm:$0xff]  ;;  %v447_v37 = vld [vmem:[#allocation2 + $0x18] sm:$0xff]  ;;  %vm1123_vm0 = vcmask 1043456  }
  0x72   : > { %12560 = vsyncadd (%p15496_p1), [#allocation12], 4294967280  ;;  %508 = vmatprep.subr.mxu0 %v15474_v0  ;;  %799 = vmatprep.subr.mxu1 %v15474_v0  ;;  %v736_v34 = vld [vmem:[#allocation2 + $0x208] sm:$0xff]  ;;  %v735_v36 = vld [vmem:[#allocation2 + $0x200] sm:$0xff]  ;;  %vm1026_vm1 = vcmask 31744   ;;  %vm6267_vm2 = vcmask 523264  }
  0x73   : > { %s408_s21 = scalar_select %p407_p3, %s12665_s13, 1  ;;  %572 = vmatprep.mubr.f32.mxu0 %v445_v33  ;;  %v738_v38 = vld [vmem:[#allocation2 + $0x218] sm:$0xff]  ;;  %863 = vmatprep.mubr.f32.mxu1 %v736_v34  ;;  %v446_v39 = vld [vmem:[#allocation2 + $0x10] sm:$0xff]  ;;  %v449_v41 = vld [vmem:[#allocation2 + $0x28] sm:$0xff]  ;;  %vm6538_vm3 = vcmask 64512   ;;  %vm12592_vm4 = vmmov 0  }
  0x74   : > { %v737_v40 = vld [vmem:[#allocation2 + $0x210] sm:$0xff]  ;;  %v740_v42 = vld [vmem:[#allocation2 + $0x228] sm:$0xff]  ;;  %v448_v43 = vld [vmem:[#allocation2 + $0x20] sm:$0xff]  ;;  %vm8756_vm5 = vcmask 130048   ;;  %s405_s27 = sand.u32 1, %s12571_s10   ;;  %s10631_s14 = sshll.u32 %s12665_s13, 4 }
  0x75   : > { %s10634_s24 = sshll.u32 %s408_s21, 8  ;;  %v739_v44 = vld [vmem:[#allocation2 + $0x220] sm:$0xff]  ;;  %v451_v45 = vld [vmem:[#allocation2 + $0x38] sm:$0xff]  ;;  %v450_v47 = vld [vmem:[#allocation2 + $0x30] sm:$0xff]  ;;  %vm9986_vm6 = vcmask 90112   ;;  %s15426_s16 = scalar_lea.hbm %s15470_s9, %s10631_s14 }
  0x76   : > { %s12791_s22 = scalar_lea.vmem %s15461_s0, %s10634_s24  ;;  %v742_v46 = vld [vmem:[#allocation2 + $0x238] sm:$0xff]  ;;  %v741_v48 = vld [vmem:[#allocation2 + $0x230] sm:$0xff]  ;;  %v453_v49 = vld [vmem:[#allocation2 + $0x48] sm:$0xff]  ;;  %s9989_s17 = scalar_lea.sflag [#allocation4], %s405_s27 }
  0x77   : > { %v12794_v1 = vld [vmem:[%s12791_s22 + $0x78] sm:$0xff]  ;;  %v12797_v2 = vld [vmem:[%s12791_s22 + $0x70] sm:$0xff]  ;;  %v12804_v3 = vld [vmem:[%s12791_s22 + $0x68] sm:$0xff]  ;;  %s12593_s13 = smov [#allocation13]  }
  0x78   : > { %509 = vmatpush1.msra.mxu0 %v12794_v1  ;;  %800 = vmatpush1.msra.mxu1 %v12794_v1  ;;  %v12811_v4 = vld [vmem:[%s12791_s22 + $0x60] sm:$0xff]  ;;  %v12818_v5 = vld [vmem:[%s12791_s22 + $0x58] sm:$0xff]  ;;  %v12825_v6 = vld [vmem:[%s12791_s22 + $0x50] sm:$0xff]  ;;  %s12507_s18 = sshll.u32 %s12593_s13, 4  ;;  %s12508_s18 = int_to_ptr.vmem [resolvable:$false] %s12507_s18 }
  0x79   : > { %510 = vmatprep.subr.mxu0 %v15474_v0  ;;  %801 = vmatprep.subr.mxu1 %v15474_v0  ;;  %v12832_v7 = vld [vmem:[%s12791_s22 + $0x48] sm:$0xff]  ;;  %v12839_v8 = vld [vmem:[%s12791_s22 + $0x40] sm:$0xff]  ;;  %v12846_v9 = vld [vmem:[%s12791_s22 + $0x38] sm:$0xff]  ;;  %s12509_s28 = scalar_lea.vmem %s12508_s18, 32 }
  0x7a   : > { %511 = vmatpush1.msra.mxu0 %v12797_v2  ;;  %802 = vmatpush1.msra.mxu1 %v12797_v2  ;;  %v12853_v10 = vld [vmem:[%s12791_s22 + $0x30] sm:$0xff]  ;;  %v12860_v11 = vld [vmem:[%s12791_s22 + $0x28] sm:$0xff]  ;;  %v12867_v12 = vld [vmem:[%s12791_s22 + $0x20] sm:$0xff] }
  0x7b   : > { %512 = vmatprep.subr.mxu0 %v15474_v0  ;;  %803 = vmatprep.subr.mxu1 %v15474_v0  ;;  %v12874_v13 = vld [vmem:[%s12791_s22 + $0x18] sm:$0xff]  ;;  %v12881_v14 = vld [vmem:[%s12791_s22 + $0x10] sm:$0xff]  ;;  %v12888_v15 = vld [vmem:[%s12791_s22 + $0x8] sm:$0xff] }
  0x7c   : > { %513 = vmatpush1.msra.mxu0 %v12804_v3  ;;  %804 = vmatpush1.msra.mxu1 %v12804_v3  ;;  %v12895_v16 = vld [vmem:[%s12791_s22] sm:$0xff]  ;;  %v12902_v17 = vld [vmem:[%s12791_s22 + $0xf8] sm:$0xff]  ;;  %v12909_v18 = vld [vmem:[%s12791_s22 + $0xf0] sm:$0xff] }
  0x7d   : > { %514 = vmatprep.subr.mxu0 %v15474_v0  ;;  %805 = vmatprep.subr.mxu1 %v15474_v0  ;;  %v12916_v19 = vld [vmem:[%s12791_s22 + $0xe8] sm:$0xff]  ;;  %v12923_v20 = vld [vmem:[%s12791_s22 + $0xe0] sm:$0xff]  ;;  %v12930_v21 = vld [vmem:[%s12791_s22 + $0xd8] sm:$0xff] }
  0x7e   : > { %515 = vmatpush1.msra.mxu0 %v12811_v4  ;;  %806 = vmatpush1.msra.mxu1 %v12811_v4  ;;  %v12937_v22 = vld [vmem:[%s12791_s22 + $0xd0] sm:$0xff]  ;;  %v12944_v23 = vld [vmem:[%s12791_s22 + $0xc8] sm:$0xff]  ;;  %v12951_v24 = vld [vmem:[%s12791_s22 + $0xc0] sm:$0xff] }
  0x7f   : > { %516 = vmatprep.subr.mxu0 %v15474_v0  ;;  %807 = vmatprep.subr.mxu1 %v15474_v0  ;;  %v12958_v25 = vld [vmem:[%s12791_s22 + $0xb8] sm:$0xff]  ;;  %v12965_v26 = vld [vmem:[%s12791_s22 + $0xb0] sm:$0xff]  ;;  %v12972_v27 = vld [vmem:[%s12791_s22 + $0xa8] sm:$0xff] }
  0x80   : > { %517 = vmatpush1.msra.mxu0 %v12818_v5  ;;  %808 = vmatpush1.msra.mxu1 %v12818_v5  ;;  %v12979_v28 = vld [vmem:[%s12791_s22 + $0xa0] sm:$0xff]  ;;  %v12986_v29 = vld [vmem:[%s12791_s22 + $0x98] sm:$0xff]  ;;  %v12993_v30 = vld [vmem:[%s12791_s22 + $0x90] sm:$0xff] }
  0x81   : > { %518 = vmatprep.subr.mxu0 %v15474_v0  ;;  %809 = vmatprep.subr.mxu1 %v15474_v0  ;;  %v13000_v31 = vld [vmem:[%s12791_s22 + $0x88] sm:$0xff]  ;;  %v13007_v32 = vld [vmem:[%s12791_s22 + $0x80] sm:$0xff]  ;;  %v455_v53 = vld [vmem:[#allocation2 + $0x58] sm:$0xff] }
  0x82   : > { %519 = vmatpush1.msra.mxu0 %v12825_v6  ;;  %810 = vmatpush1.msra.mxu1 %v12825_v6  ;;  %v744_v50 = vld [vmem:[#allocation2 + $0x248] sm:$0xff]  ;;  %v452_v51 = vld [vmem:[#allocation2 + $0x40] sm:$0xff]  ;;  %v746_v54 = vld [vmem:[#allocation2 + $0x258] sm:$0xff] }
  0x83   : > { %520 = vmatprep.subr.mxu0 %v15474_v0  ;;  %811 = vmatprep.subr.mxu1 %v15474_v0  ;;  %v743_v52 = vld [vmem:[#allocation2 + $0x240] sm:$0xff]  ;;  %v454_v55 = vld [vmem:[#allocation2 + $0x50] sm:$0xff]  ;;  %v457_v57 = vld [vmem:[#allocation2 + $0x68] sm:$0xff] }
  0x84   : > { %521 = vmatpush1.msra.mxu0 %v12832_v7  ;;  %812 = vmatpush1.msra.mxu1 %v12832_v7  ;;  %v745_v56 = vld [vmem:[#allocation2 + $0x250] sm:$0xff]  ;;  %v748_v58 = vld [vmem:[#allocation2 + $0x268] sm:$0xff]  ;;  %v456_v59 = vld [vmem:[#allocation2 + $0x60] sm:$0xff] }
  0x85   : > { %522 = vmatprep.subr.mxu0 %v15474_v0  ;;  %813 = vmatprep.subr.mxu1 %v15474_v0  ;;  %v747_v60 = vld [vmem:[#allocation2 + $0x260] sm:$0xff]  ;;  %v459_v61 = vld [vmem:[#allocation2 + $0x78] sm:$0xff]  ;;  %v458_v63 = vld [vmem:[#allocation2 + $0x70] sm:$0xff] }
  0x86   : > { %523 = vmatpush1.msra.mxu0 %v12839_v8  ;;  %814 = vmatpush1.msra.mxu1 %v12839_v8  ;;  %v750_v62 = vld [vmem:[#allocation2 + $0x278] sm:$0xff]  ;;  %v749_v33 = vld [vmem:[#allocation2 + $0x270] sm:$0xff]  ;;  %v461_v34 = vld [vmem:[#allocation2 + $0x88] sm:$0xff] }
  0x87   : > { %524 = vmatprep.subr.mxu0 %v15474_v0  ;;  %815 = vmatprep.subr.mxu1 %v15474_v0 }
  0x88   : > { %525 = vmatpush1.msra.mxu0 %v12846_v9  ;;  %816 = vmatpush1.msra.mxu1 %v12846_v9 }
  0x89   : > { %526 = vmatprep.subr.mxu0 %v15474_v0  ;;  %817 = vmatprep.subr.mxu1 %v15474_v0 }
  0x8a   : > { %527 = vmatpush1.msra.mxu0 %v12853_v10  ;;  %818 = vmatpush1.msra.mxu1 %v12853_v10 }
  0x8b   : > { %528 = vmatprep.subr.mxu0 %v15474_v0  ;;  %819 = vmatprep.subr.mxu1 %v15474_v0 }
  0x8c   : > { %529 = vmatpush1.msra.mxu0 %v12860_v11  ;;  %820 = vmatpush1.msra.mxu1 %v12860_v11 }
  0x8d   : > { %530 = vmatprep.subr.mxu0 %v15474_v0  ;;  %821 = vmatprep.subr.mxu1 %v15474_v0 }
  0x8e   : > { %531 = vmatpush1.msra.mxu0 %v12867_v12  ;;  %822 = vmatpush1.msra.mxu1 %v12867_v12 }
  0x8f   : > { %532 = vmatprep.subr.mxu0 %v15474_v0  ;;  %823 = vmatprep.subr.mxu1 %v15474_v0 }
  0x90   : > { %533 = vmatpush1.msra.mxu0 %v12874_v13  ;;  %824 = vmatpush1.msra.mxu1 %v12874_v13 }
  0x91   : > { %534 = vmatprep.subr.mxu0 %v15474_v0  ;;  %825 = vmatprep.subr.mxu1 %v15474_v0 }
  0x92   : > { %535 = vmatpush1.msra.mxu0 %v12881_v14  ;;  %826 = vmatpush1.msra.mxu1 %v12881_v14 }
  0x93   : > { %536 = vmatprep.subr.mxu0 %v15474_v0  ;;  %827 = vmatprep.subr.mxu1 %v15474_v0 }
  0x94   : > { %537 = vmatpush1.msra.mxu0 %v12888_v15  ;;  %828 = vmatpush1.msra.mxu1 %v12888_v15 }
  0x95   : > { %538 = vmatprep.subr.mxu0 %v15474_v0  ;;  %829 = vmatprep.subr.mxu1 %v15474_v0 }
  0x96   : > { %539 = vmatpush1.msra.mxu0 %v12895_v16  ;;  %830 = vmatpush1.msra.mxu1 %v12895_v16 }
  0x97   : > { %540 = vmatprep.subr.mxu0 %v15474_v0  ;;  %831 = vmatprep.subr.mxu1 %v15474_v0 }
  0x98   : > { %541 = vmatpush2.msra.mxu0 %v12902_v17  ;;  %832 = vmatpush2.msra.mxu1 %v12902_v17 }
  0x99   : > { %542 = vmatprep.subr.mxu0 %v15474_v0  ;;  %833 = vmatprep.subr.mxu1 %v15474_v0 }
  0x9a   : > { %543 = vmatpush2.msra.mxu0 %v12909_v18  ;;  %834 = vmatpush2.msra.mxu1 %v12909_v18 }
  0x9b   : > { %544 = vmatprep.subr.mxu0 %v15474_v0  ;;  %835 = vmatprep.subr.mxu1 %v15474_v0 }
  0x9c   : > { %545 = vmatpush2.msra.mxu0 %v12916_v19  ;;  %836 = vmatpush2.msra.mxu1 %v12916_v19 }
  0x9d   : > { %546 = vmatprep.subr.mxu0 %v15474_v0  ;;  %837 = vmatprep.subr.mxu1 %v15474_v0 }
  0x9e   : > { %547 = vmatpush2.msra.mxu0 %v12923_v20  ;;  %838 = vmatpush2.msra.mxu1 %v12923_v20 }
  0x9f   : > { %548 = vmatprep.subr.mxu0 %v15474_v0  ;;  %839 = vmatprep.subr.mxu1 %v15474_v0 }
  0xa0   : > { %549 = vmatpush2.msra.mxu0 %v12930_v21  ;;  %840 = vmatpush2.msra.mxu1 %v12930_v21 }
  0xa1   : > { %550 = vmatprep.subr.mxu0 %v15474_v0  ;;  %841 = vmatprep.subr.mxu1 %v15474_v0 }
  0xa2   : > { %551 = vmatpush2.msra.mxu0 %v12937_v22  ;;  %842 = vmatpush2.msra.mxu1 %v12937_v22 }
  0xa3   : > { %552 = vmatprep.subr.mxu0 %v15474_v0  ;;  %843 = vmatprep.subr.mxu1 %v15474_v0 }
  0xa4   : > { %553 = vmatpush2.msra.mxu0 %v12944_v23  ;;  %844 = vmatpush2.msra.mxu1 %v12944_v23 }
  0xa5   : > { %554 = vmatprep.subr.mxu0 %v15474_v0  ;;  %845 = vmatprep.subr.mxu1 %v15474_v0 }
  0xa6   : > { %555 = vmatpush2.msra.mxu0 %v12951_v24  ;;  %846 = vmatpush2.msra.mxu1 %v12951_v24 }
  0xa7   : > { %556 = vmatprep.subr.mxu0 %v15474_v0  ;;  %847 = vmatprep.subr.mxu1 %v15474_v0 }
  0xa8   : > { %557 = vmatpush2.msra.mxu0 %v12958_v25  ;;  %848 = vmatpush2.msra.mxu1 %v12958_v25 }
  0xa9   : > { %558 = vmatprep.subr.mxu0 %v15474_v0  ;;  %849 = vmatprep.subr.mxu1 %v15474_v0 }
  0xaa   : > { %559 = vmatpush2.msra.mxu0 %v12965_v26  ;;  %850 = vmatpush2.msra.mxu1 %v12965_v26 }
  0xab   : > { %560 = vmatprep.subr.mxu0 %v15474_v0  ;;  %851 = vmatprep.subr.mxu1 %v15474_v0 }
  0xac   : > { %561 = vmatpush2.msra.mxu0 %v12972_v27  ;;  %852 = vmatpush2.msra.mxu1 %v12972_v27 }
  0xad   : > { %562 = vmatprep.subr.mxu0 %v15474_v0  ;;  %853 = vmatprep.subr.mxu1 %v15474_v0 }
  0xae   : > { %563 = vmatpush2.msra.mxu0 %v12979_v28  ;;  %854 = vmatpush2.msra.mxu1 %v12979_v28 }
  0xaf   : > { %564 = vmatprep.subr.mxu0 %v15474_v0  ;;  %855 = vmatprep.subr.mxu1 %v15474_v0 }
  0xb0   : > { %565 = vmatpush2.msra.mxu0 %v12986_v29  ;;  %856 = vmatpush2.msra.mxu1 %v12986_v29 }
  0xb1   : > { %566 = vmatprep.subr.mxu0 %v15474_v0  ;;  %857 = vmatprep.subr.mxu1 %v15474_v0 }
  0xb2   : > { %567 = vmatpush2.msra.mxu0 %v12993_v30  ;;  %858 = vmatpush2.msra.mxu1 %v12993_v30 }
  0xb3   : > { %568 = vmatprep.subr.mxu0 %v15474_v0  ;;  %859 = vmatprep.subr.mxu1 %v15474_v0 }
  0xb4   : > { %569 = vmatpush2.msra.mxu0 %v13000_v31  ;;  %860 = vmatpush2.msra.mxu1 %v13000_v31 }
  0xb5   : > { %570 = vmatprep.subr.mxu0 %v15474_v0  ;;  %861 = vmatprep.subr.mxu1 %v15474_v0 }
  0xb6   : > { %571 = vmatpush2.msra.mxu0 %v13007_v32  ;;  %862 = vmatpush2.msra.mxu1 %v13007_v32 }
  0xb7   : > { %573 = vmatmul.mubr.f32.vlgmr.msra.gmra.mxu0 %v444_v35  ;;  %864 = vmatmul.mubr.f32.vlgmr.msra.gmra.mxu1 %v735_v36  ;;  %v752_v35 = vld [vmem:[#allocation2 + $0x288] sm:$0xff]  ;;  %v460_v36 = vld [vmem:[#allocation2 + $0x80] sm:$0xff] }
  0xb8   : > { %577 = vmatprep.mubr.f32.mxu0 %v447_v37  ;;  %868 = vmatprep.mubr.f32.mxu1 %v738_v38  ;;  %v751_v37 = vld [vmem:[#allocation2 + $0x280] sm:$0xff]  ;;  %v463_v38 = vld [vmem:[#allocation2 + $0x98] sm:$0xff] }
  0xbb   : > { %578 = vmatmul.mubr.f32.gmra.mxu0 %v446_v39  ;;  %869 = vmatmul.mubr.f32.gmra.mxu1 %v737_v40  ;;  %v754_v39 = vld [vmem:[#allocation2 + $0x298] sm:$0xff]  ;;  %v462_v40 = vld [vmem:[#allocation2 + $0x90] sm:$0xff] }
  0xbc   : > { %582 = vmatprep.mubr.f32.mxu0 %v449_v41  ;;  %873 = vmatprep.mubr.f32.mxu1 %v740_v42  ;;  %v753_v41 = vld [vmem:[#allocation2 + $0x290] sm:$0xff]  ;;  %v465_v42 = vld [vmem:[#allocation2 + $0xa8] sm:$0xff] }
  0xbf   : > { %583 = vmatmul.mubr.f32.gmra.mxu0 %v448_v43  ;;  %874 = vmatmul.mubr.f32.gmra.mxu1 %v739_v44  ;;  %v756_v43 = vld [vmem:[#allocation2 + $0x2a8] sm:$0xff]  ;;  %v464_v44 = vld [vmem:[#allocation2 + $0xa0] sm:$0xff] }
  0xc0   : > { %587 = vmatprep.mubr.f32.mxu0 %v451_v45  ;;  %878 = vmatprep.mubr.f32.mxu1 %v742_v46  ;;  %v755_v45 = vld [vmem:[#allocation2 + $0x2a0] sm:$0xff]  ;;  %v467_v46 = vld [vmem:[#allocation2 + $0xb8] sm:$0xff] }
  0xc3   : > { %588 = vmatmul.mubr.f32.gmra.mxu0 %v450_v47  ;;  %879 = vmatmul.mubr.f32.gmra.mxu1 %v741_v48  ;;  %v758_v47 = vld [vmem:[#allocation2 + $0x2b8] sm:$0xff]  ;;  %v466_v48 = vld [vmem:[#allocation2 + $0xb0] sm:$0xff] }
  0xc4   : > { %592 = vmatprep.mubr.f32.mxu0 %v453_v49  ;;  %883 = vmatprep.mubr.f32.mxu1 %v744_v50  ;;  %v757_v49 = vld [vmem:[#allocation2 + $0x2b0] sm:$0xff]  ;;  %v469_v50 = vld [vmem:[#allocation2 + $0xc8] sm:$0xff] }
  0xc7   : > { %593 = vmatmul.mubr.f32.gmra.mxu0 %v452_v51  ;;  %884 = vmatmul.mubr.f32.gmra.mxu1 %v743_v52  ;;  %v760_v51 = vld [vmem:[#allocation2 + $0x2c8] sm:$0xff]  ;;  %v468_v52 = vld [vmem:[#allocation2 + $0xc0] sm:$0xff] }
  0xc8   : > { %597 = vmatprep.mubr.f32.mxu0 %v455_v53  ;;  %888 = vmatprep.mubr.f32.mxu1 %v746_v54  ;;  %v759_v53 = vld [vmem:[#allocation2 + $0x2c0] sm:$0xff]  ;;  %v471_v54 = vld [vmem:[#allocation2 + $0xd8] sm:$0xff] }
  0xcb   : > { %598 = vmatmul.mubr.f32.gmra.mxu0 %v454_v55  ;;  %889 = vmatmul.mubr.f32.gmra.mxu1 %v745_v56  ;;  %v762_v55 = vld [vmem:[#allocation2 + $0x2d8] sm:$0xff]  ;;  %v470_v56 = vld [vmem:[#allocation2 + $0xd0] sm:$0xff] }
  0xcc   : > { %602 = vmatprep.mubr.f32.mxu0 %v457_v57  ;;  %893 = vmatprep.mubr.f32.mxu1 %v748_v58  ;;  %v761_v57 = vld [vmem:[#allocation2 + $0x2d0] sm:$0xff]  ;;  %v473_v58 = vld [vmem:[#allocation2 + $0xe8] sm:$0xff] }
  0xcf   : > { %603 = vmatmul.mubr.f32.gmra.mxu0 %v456_v59  ;;  %894 = vmatmul.mubr.f32.gmra.mxu1 %v747_v60  ;;  %v764_v59 = vld [vmem:[#allocation2 + $0x2e8] sm:$0xff]  ;;  %v472_v60 = vld [vmem:[#allocation2 + $0xe0] sm:$0xff] }
  0xd0   : > { %607 = vmatprep.mubr.f32.mxu0 %v459_v61  ;;  %898 = vmatprep.mubr.f32.mxu1 %v750_v62  ;;  %v763_v61 = vld [vmem:[#allocation2 + $0x2e0] sm:$0xff]  ;;  %v475_v62 = vld [vmem:[#allocation2 + $0xf8] sm:$0xff] }
  0xd3   : > { %608 = vmatmul.mubr.f32.gmra.mxu0 %v458_v63  ;;  %899 = vmatmul.mubr.f32.gmra.mxu1 %v749_v33  ;;  %v766_v63 = vld [vmem:[#allocation2 + $0x2f8] sm:$0xff]  ;;  %v474_v33 = vld [vmem:[#allocation2 + $0xf0] sm:$0xff] }
  0xd4   : > { %612 = vmatprep.mubr.f32.mxu0 %v461_v34  ;;  %903 = vmatprep.mubr.f32.mxu1 %v752_v35  ;;  %v765_v34 = vld [vmem:[#allocation2 + $0x2f0] sm:$0xff]  ;;  %v477_v35 = vld [vmem:[#allocation2 + $0x108] sm:$0xff] }
  0xd7   : > { %613 = vmatmul.mubr.f32.gmra.mxu0 %v460_v36  ;;  %904 = vmatmul.mubr.f32.gmra.mxu1 %v751_v37  ;;  %v768_v36 = vld [vmem:[#allocation2 + $0x308] sm:$0xff]  ;;  %v476_v37 = vld [vmem:[#allocation2 + $0x100] sm:$0xff] }
  0xd8   : > { %617 = vmatprep.mubr.f32.mxu0 %v463_v38  ;;  %908 = vmatprep.mubr.f32.mxu1 %v754_v39  ;;  %v767_v38 = vld [vmem:[#allocation2 + $0x300] sm:$0xff]  ;;  %v479_v39 = vld [vmem:[#allocation2 + $0x118] sm:$0xff] }
  0xdb   : > { %618 = vmatmul.mubr.f32.gmra.mxu0 %v462_v40  ;;  %909 = vmatmul.mubr.f32.gmra.mxu1 %v753_v41  ;;  %v770_v40 = vld [vmem:[#allocation2 + $0x318] sm:$0xff]  ;;  %v10134_v41 = vld [vmem:[%s15463_s2 + $0x4] sm:$0xf] }
  0xdc   : > { %622 = vmatprep.mubr.f32.mxu0 %v465_v42  ;;  %913 = vmatprep.mubr.f32.mxu1 %v756_v43  ;;  %v478_v42 = vld [vmem:[#allocation2 + $0x110] sm:$0xff] }
  0xdd   : > { %v769_v43 = vld [vmem:[#allocation2 + $0x310] sm:$0xff]  ;;  %11205 = vmatprep.subr.msk.mxu0 %vm1123_vm0, %v10134_v41 }
  0xde   : > { %11206 = vmatpush3.msk.msra.mxu0 %vm1123_vm0, %v10134_v41  ;;  %v783_v41 = vld [vmem:[#allocation2 + $0x380] sm:$0xff] }
  0xdf   : > { %623 = vmatmul.mubr.f32.gmra.mxu0 %v464_v44  ;;  %914 = vmatmul.mubr.f32.gmra.mxu1 %v755_v45  ;;  %v481_v44 = vld [vmem:[#allocation2 + $0x128] sm:$0xff] }
  0xe0   : > { %627 = vmatprep.mubr.f32.mxu0 %v467_v46  ;;  %918 = vmatprep.mubr.f32.mxu1 %v758_v47  ;;  %v772_v45 = vld [vmem:[#allocation2 + $0x328] sm:$0xff]  ;;  %v733_v46 = vld [vmem:[%s15463_s2] sm:$0xf] }
  0xe1   : > { %11255 = vmatprep.subr.msk.mxu1 %vm1123_vm0, %v733_v46  ;;  %v480_v47 = vld [vmem:[#allocation2 + $0x120] sm:$0xff]  ;;  %1741 = vmatprep.subr.mxu0 %v15474_v0 }
  0xe2   : > { %11256 = vmatpush3.msk.msra.mxu1 %vm1123_vm0, %v733_v46  ;;  %v497_v46 = vld [vmem:[#allocation2 + $0x1a8] sm:$0xff] }
  0xe3   : > { %628 = vmatmul.mubr.f32.gmra.mxu0 %v466_v48  ;;  %919 = vmatmul.mubr.f32.gmra.mxu1 %v757_v49  ;;  %v771_v48 = vld [vmem:[#allocation2 + $0x320] sm:$0xff]  ;;  %v483_v49 = vld [vmem:[#allocation2 + $0x138] sm:$0xff] }
  0xe4   : > { %632 = vmatprep.mubr.f32.mxu0 %v469_v50  ;;  %923 = vmatprep.mubr.f32.mxu1 %v760_v51  ;;  %v774_v50 = vld [vmem:[#allocation2 + $0x338] sm:$0xff]  ;;  %v482_v51 = vld [vmem:[#allocation2 + $0x130] sm:$0xff] }
  0xe7   : > { %633 = vmatmul.mubr.f32.gmra.mxu0 %v468_v52  ;;  %924 = vmatmul.mubr.f32.gmra.mxu1 %v759_v53  ;;  %v773_v52 = vld [vmem:[#allocation2 + $0x330] sm:$0xff]  ;;  %v485_v53 = vld [vmem:[#allocation2 + $0x148] sm:$0xff] }
  0xe8   : > { %637 = vmatprep.mubr.f32.mxu0 %v471_v54  ;;  %928 = vmatprep.mubr.f32.mxu1 %v762_v55  ;;  %v776_v54 = vld [vmem:[#allocation2 + $0x348] sm:$0xff]  ;;  %v484_v55 = vld [vmem:[#allocation2 + $0x140] sm:$0xff] }
  0xeb   : > { %638 = vmatmul.mubr.f32.gmra.mxu0 %v470_v56  ;;  %929 = vmatmul.mubr.f32.gmra.mxu1 %v761_v57  ;;  %v775_v56 = vld [vmem:[#allocation2 + $0x340] sm:$0xff]  ;;  %v487_v57 = vld [vmem:[#allocation2 + $0x158] sm:$0xff] }
  0xec   : > { %642 = vmatprep.mubr.f32.mxu0 %v473_v58  ;;  %933 = vmatprep.mubr.f32.mxu1 %v764_v59  ;;  %v778_v58 = vld [vmem:[#allocation2 + $0x358] sm:$0xff]  ;;  %v486_v59 = vld [vmem:[#allocation2 + $0x150] sm:$0xff] }
  0xef   : > { %643 = vmatmul.mubr.f32.gmra.mxu0 %v472_v60  ;;  %934 = vmatmul.mubr.f32.gmra.mxu1 %v763_v61  ;;  %v777_v60 = vld [vmem:[#allocation2 + $0x350] sm:$0xff]  ;;  %v489_v61 = vld [vmem:[#allocation2 + $0x168] sm:$0xff] }
  0xf0   : > { %647 = vmatprep.mubr.f32.mxu0 %v475_v62  ;;  %938 = vmatprep.mubr.f32.mxu1 %v766_v63  ;;  %v780_v62 = vld [vmem:[#allocation2 + $0x368] sm:$0xff]  ;;  %v488_v63 = vld [vmem:[#allocation2 + $0x160] sm:$0xff] }
  0xf3   : > { %648 = vmatmul.mubr.f32.gmra.mxu0 %v474_v33  ;;  %939 = vmatmul.mubr.f32.gmra.mxu1 %v765_v34  ;;  %v779_v33 = vld [vmem:[#allocation2 + $0x360] sm:$0xff]  ;;  %v491_v34 = vld [vmem:[#allocation2 + $0x178] sm:$0xff] }
  0xf4   : > { %652 = vmatprep.mubr.f32.mxu0 %v477_v35  ;;  %943 = vmatprep.mubr.f32.mxu1 %v768_v36  ;;  %v782_v35 = vld [vmem:[#allocation2 + $0x378] sm:$0xff]  ;;  %v490_v36 = vld [vmem:[#allocation2 + $0x170] sm:$0xff] }
  0xf7   : > { %653 = vmatmul.mubr.f32.gmra.mxu0 %v476_v37  ;;  %944 = vmatmul.mubr.f32.gmra.mxu1 %v767_v38  ;;  %v781_v37 = vld [vmem:[#allocation2 + $0x370] sm:$0xff]  ;;  %v493_v38 = vld [vmem:[#allocation2 + $0x188] sm:$0xff] }
  0xf8   : > { %657 = vmatprep.mubr.f32.mxu0 %v479_v39  ;;  %948 = vmatprep.mubr.f32.mxu1 %v770_v40  ;;  %v784_v39 = vld [vmem:[#allocation2 + $0x388] sm:$0xff]  ;;  %v492_v40 = vld [vmem:[#allocation2 + $0x180] sm:$0xff] }
  0xfb   : > { %658 = vmatmul.mubr.f32.gmra.mxu0 %v478_v42  ;;  %949 = vmatmul.mubr.f32.gmra.mxu1 %v769_v43  ;;  %v495_v42 = vld [vmem:[#allocation2 + $0x198] sm:$0xff] }
  0xfc   : > { %662 = vmatprep.mubr.f32.mxu0 %v481_v44  ;;  %953 = vmatprep.mubr.f32.mxu1 %v772_v45  ;;  %v786_v43 = vld [vmem:[#allocation2 + $0x398] sm:$0xff]  ;;  %v494_v44 = vld [vmem:[#allocation2 + $0x190] sm:$0xff] }
  0xfd   : > { %v785_v45 = vld [vmem:[#allocation2 + $0x390] sm:$0xff] }
  0xff   : > { %663 = vmatmul.mubr.f32.gmra.mxu0 %v480_v47  ;;  %954 = vmatmul.mubr.f32.gmra.mxu1 %v771_v48  ;;  %v788_v47 = vld [vmem:[#allocation2 + $0x3a8] sm:$0xff]  ;;  %v496_v48 = vld [vmem:[#allocation2 + $0x1a0] sm:$0xff] }
 0x100   : > { %667 = vmatprep.mubr.f32.mxu0 %v483_v49  ;;  %958 = vmatprep.mubr.f32.mxu1 %v774_v50  ;;  %v787_v49 = vld [vmem:[#allocation2 + $0x3a0] sm:$0xff]  ;;  %v499_v50 = vld [vmem:[#allocation2 + $0x1b8] sm:$0xff] }
 0x103   : > { %668 = vmatmul.mubr.f32.gmra.mxu0 %v482_v51  ;;  %959 = vmatmul.mubr.f32.gmra.mxu1 %v773_v52  ;;  %v790_v51 = vld [vmem:[#allocation2 + $0x3b8] sm:$0xff]  ;;  %v498_v52 = vld [vmem:[#allocation2 + $0x1b0] sm:$0xff] }
 0x104   : > { %672 = vmatprep.mubr.f32.mxu0 %v485_v53  ;;  %963 = vmatprep.mubr.f32.mxu1 %v776_v54  ;;  %v789_v53 = vld [vmem:[#allocation2 + $0x3b0] sm:$0xff]  ;;  %v501_v54 = vld [vmem:[#allocation2 + $0x1c8] sm:$0xff] }
 0x107   : > { %673 = vmatmul.mubr.f32.gmra.mxu0 %v484_v55  ;;  %964 = vmatmul.mubr.f32.gmra.mxu1 %v775_v56  ;;  %v792_v55 = vld [vmem:[#allocation2 + $0x3c8] sm:$0xff]  ;;  %v500_v56 = vld [vmem:[#allocation2 + $0x1c0] sm:$0xff] }
 0x108   : > { %677 = vmatprep.mubr.f32.mxu0 %v487_v57  ;;  %968 = vmatprep.mubr.f32.mxu1 %v778_v58  ;;  %v791_v57 = vld [vmem:[#allocation2 + $0x3c0] sm:$0xff]  ;;  %v503_v58 = vld [vmem:[#allocation2 + $0x1d8] sm:$0xff] }
 0x10b   : > { %678 = vmatmul.mubr.f32.gmra.mxu0 %v486_v59  ;;  %969 = vmatmul.mubr.f32.gmra.mxu1 %v777_v60  ;;  %v794_v59 = vld [vmem:[#allocation2 + $0x3d8] sm:$0xff]  ;;  %v502_v60 = vld [vmem:[#allocation2 + $0x1d0] sm:$0xff] }
 0x10c   : > { %682 = vmatprep.mubr.f32.mxu0 %v489_v61  ;;  %973 = vmatprep.mubr.f32.mxu1 %v780_v62  ;;  %v793_v61 = vld [vmem:[#allocation2 + $0x3d0] sm:$0xff]  ;;  %v505_v62 = vld [vmem:[#allocation2 + $0x1e8] sm:$0xff] }
 0x10f   : > { %683 = vmatmul.mubr.f32.gmra.mxu0 %v488_v63  ;;  %974 = vmatmul.mubr.f32.gmra.mxu1 %v779_v33  ;;  %v796_v63 = vld [vmem:[#allocation2 + $0x3e8] sm:$0xff]  ;;  %v504_v33 = vld [vmem:[#allocation2 + $0x1e0] sm:$0xff] }
 0x110   : > { %687 = vmatprep.mubr.f32.mxu0 %v491_v34  ;;  %978 = vmatprep.mubr.f32.mxu1 %v782_v35  ;;  %v795_v34 = vld [vmem:[#allocation2 + $0x3e0] sm:$0xff]  ;;  %v507_v35 = vld [vmem:[#allocation2 + $0x1f8] sm:$0xff] }
 0x113   : > { %688 = vmatmul.mubr.f32.gmra.mxu0 %v490_v36  ;;  %979 = vmatmul.mubr.f32.gmra.mxu1 %v781_v37  ;;  %v798_v36 = vld [vmem:[#allocation2 + $0x3f8] sm:$0xff]  ;;  %v506_v37 = vld [vmem:[#allocation2 + $0x1f0] sm:$0xff] }
 0x114   : > { %692 = vmatprep.mubr.f32.mxu0 %v493_v38  ;;  %983 = vmatprep.mubr.f32.mxu1 %v784_v39  ;;  %v797_v38 = vld [vmem:[#allocation2 + $0x3f0] sm:$0xff] }
 0x117   : > { %693 = vmatmul.mubr.f32.gmra.mxu0 %v492_v40  ;;  %984 = vmatmul.mubr.f32.gmra.mxu1 %v783_v41 }
 0x118   : > { %697 = vmatprep.mubr.f32.mxu0 %v495_v42  ;;  %988 = vmatprep.mubr.f32.mxu1 %v786_v43 }
 0x11b   : > { %698 = vmatmul.mubr.f32.gmra.mxu0 %v494_v44  ;;  %989 = vmatmul.mubr.f32.gmra.mxu1 %v785_v45 }
 0x11c   : > { %702 = vmatprep.mubr.f32.mxu0 %v497_v46  ;;  %993 = vmatprep.mubr.f32.mxu1 %v788_v47 }
 0x11f   : > { %703 = vmatmul.mubr.f32.gmra.mxu0 %v496_v48  ;;  %994 = vmatmul.mubr.f32.gmra.mxu1 %v787_v49 }
 0x120   : > { %707 = vmatprep.mubr.f32.mxu0 %v499_v50  ;;  %998 = vmatprep.mubr.f32.mxu1 %v790_v51 }
 0x123   : > { %708 = vmatmul.mubr.f32.gmra.mxu0 %v498_v52  ;;  %999 = vmatmul.mubr.f32.gmra.mxu1 %v789_v53 }
 0x124   : > { %712 = vmatprep.mubr.f32.mxu0 %v501_v54  ;;  %1003 = vmatprep.mubr.f32.mxu1 %v792_v55 }
 0x127   : > { %713 = vmatmul.mubr.f32.gmra.mxu0 %v500_v56  ;;  %1004 = vmatmul.mubr.f32.gmra.mxu1 %v791_v57 }
 0x128   : > { %717 = vmatprep.mubr.f32.mxu0 %v503_v58  ;;  %1008 = vmatprep.mubr.f32.mxu1 %v794_v59 }
 0x12b   : > { %718 = vmatmul.mubr.f32.gmra.mxu0 %v502_v60  ;;  %1009 = vmatmul.mubr.f32.gmra.mxu1 %v793_v61 }
 0x12c   : > { %722 = vmatprep.mubr.f32.mxu0 %v505_v62  ;;  %1013 = vmatprep.mubr.f32.mxu1 %v796_v63 }
 0x12f   : > { %723 = vmatmul.mubr.f32.gmra.mxu0 %v504_v33  ;;  %1014 = vmatmul.mubr.f32.gmra.mxu1 %v795_v34 }
 0x130   : > { %727 = vmatprep.mubr.f32.mxu0 %v507_v35  ;;  %1018 = vmatprep.mubr.f32.mxu1 %v798_v36 }
 0x133   : > { %728 = vmatmul.mubr.f32.gmra.mxu0 %v506_v37  ;;  %1019 = vmatmul.mubr.f32.gmra.mxu1 %v797_v38 }
 0x177   : > { %v574_v39 = vpop.f32.mrf.mxu0  ;;  %v865_v40 = vpop.f32.mrf.mxu1 }
 0x178   : > { %11207 = vmatprep.mubr.msk.f32.mxu0 %vm1026_vm1, %v865_v40  ;;  %11257 = vmatprep.mubr.msk.f32.mxu1 %vm1026_vm1, %v574_v39 }
 0x179   : > { %v576_v41 = vpop.f32.mrf.mxu0  ;;  %v867_v42 = vpop.f32.mrf.mxu1 }
 0x17b   : > { %v579_v43 = vpop.f32.mrf.mxu0  ;;  %v870_v44 = vpop.f32.mrf.mxu1 }
 0x17c   : > { %11208 = vmatmul.mubr.msk.f32.vlgmr.msra.gmra.mxu0 %vm1026_vm1, %v870_v44  ;;  %11258 = vmatmul.mubr.msk.f32.vlgmr.msra.gmra.mxu1 %vm1026_vm1, %v579_v43 }
 0x17d   : > { %v581_v45 = vpop.f32.mrf.mxu0  ;;  %v872_v46 = vpop.f32.mrf.mxu1  ;;  %1742 = vmatpush1.msra.mxu0 %v12794_v1 }
 0x17e   : > { %1743 = vmatprep.subr.mxu0 %v15474_v0 }
 0x17f   : > { %v584_v47 = vpop.f32.mrf.mxu0  ;;  %v875_v48 = vpop.f32.mrf.mxu1  ;;  %1744 = vmatpush1.msra.mxu0 %v12797_v2 }
 0x180   : > { %11210 = vmatprep.mubr.msk.f32.mxu0 %vm1026_vm1, %v875_v48  ;;  %11260 = vmatprep.mubr.msk.f32.mxu1 %vm1026_vm1, %v584_v47 }
 0x181   : > { %v586_v49 = vpop.f32.mrf.mxu0  ;;  %v877_v50 = vpop.f32.mrf.mxu1  ;;  %1745 = vmatprep.subr.mxu0 %v15474_v0 }
 0x182   : > { %1746 = vmatpush1.msra.mxu0 %v12804_v3 }
 0x183   : > { %v589_v51 = vpop.f32.mrf.mxu0  ;;  %v880_v52 = vpop.f32.mrf.mxu1  ;;  %1747 = vmatprep.subr.mxu0 %v15474_v0 }
 0x184   : > { %11211 = vmatmul.mubr.msk.f32.gmra.mxu0 %vm1026_vm1, %v880_v52  ;;  %11261 = vmatmul.mubr.msk.f32.gmra.mxu1 %vm1026_vm1, %v589_v51 }
 0x185   : > { %v591_v1 = vpop.f32.mrf.mxu0  ;;  %v882_v2 = vpop.f32.mrf.mxu1  ;;  %1748 = vmatpush1.msra.mxu0 %v12811_v4 }
 0x186   : > { %1749 = vmatprep.subr.mxu0 %v15474_v0 }
 0x187   : > { %v594_v53 = vpop.f32.mrf.mxu0  ;;  %v885_v54 = vpop.f32.mrf.mxu1  ;;  %1750 = vmatpush1.msra.mxu0 %v12818_v5 }
 0x188   : > { %11213 = vmatprep.mubr.msk.f32.mxu0 %vm1026_vm1, %v885_v54  ;;  %11263 = vmatprep.mubr.msk.f32.mxu1 %vm1026_vm1, %v594_v53 }
 0x189   : > { %v596_v3 = vpop.f32.mrf.mxu0  ;;  %v887_v55 = vpop.f32.mrf.mxu1  ;;  %1751 = vmatprep.subr.mxu0 %v15474_v0 }
 0x18a   : > { %1752 = vmatpush1.msra.mxu0 %v12825_v6 }
 0x18b   : > { %v599_v56 = vpop.f32.mrf.mxu0  ;;  %v890_v57 = vpop.f32.mrf.mxu1  ;;  %1753 = vmatprep.subr.mxu0 %v15474_v0 }
 0x18c   : > { %11214 = vmatmul.mubr.msk.f32.gmra.mxu0 %vm1026_vm1, %v890_v57  ;;  %11264 = vmatmul.mubr.msk.f32.gmra.mxu1 %vm1026_vm1, %v599_v56 }
 0x18d   : > { %v601_v4 = vpop.f32.mrf.mxu0  ;;  %v892_v5 = vpop.f32.mrf.mxu1  ;;  %1754 = vmatpush1.msra.mxu0 %v12832_v7 }
 0x18e   : > { %1755 = vmatprep.subr.mxu0 %v15474_v0 }
 0x18f   : > { %v604_v58 = vpop.f32.mrf.mxu0  ;;  %v895_v59 = vpop.f32.mrf.mxu1  ;;  %1756 = vmatpush1.msra.mxu0 %v12839_v8 }
 0x190   : > { %11216 = vmatprep.mubr.msk.f32.mxu0 %vm1026_vm1, %v895_v59  ;;  %11266 = vmatprep.mubr.msk.f32.mxu1 %vm1026_vm1, %v604_v58 }
 0x191   : > { %v606_v6 = vpop.f32.mrf.mxu0  ;;  %v897_v60 = vpop.f32.mrf.mxu1  ;;  %1757 = vmatprep.subr.mxu0 %v15474_v0 }
 0x192   : > { %1758 = vmatpush1.msra.mxu0 %v12846_v9 }
 0x193   : > { %v609_v61 = vpop.f32.mrf.mxu0  ;;  %v900_v62 = vpop.f32.mrf.mxu1  ;;  %1759 = vmatprep.subr.mxu0 %v15474_v0 }
 0x194   : > { %11217 = vmatmul.mubr.msk.f32.gmra.mxu0 %vm1026_vm1, %v900_v62  ;;  %11267 = vmatmul.mubr.msk.f32.gmra.mxu1 %vm1026_vm1, %v609_v61 }
 0x195   : > { %v611_v7 = vpop.f32.mrf.mxu0  ;;  %v902_v8 = vpop.f32.mrf.mxu1  ;;  %1760 = vmatpush1.msra.mxu0 %v12853_v10 }
 0x196   : > { %1761 = vmatprep.subr.mxu0 %v15474_v0 }
 0x197   : > { %v614_v63 = vpop.f32.mrf.mxu0  ;;  %v905_v33 = vpop.f32.mrf.mxu1  ;;  %1762 = vmatpush1.msra.mxu0 %v12860_v11 }
 0x198   : > { %11219 = vmatprep.mubr.msk.f32.mxu0 %vm1026_vm1, %v905_v33  ;;  %11269 = vmatprep.mubr.msk.f32.mxu1 %vm1026_vm1, %v614_v63 }
 0x199   : > { %v616_v9 = vpop.f32.mrf.mxu0  ;;  %v907_v34 = vpop.f32.mrf.mxu1  ;;  %1763 = vmatprep.subr.mxu0 %v15474_v0 }
 0x19a   : > { %1764 = vmatpush1.msra.mxu0 %v12867_v12 }
 0x19b   : > { %v619_v35 = vpop.f32.mrf.mxu0  ;;  %v910_v36 = vpop.f32.mrf.mxu1  ;;  %1765 = vmatprep.subr.mxu0 %v15474_v0 }
 0x19c   : > { %11220 = vmatmul.mubr.msk.f32.gmra.mxu0 %vm1026_vm1, %v910_v36  ;;  %11270 = vmatmul.mubr.msk.f32.gmra.mxu1 %vm1026_vm1, %v619_v35 }
 0x19d   : > { %v621_v10 = vpop.f32.mrf.mxu0  ;;  %v912_v11 = vpop.f32.mrf.mxu1  ;;  %1766 = vmatpush1.msra.mxu0 %v12874_v13 }
 0x19e   : > { %1767 = vmatprep.subr.mxu0 %v15474_v0 }
 0x19f   : > { %v624_v37 = vpop.f32.mrf.mxu0  ;;  %v915_v38 = vpop.f32.mrf.mxu1  ;;  %1768 = vmatpush1.msra.mxu0 %v12881_v14 }
 0x1a0   : > { %11222 = vmatprep.mubr.msk.f32.mxu0 %vm1026_vm1, %v915_v38  ;;  %11272 = vmatprep.mubr.msk.f32.mxu1 %vm1026_vm1, %v624_v37 }
 0x1a1   : > { %v626_v12 = vpop.f32.mrf.mxu0  ;;  %v917_v39 = vpop.f32.mrf.mxu1  ;;  %1769 = vmatprep.subr.mxu0 %v15474_v0 }
 0x1a2   : > { %1770 = vmatpush1.msra.mxu0 %v12888_v15 }
 0x1a3   : > { %v629_v40 = vpop.f32.mrf.mxu0  ;;  %v920_v41 = vpop.f32.mrf.mxu1  ;;  %1771 = vmatprep.subr.mxu0 %v15474_v0 }
 0x1a4   : > { %11223 = vmatmul.mubr.msk.f32.gmra.mxu0 %vm1026_vm1, %v920_v41  ;;  %11273 = vmatmul.mubr.msk.f32.gmra.mxu1 %vm1026_vm1, %v629_v40 }
 0x1a5   : > { %v631_v13 = vpop.f32.mrf.mxu0  ;;  %v922_v14 = vpop.f32.mrf.mxu1  ;;  %1772 = vmatpush1.msra.mxu0 %v12895_v16 }
 0x1a6   : > { %1773 = vmatprep.subr.mxu0 %v15474_v0 }
 0x1a7   : > { %v634_v42 = vpop.f32.mrf.mxu0  ;;  %v925_v43 = vpop.f32.mrf.mxu1  ;;  %1774 = vmatpush2.msra.mxu0 %v12902_v17 }
 0x1a8   : > { %11225 = vmatprep.mubr.msk.f32.mxu0 %vm1026_vm1, %v925_v43  ;;  %11275 = vmatprep.mubr.msk.f32.mxu1 %vm1026_vm1, %v634_v42 }
 0x1a9   : > { %v636_v15 = vpop.f32.mrf.mxu0  ;;  %v927_v44 = vpop.f32.mrf.mxu1  ;;  %1775 = vmatprep.subr.mxu0 %v15474_v0 }
 0x1aa   : > { %1776 = vmatpush2.msra.mxu0 %v12909_v18 }
 0x1ab   : > { %v639_v45 = vpop.f32.mrf.mxu0  ;;  %v930_v46 = vpop.f32.mrf.mxu1  ;;  %1777 = vmatprep.subr.mxu0 %v15474_v0 }
 0x1ac   : > { %11226 = vmatmul.mubr.msk.f32.gmra.mxu0 %vm1026_vm1, %v930_v46  ;;  %11276 = vmatmul.mubr.msk.f32.gmra.mxu1 %vm1026_vm1, %v639_v45 }
 0x1ad   : > { %v641_v16 = vpop.f32.mrf.mxu0  ;;  %v932_v17 = vpop.f32.mrf.mxu1  ;;  %1778 = vmatpush2.msra.mxu0 %v12916_v19 }
 0x1ae   : > { %1779 = vmatprep.subr.mxu0 %v15474_v0 }
 0x1af   : > { %v644_v47 = vpop.f32.mrf.mxu0  ;;  %v935_v48 = vpop.f32.mrf.mxu1  ;;  %1780 = vmatpush2.msra.mxu0 %v12923_v20 }
 0x1b0   : > { %11228 = vmatprep.mubr.msk.f32.mxu0 %vm1026_vm1, %v935_v48  ;;  %11278 = vmatprep.mubr.msk.f32.mxu1 %vm1026_vm1, %v644_v47 }
 0x1b1   : > { %v646_v18 = vpop.f32.mrf.mxu0  ;;  %v937_v49 = vpop.f32.mrf.mxu1  ;;  %1781 = vmatprep.subr.mxu0 %v15474_v0 }
 0x1b2   : > { %1782 = vmatpush2.msra.mxu0 %v12930_v21 }
 0x1b3   : > { %v649_v50 = vpop.f32.mrf.mxu0  ;;  %v940_v51 = vpop.f32.mrf.mxu1  ;;  %1783 = vmatprep.subr.mxu0 %v15474_v0 }
 0x1b4   : > { %11229 = vmatmul.mubr.msk.f32.gmra.mxu0 %vm1026_vm1, %v940_v51  ;;  %11279 = vmatmul.mubr.msk.f32.gmra.mxu1 %vm1026_vm1, %v649_v50  ;;  %v1678_v51 = vld [vmem:[#allocation2 + $0x408] sm:$0xff] }
 0x1b5   : > { %v651_v19 = vpop.f32.mrf.mxu0  ;;  %v942_v20 = vpop.f32.mrf.mxu1  ;;  %1784 = vmatpush2.msra.mxu0 %v12937_v22 }
 0x1b6   : > { %1785 = vmatprep.subr.mxu0 %v15474_v0 }
 0x1b7   : > { %v654_v52 = vpop.f32.mrf.mxu0  ;;  %v945_v1 = vpop.f32.mrf.mxu1  ;;  %1786 = vmatpush2.msra.mxu0 %v12944_v23 }
 0x1b8   : > { %11231 = vmatprep.mubr.msk.f32.mxu0 %vm1026_vm1, %v945_v1  ;;  %11281 = vmatprep.mubr.msk.f32.mxu1 %vm1026_vm1, %v654_v52  ;;  %v1677_v1 = vld [vmem:[#allocation2 + $0x400] sm:$0xff] }
 0x1b9   : > { %v656_v21 = vpop.f32.mrf.mxu0  ;;  %v947_v2 = vpop.f32.mrf.mxu1  ;;  %1787 = vmatprep.subr.mxu0 %v15474_v0 }
 0x1ba   : > { %1788 = vmatpush2.msra.mxu0 %v12951_v24  ;;  %v1680_v2 = vld [vmem:[#allocation2 + $0x418] sm:$0xff] }
 0x1bb   : > { %v659_v53 = vpop.f32.mrf.mxu0  ;;  %v950_v54 = vpop.f32.mrf.mxu1  ;;  %1789 = vmatprep.subr.mxu0 %v15474_v0 }
 0x1bc   : > { %11232 = vmatmul.mubr.msk.f32.gmra.mxu0 %vm1026_vm1, %v950_v54  ;;  %11282 = vmatmul.mubr.msk.f32.gmra.mxu1 %vm1026_vm1, %v659_v53  ;;  %v1679_v53 = vld [vmem:[#allocation2 + $0x410] sm:$0xff]  ;;  %v1682_v54 = vld [vmem:[#allocation2 + $0x428] sm:$0xff] }
 0x1bd   : > { %v661_v22 = vpop.f32.mrf.mxu0  ;;  %v952_v23 = vpop.f32.mrf.mxu1  ;;  %1790 = vmatpush2.msra.mxu0 %v12958_v25 }
 0x1be   : > { %1791 = vmatprep.subr.mxu0 %v15474_v0  ;;  %v1681_v22 = vld [vmem:[#allocation2 + $0x420] sm:$0xff]  ;;  %v1684_v23 = vld [vmem:[#allocation2 + $0x438] sm:$0xff] }
 0x1bf   : > { %v664_v3 = vpop.f32.mrf.mxu0  ;;  %v955_v55 = vpop.f32.mrf.mxu1  ;;  %1792 = vmatpush2.msra.mxu0 %v12965_v26 }
 0x1c0   : > { %11234 = vmatprep.mubr.msk.f32.mxu0 %vm1026_vm1, %v955_v55  ;;  %11284 = vmatprep.mubr.msk.f32.mxu1 %vm1026_vm1, %v664_v3  ;;  %v1683_v3 = vld [vmem:[#allocation2 + $0x430] sm:$0xff]  ;;  %v1686_v55 = vld [vmem:[#allocation2 + $0x448] sm:$0xff] }
 0x1c1   : > { %v666_v24 = vpop.f32.mrf.mxu0  ;;  %v957_v56 = vpop.f32.mrf.mxu1  ;;  %1793 = vmatprep.subr.mxu0 %v15474_v0 }
 0x1c2   : > { %1794 = vmatpush2.msra.mxu0 %v12972_v27  ;;  %v1685_v24 = vld [vmem:[#allocation2 + $0x440] sm:$0xff]  ;;  %v1688_v56 = vld [vmem:[#allocation2 + $0x458] sm:$0xff] }
 0x1c3   : > { %v669_v57 = vpop.f32.mrf.mxu0  ;;  %v960_v4 = vpop.f32.mrf.mxu1  ;;  %1795 = vmatprep.subr.mxu0 %v15474_v0 }
 0x1c4   : > { %11235 = vmatmul.mubr.msk.f32.gmra.mxu0 %vm1026_vm1, %v960_v4  ;;  %11285 = vmatmul.mubr.msk.f32.gmra.mxu1 %vm1026_vm1, %v669_v57  ;;  %v1687_v57 = vld [vmem:[#allocation2 + $0x450] sm:$0xff]  ;;  %v1690_v4 = vld [vmem:[#allocation2 + $0x468] sm:$0xff] }
 0x1c5   : > { %v671_v25 = vpop.f32.mrf.mxu0  ;;  %v962_v26 = vpop.f32.mrf.mxu1  ;;  %1796 = vmatpush2.msra.mxu0 %v12979_v28 }
 0x1c6   : > { %1797 = vmatprep.subr.mxu0 %v15474_v0  ;;  %v1689_v25 = vld [vmem:[#allocation2 + $0x460] sm:$0xff]  ;;  %v1692_v26 = vld [vmem:[#allocation2 + $0x478] sm:$0xff] }
 0x1c7   : > { %v674_v5 = vpop.f32.mrf.mxu0  ;;  %v965_v58 = vpop.f32.mrf.mxu1  ;;  %1798 = vmatpush2.msra.mxu0 %v12986_v29 }
 0x1c8   : > { %11237 = vmatprep.mubr.msk.f32.mxu0 %vm1026_vm1, %v965_v58  ;;  %11287 = vmatprep.mubr.msk.f32.mxu1 %vm1026_vm1, %v674_v5  ;;  %v1691_v5 = vld [vmem:[#allocation2 + $0x470] sm:$0xff]  ;;  %v1694_v58 = vld [vmem:[#allocation2 + $0x488] sm:$0xff] }
 0x1c9   : > { %v676_v27 = vpop.f32.mrf.mxu0  ;;  %v967_v59 = vpop.f32.mrf.mxu1  ;;  %1799 = vmatprep.subr.mxu0 %v15474_v0 }
 0x1ca   : > { %1800 = vmatpush2.msra.mxu0 %v12993_v30  ;;  %v1693_v27 = vld [vmem:[#allocation2 + $0x480] sm:$0xff]  ;;  %v1696_v59 = vld [vmem:[#allocation2 + $0x498] sm:$0xff] }
 0x1cb   : > { %v679_v6 = vpop.f32.mrf.mxu0  ;;  %v970_v60 = vpop.f32.mrf.mxu1  ;;  %1801 = vmatprep.subr.mxu0 %v15474_v0 }
 0x1cc   : > { %11238 = vmatmul.mubr.msk.f32.gmra.mxu0 %vm1026_vm1, %v970_v60  ;;  %11288 = vmatmul.mubr.msk.f32.gmra.mxu1 %vm1026_vm1, %v679_v6  ;;  %v1695_v6 = vld [vmem:[#allocation2 + $0x490] sm:$0xff]  ;;  %v1698_v60 = vld [vmem:[#allocation2 + $0x4a8] sm:$0xff] }
 0x1cd   : > { %v681_v28 = vpop.f32.mrf.mxu0  ;;  %v972_v29 = vpop.f32.mrf.mxu1  ;;  %1802 = vmatpush2.msra.mxu0 %v13000_v31 }
 0x1ce   : > { %1803 = vmatprep.subr.mxu0 %v15474_v0  ;;  %v1697_v28 = vld [vmem:[#allocation2 + $0x4a0] sm:$0xff]  ;;  %v1700_v29 = vld [vmem:[#allocation2 + $0x4b8] sm:$0xff] }
 0x1cf   : > { %v684_v61 = vpop.f32.mrf.mxu0  ;;  %v975_v62 = vpop.f32.mrf.mxu1  ;;  %1804 = vmatpush2.msra.mxu0 %v13007_v32 }
 0x1d0   : > { %11240 = vmatprep.mubr.msk.f32.mxu0 %vm1026_vm1, %v975_v62  ;;  %11290 = vmatprep.mubr.msk.f32.mxu1 %vm1026_vm1, %v684_v61  ;;  %v1699_v61 = vld [vmem:[#allocation2 + $0x4b0] sm:$0xff]  ;;  %v1702_v62 = vld [vmem:[#allocation2 + $0x4c8] sm:$0xff] }
 0x1d1   : > { %v686_v30 = vpop.f32.mrf.mxu0  ;;  %v977_v7 = vpop.f32.mrf.mxu1 }
 0x1d2   : > { %v1701_v30 = vld [vmem:[#allocation2 + $0x4c0] sm:$0xff]  ;;  %v1704_v7 = vld [vmem:[#allocation2 + $0x4d8] sm:$0xff] }
 0x1d3   : > { %v689_v8 = vpop.f32.mrf.mxu0  ;;  %v980_v63 = vpop.f32.mrf.mxu1 }
 0x1d4   : > { %11241 = vmatmul.mubr.msk.f32.gmra.mxu0 %vm1026_vm1, %v980_v63  ;;  %11291 = vmatmul.mubr.msk.f32.gmra.mxu1 %vm1026_vm1, %v689_v8  ;;  %v1703_v8 = vld [vmem:[#allocation2 + $0x4d0] sm:$0xff]  ;;  %v1706_v63 = vld [vmem:[#allocation2 + $0x4e8] sm:$0xff] }
 0x1d5   : > { %v691_v33 = vpop.f32.mrf.mxu0  ;;  %v982_v31 = vpop.f32.mrf.mxu1 }
 0x1d6   : > { %v1705_v33 = vld [vmem:[#allocation2 + $0x4e0] sm:$0xff]  ;;  %v1708_v31 = vld [vmem:[#allocation2 + $0x4f8] sm:$0xff] }
 0x1d7   : > { %v694_v9 = vpop.f32.mrf.mxu0  ;;  %v985_v34 = vpop.f32.mrf.mxu1 }
 0x1d8   : > { %11243 = vmatprep.mubr.msk.f32.mxu0 %vm1026_vm1, %v985_v34  ;;  %11293 = vmatprep.mubr.msk.f32.mxu1 %vm1026_vm1, %v694_v9  ;;  %v1707_v9 = vld [vmem:[#allocation2 + $0x4f0] sm:$0xff]  ;;  %v1710_v34 = vld [vmem:[#allocation2 + $0x508] sm:$0xff] }
 0x1d9   : > { %v696_v32 = vpop.f32.mrf.mxu0  ;;  %v987_v35 = vpop.f32.mrf.mxu1 }
 0x1da   : > { %v1709_v32 = vld [vmem:[#allocation2 + $0x500] sm:$0xff]  ;;  %v1712_v35 = vld [vmem:[#allocation2 + $0x518] sm:$0xff] }
 0x1db   : > { %v699_v36 = vpop.f32.mrf.mxu0  ;;  %v990_v10 = vpop.f32.mrf.mxu1 }
 0x1dc   : > { %11244 = vmatmul.mubr.msk.f32.gmra.mxu0 %vm1026_vm1, %v990_v10  ;;  %11294 = vmatmul.mubr.msk.f32.gmra.mxu1 %vm1026_vm1, %v699_v36  ;;  %v1711_v36 = vld [vmem:[#allocation2 + $0x510] sm:$0xff]  ;;  %v1714_v10 = vld [vmem:[#allocation2 + $0x528] sm:$0xff] }
 0x1dd   : > { %v701_v11 = vpop.f32.mrf.mxu0  ;;  %v992_v37 = vpop.f32.mrf.mxu1 }
 0x1de   : > { %v10201_v11 = vld [vmem:[%s15463_s2 + $0x8] sm:$0xf] }
 0x1df   : > { %v704_v38 = vpop.f32.mrf.mxu0  ;;  %v995_v12 = vpop.f32.mrf.mxu1  ;;  %11305 = vmatprep.subr.msk.mxu1 %vm1123_vm0, %v10201_v11 }
 0x1e0   : > { %11246 = vmatprep.mubr.msk.f32.mxu0 %vm1026_vm1, %v995_v12  ;;  %11296 = vmatprep.mubr.msk.f32.mxu1 %vm1026_vm1, %v704_v38 }
 0x1e1   : > { %v706_v39 = vpop.f32.mrf.mxu0  ;;  %v997_v40 = vpop.f32.mrf.mxu1  ;;  %11306 = vmatpush3.msk.msra.mxu1 %vm1123_vm0, %v10201_v11 }
 0x1e2   : > { %v1713_v39 = vld [vmem:[#allocation2 + $0x520] sm:$0xff]  ;;  %2389 = vmatprep.subr.mxu1 %v15474_v0  ;;  %v1716_v40 = vld [vmem:[#allocation2 + $0x538] sm:$0xff] }
 0x1e3   : > { %v709_v41 = vpop.f32.mrf.mxu0  ;;  %v1000_v13 = vpop.f32.mrf.mxu1 }
 0x1e4   : > { %11247 = vmatmul.mubr.msk.f32.gmra.mxu0 %vm1026_vm1, %v1000_v13  ;;  %11297 = vmatmul.mubr.msk.f32.gmra.mxu1 %vm1026_vm1, %v709_v41  ;;  %v1715_v41 = vld [vmem:[#allocation2 + $0x530] sm:$0xff] }
 0x1e5   : > { %v711_v14 = vpop.f32.mrf.mxu0  ;;  %v1002_v42 = vpop.f32.mrf.mxu1 }
 0x1e6   : > { %v1718_v42 = vld [vmem:[#allocation2 + $0x548] sm:$0xff] }
 0x1e7   : > { %v714_v43 = vpop.f32.mrf.mxu0  ;;  %v1005_v15 = vpop.f32.mrf.mxu1 }
 0x1e8   : > { %11249 = vmatprep.mubr.msk.f32.mxu0 %vm1026_vm1, %v1005_v15  ;;  %11299 = vmatprep.mubr.msk.f32.mxu1 %vm1026_vm1, %v714_v43 }
 0x1e9   : > { %v716_v44 = vpop.f32.mrf.mxu0  ;;  %v1007_v45 = vpop.f32.mrf.mxu1 }
 0x1ea   : > { %v1717_v45 = vld [vmem:[#allocation2 + $0x540] sm:$0xff] }
 0x1eb   : > { %v719_v46 = vpop.f32.mrf.mxu0  ;;  %v1010_v16 = vpop.f32.mrf.mxu1 }
 0x1ec   : > { %11250 = vmatmul.mubr.msk.f32.gmra.mxu0 %vm1026_vm1, %v1010_v16  ;;  %11300 = vmatmul.mubr.msk.f32.gmra.mxu1 %vm1026_vm1, %v719_v46  ;;  %v1720_v46 = vld [vmem:[#allocation2 + $0x558] sm:$0xff]  ;;  %v1719_v16 = vld [vmem:[#allocation2 + $0x550] sm:$0xff] }
 0x1ed   : > { %v721_v17 = vpop.f32.mrf.mxu0  ;;  %v1012_v47 = vpop.f32.mrf.mxu1 }
 0x1ef   : > { %v724_v48 = vpop.f32.mrf.mxu0  ;;  %v1015_v18 = vpop.f32.mrf.mxu1 }
 0x1f0   : > { %11252 = vmatprep.mubr.msk.f32.mxu0 %vm1026_vm1, %v1015_v18  ;;  %11302 = vmatprep.mubr.msk.f32.mxu1 %vm1026_vm1, %v724_v48  ;;  %v1722_v48 = vld [vmem:[#allocation2 + $0x568] sm:$0xff] }
 0x1f1   : > { %v726_v49 = vpop.f32.mrf.mxu0  ;;  %v1017_v50 = vpop.f32.mrf.mxu1 }
 0x1f3   : > { %v729_v19 = vpop.f32.mrf.mxu0  ;;  %v1020_v20 = vpop.f32.mrf.mxu1 }
 0x1f4   : > { %11253 = vmatmul.mubr.msk.f32.gmra.mxu0 %vm1026_vm1, %v1020_v20  ;;  %11303 = vmatmul.mubr.msk.f32.gmra.mxu1 %vm1026_vm1, %v729_v19  ;;  %v1724_v19 = vld [vmem:[#allocation2 + $0x578] sm:$0xff]  ;;  %v1723_v20 = vld [vmem:[#allocation2 + $0x570] sm:$0xff] }
 0x1f5   : > { %v1022_v52 = vpop.f32.mrf.mxu1  ;;  %1805 = vmatprep.mubr.f32.mxu0 %v1678_v51  ;;  %v731_v21 = vpop.f32.mrf.mxu0  ;;  %v1721_v51 = vld [vmem:[#allocation2 + $0x560] sm:$0xff] }
 0x1f6   : > { %v1726_v21 = vld [vmem:[#allocation2 + $0x588] sm:$0xff] }
 0x1f8   : > { %1806 = vmatmul.mubr.f32.vlgmr.msra.gmra.mxu0 %v1677_v1 }
 0x1f9   : > { %1810 = vmatprep.mubr.f32.mxu0 %v1680_v2 }
 0x1fc   : > { %1811 = vmatmul.mubr.f32.gmra.mxu0 %v1679_v53 }
 0x1fd   : > { %1815 = vmatprep.mubr.f32.mxu0 %v1682_v54 }
 0x200   : > { %1816 = vmatmul.mubr.f32.gmra.mxu0 %v1681_v22  ;;  %v1725_v22 = vld [vmem:[#allocation2 + $0x580] sm:$0xff] }
 0x201   : > { %1820 = vmatprep.mubr.f32.mxu0 %v1684_v23  ;;  %v1728_v23 = vld [vmem:[#allocation2 + $0x598] sm:$0xff] }
 0x204   : > { %1821 = vmatmul.mubr.f32.gmra.mxu0 %v1683_v3  ;;  %v1727_v3 = vld [vmem:[#allocation2 + $0x590] sm:$0xff] }
 0x205   : > { %1825 = vmatprep.mubr.f32.mxu0 %v1686_v55 }
 0x208   : > { %1826 = vmatmul.mubr.f32.gmra.mxu0 %v1685_v24 }
 0x209   : > { %1830 = vmatprep.mubr.f32.mxu0 %v1688_v56  ;;  %v1730_v56 = vld [vmem:[#allocation2 + $0x5a8] sm:$0xff] }
 0x20c   : > { %1831 = vmatmul.mubr.f32.gmra.mxu0 %v1687_v57 }
 0x20d   : > { %1835 = vmatprep.mubr.f32.mxu0 %v1690_v4 }
 0x210   : > { %1836 = vmatmul.mubr.f32.gmra.mxu0 %v1689_v25 }
 0x211   : > { %1840 = vmatprep.mubr.f32.mxu0 %v1692_v26  ;;  %v1729_v26 = vld [vmem:[#allocation2 + $0x5a0] sm:$0xff] }
 0x214   : > { %1841 = vmatmul.mubr.f32.gmra.mxu0 %v1691_v5  ;;  %v1732_v5 = vld [vmem:[#allocation2 + $0x5b8] sm:$0xff] }
 0x215   : > { %1845 = vmatprep.mubr.f32.mxu0 %v1694_v58  ;;  %v1731_v58 = vld [vmem:[#allocation2 + $0x5b0] sm:$0xff] }
 0x218   : > { %1846 = vmatmul.mubr.f32.gmra.mxu0 %v1693_v27 }
 0x219   : > { %1850 = vmatprep.mubr.f32.mxu0 %v1696_v59 }
 0x21c   : > { %1851 = vmatmul.mubr.f32.gmra.mxu0 %v1695_v6  ;;  %v1734_v6 = vld [vmem:[#allocation2 + $0x5c8] sm:$0xff] }
 0x21d   : > { %1855 = vmatprep.mubr.f32.mxu0 %v1698_v60 }
 0x220   : > { %1856 = vmatmul.mubr.f32.gmra.mxu0 %v1697_v28 }
 0x221   : > { %1860 = vmatprep.mubr.f32.mxu0 %v1700_v29 }
 0x224   : > { %1861 = vmatmul.mubr.f32.gmra.mxu0 %v1699_v61  ;;  %v1733_v61 = vld [vmem:[#allocation2 + $0x5c0] sm:$0xff] }
 0x225   : > { %1865 = vmatprep.mubr.f32.mxu0 %v1702_v62  ;;  %v1736_v62 = vld [vmem:[#allocation2 + $0x5d8] sm:$0xff] }
 0x228   : > { %1866 = vmatmul.mubr.f32.gmra.mxu0 %v1701_v30  ;;  %v1735_v30 = vld [vmem:[#allocation2 + $0x5d0] sm:$0xff] }
 0x229   : > { %1870 = vmatprep.mubr.f32.mxu0 %v1704_v7 }
 0x22c   : > { %1871 = vmatmul.mubr.f32.gmra.mxu0 %v1703_v8 }
 0x22d   : > { %1875 = vmatprep.mubr.f32.mxu0 %v1706_v63  ;;  %v1738_v63 = vld [vmem:[#allocation2 + $0x5e8] sm:$0xff] }
 0x230   : > { %1876 = vmatmul.mubr.f32.gmra.mxu0 %v1705_v33 }
 0x231   : > { %1880 = vmatprep.mubr.f32.mxu0 %v1708_v31 }
 0x234   : > { %1881 = vmatmul.mubr.f32.gmra.mxu0 %v1707_v9 }
 0x235   : > { %1885 = vmatprep.mubr.f32.mxu0 %v1710_v34  ;;  %v1737_v34 = vld [vmem:[#allocation2 + $0x5e0] sm:$0xff] }
 0x238   : > { %1886 = vmatmul.mubr.f32.gmra.mxu0 %v1709_v32  ;;  %v1740_v32 = vld [vmem:[#allocation2 + $0x5f8] sm:$0xff] }
 0x239   : > { %1890 = vmatprep.mubr.f32.mxu0 %v1712_v35  ;;  %v1739_v35 = vld [vmem:[#allocation2 + $0x5f0] sm:$0xff] }
 0x23c   : > { %v11209_v37 = vpop.f32.mrf.mxu0  ;;  %v11259_v38 = vpop.f32.mrf.mxu1  ;;  %1891 = vmatmul.mubr.f32.gmra.mxu0 %v1711_v36 }
 0x23d   : > { %v13158_v12 = vadd.f32 %v11259_v38, %v11209_v37  ;;  %1895 = vmatprep.mubr.f32.mxu0 %v1714_v10 }
 0x23e   : > { %v13161_v13 = vpop.f32.mrf.mxu0  ;;  %v13163_v14 = vpop.f32.mrf.mxu1 }
 0x240   : > { %1896 = vmatmul.mubr.f32.gmra.mxu0 %v1713_v39 }
 0x241   : > { %1900 = vmatprep.mubr.f32.mxu0 %v1716_v40 }
 0x244   : > { %v11212_v43 = vpop.f32.mrf.mxu0  ;;  %v11262_v15 = vpop.f32.mrf.mxu1  ;;  %1901 = vmatmul.mubr.f32.gmra.mxu0 %v1715_v41 }
 0x245   : > { %v13165_v44 = vadd.f32 %v11262_v15, %v11212_v43  ;;  %1905 = vmatprep.mubr.f32.mxu0 %v1718_v42 }
 0x246   : > { %v13167_v17 = vpop.f32.mrf.mxu0  ;;  %v13169_v47 = vpop.f32.mrf.mxu1 }
 0x247   : > { %15497 = vst [vmem:[#allocation20_spill] sm:$0xff] %v13169_v47  ;;  %v2365_v47 = vld [vmem:[#allocation2 + $0x740] sm:$0xff] }
 0x248   : > { %1906 = vmatmul.mubr.f32.gmra.mxu0 %v1717_v45 }
 0x249   : > { %1910 = vmatprep.mubr.f32.mxu0 %v1720_v46 }
 0x24c   : > { %v11215_v18 = vpop.f32.mrf.mxu0  ;;  %v11265_v49 = vpop.f32.mrf.mxu1  ;;  %1911 = vmatmul.mubr.f32.gmra.mxu0 %v1719_v16 }
 0x24d   : > { %v13171_v50 = vadd.f32 %v11265_v49, %v11215_v18  ;;  %1915 = vmatprep.mubr.f32.mxu0 %v1722_v48 }
 0x24e   : > { %v13173_v52 = vpop.f32.mrf.mxu0  ;;  %v13175_v1 = vpop.f32.mrf.mxu1 }
 0x24f   : > { %15498 = vst [vmem:[#allocation21_spill] sm:$0xff] %v13173_v52  ;;  %15499 = vst [vmem:[#allocation22_spill] sm:$0xff] %v13175_v1 }
 0x250   : > { %1916 = vmatmul.mubr.f32.gmra.mxu0 %v1721_v51 }
 0x251   : > { %1920 = vmatprep.mubr.f32.mxu0 %v1724_v19 }
 0x254   : > { %v11218_v2 = vpop.f32.mrf.mxu0  ;;  %v11268_v53 = vpop.f32.mrf.mxu1  ;;  %1921 = vmatmul.mubr.f32.gmra.mxu0 %v1723_v20 }
 0x255   : > { %v13177_v54 = vadd.f32 %v11268_v53, %v11218_v2  ;;  %1925 = vmatprep.mubr.f32.mxu0 %v1726_v21 }
 0x256   : > { %v13179_v55 = vpop.f32.mrf.mxu0  ;;  %v13181_v24 = vpop.f32.mrf.mxu1 }
 0x257   : > { %15500 = vst [vmem:[#allocation23_spill] sm:$0xff] %v13179_v55  ;;  %15501 = vst [vmem:[#allocation24_spill] sm:$0xff] %v13181_v24 }
 0x258   : > { %1926 = vmatmul.mubr.f32.gmra.mxu0 %v1725_v22 }
 0x259   : > { %1930 = vmatprep.mubr.f32.mxu0 %v1728_v23 }
 0x25c   : > { %v11221_v57 = vpop.f32.mrf.mxu0  ;;  %v11271_v4 = vpop.f32.mrf.mxu1  ;;  %1931 = vmatmul.mubr.f32.gmra.mxu0 %v1727_v3 }
 0x25d   : > { %v13183_v25 = vadd.f32 %v11271_v4, %v11221_v57  ;;  %1935 = vmatprep.mubr.f32.mxu0 %v1730_v56 }
 0x25e   : > { %v13185_v27 = vpop.f32.mrf.mxu0  ;;  %v13187_v59 = vpop.f32.mrf.mxu1 }
 0x25f   : > { %15502 = vst [vmem:[#allocation25_spill] sm:$0xff] %v13185_v27  ;;  %15503 = vst [vmem:[#allocation26_spill] sm:$0xff] %v13187_v59 }
 0x260   : > { %1936 = vmatmul.mubr.f32.gmra.mxu0 %v1729_v26 }
 0x261   : > { %1940 = vmatprep.mubr.f32.mxu0 %v1732_v5 }
 0x264   : > { %v11224_v60 = vpop.f32.mrf.mxu0  ;;  %v11274_v28 = vpop.f32.mrf.mxu1  ;;  %1941 = vmatmul.mubr.f32.gmra.mxu0 %v1731_v58 }
 0x265   : > { %v13189_v29 = vadd.f32 %v11274_v28, %v11224_v60  ;;  %1945 = vmatprep.mubr.f32.mxu0 %v1734_v6 }
 0x266   : > { %v13191_v7 = vpop.f32.mrf.mxu0  ;;  %v13193_v8 = vpop.f32.mrf.mxu1 }
 0x267   : > { %15504 = vst [vmem:[#allocation27_spill] sm:$0xff] %v13191_v7  ;;  %15505 = vst [vmem:[#allocation28_spill] sm:$0xff] %v13193_v8 }
 0x268   : > { %1946 = vmatmul.mubr.f32.gmra.mxu0 %v1733_v61 }
 0x269   : > { %1950 = vmatprep.mubr.f32.mxu0 %v1736_v62 }
 0x26c   : > { %v11227_v33 = vpop.f32.mrf.mxu0  ;;  %v11277_v31 = vpop.f32.mrf.mxu1  ;;  %1951 = vmatmul.mubr.f32.gmra.mxu0 %v1735_v30 }
 0x26d   : > { %v13195_v9 = vadd.f32 %v11277_v31, %v11227_v33  ;;  %1955 = vmatprep.mubr.f32.mxu0 %v1738_v63 }
 0x26e   : > { %v13197_v36 = vpop.f32.mrf.mxu0  ;;  %v13199_v10 = vpop.f32.mrf.mxu1 }
 0x26f   : > { %15506 = vst [vmem:[#allocation29_spill] sm:$0xff] %v13197_v36  ;;  %15507 = vst [vmem:[#allocation30_spill] sm:$0xff] %v13199_v10  ;;  %v13421_v10 = vld [vmem:[%s12791_s22 + $0x88] sm:$0xff]  ;;  %v13426_v36 = vld [vmem:[%s12791_s22 + $0x80] sm:$0xff] }
 0x270   : > { %1956 = vmatmul.mubr.f32.gmra.mxu0 %v1737_v34 }
 0x271   : > { %1960 = vmatprep.mubr.f32.mxu0 %v1740_v32 }
 0x274   : > { %v11230_v11 = vpop.f32.mrf.mxu0  ;;  %v11280_v37 = vpop.f32.mrf.mxu1  ;;  %1961 = vmatmul.mubr.f32.gmra.mxu0 %v1739_v35 }
 0x275   : > { %v13201_v38 = vadd.f32 %v11280_v37, %v11230_v11 }
 0x276   : > { %v13203_v39 = vpop.f32.mrf.mxu0  ;;  %v13205_v40 = vpop.f32.mrf.mxu1 }
 0x277   : > { %15508 = vst [vmem:[#allocation31_spill] sm:$0xff] %v13203_v39  ;;  %15509 = vst [vmem:[#allocation32_spill] sm:$0xff] %v13205_v40  ;;  %v13410_v40 = vld [vmem:[%s12791_s22 + $0x98] sm:$0xff]  ;;  %v13415_v39 = vld [vmem:[%s12791_s22 + $0x90] sm:$0xff] }
 0x27c   : > { %v11233_v41 = vpop.f32.mrf.mxu0  ;;  %v11283_v42 = vpop.f32.mrf.mxu1 }
 0x27d   : > { %v13207_v43 = vadd.f32 %v11283_v42, %v11233_v41 }
 0x27e   : > { %v13209_v15 = vpop.f32.mrf.mxu0  ;;  %v13211_v45 = vpop.f32.mrf.mxu1 }
 0x27f   : > { %15510 = vst [vmem:[#allocation33_spill] sm:$0xff] %v13209_v15  ;;  %15511 = vst [vmem:[#allocation34_spill] sm:$0xff] %v13211_v45  ;;  %v13399_v45 = vld [vmem:[%s12791_s22 + $0xa8] sm:$0xff]  ;;  %v13404_v15 = vld [vmem:[%s12791_s22 + $0xa0] sm:$0xff] }
 0x284   : > { %v11236_v46 = vpop.f32.mrf.mxu0  ;;  %v11286_v16 = vpop.f32.mrf.mxu1 }
 0x285   : > { %v13213_v48 = vadd.f32 %v11286_v16, %v11236_v46 }
 0x286   : > { %v13215_v18 = vpop.f32.mrf.mxu0  ;;  %v13217_v49 = vpop.f32.mrf.mxu1 }
 0x287   : > { %15512 = vst [vmem:[#allocation35_spill] sm:$0xff] %v13215_v18  ;;  %15513 = vst [vmem:[#allocation36_spill] sm:$0xff] %v13217_v49  ;;  %v13388_v49 = vld [vmem:[%s12791_s22 + $0xb8] sm:$0xff]  ;;  %v13393_v18 = vld [vmem:[%s12791_s22 + $0xb0] sm:$0xff] }
 0x28c   : > { %v11239_v51 = vpop.f32.mrf.mxu0  ;;  %v11289_v19 = vpop.f32.mrf.mxu1 }
 0x28d   : > { %v13219_v20 = vadd.f32 %v11289_v19, %v11239_v51  ;;  %v13256_v51 = vld [vmem:[%s12791_s22 + $0x78] sm:$0xff] }
 0x28e   : > { %v13221_v21 = vpop.f32.mrf.mxu0  ;;  %v13223_v2 = vpop.f32.mrf.mxu1 }
 0x28f   : > { %15514 = vst [vmem:[#allocation37_spill] sm:$0xff] %v13221_v21  ;;  %15515 = vst [vmem:[#allocation38_spill] sm:$0xff] %v13223_v2  ;;  %v13377_v2 = vld [vmem:[%s12791_s22 + $0xc8] sm:$0xff]  ;;  %v13382_v21 = vld [vmem:[%s12791_s22 + $0xc0] sm:$0xff] }
 0x294   : > { %v11242_v53 = vpop.f32.mrf.mxu0  ;;  %v11292_v22 = vpop.f32.mrf.mxu1 }
 0x295   : > { %v13225_v23 = vadd.f32 %v11292_v22, %v11242_v53  ;;  %v13261_v53 = vld [vmem:[%s12791_s22 + $0x70] sm:$0xff] }
 0x296   : > { %v13227_v3 = vpop.f32.mrf.mxu0  ;;  %v13229_v56 = vpop.f32.mrf.mxu1 }
 0x297   : > { %15516 = vst [vmem:[#allocation39_spill] sm:$0xff] %v13227_v3  ;;  %15517 = vst [vmem:[#allocation40_spill] sm:$0xff] %v13229_v56  ;;  %v13366_v56 = vld [vmem:[%s12791_s22 + $0xd8] sm:$0xff]  ;;  %v13371_v3 = vld [vmem:[%s12791_s22 + $0xd0] sm:$0xff] }
 0x29c   : > { %v11245_v57 = vpop.f32.mrf.mxu0  ;;  %v11295_v4 = vpop.f32.mrf.mxu1 }
 0x29d   : > { %v13231_v26 = vadd.f32 %v11295_v4, %v11245_v57  ;;  %v13267_v57 = vld [vmem:[%s12791_s22 + $0x68] sm:$0xff] }
 0x29e   : > { %v13233_v5 = vpop.f32.mrf.mxu0  ;;  %v13235_v58 = vpop.f32.mrf.mxu1 }
 0x29f   : > { %15518 = vst [vmem:[#allocation41_spill] sm:$0xff] %v13233_v5  ;;  %15519 = vst [vmem:[#allocation42_spill] sm:$0xff] %v13235_v58  ;;  %v13355_v58 = vld [vmem:[%s12791_s22 + $0xe8] sm:$0xff]  ;;  %v13360_v5 = vld [vmem:[%s12791_s22 + $0xe0] sm:$0xff] }
 0x2a4   : > { %v11248_v6 = vpop.f32.mrf.mxu0  ;;  %v11298_v60 = vpop.f32.mrf.mxu1 }
 0x2a5   : > { %v13237_v28 = vadd.f32 %v11298_v60, %v11248_v6  ;;  %v13272_v6 = vld [vmem:[%s12791_s22 + $0x60] sm:$0xff] }
 0x2a6   : > { %v13239_v61 = vpop.f32.mrf.mxu0  ;;  %v13241_v62 = vpop.f32.mrf.mxu1 }
 0x2a7   : > { %15520 = vst [vmem:[#allocation43_spill] sm:$0xff] %v13239_v61  ;;  %15521 = vst [vmem:[#allocation44_spill] sm:$0xff] %v13241_v62  ;;  %v13344_v62 = vld [vmem:[%s12791_s22 + $0xf8] sm:$0xff]  ;;  %v13349_v61 = vld [vmem:[%s12791_s22 + $0xf0] sm:$0xff] }
 0x2ac   : > { %v11251_v30 = vpop.f32.mrf.mxu0  ;;  %v11301_v63 = vpop.f32.mrf.mxu1 }
 0x2ad   : > { %v13243_v33 = vadd.f32 %v11301_v63, %v11251_v30  ;;  %v13278_v30 = vld [vmem:[%s12791_s22 + $0x58] sm:$0xff] }
 0x2ae   : > { %v13245_v31 = vpop.f32.mrf.mxu0  ;;  %v13247_v34 = vpop.f32.mrf.mxu1 }
 0x2af   : > { %15522 = vst [vmem:[#allocation45_spill] sm:$0xff] %v13245_v31  ;;  %15523 = vst [vmem:[#allocation46_spill] sm:$0xff] %v13247_v34  ;;  %v13333_v34 = vld [vmem:[%s12791_s22 + $0x8] sm:$0xff]  ;;  %v13338_v31 = vld [vmem:[%s12791_s22] sm:$0xff] }
 0x2b4   : > { %v11254_v32 = vpop.f32.mrf.mxu0  ;;  %v11304_v35 = vpop.f32.mrf.mxu1 }
 0x2b5   : > { %v13249_v11 = vadd.f32 %v11304_v35, %v11254_v32  ;;  %v13283_v32 = vld [vmem:[%s12791_s22 + $0x50] sm:$0xff] }
 0x2b6   : > { %v13251_v37 = vpop.f32.mrf.mxu0 }
 0x2b7   : > { %15524 = vst [vmem:[#allocation47_spill] sm:$0xff] %v13251_v37  ;;  %v13327_v37 = vld [vmem:[%s12791_s22 + $0x10] sm:$0xff] }
 0x2b8   : > { %v1807_v41 = vpop.f32.mrf.mxu0 }
 0x2b9   : > { %11307 = vmatprep.mubr.msk.f32.mxu1 %vm1026_vm1, %v1807_v41  ;;  %v13289_v41 = vld [vmem:[%s12791_s22 + $0x48] sm:$0xff] }
 0x2ba   : > { %v1809_v42 = vpop.f32.mrf.mxu0 }
 0x2bc   : > { %v1812_v46 = vpop.f32.mrf.mxu0 }
 0x2bd   : > { %11308 = vmatmul.mubr.msk.f32.vlgmr.msra.gmra.mxu1 %vm1026_vm1, %v1812_v46  ;;  %v13294_v46 = vld [vmem:[%s12791_s22 + $0x40] sm:$0xff] }
 0x2be   : > { %v1814_v16 = vpop.f32.mrf.mxu0  ;;  %2390 = vmatpush1.msra.mxu1 %v13256_v51 }
 0x2bf   : > { %2391 = vmatprep.subr.mxu1 %v15474_v0 }
 0x2c0   : > { %v1817_v19 = vpop.f32.mrf.mxu0  ;;  %2392 = vmatpush1.msra.mxu1 %v13261_v53 }
 0x2c1   : > { %11310 = vmatprep.mubr.msk.f32.mxu1 %vm1026_vm1, %v1817_v19  ;;  %2393 = vmatprep.subr.mxu1 %v15474_v0  ;;  %v13300_v19 = vld [vmem:[%s12791_s22 + $0x38] sm:$0xff] }
 0x2c2   : > { %v1819_v22 = vpop.f32.mrf.mxu0  ;;  %2394 = vmatpush1.msra.mxu1 %v13267_v57 }
 0x2c3   : > { %2395 = vmatprep.subr.mxu1 %v15474_v0 }
 0x2c4   : > { %v1822_v4 = vpop.f32.mrf.mxu0  ;;  %2396 = vmatpush1.msra.mxu1 %v13272_v6 }
 0x2c5   : > { %11311 = vmatmul.mubr.msk.f32.gmra.mxu1 %vm1026_vm1, %v1822_v4  ;;  %2397 = vmatprep.subr.mxu1 %v15474_v0  ;;  %v13305_v4 = vld [vmem:[%s12791_s22 + $0x30] sm:$0xff] }
 0x2c6   : > { %v1824_v60 = vpop.f32.mrf.mxu0  ;;  %2398 = vmatpush1.msra.mxu1 %v13278_v30 }
 0x2c7   : > { %2399 = vmatprep.subr.mxu1 %v15474_v0 }
 0x2c8   : > { %v1827_v63 = vpop.f32.mrf.mxu0  ;;  %2400 = vmatpush1.msra.mxu1 %v13283_v32 }
 0x2c9   : > { %11313 = vmatprep.mubr.msk.f32.mxu1 %vm1026_vm1, %v1827_v63  ;;  %2401 = vmatprep.subr.mxu1 %v15474_v0  ;;  %v13311_v63 = vld [vmem:[%s12791_s22 + $0x28] sm:$0xff] }
 0x2ca   : > { %v1829_v35 = vpop.f32.mrf.mxu0  ;;  %2402 = vmatpush1.msra.mxu1 %v13289_v41 }
 0x2cb   : > { %2403 = vmatprep.subr.mxu1 %v15474_v0 }
 0x2cc   : > { %v1832_v42 = vpop.f32.mrf.mxu0  ;;  %2404 = vmatpush1.msra.mxu1 %v13294_v46 }
 0x2cd   : > { %11314 = vmatmul.mubr.msk.f32.gmra.mxu1 %vm1026_vm1, %v1832_v42  ;;  %2405 = vmatprep.subr.mxu1 %v15474_v0  ;;  %v13316_v42 = vld [vmem:[%s12791_s22 + $0x20] sm:$0xff] }
 0x2ce   : > { %v1834_v16 = vpop.f32.mrf.mxu0  ;;  %2406 = vmatpush1.msra.mxu1 %v13300_v19 }
 0x2cf   : > { %2407 = vmatprep.subr.mxu1 %v15474_v0 }
 0x2d0   : > { %v1837_v22 = vpop.f32.mrf.mxu0  ;;  %2408 = vmatpush1.msra.mxu1 %v13305_v4 }
 0x2d1   : > { %11316 = vmatprep.mubr.msk.f32.mxu1 %vm1026_vm1, %v1837_v22  ;;  %2409 = vmatprep.subr.mxu1 %v15474_v0  ;;  %v13322_v22 = vld [vmem:[%s12791_s22 + $0x18] sm:$0xff] }
 0x2d2   : > { %v1839_v60 = vpop.f32.mrf.mxu0  ;;  %2410 = vmatpush1.msra.mxu1 %v13311_v63 }
 0x2d3   : > { %2411 = vmatprep.subr.mxu1 %v15474_v0 }
 0x2d4   : > { %v1842_v35 = vpop.f32.mrf.mxu0  ;;  %2412 = vmatpush1.msra.mxu1 %v13316_v42 }
 0x2d5   : > { %11317 = vmatmul.mubr.msk.f32.gmra.mxu1 %vm1026_vm1, %v1842_v35  ;;  %2413 = vmatprep.subr.mxu1 %v15474_v0 }
 0x2d6   : > { %v1844_v16 = vpop.f32.mrf.mxu0  ;;  %2414 = vmatpush1.msra.mxu1 %v13322_v22 }
 0x2d7   : > { %2415 = vmatprep.subr.mxu1 %v15474_v0 }
 0x2d8   : > { %v1847_v60 = vpop.f32.mrf.mxu0  ;;  %2416 = vmatpush1.msra.mxu1 %v13327_v37 }
 0x2d9   : > { %11319 = vmatprep.mubr.msk.f32.mxu1 %vm1026_vm1, %v1847_v60  ;;  %2417 = vmatprep.subr.mxu1 %v15474_v0 }
 0x2da   : > { %v1849_v35 = vpop.f32.mrf.mxu0  ;;  %2418 = vmatpush1.msra.mxu1 %v13333_v34 }
 0x2db   : > { %2419 = vmatprep.subr.mxu1 %v15474_v0 }
 0x2dc   : > { %v1852_v16 = vpop.f32.mrf.mxu0  ;;  %2420 = vmatpush1.msra.mxu1 %v13338_v31 }
 0x2dd   : > { %11320 = vmatmul.mubr.msk.f32.gmra.mxu1 %vm1026_vm1, %v1852_v16  ;;  %2421 = vmatprep.subr.mxu1 %v15474_v0 }
 0x2de   : > { %v1854_v60 = vpop.f32.mrf.mxu0  ;;  %2422 = vmatpush2.msra.mxu1 %v13344_v62 }
 0x2df   : > { %2423 = vmatprep.subr.mxu1 %v15474_v0 }
 0x2e0   : > { %v1857_v35 = vpop.f32.mrf.mxu0  ;;  %2424 = vmatpush2.msra.mxu1 %v13349_v61 }
 0x2e1   : > { %11322 = vmatprep.mubr.msk.f32.mxu1 %vm1026_vm1, %v1857_v35  ;;  %2425 = vmatprep.subr.mxu1 %v15474_v0 }
 0x2e2   : > { %v1859_v16 = vpop.f32.mrf.mxu0  ;;  %2426 = vmatpush2.msra.mxu1 %v13355_v58 }
 0x2e3   : > { %2427 = vmatprep.subr.mxu1 %v15474_v0 }
 0x2e4   : > { %v1862_v60 = vpop.f32.mrf.mxu0  ;;  %2428 = vmatpush2.msra.mxu1 %v13360_v5 }
 0x2e5   : > { %11323 = vmatmul.mubr.msk.f32.gmra.mxu1 %vm1026_vm1, %v1862_v60  ;;  %2429 = vmatprep.subr.mxu1 %v15474_v0 }
 0x2e6   : > { %v1864_v35 = vpop.f32.mrf.mxu0  ;;  %2430 = vmatpush2.msra.mxu1 %v13366_v56 }
 0x2e7   : > { %2431 = vmatprep.subr.mxu1 %v15474_v0 }
 0x2e8   : > { %v1867_v16 = vpop.f32.mrf.mxu0  ;;  %2432 = vmatpush2.msra.mxu1 %v13371_v3 }
 0x2e9   : > { %11325 = vmatprep.mubr.msk.f32.mxu1 %vm1026_vm1, %v1867_v16  ;;  %2433 = vmatprep.subr.mxu1 %v15474_v0 }
 0x2ea   : > { %v1869_v60 = vpop.f32.mrf.mxu0  ;;  %2434 = vmatpush2.msra.mxu1 %v13377_v2 }
 0x2eb   : > { %2435 = vmatprep.subr.mxu1 %v15474_v0 }
 0x2ec   : > { %v1872_v35 = vpop.f32.mrf.mxu0  ;;  %2436 = vmatpush2.msra.mxu1 %v13382_v21 }
 0x2ed   : > { %11326 = vmatmul.mubr.msk.f32.gmra.mxu1 %vm1026_vm1, %v1872_v35  ;;  %2437 = vmatprep.subr.mxu1 %v15474_v0 }
 0x2ee   : > { %v1874_v16 = vpop.f32.mrf.mxu0  ;;  %2438 = vmatpush2.msra.mxu1 %v13388_v49 }
 0x2ef   : > { %2439 = vmatprep.subr.mxu1 %v15474_v0 }
 0x2f0   : > { %v1877_v60 = vpop.f32.mrf.mxu0  ;;  %2440 = vmatpush2.msra.mxu1 %v13393_v18 }
 0x2f1   : > { %11328 = vmatprep.mubr.msk.f32.mxu1 %vm1026_vm1, %v1877_v60  ;;  %2441 = vmatprep.subr.mxu1 %v15474_v0 }
 0x2f2   : > { %v1879_v35 = vpop.f32.mrf.mxu0  ;;  %2442 = vmatpush2.msra.mxu1 %v13399_v45 }
 0x2f3   : > { %2443 = vmatprep.subr.mxu1 %v15474_v0 }
 0x2f4   : > { %v1882_v16 = vpop.f32.mrf.mxu0  ;;  %2444 = vmatpush2.msra.mxu1 %v13404_v15 }
 0x2f5   : > { %11329 = vmatmul.mubr.msk.f32.gmra.mxu1 %vm1026_vm1, %v1882_v16  ;;  %2445 = vmatprep.subr.mxu1 %v15474_v0 }
 0x2f6   : > { %v1884_v60 = vpop.f32.mrf.mxu0  ;;  %2446 = vmatpush2.msra.mxu1 %v13410_v40 }
 0x2f7   : > { %2447 = vmatprep.subr.mxu1 %v15474_v0 }
 0x2f8   : > { %v1887_v35 = vpop.f32.mrf.mxu0  ;;  %2448 = vmatpush2.msra.mxu1 %v13415_v39 }
 0x2f9   : > { %11331 = vmatprep.mubr.msk.f32.mxu1 %vm1026_vm1, %v1887_v35  ;;  %2449 = vmatprep.subr.mxu1 %v15474_v0 }
 0x2fa   : > { %v1889_v16 = vpop.f32.mrf.mxu0  ;;  %2450 = vmatpush2.msra.mxu1 %v13421_v10 }
 0x2fb   : > { %2451 = vmatprep.subr.mxu1 %v15474_v0 }
 0x2fc   : > { %v1892_v60 = vpop.f32.mrf.mxu0  ;;  %2452 = vmatpush2.msra.mxu1 %v13426_v36 }
 0x2fd   : > { %11332 = vmatmul.mubr.msk.f32.gmra.mxu1 %vm1026_vm1, %v1892_v60 }
 0x2fe   : > { %v1894_v8 = vpop.f32.mrf.mxu0 }
 0x300   : > { %v1897_v7 = vpop.f32.mrf.mxu0 }
 0x301   : > { %11334 = vmatprep.mubr.msk.f32.mxu1 %vm1026_vm1, %v1897_v7 }
 0x302   : > { %v1899_v35 = vpop.f32.mrf.mxu0 }
 0x304   : > { %v1902_v59 = vpop.f32.mrf.mxu0 }
 0x305   : > { %11335 = vmatmul.mubr.msk.f32.gmra.mxu1 %vm1026_vm1, %v1902_v59 }
 0x306   : > { %v1904_v16 = vpop.f32.mrf.mxu0 }
 0x308   : > { %v1907_v27 = vpop.f32.mrf.mxu0 }
 0x309   : > { %11337 = vmatprep.mubr.msk.f32.mxu1 %vm1026_vm1, %v1907_v27 }
 0x30a   : > { %v1909_v0 = vpop.f32.mrf.mxu0 }
 0x30c   : > { %v1912_v24 = vpop.f32.mrf.mxu0 }
 0x30d   : > { %11338 = vmatmul.mubr.msk.f32.gmra.mxu1 %vm1026_vm1, %v1912_v24 }
 0x30e   : > { %v1914_v55 = vpop.f32.mrf.mxu0 }
 0x310   : > { %v1917_v1 = vpop.f32.mrf.mxu0 }
 0x311   : > { %11340 = vmatprep.mubr.msk.f32.mxu1 %vm1026_vm1, %v1917_v1 }
 0x312   : > { %v1919_v8 = vpop.f32.mrf.mxu0 }
 0x314   : > { %v1922_v60 = vpop.f32.mrf.mxu0 }
 0x315   : > { %11341 = vmatmul.mubr.msk.f32.gmra.mxu1 %vm1026_vm1, %v1922_v60 }
 0x316   : > { %v1924_v7 = vpop.f32.mrf.mxu0 }
 0x318   : > { %v1927_v35 = vpop.f32.mrf.mxu0 }
 0x319   : > { %11343 = vmatprep.mubr.msk.f32.mxu1 %vm1026_vm1, %v1927_v35 }
 0x31a   : > { %v1929_v59 = vpop.f32.mrf.mxu0 }
 0x31c   : > { %v1932_v16 = vpop.f32.mrf.mxu0 }
 0x31d   : > { %11344 = vmatmul.mubr.msk.f32.gmra.mxu1 %vm1026_vm1, %v1932_v16 }
 0x31e   : > { %v1934_v0 = vpop.f32.mrf.mxu0 }
 0x31f   : > { %v2326_v0 = vld [vmem:[#allocation2 + $0x608] sm:$0xff] }
 0x320   : > { %v1937_v27 = vpop.f32.mrf.mxu0 }
 0x321   : > { %11346 = vmatprep.mubr.msk.f32.mxu1 %vm1026_vm1, %v1937_v27 }
 0x322   : > { %v1939_v55 = vpop.f32.mrf.mxu0 }
 0x323   : > { %v2325_v55 = vld [vmem:[#allocation2 + $0x600] sm:$0xff] }
 0x324   : > { %v1942_v24 = vpop.f32.mrf.mxu0 }
 0x325   : > { %11347 = vmatmul.mubr.msk.f32.gmra.mxu1 %vm1026_vm1, %v1942_v24  ;;  %v2328_v24 = vld [vmem:[#allocation2 + $0x618] sm:$0xff] }
 0x326   : > { %v1944_v1 = vpop.f32.mrf.mxu0 }
 0x327   : > { %v2327_v1 = vld [vmem:[#allocation2 + $0x610] sm:$0xff] }
 0x328   : > { %v1947_v8 = vpop.f32.mrf.mxu0 }
 0x329   : > { %11349 = vmatprep.mubr.msk.f32.mxu1 %vm1026_vm1, %v1947_v8  ;;  %v2330_v8 = vld [vmem:[#allocation2 + $0x628] sm:$0xff] }
 0x32a   : > { %v1949_v60 = vpop.f32.mrf.mxu0 }
 0x32b   : > { %v2329_v60 = vld [vmem:[#allocation2 + $0x620] sm:$0xff] }
 0x32c   : > { %v1952_v7 = vpop.f32.mrf.mxu0 }
 0x32d   : > { %11350 = vmatmul.mubr.msk.f32.gmra.mxu1 %vm1026_vm1, %v1952_v7  ;;  %v2332_v7 = vld [vmem:[#allocation2 + $0x638] sm:$0xff] }
 0x32e   : > { %v1954_v35 = vpop.f32.mrf.mxu0 }
 0x32f   : > { %v2331_v35 = vld [vmem:[#allocation2 + $0x630] sm:$0xff] }
 0x330   : > { %v1957_v59 = vpop.f32.mrf.mxu0 }
 0x331   : > { %11352 = vmatprep.mubr.msk.f32.mxu1 %vm1026_vm1, %v1957_v59  ;;  %v2334_v59 = vld [vmem:[#allocation2 + $0x648] sm:$0xff] }
 0x332   : > { %v1959_v16 = vpop.f32.mrf.mxu0 }
 0x333   : > { %v2333_v16 = vld [vmem:[#allocation2 + $0x640] sm:$0xff] }
 0x334   : > { %v1962_v52 = vpop.f32.mrf.mxu0 }
 0x335   : > { %11353 = vmatmul.mubr.msk.f32.gmra.mxu1 %vm1026_vm1, %v1962_v52  ;;  %v2336_v52 = vld [vmem:[#allocation2 + $0x658] sm:$0xff] }
 0x336   : > { %v1964_v27 = vpop.f32.mrf.mxu0  ;;  %2453 = vmatprep.mubr.f32.mxu1 %v2326_v0  ;;  %v2335_v0 = vld [vmem:[#allocation2 + $0x650] sm:$0xff] }
 0x337   : > { %v2338_v27 = vld [vmem:[#allocation2 + $0x668] sm:$0xff] }
 0x339   : > { %2454 = vmatmul.mubr.f32.vlgmr.msra.gmra.mxu1 %v2325_v55  ;;  %v2337_v55 = vld [vmem:[#allocation2 + $0x660] sm:$0xff] }
 0x33a   : > { %2458 = vmatprep.mubr.f32.mxu1 %v2328_v24  ;;  %v2340_v24 = vld [vmem:[#allocation2 + $0x678] sm:$0xff] }
 0x33d   : > { %2459 = vmatmul.mubr.f32.gmra.mxu1 %v2327_v1  ;;  %v2339_v1 = vld [vmem:[#allocation2 + $0x670] sm:$0xff] }
 0x33e   : > { %2463 = vmatprep.mubr.f32.mxu1 %v2330_v8  ;;  %v2342_v8 = vld [vmem:[#allocation2 + $0x688] sm:$0xff] }
 0x341   : > { %2464 = vmatmul.mubr.f32.gmra.mxu1 %v2329_v60  ;;  %v2341_v60 = vld [vmem:[#allocation2 + $0x680] sm:$0xff] }
 0x342   : > { %2468 = vmatprep.mubr.f32.mxu1 %v2332_v7  ;;  %v2344_v7 = vld [vmem:[#allocation2 + $0x698] sm:$0xff] }
 0x345   : > { %2469 = vmatmul.mubr.f32.gmra.mxu1 %v2331_v35  ;;  %v2343_v35 = vld [vmem:[#allocation2 + $0x690] sm:$0xff] }
 0x346   : > { %2473 = vmatprep.mubr.f32.mxu1 %v2334_v59  ;;  %v2346_v59 = vld [vmem:[#allocation2 + $0x6a8] sm:$0xff] }
 0x349   : > { %2474 = vmatmul.mubr.f32.gmra.mxu1 %v2333_v16  ;;  %v2345_v16 = vld [vmem:[#allocation2 + $0x6a0] sm:$0xff] }
 0x34a   : > { %2478 = vmatprep.mubr.f32.mxu1 %v2336_v52  ;;  %v2348_v52 = vld [vmem:[#allocation2 + $0x6b8] sm:$0xff] }
 0x34d   : > { %2479 = vmatmul.mubr.f32.gmra.mxu1 %v2335_v0  ;;  %v2347_v0 = vld [vmem:[#allocation2 + $0x6b0] sm:$0xff] }
 0x34e   : > { %2483 = vmatprep.mubr.f32.mxu1 %v2338_v27  ;;  %v2350_v27 = vld [vmem:[#allocation2 + $0x6c8] sm:$0xff] }
 0x351   : > { %2484 = vmatmul.mubr.f32.gmra.mxu1 %v2337_v55  ;;  %v2349_v55 = vld [vmem:[#allocation2 + $0x6c0] sm:$0xff] }
 0x352   : > { %2488 = vmatprep.mubr.f32.mxu1 %v2340_v24  ;;  %v2352_v24 = vld [vmem:[#allocation2 + $0x6d8] sm:$0xff] }
 0x355   : > { %2489 = vmatmul.mubr.f32.gmra.mxu1 %v2339_v1  ;;  %v2351_v1 = vld [vmem:[#allocation2 + $0x6d0] sm:$0xff] }
 0x356   : > { %2493 = vmatprep.mubr.f32.mxu1 %v2342_v8  ;;  %v2354_v8 = vld [vmem:[#allocation2 + $0x6e8] sm:$0xff] }
 0x359   : > { %2494 = vmatmul.mubr.f32.gmra.mxu1 %v2341_v60  ;;  %v2353_v60 = vld [vmem:[#allocation2 + $0x6e0] sm:$0xff] }
 0x35a   : > { %2498 = vmatprep.mubr.f32.mxu1 %v2344_v7  ;;  %v2356_v7 = vld [vmem:[#allocation2 + $0x6f8] sm:$0xff] }
 0x35d   : > { %2499 = vmatmul.mubr.f32.gmra.mxu1 %v2343_v35  ;;  %v2355_v35 = vld [vmem:[#allocation2 + $0x6f0] sm:$0xff] }
 0x35e   : > { %2503 = vmatprep.mubr.f32.mxu1 %v2346_v59  ;;  %v2358_v59 = vld [vmem:[#allocation2 + $0x708] sm:$0xff] }
 0x361   : > { %2504 = vmatmul.mubr.f32.gmra.mxu1 %v2345_v16  ;;  %v2357_v16 = vld [vmem:[#allocation2 + $0x700] sm:$0xff] }
 0x362   : > { %2508 = vmatprep.mubr.f32.mxu1 %v2348_v52  ;;  %v2360_v52 = vld [vmem:[#allocation2 + $0x718] sm:$0xff] }
 0x365   : > { %2509 = vmatmul.mubr.f32.gmra.mxu1 %v2347_v0  ;;  %v10235_v0 = vld [vmem:[%s15463_s2 + $0xc] sm:$0xf] }
 0x366   : > { %2513 = vmatprep.mubr.f32.mxu1 %v2350_v27  ;;  %v2359_v27 = vld [vmem:[#allocation2 + $0x710] sm:$0xff]  ;;  %11355 = vmatprep.subr.msk.mxu0 %vm1123_vm0, %v10235_v0 }
 0x367   : > { %11356 = vmatpush3.msk.msra.mxu0 %vm1123_vm0, %v10235_v0 }
 0x369   : > { %2514 = vmatmul.mubr.f32.gmra.mxu1 %v2349_v55  ;;  %v13448_v55 = vpop.f32.mrf.mxu1 }
 0x36a   : > { %2518 = vmatprep.mubr.f32.mxu1 %v2352_v24  ;;  %15525 = vst [vmem:[#allocation48_spill] sm:$0xff] %v13448_v55  ;;  %v2362_v24 = vld [vmem:[#allocation2 + $0x728] sm:$0xff] }
 0x36d   : > { %2519 = vmatmul.mubr.f32.gmra.mxu1 %v2351_v1  ;;  %v15526_v1 = vmov 0.0  }
 0x36e   : > { %2523 = vmatprep.mubr.f32.mxu1 %v2354_v8  ;;  %3037 = vmatprep.subr.mxu0 %v15526_v1 }
 0x371   : > { %2524 = vmatmul.mubr.f32.gmra.mxu1 %v2353_v60 }
 0x372   : > { %2528 = vmatprep.mubr.f32.mxu1 %v2356_v7  ;;  %v2361_v7 = vld [vmem:[#allocation2 + $0x720] sm:$0xff] }
 0x375   : > { %2529 = vmatmul.mubr.f32.gmra.mxu1 %v2355_v35  ;;  %v2364_v35 = vld [vmem:[#allocation2 + $0x738] sm:$0xff] }
 0x376   : > { %2533 = vmatprep.mubr.f32.mxu1 %v2358_v59  ;;  %v2363_v59 = vld [vmem:[#allocation2 + $0x730] sm:$0xff] }
 0x379   : > { %2534 = vmatmul.mubr.f32.gmra.mxu1 %v2357_v16 }
 0x37a   : > { %2538 = vmatprep.mubr.f32.mxu1 %v2360_v52  ;;  %v2366_v52 = vld [vmem:[#allocation2 + $0x748] sm:$0xff] }
 0x37d   : > { %v11309_v8 = vpop.f32.mrf.mxu1  ;;  %2539 = vmatmul.mubr.f32.gmra.mxu1 %v2359_v27  ;;  %v2368_v27 = vld [vmem:[#allocation2 + $0x758] sm:$0xff] }
 0x37e   : > { %v13453_v60 = vadd.f32 %v11309_v8, %v13158_v12  ;;  %2543 = vmatprep.mubr.f32.mxu1 %v2362_v24  ;;  %v2367_v12 = vld [vmem:[#allocation2 + $0x750] sm:$0xff]  ;;  %v2370_v8 = vld [vmem:[#allocation2 + $0x768] sm:$0xff] }
 0x37f   : > { %v13455_v16 = vpop.f32.mrf.mxu1 }
 0x380   : > { %15527 = vst [vmem:[#allocation49_spill] sm:$0xff] %v13455_v16  ;;  %v2369_v16 = vld [vmem:[#allocation2 + $0x760] sm:$0xff] }
 0x381   : > { %2544 = vmatmul.mubr.f32.gmra.mxu1 %v2361_v7 }
 0x382   : > { %2548 = vmatprep.mubr.f32.mxu1 %v2364_v35 }
 0x385   : > { %v11312_v55 = vpop.f32.mrf.mxu1  ;;  %2549 = vmatmul.mubr.f32.gmra.mxu1 %v2363_v59  ;;  %v2372_v59 = vld [vmem:[#allocation2 + $0x778] sm:$0xff] }
 0x386   : > { %v13458_v0 = vadd.f32 %v11312_v55, %v13165_v44  ;;  %2553 = vmatprep.mubr.f32.mxu1 %v2366_v52  ;;  %v2371_v44 = vld [vmem:[#allocation2 + $0x770] sm:$0xff]  ;;  %v2374_v52 = vld [vmem:[#allocation2 + $0x788] sm:$0xff] }
 0x387   : > { %v13460_v24 = vpop.f32.mrf.mxu1 }
 0x388   : > { %15528 = vst [vmem:[#allocation50_spill] sm:$0xff] %v13460_v24  ;;  %v2373_v24 = vld [vmem:[#allocation2 + $0x780] sm:$0xff] }
 0x389   : > { %2554 = vmatmul.mubr.f32.gmra.mxu1 %v2365_v47 }
 0x38a   : > { %2558 = vmatprep.mubr.f32.mxu1 %v2368_v27 }
 0x38d   : > { %v11315_v7 = vpop.f32.mrf.mxu1  ;;  %2559 = vmatmul.mubr.f32.gmra.mxu1 %v2367_v12  ;;  %v2376_v12 = vld [vmem:[#allocation2 + $0x798] sm:$0xff] }
 0x38e   : > { %v13463_v35 = vadd.f32 %v11315_v7, %v13171_v50  ;;  %2563 = vmatprep.mubr.f32.mxu1 %v2370_v8  ;;  %v2375_v50 = vld [vmem:[#allocation2 + $0x790] sm:$0xff]  ;;  %v2378_v7 = vld [vmem:[#allocation2 + $0x7a8] sm:$0xff] }
 0x38f   : > { %v13465_v55 = vpop.f32.mrf.mxu1 }
 0x390   : > { %15529 = vst [vmem:[#allocation51_spill] sm:$0xff] %v13465_v55  ;;  %v2377_v55 = vld [vmem:[#allocation2 + $0x7a0] sm:$0xff] }
 0x391   : > { %2564 = vmatmul.mubr.f32.gmra.mxu1 %v2369_v16 }
 0x392   : > { %2568 = vmatprep.mubr.f32.mxu1 %v2372_v59 }
 0x395   : > { %v11318_v47 = vpop.f32.mrf.mxu1  ;;  %2569 = vmatmul.mubr.f32.gmra.mxu1 %v2371_v44  ;;  %v2380_v44 = vld [vmem:[#allocation2 + $0x7b8] sm:$0xff] }
 0x396   : > { %v13468_v27 = vadd.f32 %v11318_v47, %v13177_v54  ;;  %2573 = vmatprep.mubr.f32.mxu1 %v2374_v52  ;;  %v2379_v54 = vld [vmem:[#allocation2 + $0x7b0] sm:$0xff]  ;;  %v2382_v47 = vld [vmem:[#allocation2 + $0x7c8] sm:$0xff] }
 0x397   : > { %v13470_v8 = vpop.f32.mrf.mxu1 }
 0x398   : > { %15530 = vst [vmem:[#allocation52_spill] sm:$0xff] %v13470_v8  ;;  %v2381_v8 = vld [vmem:[#allocation2 + $0x7c0] sm:$0xff] }
 0x399   : > { %2574 = vmatmul.mubr.f32.gmra.mxu1 %v2373_v24 }
 0x39a   : > { %2578 = vmatprep.mubr.f32.mxu1 %v2376_v12 }
 0x39d   : > { %v11321_v16 = vpop.f32.mrf.mxu1  ;;  %2579 = vmatmul.mubr.f32.gmra.mxu1 %v2375_v50  ;;  %v2384_v50 = vld [vmem:[#allocation2 + $0x7d8] sm:$0xff] }
 0x39e   : > { %v13473_v59 = vadd.f32 %v11321_v16, %v13183_v25  ;;  %2583 = vmatprep.mubr.f32.mxu1 %v2378_v7  ;;  %v2383_v25 = vld [vmem:[#allocation2 + $0x7d0] sm:$0xff]  ;;  %v2386_v16 = vld [vmem:[#allocation2 + $0x7e8] sm:$0xff] }
 0x39f   : > { %v13475_v52 = vpop.f32.mrf.mxu1 }
 0x3a0   : > { %15531 = vst [vmem:[#allocation53_spill] sm:$0xff] %v13475_v52  ;;  %v2385_v52 = vld [vmem:[#allocation2 + $0x7e0] sm:$0xff] }
 0x3a1   : > { %2584 = vmatmul.mubr.f32.gmra.mxu1 %v2377_v55 }
 0x3a2   : > { %2588 = vmatprep.mubr.f32.mxu1 %v2380_v44 }
 0x3a5   : > { %v11324_v24 = vpop.f32.mrf.mxu1  ;;  %2589 = vmatmul.mubr.f32.gmra.mxu1 %v2379_v54  ;;  %v2388_v54 = vld [vmem:[#allocation2 + $0x7f8] sm:$0xff] }
 0x3a6   : > { %v13478_v12 = vadd.f32 %v11324_v24, %v13189_v29  ;;  %2593 = vmatprep.mubr.f32.mxu1 %v2382_v47  ;;  %v2387_v29 = vld [vmem:[#allocation2 + $0x7f0] sm:$0xff] }
 0x3a7   : > { %v13480_v7 = vpop.f32.mrf.mxu1 }
 0x3a8   : > { %15532 = vst [vmem:[#allocation54_spill] sm:$0xff] %v13480_v7 }
 0x3a9   : > { %2594 = vmatmul.mubr.f32.gmra.mxu1 %v2381_v8 }
 0x3aa   : > { %2598 = vmatprep.mubr.f32.mxu1 %v2384_v50 }
 0x3ad   : > { %v11327_v55 = vpop.f32.mrf.mxu1  ;;  %2599 = vmatmul.mubr.f32.gmra.mxu1 %v2383_v25 }
 0x3ae   : > { %v13483_v44 = vadd.f32 %v11327_v55, %v13195_v9  ;;  %2603 = vmatprep.mubr.f32.mxu1 %v2386_v16 }
 0x3af   : > { %v13485_v47 = vpop.f32.mrf.mxu1 }
 0x3b0   : > { %15533 = vst [vmem:[#allocation55_spill] sm:$0xff] %v13485_v47 }
 0x3b1   : > { %2604 = vmatmul.mubr.f32.gmra.mxu1 %v2385_v52 }
 0x3b2   : > { %2608 = vmatprep.mubr.f32.mxu1 %v2388_v54 }
 0x3b5   : > { %v11330_v24 = vpop.f32.mrf.mxu1  ;;  %2609 = vmatmul.mubr.f32.gmra.mxu1 %v2387_v29 }
 0x3b6   : > { %v13488_v8 = vadd.f32 %v11330_v24, %v13201_v38 }
 0x3b7   : > { %v13490_v50 = vpop.f32.mrf.mxu1 }
 0x3b8   : > { %15534 = vst [vmem:[#allocation56_spill] sm:$0xff] %v13490_v50 }
 0x3bd   : > { %v11333_v7 = vpop.f32.mrf.mxu1 }
 0x3be   : > { %v13493_v25 = vadd.f32 %v11333_v7, %v13207_v43 }
 0x3bf   : > { %v13495_v9 = vpop.f32.mrf.mxu1 }
 0x3c0   : > { %15535 = vst [vmem:[#allocation57_spill] sm:$0xff] %v13495_v9 }
 0x3c5   : > { %v11336_v16 = vpop.f32.mrf.mxu1 }
 0x3c6   : > { %v13498_v52 = vadd.f32 %v11336_v16, %v13213_v48 }
 0x3c7   : > { %v13500_v55 = vpop.f32.mrf.mxu1 }
 0x3c8   : > { %15536 = vst [vmem:[#allocation58_spill] sm:$0xff] %v13500_v55 }
 0x3cd   : > { %v11339_v54 = vpop.f32.mrf.mxu1 }
 0x3ce   : > { %v13503_v29 = vadd.f32 %v11339_v54, %v13219_v20 }
 0x3cf   : > { %v13505_v38 = vpop.f32.mrf.mxu1 }
 0x3d0   : > { %15537 = vst [vmem:[#allocation59_spill] sm:$0xff] %v13505_v38 }
 0x3d5   : > { %v11342_v24 = vpop.f32.mrf.mxu1 }
 0x3d6   : > { %v13508_v50 = vadd.f32 %v11342_v24, %v13225_v23 }
 0x3d7   : > { %v13510_v43 = vpop.f32.mrf.mxu1 }
 0x3d8   : > { %15538 = vst [vmem:[#allocation60_spill] sm:$0xff] %v13510_v43 }
 0x3dd   : > { %v11345_v7 = vpop.f32.mrf.mxu1 }
 0x3de   : > { %v13513_v9 = vadd.f32 %v11345_v7, %v13231_v26 }
 0x3df   : > { %v13515_v48 = vpop.f32.mrf.mxu1 }
 0x3e0   : > { %15539 = vst [vmem:[#allocation61_spill] sm:$0xff] %v13515_v48 }
 0x3e5   : > { %v11348_v16 = vpop.f32.mrf.mxu1 }
 0x3e6   : > { %v13518_v55 = vadd.f32 %v11348_v16, %v13237_v28 }
 0x3e7   : > { %v13520_v20 = vpop.f32.mrf.mxu1 }
 0x3e8   : > { %15540 = vst [vmem:[#allocation62_spill] sm:$0xff] %v13520_v20 }
 0x3ed   : > { %v11351_v54 = vpop.f32.mrf.mxu1 }
 0x3ee   : > { %v13523_v38 = vadd.f32 %v11351_v54, %v13243_v33 }
 0x3ef   : > { %v13525_v23 = vpop.f32.mrf.mxu1 }
 0x3f0   : > { %15541 = vst [vmem:[#allocation63_spill] sm:$0xff] %v13525_v23 }
 0x3f5   : > { %v11354_v24 = vpop.f32.mrf.mxu1 }
 0x3f6   : > { %v13528_v43 = vadd.f32 %v11354_v24, %v13249_v11 }
 0x3f7   : > { %v13530_v26 = vpop.f32.mrf.mxu1 }
 0x3f8   : > { %15542 = vst [vmem:[#allocation64_spill] sm:$0xff] %v13530_v26 }
 0x3f9   : > { %v2455_v7 = vpop.f32.mrf.mxu1 }
 0x3fa   : > { %11357 = vmatprep.mubr.msk.f32.mxu0 %vm1026_vm1, %v2455_v7 }
 0x3fb   : > { %v2457_v48 = vpop.f32.mrf.mxu1 }
 0x3fd   : > { %v2460_v28 = vpop.f32.mrf.mxu1 }
 0x3fe   : > { %11358 = vmatmul.mubr.msk.f32.vlgmr.msra.gmra.mxu0 %vm1026_vm1, %v2460_v28 }
 0x3ff   : > { %v2462_v16 = vpop.f32.mrf.mxu1  ;;  %3038 = vmatpush1.msra.mxu0 %v13256_v51 }
 0x400   : > { %3039 = vmatprep.subr.mxu0 %v15526_v1 }
 0x401   : > { %v2465_v33 = vpop.f32.mrf.mxu1  ;;  %3040 = vmatpush1.msra.mxu0 %v13261_v53 }
 0x402   : > { %11360 = vmatprep.mubr.msk.f32.mxu0 %vm1026_vm1, %v2465_v33  ;;  %3041 = vmatprep.subr.mxu0 %v15526_v1 }
 0x403   : > { %v2467_v11 = vpop.f32.mrf.mxu1  ;;  %3042 = vmatpush1.msra.mxu0 %v13267_v57 }
 0x404   : > { %3043 = vmatprep.subr.mxu0 %v15526_v1 }
 0x405   : > { %v2470_v48 = vpop.f32.mrf.mxu1  ;;  %3044 = vmatpush1.msra.mxu0 %v13272_v6 }
 0x406   : > { %11361 = vmatmul.mubr.msk.f32.gmra.mxu0 %vm1026_vm1, %v2470_v48  ;;  %3045 = vmatprep.subr.mxu0 %v15526_v1 }
 0x407   : > { %v2472_v51 = vpop.f32.mrf.mxu1  ;;  %3046 = vmatpush1.msra.mxu0 %v13278_v30 }
 0x408   : > { %3047 = vmatprep.subr.mxu0 %v15526_v1 }
 0x409   : > { %v2475_v53 = vpop.f32.mrf.mxu1  ;;  %3048 = vmatpush1.msra.mxu0 %v13283_v32 }
 0x40a   : > { %11363 = vmatprep.mubr.msk.f32.mxu0 %vm1026_vm1, %v2475_v53  ;;  %3049 = vmatprep.subr.mxu0 %v15526_v1 }
 0x40b   : > { %v2477_v57 = vpop.f32.mrf.mxu1  ;;  %3050 = vmatpush1.msra.mxu0 %v13289_v41 }
 0x40c   : > { %3051 = vmatprep.subr.mxu0 %v15526_v1 }
 0x40d   : > { %v2480_v6 = vpop.f32.mrf.mxu1  ;;  %3052 = vmatpush1.msra.mxu0 %v13294_v46 }
 0x40e   : > { %11364 = vmatmul.mubr.msk.f32.gmra.mxu0 %vm1026_vm1, %v2480_v6  ;;  %3053 = vmatprep.subr.mxu0 %v15526_v1 }
 0x40f   : > { %v2482_v30 = vpop.f32.mrf.mxu1  ;;  %3054 = vmatpush1.msra.mxu0 %v13300_v19 }
 0x410   : > { %3055 = vmatprep.subr.mxu0 %v15526_v1 }
 0x411   : > { %v2485_v32 = vpop.f32.mrf.mxu1  ;;  %3056 = vmatpush1.msra.mxu0 %v13305_v4 }
 0x412   : > { %11366 = vmatprep.mubr.msk.f32.mxu0 %vm1026_vm1, %v2485_v32  ;;  %3057 = vmatprep.subr.mxu0 %v15526_v1 }
 0x413   : > { %v2487_v41 = vpop.f32.mrf.mxu1  ;;  %3058 = vmatpush1.msra.mxu0 %v13311_v63 }
 0x414   : > { %3059 = vmatprep.subr.mxu0 %v15526_v1 }
 0x415   : > { %v2490_v46 = vpop.f32.mrf.mxu1  ;;  %3060 = vmatpush1.msra.mxu0 %v13316_v42 }
 0x416   : > { %11367 = vmatmul.mubr.msk.f32.gmra.mxu0 %vm1026_vm1, %v2490_v46  ;;  %3061 = vmatprep.subr.mxu0 %v15526_v1 }
 0x417   : > { %v2492_v19 = vpop.f32.mrf.mxu1  ;;  %3062 = vmatpush1.msra.mxu0 %v13322_v22 }
 0x418   : > { %3063 = vmatprep.subr.mxu0 %v15526_v1 }
 0x419   : > { %v2495_v4 = vpop.f32.mrf.mxu1  ;;  %3064 = vmatpush1.msra.mxu0 %v13327_v37 }
 0x41a   : > { %11369 = vmatprep.mubr.msk.f32.mxu0 %vm1026_vm1, %v2495_v4  ;;  %3065 = vmatprep.subr.mxu0 %v15526_v1 }
 0x41b   : > { %v2497_v63 = vpop.f32.mrf.mxu1  ;;  %3066 = vmatpush1.msra.mxu0 %v13333_v34 }
 0x41c   : > { %3067 = vmatprep.subr.mxu0 %v15526_v1 }
 0x41d   : > { %v2500_v42 = vpop.f32.mrf.mxu1  ;;  %3068 = vmatpush1.msra.mxu0 %v13338_v31 }
 0x41e   : > { %11370 = vmatmul.mubr.msk.f32.gmra.mxu0 %vm1026_vm1, %v2500_v42  ;;  %3069 = vmatprep.subr.mxu0 %v15526_v1 }
 0x41f   : > { %v2502_v22 = vpop.f32.mrf.mxu1  ;;  %3070 = vmatpush2.msra.mxu0 %v13344_v62 }
 0x420   : > { %3071 = vmatprep.subr.mxu0 %v15526_v1 }
 0x421   : > { %v2505_v37 = vpop.f32.mrf.mxu1  ;;  %3072 = vmatpush2.msra.mxu0 %v13349_v61 }
 0x422   : > { %11372 = vmatprep.mubr.msk.f32.mxu0 %vm1026_vm1, %v2505_v37  ;;  %3073 = vmatprep.subr.mxu0 %v15526_v1 }
 0x423   : > { %v2507_v34 = vpop.f32.mrf.mxu1  ;;  %3074 = vmatpush2.msra.mxu0 %v13355_v58 }
 0x424   : > { %3075 = vmatprep.subr.mxu0 %v15526_v1 }
 0x425   : > { %v2510_v31 = vpop.f32.mrf.mxu1  ;;  %3076 = vmatpush2.msra.mxu0 %v13360_v5 }
 0x426   : > { %11373 = vmatmul.mubr.msk.f32.gmra.mxu0 %vm1026_vm1, %v2510_v31  ;;  %3077 = vmatprep.subr.mxu0 %v15526_v1  ;;  %v2974_v31 = vld [vmem:[#allocation2 + $0x808] sm:$0xff] }
 0x427   : > { %v2512_v62 = vpop.f32.mrf.mxu1  ;;  %3078 = vmatpush2.msra.mxu0 %v13366_v56 }
 0x428   : > { %3079 = vmatprep.subr.mxu0 %v15526_v1 }
 0x429   : > { %v2515_v61 = vpop.f32.mrf.mxu1  ;;  %3080 = vmatpush2.msra.mxu0 %v13371_v3 }
 0x42a   : > { %11375 = vmatprep.mubr.msk.f32.mxu0 %vm1026_vm1, %v2515_v61  ;;  %3081 = vmatprep.subr.mxu0 %v15526_v1 }
 0x42b   : > { %v2517_v58 = vpop.f32.mrf.mxu1  ;;  %3082 = vmatpush2.msra.mxu0 %v13377_v2 }
 0x42c   : > { %3083 = vmatprep.subr.mxu0 %v15526_v1  ;;  %v2973_v58 = vld [vmem:[#allocation2 + $0x800] sm:$0xff] }
 0x42d   : > { %v2520_v5 = vpop.f32.mrf.mxu1  ;;  %3084 = vmatpush2.msra.mxu0 %v13382_v21 }
 0x42e   : > { %11376 = vmatmul.mubr.msk.f32.gmra.mxu0 %vm1026_vm1, %v2520_v5  ;;  %3085 = vmatprep.subr.mxu0 %v15526_v1  ;;  %v2976_v5 = vld [vmem:[#allocation2 + $0x818] sm:$0xff] }
 0x42f   : > { %v2522_v56 = vpop.f32.mrf.mxu1  ;;  %3086 = vmatpush2.msra.mxu0 %v13388_v49 }
 0x430   : > { %3087 = vmatprep.subr.mxu0 %v15526_v1  ;;  %v2975_v56 = vld [vmem:[#allocation2 + $0x810] sm:$0xff] }
 0x431   : > { %v2525_v3 = vpop.f32.mrf.mxu1  ;;  %3088 = vmatpush2.msra.mxu0 %v13393_v18 }
 0x432   : > { %11378 = vmatprep.mubr.msk.f32.mxu0 %vm1026_vm1, %v2525_v3  ;;  %3089 = vmatprep.subr.mxu0 %v15526_v1  ;;  %v2978_v3 = vld [vmem:[#allocation2 + $0x828] sm:$0xff] }
 0x433   : > { %v2527_v2 = vpop.f32.mrf.mxu1  ;;  %3090 = vmatpush2.msra.mxu0 %v13399_v45 }
 0x434   : > { %3091 = vmatprep.subr.mxu0 %v15526_v1  ;;  %v2977_v2 = vld [vmem:[#allocation2 + $0x820] sm:$0xff] }
 0x435   : > { %v2530_v21 = vpop.f32.mrf.mxu1  ;;  %3092 = vmatpush2.msra.mxu0 %v13404_v15 }
 0x436   : > { %11379 = vmatmul.mubr.msk.f32.gmra.mxu0 %vm1026_vm1, %v2530_v21  ;;  %3093 = vmatprep.subr.mxu0 %v15526_v1  ;;  %v2980_v21 = vld [vmem:[#allocation2 + $0x838] sm:$0xff] }
 0x437   : > { %v2532_v49 = vpop.f32.mrf.mxu1  ;;  %3094 = vmatpush2.msra.mxu0 %v13410_v40 }
 0x438   : > { %3095 = vmatprep.subr.mxu0 %v15526_v1  ;;  %v2979_v49 = vld [vmem:[#allocation2 + $0x830] sm:$0xff] }
 0x439   : > { %v2535_v18 = vpop.f32.mrf.mxu1  ;;  %3096 = vmatpush2.msra.mxu0 %v13415_v39 }
 0x43a   : > { %11381 = vmatprep.mubr.msk.f32.mxu0 %vm1026_vm1, %v2535_v18  ;;  %3097 = vmatprep.subr.mxu0 %v15526_v1  ;;  %v2982_v18 = vld [vmem:[#allocation2 + $0x848] sm:$0xff] }
 0x43b   : > { %v2537_v45 = vpop.f32.mrf.mxu1  ;;  %3098 = vmatpush2.msra.mxu0 %v13421_v10 }
 0x43c   : > { %3099 = vmatprep.subr.mxu0 %v15526_v1  ;;  %v2981_v45 = vld [vmem:[#allocation2 + $0x840] sm:$0xff] }
 0x43d   : > { %v2540_v15 = vpop.f32.mrf.mxu1  ;;  %3100 = vmatpush2.msra.mxu0 %v13426_v36 }
 0x43e   : > { %11382 = vmatmul.mubr.msk.f32.gmra.mxu0 %vm1026_vm1, %v2540_v15  ;;  %v2984_v15 = vld [vmem:[#allocation2 + $0x858] sm:$0xff] }
 0x43f   : > { %v2542_v40 = vpop.f32.mrf.mxu1 }
 0x440   : > { %v2983_v40 = vld [vmem:[#allocation2 + $0x850] sm:$0xff] }
 0x441   : > { %v2545_v54 = vpop.f32.mrf.mxu1 }
 0x442   : > { %11384 = vmatprep.mubr.msk.f32.mxu0 %vm1026_vm1, %v2545_v54  ;;  %v2986_v54 = vld [vmem:[#allocation2 + $0x868] sm:$0xff] }
 0x443   : > { %v2547_v24 = vpop.f32.mrf.mxu1 }
 0x444   : > { %v2985_v24 = vld [vmem:[#allocation2 + $0x860] sm:$0xff] }
 0x445   : > { %v2550_v39 = vpop.f32.mrf.mxu1 }
 0x446   : > { %11385 = vmatmul.mubr.msk.f32.gmra.mxu0 %vm1026_vm1, %v2550_v39  ;;  %v2988_v39 = vld [vmem:[#allocation2 + $0x878] sm:$0xff] }
 0x447   : > { %v2552_v7 = vpop.f32.mrf.mxu1 }
 0x448   : > { %v2987_v7 = vld [vmem:[#allocation2 + $0x870] sm:$0xff] }
 0x449   : > { %v2555_v28 = vpop.f32.mrf.mxu1 }
 0x44a   : > { %11387 = vmatprep.mubr.msk.f32.mxu0 %vm1026_vm1, %v2555_v28  ;;  %v2990_v28 = vld [vmem:[#allocation2 + $0x888] sm:$0xff] }
 0x44b   : > { %v2557_v10 = vpop.f32.mrf.mxu1 }
 0x44c   : > { %v2989_v10 = vld [vmem:[#allocation2 + $0x880] sm:$0xff] }
 0x44d   : > { %v2560_v16 = vpop.f32.mrf.mxu1 }
 0x44e   : > { %11388 = vmatmul.mubr.msk.f32.gmra.mxu0 %vm1026_vm1, %v2560_v16  ;;  %v2992_v16 = vld [vmem:[#allocation2 + $0x898] sm:$0xff] }
 0x44f   : > { %v2562_v33 = vpop.f32.mrf.mxu1 }
 0x450   : > { %v2991_v33 = vld [vmem:[#allocation2 + $0x890] sm:$0xff] }
 0x451   : > { %v2565_v36 = vpop.f32.mrf.mxu1 }
 0x452   : > { %11390 = vmatprep.mubr.msk.f32.mxu0 %vm1026_vm1, %v2565_v36  ;;  %v2994_v36 = vld [vmem:[#allocation2 + $0x8a8] sm:$0xff] }
 0x453   : > { %v2567_v11 = vpop.f32.mrf.mxu1 }
 0x454   : > { %v2993_v11 = vld [vmem:[#allocation2 + $0x8a0] sm:$0xff] }
 0x455   : > { %v2570_v48 = vpop.f32.mrf.mxu1 }
 0x456   : > { %11391 = vmatmul.mubr.msk.f32.gmra.mxu0 %vm1026_vm1, %v2570_v48  ;;  %v2996_v48 = vld [vmem:[#allocation2 + $0x8b8] sm:$0xff] }
 0x457   : > { %v2572_v51 = vpop.f32.mrf.mxu1 }
 0x458   : > { %v2995_v51 = vld [vmem:[#allocation2 + $0x8b0] sm:$0xff] }
 0x459   : > { %v2575_v53 = vpop.f32.mrf.mxu1 }
 0x45a   : > { %11393 = vmatprep.mubr.msk.f32.mxu0 %vm1026_vm1, %v2575_v53  ;;  %v2998_v53 = vld [vmem:[#allocation2 + $0x8c8] sm:$0xff] }
 0x45b   : > { %v2577_v57 = vpop.f32.mrf.mxu1 }
 0x45c   : > { %v2997_v57 = vld [vmem:[#allocation2 + $0x8c0] sm:$0xff] }
 0x45d   : > { %v2580_v6 = vpop.f32.mrf.mxu1 }
 0x45e   : > { %11394 = vmatmul.mubr.msk.f32.gmra.mxu0 %vm1026_vm1, %v2580_v6  ;;  %v3000_v6 = vld [vmem:[#allocation2 + $0x8d8] sm:$0xff] }
 0x45f   : > { %v2582_v30 = vpop.f32.mrf.mxu1 }
 0x460   : > { %v2999_v30 = vld [vmem:[#allocation2 + $0x8d0] sm:$0xff] }
 0x461   : > { %v2585_v32 = vpop.f32.mrf.mxu1 }
 0x462   : > { %11396 = vmatprep.mubr.msk.f32.mxu0 %vm1026_vm1, %v2585_v32  ;;  %v3002_v32 = vld [vmem:[#allocation2 + $0x8e8] sm:$0xff] }
 0x463   : > { %v2587_v41 = vpop.f32.mrf.mxu1 }
 0x464   : > { %v3001_v41 = vld [vmem:[#allocation2 + $0x8e0] sm:$0xff] }
 0x465   : > { %v2590_v46 = vpop.f32.mrf.mxu1 }
 0x466   : > { %11397 = vmatmul.mubr.msk.f32.gmra.mxu0 %vm1026_vm1, %v2590_v46  ;;  %v3004_v46 = vld [vmem:[#allocation2 + $0x8f8] sm:$0xff] }
 0x467   : > { %v2592_v19 = vpop.f32.mrf.mxu1 }
 0x468   : > { %v3003_v19 = vld [vmem:[#allocation2 + $0x8f0] sm:$0xff] }
 0x469   : > { %v2595_v4 = vpop.f32.mrf.mxu1 }
 0x46a   : > { %11399 = vmatprep.mubr.msk.f32.mxu0 %vm1026_vm1, %v2595_v4  ;;  %v3006_v4 = vld [vmem:[#allocation2 + $0x908] sm:$0xff] }
 0x46b   : > { %v2597_v63 = vpop.f32.mrf.mxu1 }
 0x46c   : > { %v3005_v63 = vld [vmem:[#allocation2 + $0x900] sm:$0xff] }
 0x46d   : > { %v2600_v42 = vpop.f32.mrf.mxu1 }
 0x46e   : > { %11400 = vmatmul.mubr.msk.f32.gmra.mxu0 %vm1026_vm1, %v2600_v42  ;;  %v3008_v42 = vld [vmem:[#allocation2 + $0x918] sm:$0xff] }
 0x46f   : > { %v2602_v22 = vpop.f32.mrf.mxu1 }
 0x470   : > { %v10269_v22 = vld [vmem:[%s15463_s2 + $0x10] sm:$0xf] }
 0x471   : > { %v2605_v37 = vpop.f32.mrf.mxu1  ;;  %11405 = vmatprep.subr.msk.mxu1 %vm1123_vm0, %v10269_v22 }
 0x472   : > { %11402 = vmatprep.mubr.msk.f32.mxu0 %vm1026_vm1, %v2605_v37  ;;  %v3007_v37 = vld [vmem:[#allocation2 + $0x910] sm:$0xff]  ;;  %11406 = vmatpush3.msk.msra.mxu1 %vm1123_vm0, %v10269_v22 }
 0x473   : > { %v2607_v34 = vpop.f32.mrf.mxu1  ;;  %3685 = vmatprep.subr.mxu1 %v15526_v1 }
 0x474   : > { %v3010_v34 = vld [vmem:[#allocation2 + $0x928] sm:$0xff] }
 0x475   : > { %v2610_v62 = vpop.f32.mrf.mxu1 }
 0x476   : > { %11403 = vmatmul.mubr.msk.f32.gmra.mxu0 %vm1026_vm1, %v2610_v62 }
 0x477   : > { %v2612_v61 = vpop.f32.mrf.mxu1  ;;  %3101 = vmatprep.mubr.f32.mxu0 %v2974_v31 }
 0x478   : > { %v3009_v61 = vld [vmem:[#allocation2 + $0x920] sm:$0xff] }
 0x47a   : > { %3102 = vmatmul.mubr.f32.vlgmr.msra.gmra.mxu0 %v2973_v58  ;;  %v3012_v58 = vld [vmem:[#allocation2 + $0x938] sm:$0xff] }
 0x47b   : > { %3106 = vmatprep.mubr.f32.mxu0 %v2976_v5  ;;  %v3011_v5 = vld [vmem:[#allocation2 + $0x930] sm:$0xff] }
 0x47e   : > { %3107 = vmatmul.mubr.f32.gmra.mxu0 %v2975_v56 }
 0x47f   : > { %3111 = vmatprep.mubr.f32.mxu0 %v2978_v3  ;;  %v3014_v3 = vld [vmem:[#allocation2 + $0x948] sm:$0xff] }
 0x482   : > { %3112 = vmatmul.mubr.f32.gmra.mxu0 %v2977_v2 }
 0x483   : > { %3116 = vmatprep.mubr.f32.mxu0 %v2980_v21 }
 0x486   : > { %3117 = vmatmul.mubr.f32.gmra.mxu0 %v2979_v49  ;;  %v3013_v49 = vld [vmem:[#allocation2 + $0x940] sm:$0xff] }
 0x487   : > { %3121 = vmatprep.mubr.f32.mxu0 %v2982_v18  ;;  %v3016_v18 = vld [vmem:[#allocation2 + $0x958] sm:$0xff] }
 0x48a   : > { %3122 = vmatmul.mubr.f32.gmra.mxu0 %v2981_v45 }
 0x48b   : > { %3126 = vmatprep.mubr.f32.mxu0 %v2984_v15  ;;  %v3018_v15 = vld [vmem:[#allocation2 + $0x968] sm:$0xff] }
 0x48e   : > { %3127 = vmatmul.mubr.f32.gmra.mxu0 %v2983_v40 }
 0x48f   : > { %3131 = vmatprep.mubr.f32.mxu0 %v2986_v54 }
 0x492   : > { %3132 = vmatmul.mubr.f32.gmra.mxu0 %v2985_v24  ;;  %v3017_v24 = vld [vmem:[#allocation2 + $0x960] sm:$0xff] }
 0x493   : > { %3136 = vmatprep.mubr.f32.mxu0 %v2988_v39  ;;  %v3020_v39 = vld [vmem:[#allocation2 + $0x978] sm:$0xff] }
 0x496   : > { %3137 = vmatmul.mubr.f32.gmra.mxu0 %v2987_v7 }
 0x497   : > { %3141 = vmatprep.mubr.f32.mxu0 %v2990_v28  ;;  %v3022_v28 = vld [vmem:[#allocation2 + $0x988] sm:$0xff] }
 0x49a   : > { %3142 = vmatmul.mubr.f32.gmra.mxu0 %v2989_v10 }
 0x49b   : > { %3146 = vmatprep.mubr.f32.mxu0 %v2992_v16 }
 0x49e   : > { %3147 = vmatmul.mubr.f32.gmra.mxu0 %v2991_v33  ;;  %v3021_v33 = vld [vmem:[#allocation2 + $0x980] sm:$0xff] }
 0x49f   : > { %3151 = vmatprep.mubr.f32.mxu0 %v2994_v36  ;;  %v3024_v36 = vld [vmem:[#allocation2 + $0x998] sm:$0xff] }
 0x4a2   : > { %3152 = vmatmul.mubr.f32.gmra.mxu0 %v2993_v11 }
 0x4a3   : > { %3156 = vmatprep.mubr.f32.mxu0 %v2996_v48  ;;  %v3026_v48 = vld [vmem:[#allocation2 + $0x9a8] sm:$0xff] }
 0x4a6   : > { %3157 = vmatmul.mubr.f32.gmra.mxu0 %v2995_v51 }
 0x4a7   : > { %3161 = vmatprep.mubr.f32.mxu0 %v2998_v53 }
 0x4aa   : > { %3162 = vmatmul.mubr.f32.gmra.mxu0 %v2997_v57  ;;  %v3025_v57 = vld [vmem:[#allocation2 + $0x9a0] sm:$0xff] }
 0x4ab   : > { %3166 = vmatprep.mubr.f32.mxu0 %v3000_v6  ;;  %v3028_v6 = vld [vmem:[#allocation2 + $0x9b8] sm:$0xff] }
 0x4ae   : > { %3167 = vmatmul.mubr.f32.gmra.mxu0 %v2999_v30 }
 0x4af   : > { %3171 = vmatprep.mubr.f32.mxu0 %v3002_v32  ;;  %v3030_v32 = vld [vmem:[#allocation2 + $0x9c8] sm:$0xff] }
 0x4b2   : > { %3172 = vmatmul.mubr.f32.gmra.mxu0 %v3001_v41 }
 0x4b3   : > { %3176 = vmatprep.mubr.f32.mxu0 %v3004_v46 }
 0x4b6   : > { %3177 = vmatmul.mubr.f32.gmra.mxu0 %v3003_v19  ;;  %v3029_v19 = vld [vmem:[#allocation2 + $0x9c0] sm:$0xff] }
 0x4b7   : > { %3181 = vmatprep.mubr.f32.mxu0 %v3006_v4  ;;  %v3032_v4 = vld [vmem:[#allocation2 + $0x9d8] sm:$0xff] }
 0x4ba   : > { %3182 = vmatmul.mubr.f32.gmra.mxu0 %v3005_v63 }
 0x4bb   : > { %3186 = vmatprep.mubr.f32.mxu0 %v3008_v42  ;;  %v3034_v42 = vld [vmem:[#allocation2 + $0x9e8] sm:$0xff] }
 0x4be   : > { %v11359_v31 = vpop.f32.mrf.mxu0  ;;  %3187 = vmatmul.mubr.f32.gmra.mxu0 %v3007_v37 }
 0x4bf   : > { %v13634_v62 = vadd.f32 %v11359_v31, %v13453_v60  ;;  %3191 = vmatprep.mubr.f32.mxu0 %v3010_v34  ;;  %v3015_v60 = vld [vmem:[#allocation2 + $0x950] sm:$0xff]  ;;  %v3033_v34 = vld [vmem:[#allocation2 + $0x9e0] sm:$0xff]  ;;  %v3036_v31 = vld [vmem:[#allocation2 + $0x9f8] sm:$0xff] }
 0x4c0   : > { %v13636_v56 = vpop.f32.mrf.mxu0 }
 0x4c1   : > { %15543 = vst [vmem:[#allocation65_spill] sm:$0xff] %v13636_v56 }
 0x4c2   : > { %3192 = vmatmul.mubr.f32.gmra.mxu0 %v3009_v61 }
 0x4c3   : > { %3196 = vmatprep.mubr.f32.mxu0 %v3012_v58 }
 0x4c6   : > { %v11362_v2 = vpop.f32.mrf.mxu0  ;;  %3197 = vmatmul.mubr.f32.gmra.mxu0 %v3011_v5 }
 0x4c7   : > { %v13639_v21 = vadd.f32 %v11362_v2, %v13458_v0  ;;  %3201 = vmatprep.mubr.f32.mxu0 %v3014_v3  ;;  %v3019_v0 = vld [vmem:[#allocation2 + $0x970] sm:$0xff] }
 0x4c8   : > { %v13641_v45 = vpop.f32.mrf.mxu0 }
 0x4c9   : > { %15544 = vst [vmem:[#allocation66_spill] sm:$0xff] %v13641_v45 }
 0x4ca   : > { %3202 = vmatmul.mubr.f32.gmra.mxu0 %v3013_v49 }
 0x4cb   : > { %3206 = vmatprep.mubr.f32.mxu0 %v3016_v18 }
 0x4ce   : > { %v11365_v40 = vpop.f32.mrf.mxu0  ;;  %3207 = vmatmul.mubr.f32.gmra.mxu0 %v3015_v60 }
 0x4cf   : > { %v13644_v54 = vadd.f32 %v11365_v40, %v13463_v35  ;;  %3211 = vmatprep.mubr.f32.mxu0 %v3018_v15  ;;  %v3023_v35 = vld [vmem:[#allocation2 + $0x990] sm:$0xff] }
 0x4d0   : > { %v13646_v7 = vpop.f32.mrf.mxu0 }
 0x4d1   : > { %15545 = vst [vmem:[#allocation67_spill] sm:$0xff] %v13646_v7 }
 0x4d2   : > { %3212 = vmatmul.mubr.f32.gmra.mxu0 %v3017_v24 }
 0x4d3   : > { %3216 = vmatprep.mubr.f32.mxu0 %v3020_v39 }
 0x4d6   : > { %v11368_v10 = vpop.f32.mrf.mxu0  ;;  %3217 = vmatmul.mubr.f32.gmra.mxu0 %v3019_v0 }
 0x4d7   : > { %v13649_v16 = vadd.f32 %v11368_v10, %v13468_v27  ;;  %3221 = vmatprep.mubr.f32.mxu0 %v3022_v28  ;;  %v3027_v27 = vld [vmem:[#allocation2 + $0x9b0] sm:$0xff] }
 0x4d8   : > { %v13651_v11 = vpop.f32.mrf.mxu0 }
 0x4d9   : > { %15546 = vst [vmem:[#allocation68_spill] sm:$0xff] %v13651_v11 }
 0x4da   : > { %3222 = vmatmul.mubr.f32.gmra.mxu0 %v3021_v33 }
 0x4db   : > { %3226 = vmatprep.mubr.f32.mxu0 %v3024_v36 }
 0x4de   : > { %v11371_v51 = vpop.f32.mrf.mxu0  ;;  %3227 = vmatmul.mubr.f32.gmra.mxu0 %v3023_v35 }
 0x4df   : > { %v13654_v53 = vadd.f32 %v11371_v51, %v13473_v59  ;;  %3231 = vmatprep.mubr.f32.mxu0 %v3026_v48  ;;  %v3031_v59 = vld [vmem:[#allocation2 + $0x9d0] sm:$0xff] }
 0x4e0   : > { %v13656_v30 = vpop.f32.mrf.mxu0 }
 0x4e1   : > { %15547 = vst [vmem:[#allocation69_spill] sm:$0xff] %v13656_v30 }
 0x4e2   : > { %3232 = vmatmul.mubr.f32.gmra.mxu0 %v3025_v57 }
 0x4e3   : > { %3236 = vmatprep.mubr.f32.mxu0 %v3028_v6 }
 0x4e6   : > { %v11374_v41 = vpop.f32.mrf.mxu0  ;;  %3237 = vmatmul.mubr.f32.gmra.mxu0 %v3027_v27 }
 0x4e7   : > { %v13659_v46 = vadd.f32 %v11374_v41, %v13478_v12  ;;  %3241 = vmatprep.mubr.f32.mxu0 %v3030_v32  ;;  %v3035_v12 = vld [vmem:[#allocation2 + $0x9f0] sm:$0xff] }
 0x4e8   : > { %v13661_v63 = vpop.f32.mrf.mxu0  ;;  %v13721_v41 = vld [vmem:[%s12791_s22 + $0x70] sm:$0xff] }
 0x4e9   : > { %15548 = vst [vmem:[#allocation70_spill] sm:$0xff] %v13661_v63  ;;  %v13886_v63 = vld [vmem:[%s12791_s22 + $0x80] sm:$0xff] }
 0x4ea   : > { %3242 = vmatmul.mubr.f32.gmra.mxu0 %v3029_v19 }
 0x4eb   : > { %3246 = vmatprep.mubr.f32.mxu0 %v3032_v4  ;;  %v13727_v4 = vld [vmem:[%s12791_s22 + $0x68] sm:$0xff] }
 0x4ee   : > { %v11377_v22 = vpop.f32.mrf.mxu0  ;;  %3247 = vmatmul.mubr.f32.gmra.mxu0 %v3031_v59 }
 0x4ef   : > { %v13664_v37 = vadd.f32 %v11377_v22, %v13483_v44  ;;  %3251 = vmatprep.mubr.f32.mxu0 %v3034_v42  ;;  %v13732_v42 = vld [vmem:[%s12791_s22 + $0x60] sm:$0xff] }
 0x4f0   : > { %v13666_v61 = vpop.f32.mrf.mxu0 }
 0x4f1   : > { %15549 = vst [vmem:[#allocation71_spill] sm:$0xff] %v13666_v61  ;;  %v13881_v61 = vld [vmem:[%s12791_s22 + $0x88] sm:$0xff] }
 0x4f2   : > { %3252 = vmatmul.mubr.f32.gmra.mxu0 %v3033_v34  ;;  %v13738_v34 = vld [vmem:[%s12791_s22 + $0x58] sm:$0xff] }
 0x4f3   : > { %3256 = vmatprep.mubr.f32.mxu0 %v3036_v31 }
 0x4f6   : > { %v11380_v58 = vpop.f32.mrf.mxu0  ;;  %3257 = vmatmul.mubr.f32.gmra.mxu0 %v3035_v12  ;;  %v13743_v12 = vld [vmem:[%s12791_s22 + $0x50] sm:$0xff] }
 0x4f7   : > { %v13669_v5 = vadd.f32 %v11380_v58, %v13488_v8 }
 0x4f8   : > { %v13671_v3 = vpop.f32.mrf.mxu0 }
 0x4f9   : > { %15550 = vst [vmem:[#allocation72_spill] sm:$0xff] %v13671_v3  ;;  %v13875_v3 = vld [vmem:[%s12791_s22 + $0x90] sm:$0xff] }
 0x4fe   : > { %v11383_v2 = vpop.f32.mrf.mxu0 }
 0x4ff   : > { %v13674_v49 = vadd.f32 %v11383_v2, %v13493_v25  ;;  %v13749_v2 = vld [vmem:[%s12791_s22 + $0x48] sm:$0xff] }
 0x500   : > { %v13676_v44 = vpop.f32.mrf.mxu0 }
 0x501   : > { %15551 = vst [vmem:[#allocation73_spill] sm:$0xff] %v13676_v44  ;;  %v13870_v44 = vld [vmem:[%s12791_s22 + $0x98] sm:$0xff] }
 0x506   : > { %v11386_v18 = vpop.f32.mrf.mxu0 }
 0x507   : > { %v13679_v60 = vadd.f32 %v11386_v18, %v13498_v52 }
 0x508   : > { %v13681_v15 = vpop.f32.mrf.mxu0 }
 0x509   : > { %15552 = vst [vmem:[#allocation74_spill] sm:$0xff] %v13681_v15  ;;  %v13864_v15 = vld [vmem:[%s12791_s22 + $0xa0] sm:$0xff] }
 0x50e   : > { %v11389_v40 = vpop.f32.mrf.mxu0 }
 0x50f   : > { %v13684_v24 = vadd.f32 %v11389_v40, %v13503_v29  ;;  %v13754_v40 = vld [vmem:[%s12791_s22 + $0x40] sm:$0xff] }
 0x510   : > { %v13686_v8 = vpop.f32.mrf.mxu0 }
 0x511   : > { %15553 = vst [vmem:[#allocation75_spill] sm:$0xff] %v13686_v8  ;;  %v13859_v8 = vld [vmem:[%s12791_s22 + $0xa8] sm:$0xff] }
 0x516   : > { %v11392_v39 = vpop.f32.mrf.mxu0 }
 0x517   : > { %v13689_v0 = vadd.f32 %v11392_v39, %v13508_v50 }
 0x518   : > { %v13691_v25 = vpop.f32.mrf.mxu0 }
 0x519   : > { %15554 = vst [vmem:[#allocation76_spill] sm:$0xff] %v13691_v25  ;;  %v13853_v25 = vld [vmem:[%s12791_s22 + $0xb0] sm:$0xff] }
 0x51e   : > { %v11395_v28 = vpop.f32.mrf.mxu0 }
 0x51f   : > { %v13694_v10 = vadd.f32 %v11395_v28, %v13513_v9  ;;  %v13760_v28 = vld [vmem:[%s12791_s22 + $0x38] sm:$0xff] }
 0x520   : > { %v13696_v52 = vpop.f32.mrf.mxu0 }
 0x521   : > { %15555 = vst [vmem:[#allocation77_spill] sm:$0xff] %v13696_v52  ;;  %v13848_v52 = vld [vmem:[%s12791_s22 + $0xb8] sm:$0xff] }
 0x526   : > { %v11398_v33 = vpop.f32.mrf.mxu0 }
 0x527   : > { %v13699_v36 = vadd.f32 %v11398_v33, %v13518_v55 }
 0x528   : > { %v13701_v29 = vpop.f32.mrf.mxu0 }
 0x529   : > { %15556 = vst [vmem:[#allocation78_spill] sm:$0xff] %v13701_v29  ;;  %v13842_v29 = vld [vmem:[%s12791_s22 + $0xc0] sm:$0xff] }
 0x52e   : > { %v11401_v35 = vpop.f32.mrf.mxu0 }
 0x52f   : > { %v13704_v50 = vadd.f32 %v11401_v35, %v13523_v38  ;;  %v13716_v38 = vld [vmem:[%s12791_s22 + $0x78] sm:$0xff]  ;;  %v13765_v35 = vld [vmem:[%s12791_s22 + $0x30] sm:$0xff] }
 0x530   : > { %v13706_v48 = vpop.f32.mrf.mxu0 }
 0x531   : > { %15557 = vst [vmem:[#allocation79_spill] sm:$0xff] %v13706_v48  ;;  %v13837_v48 = vld [vmem:[%s12791_s22 + $0xc8] sm:$0xff] }
 0x536   : > { %v11404_v51 = vpop.f32.mrf.mxu0 }
 0x537   : > { %v13709_v9 = vadd.f32 %v11404_v51, %v13528_v43 }
 0x538   : > { %v13711_v57 = vpop.f32.mrf.mxu0 }
 0x539   : > { %15558 = vst [vmem:[#allocation80_spill] sm:$0xff] %v13711_v57  ;;  %v13831_v57 = vld [vmem:[%s12791_s22 + $0xd0] sm:$0xff] }
 0x53a   : > { %v3103_v6 = vpop.f32.mrf.mxu0 }
 0x53b   : > { %11407 = vmatprep.mubr.msk.f32.mxu1 %vm1026_vm1, %v3103_v6  ;;  %v13771_v6 = vld [vmem:[%s12791_s22 + $0x28] sm:$0xff] }
 0x53c   : > { %v3105_v55 = vpop.f32.mrf.mxu0 }
 0x53e   : > { %v3108_v27 = vpop.f32.mrf.mxu0 }
 0x53f   : > { %11408 = vmatmul.mubr.msk.f32.vlgmr.msra.gmra.mxu1 %vm1026_vm1, %v3108_v27  ;;  %v13776_v27 = vld [vmem:[%s12791_s22 + $0x20] sm:$0xff] }
 0x540   : > { %v3110_v32 = vpop.f32.mrf.mxu0  ;;  %3686 = vmatpush1.msra.mxu1 %v13716_v38 }
 0x541   : > { %3687 = vmatprep.subr.mxu1 %v15526_v1 }
 0x542   : > { %v3113_v43 = vpop.f32.mrf.mxu0  ;;  %3688 = vmatpush1.msra.mxu1 %v13721_v41 }
 0x543   : > { %11410 = vmatprep.mubr.msk.f32.mxu1 %vm1026_vm1, %v3113_v43  ;;  %3689 = vmatprep.subr.mxu1 %v15526_v1  ;;  %v13782_v43 = vld [vmem:[%s12791_s22 + $0x18] sm:$0xff] }
 0x544   : > { %v3115_v19 = vpop.f32.mrf.mxu0  ;;  %3690 = vmatpush1.msra.mxu1 %v13727_v4 }
 0x545   : > { %3691 = vmatprep.subr.mxu1 %v15526_v1 }
 0x546   : > { %v3118_v59 = vpop.f32.mrf.mxu0  ;;  %3692 = vmatpush1.msra.mxu1 %v13732_v42 }
 0x547   : > { %11411 = vmatmul.mubr.msk.f32.gmra.mxu1 %vm1026_vm1, %v3118_v59  ;;  %3693 = vmatprep.subr.mxu1 %v15526_v1  ;;  %v13787_v59 = vld [vmem:[%s12791_s22 + $0x10] sm:$0xff] }
 0x548   : > { %v3120_v22 = vpop.f32.mrf.mxu0  ;;  %3694 = vmatpush1.msra.mxu1 %v13738_v34 }
 0x549   : > { %3695 = vmatprep.subr.mxu1 %v15526_v1 }
 0x54a   : > { %v3123_v31 = vpop.f32.mrf.mxu0  ;;  %3696 = vmatpush1.msra.mxu1 %v13743_v12 }
 0x54b   : > { %11413 = vmatprep.mubr.msk.f32.mxu1 %vm1026_vm1, %v3123_v31  ;;  %3697 = vmatprep.subr.mxu1 %v15526_v1  ;;  %v13793_v31 = vld [vmem:[%s12791_s22 + $0x8] sm:$0xff] }
 0x54c   : > { %v3125_v58 = vpop.f32.mrf.mxu0  ;;  %3698 = vmatpush1.msra.mxu1 %v13749_v2 }
 0x54d   : > { %3699 = vmatprep.subr.mxu1 %v15526_v1 }
 0x54e   : > { %v3128_v18 = vpop.f32.mrf.mxu0  ;;  %3700 = vmatpush1.msra.mxu1 %v13754_v40 }
 0x54f   : > { %11414 = vmatmul.mubr.msk.f32.gmra.mxu1 %vm1026_vm1, %v3128_v18  ;;  %3701 = vmatprep.subr.mxu1 %v15526_v1  ;;  %v13798_v18 = vld [vmem:[%s12791_s22] sm:$0xff] }
 0x550   : > { %v3130_v39 = vpop.f32.mrf.mxu0  ;;  %3702 = vmatpush1.msra.mxu1 %v13760_v28 }
 0x551   : > { %3703 = vmatprep.subr.mxu1 %v15526_v1 }
 0x552   : > { %v3133_v33 = vpop.f32.mrf.mxu0  ;;  %3704 = vmatpush1.msra.mxu1 %v13765_v35 }
 0x553   : > { %11416 = vmatprep.mubr.msk.f32.mxu1 %vm1026_vm1, %v3133_v33  ;;  %3705 = vmatprep.subr.mxu1 %v15526_v1  ;;  %v13804_v33 = vld [vmem:[%s12791_s22 + $0xf8] sm:$0xff] }
 0x554   : > { %v3135_v51 = vpop.f32.mrf.mxu0  ;;  %3706 = vmatpush1.msra.mxu1 %v13771_v6 }
 0x555   : > { %3707 = vmatprep.subr.mxu1 %v15526_v1 }
 0x556   : > { %v3138_v55 = vpop.f32.mrf.mxu0  ;;  %3708 = vmatpush1.msra.mxu1 %v13776_v27 }
 0x557   : > { %11417 = vmatmul.mubr.msk.f32.gmra.mxu1 %vm1026_vm1, %v3138_v55  ;;  %3709 = vmatprep.subr.mxu1 %v15526_v1  ;;  %v13809_v55 = vld [vmem:[%s12791_s22 + $0xf0] sm:$0xff] }
 0x558   : > { %v3140_v32 = vpop.f32.mrf.mxu0  ;;  %3710 = vmatpush1.msra.mxu1 %v13782_v43 }
 0x559   : > { %3711 = vmatprep.subr.mxu1 %v15526_v1 }
 0x55a   : > { %v3143_v19 = vpop.f32.mrf.mxu0  ;;  %3712 = vmatpush1.msra.mxu1 %v13787_v59 }
 0x55b   : > { %11419 = vmatprep.mubr.msk.f32.mxu1 %vm1026_vm1, %v3143_v19  ;;  %3713 = vmatprep.subr.mxu1 %v15526_v1  ;;  %v13815_v19 = vld [vmem:[%s12791_s22 + $0xe8] sm:$0xff] }
 0x55c   : > { %v3145_v22 = vpop.f32.mrf.mxu0  ;;  %3714 = vmatpush1.msra.mxu1 %v13793_v31 }
 0x55d   : > { %3715 = vmatprep.subr.mxu1 %v15526_v1 }
 0x55e   : > { %v3148_v58 = vpop.f32.mrf.mxu0  ;;  %3716 = vmatpush1.msra.mxu1 %v13798_v18 }
 0x55f   : > { %11420 = vmatmul.mubr.msk.f32.gmra.mxu1 %vm1026_vm1, %v3148_v58  ;;  %3717 = vmatprep.subr.mxu1 %v15526_v1  ;;  %v13820_v58 = vld [vmem:[%s12791_s22 + $0xe0] sm:$0xff] }
 0x560   : > { %v3150_v39 = vpop.f32.mrf.mxu0  ;;  %3718 = vmatpush2.msra.mxu1 %v13804_v33 }
 0x561   : > { %3719 = vmatprep.subr.mxu1 %v15526_v1 }
 0x562   : > { %v3153_v51 = vpop.f32.mrf.mxu0  ;;  %3720 = vmatpush2.msra.mxu1 %v13809_v55 }
 0x563   : > { %11422 = vmatprep.mubr.msk.f32.mxu1 %vm1026_vm1, %v3153_v51  ;;  %3721 = vmatprep.subr.mxu1 %v15526_v1  ;;  %v13826_v51 = vld [vmem:[%s12791_s22 + $0xd8] sm:$0xff] }
 0x564   : > { %v3155_v32 = vpop.f32.mrf.mxu0  ;;  %3722 = vmatpush2.msra.mxu1 %v13815_v19 }
 0x565   : > { %3723 = vmatprep.subr.mxu1 %v15526_v1 }
 0x566   : > { %v3158_v22 = vpop.f32.mrf.mxu0  ;;  %3724 = vmatpush2.msra.mxu1 %v13820_v58 }
 0x567   : > { %11423 = vmatmul.mubr.msk.f32.gmra.mxu1 %vm1026_vm1, %v3158_v22  ;;  %3725 = vmatprep.subr.mxu1 %v15526_v1 }
 0x568   : > { %v3160_v39 = vpop.f32.mrf.mxu0  ;;  %3726 = vmatpush2.msra.mxu1 %v13826_v51 }
 0x569   : > { %3727 = vmatprep.subr.mxu1 %v15526_v1 }
 0x56a   : > { %v3163_v32 = vpop.f32.mrf.mxu0  ;;  %3728 = vmatpush2.msra.mxu1 %v13831_v57 }
 0x56b   : > { %11425 = vmatprep.mubr.msk.f32.mxu1 %vm1026_vm1, %v3163_v32  ;;  %3729 = vmatprep.subr.mxu1 %v15526_v1 }
 0x56c   : > { %v3165_v22 = vpop.f32.mrf.mxu0  ;;  %3730 = vmatpush2.msra.mxu1 %v13837_v48 }
 0x56d   : > { %3731 = vmatprep.subr.mxu1 %v15526_v1 }
 0x56e   : > { %v3168_v39 = vpop.f32.mrf.mxu0  ;;  %3732 = vmatpush2.msra.mxu1 %v13842_v29 }
 0x56f   : > { %11426 = vmatmul.mubr.msk.f32.gmra.mxu1 %vm1026_vm1, %v3168_v39  ;;  %3733 = vmatprep.subr.mxu1 %v15526_v1 }
 0x570   : > { %v3170_v32 = vpop.f32.mrf.mxu0  ;;  %3734 = vmatpush2.msra.mxu1 %v13848_v52 }
 0x571   : > { %3735 = vmatprep.subr.mxu1 %v15526_v1 }
 0x572   : > { %v3173_v22 = vpop.f32.mrf.mxu0  ;;  %3736 = vmatpush2.msra.mxu1 %v13853_v25 }
 0x573   : > { %11428 = vmatprep.mubr.msk.f32.mxu1 %vm1026_vm1, %v3173_v22  ;;  %3737 = vmatprep.subr.mxu1 %v15526_v1 }
 0x574   : > { %v3175_v39 = vpop.f32.mrf.mxu0  ;;  %3738 = vmatpush2.msra.mxu1 %v13859_v8 }
 0x575   : > { %3739 = vmatprep.subr.mxu1 %v15526_v1 }
 0x576   : > { %v3178_v32 = vpop.f32.mrf.mxu0  ;;  %3740 = vmatpush2.msra.mxu1 %v13864_v15 }
 0x577   : > { %11429 = vmatmul.mubr.msk.f32.gmra.mxu1 %vm1026_vm1, %v3178_v32  ;;  %3741 = vmatprep.subr.mxu1 %v15526_v1 }
 0x578   : > { %v3180_v22 = vpop.f32.mrf.mxu0  ;;  %3742 = vmatpush2.msra.mxu1 %v13870_v44 }
 0x579   : > { %3743 = vmatprep.subr.mxu1 %v15526_v1 }
 0x57a   : > { %v3183_v39 = vpop.f32.mrf.mxu0  ;;  %3744 = vmatpush2.msra.mxu1 %v13875_v3 }
 0x57b   : > { %11431 = vmatprep.mubr.msk.f32.mxu1 %vm1026_vm1, %v3183_v39  ;;  %3745 = vmatprep.subr.mxu1 %v15526_v1 }
 0x57c   : > { %v3185_v32 = vpop.f32.mrf.mxu0  ;;  %3746 = vmatpush2.msra.mxu1 %v13881_v61 }
 0x57d   : > { %3747 = vmatprep.subr.mxu1 %v15526_v1 }
 0x57e   : > { %v3188_v22 = vpop.f32.mrf.mxu0  ;;  %3748 = vmatpush2.msra.mxu1 %v13886_v63 }
 0x57f   : > { %11432 = vmatmul.mubr.msk.f32.gmra.mxu1 %vm1026_vm1, %v3188_v22 }
 0x580   : > { %v3190_v30 = vpop.f32.mrf.mxu0 }
 0x582   : > { %v3193_v11 = vpop.f32.mrf.mxu0 }
 0x583   : > { %11434 = vmatprep.mubr.msk.f32.mxu1 %vm1026_vm1, %v3193_v11 }
 0x584   : > { %v3195_v39 = vpop.f32.mrf.mxu0 }
 0x586   : > { %v3198_v7 = vpop.f32.mrf.mxu0 }
 0x587   : > { %11435 = vmatmul.mubr.msk.f32.gmra.mxu1 %vm1026_vm1, %v3198_v7 }
 0x588   : > { %v3200_v32 = vpop.f32.mrf.mxu0 }
 0x58a   : > { %v3203_v45 = vpop.f32.mrf.mxu0 }
 0x58b   : > { %11437 = vmatprep.mubr.msk.f32.mxu1 %vm1026_vm1, %v3203_v45 }
 0x58c   : > { %v3205_v56 = vpop.f32.mrf.mxu0 }
 0x58e   : > { %v3208_v26 = vpop.f32.mrf.mxu0 }
 0x58f   : > { %11438 = vmatmul.mubr.msk.f32.gmra.mxu1 %vm1026_vm1, %v3208_v26 }
 0x590   : > { %v3210_v23 = vpop.f32.mrf.mxu0 }
 0x592   : > { %v3213_v20 = vpop.f32.mrf.mxu0 }
 0x593   : > { %11440 = vmatprep.mubr.msk.f32.mxu1 %vm1026_vm1, %v3213_v20 }
 0x594   : > { %v3215_v30 = vpop.f32.mrf.mxu0 }
 0x596   : > { %v3218_v22 = vpop.f32.mrf.mxu0 }
 0x597   : > { %11441 = vmatmul.mubr.msk.f32.gmra.mxu1 %vm1026_vm1, %v3218_v22 }
 0x598   : > { %v3220_v11 = vpop.f32.mrf.mxu0 }
 0x59a   : > { %v3223_v39 = vpop.f32.mrf.mxu0 }
 0x59b   : > { %11443 = vmatprep.mubr.msk.f32.mxu1 %vm1026_vm1, %v3223_v39 }
 0x59c   : > { %v3225_v7 = vpop.f32.mrf.mxu0 }
 0x59e   : > { %v3228_v32 = vpop.f32.mrf.mxu0 }
 0x59f   : > { %11444 = vmatmul.mubr.msk.f32.gmra.mxu1 %vm1026_vm1, %v3228_v32 }
 0x5a0   : > { %v3230_v56 = vpop.f32.mrf.mxu0 }
 0x5a1   : > { %v3622_v56 = vld [vmem:[#allocation2 + $0xa08] sm:$0xff] }
 0x5a2   : > { %v3233_v45 = vpop.f32.mrf.mxu0 }
 0x5a3   : > { %11446 = vmatprep.mubr.msk.f32.mxu1 %vm1026_vm1, %v3233_v45 }
 0x5a4   : > { %v3235_v23 = vpop.f32.mrf.mxu0 }
 0x5a5   : > { %v3621_v23 = vld [vmem:[#allocation2 + $0xa00] sm:$0xff] }
 0x5a6   : > { %v3238_v26 = vpop.f32.mrf.mxu0 }
 0x5a7   : > { %11447 = vmatmul.mubr.msk.f32.gmra.mxu1 %vm1026_vm1, %v3238_v26  ;;  %v3624_v26 = vld [vmem:[#allocation2 + $0xa18] sm:$0xff] }
 0x5a8   : > { %v3240_v20 = vpop.f32.mrf.mxu0 }
 0x5a9   : > { %v3623_v20 = vld [vmem:[#allocation2 + $0xa10] sm:$0xff] }
 0x5aa   : > { %v3243_v30 = vpop.f32.mrf.mxu0 }
 0x5ab   : > { %11449 = vmatprep.mubr.msk.f32.mxu1 %vm1026_vm1, %v3243_v30  ;;  %v3626_v30 = vld [vmem:[#allocation2 + $0xa28] sm:$0xff] }
 0x5ac   : > { %v3245_v22 = vpop.f32.mrf.mxu0 }
 0x5ad   : > { %v3625_v22 = vld [vmem:[#allocation2 + $0xa20] sm:$0xff] }
 0x5ae   : > { %v3248_v11 = vpop.f32.mrf.mxu0 }
 0x5af   : > { %11450 = vmatmul.mubr.msk.f32.gmra.mxu1 %vm1026_vm1, %v3248_v11  ;;  %v3628_v11 = vld [vmem:[#allocation2 + $0xa38] sm:$0xff] }
 0x5b0   : > { %v3250_v39 = vpop.f32.mrf.mxu0 }
 0x5b1   : > { %v3627_v39 = vld [vmem:[#allocation2 + $0xa30] sm:$0xff] }
 0x5b2   : > { %v3253_v7 = vpop.f32.mrf.mxu0 }
 0x5b3   : > { %11452 = vmatprep.mubr.msk.f32.mxu1 %vm1026_vm1, %v3253_v7  ;;  %v3630_v7 = vld [vmem:[#allocation2 + $0xa48] sm:$0xff] }
 0x5b4   : > { %v3255_v32 = vpop.f32.mrf.mxu0 }
 0x5b5   : > { %v3629_v32 = vld [vmem:[#allocation2 + $0xa40] sm:$0xff] }
 0x5b6   : > { %v3258_v47 = vpop.f32.mrf.mxu0 }
 0x5b7   : > { %11453 = vmatmul.mubr.msk.f32.gmra.mxu1 %vm1026_vm1, %v3258_v47  ;;  %v3632_v47 = vld [vmem:[#allocation2 + $0xa58] sm:$0xff] }
 0x5b8   : > { %v3260_v45 = vpop.f32.mrf.mxu0  ;;  %3749 = vmatprep.mubr.f32.mxu1 %v3622_v56  ;;  %v3631_v56 = vld [vmem:[#allocation2 + $0xa50] sm:$0xff] }
 0x5b9   : > { %v3634_v45 = vld [vmem:[#allocation2 + $0xa68] sm:$0xff] }
 0x5bb   : > { %3750 = vmatmul.mubr.f32.vlgmr.msra.gmra.mxu1 %v3621_v23  ;;  %v3633_v23 = vld [vmem:[#allocation2 + $0xa60] sm:$0xff] }
 0x5bc   : > { %3754 = vmatprep.mubr.f32.mxu1 %v3624_v26  ;;  %v3636_v26 = vld [vmem:[#allocation2 + $0xa78] sm:$0xff] }
 0x5bf   : > { %3755 = vmatmul.mubr.f32.gmra.mxu1 %v3623_v20  ;;  %v3635_v20 = vld [vmem:[#allocation2 + $0xa70] sm:$0xff] }
 0x5c0   : > { %3759 = vmatprep.mubr.f32.mxu1 %v3626_v30  ;;  %v3638_v30 = vld [vmem:[#allocation2 + $0xa88] sm:$0xff] }
 0x5c3   : > { %3760 = vmatmul.mubr.f32.gmra.mxu1 %v3625_v22  ;;  %v3637_v22 = vld [vmem:[#allocation2 + $0xa80] sm:$0xff] }
 0x5c4   : > { %3764 = vmatprep.mubr.f32.mxu1 %v3628_v11  ;;  %v3640_v11 = vld [vmem:[#allocation2 + $0xa98] sm:$0xff] }
 0x5c7   : > { %3765 = vmatmul.mubr.f32.gmra.mxu1 %v3627_v39  ;;  %v3639_v39 = vld [vmem:[#allocation2 + $0xa90] sm:$0xff] }
 0x5c8   : > { %3769 = vmatprep.mubr.f32.mxu1 %v3630_v7  ;;  %v3642_v7 = vld [vmem:[#allocation2 + $0xaa8] sm:$0xff] }
 0x5cb   : > { %3770 = vmatmul.mubr.f32.gmra.mxu1 %v3629_v32  ;;  %v3641_v32 = vld [vmem:[#allocation2 + $0xaa0] sm:$0xff] }
 0x5cc   : > { %3774 = vmatprep.mubr.f32.mxu1 %v3632_v47  ;;  %v3644_v47 = vld [vmem:[#allocation2 + $0xab8] sm:$0xff] }
 0x5cf   : > { %3775 = vmatmul.mubr.f32.gmra.mxu1 %v3631_v56  ;;  %v3643_v56 = vld [vmem:[#allocation2 + $0xab0] sm:$0xff] }
 0x5d0   : > { %3779 = vmatprep.mubr.f32.mxu1 %v3634_v45  ;;  %v3646_v45 = vld [vmem:[#allocation2 + $0xac8] sm:$0xff] }
 0x5d3   : > { %3780 = vmatmul.mubr.f32.gmra.mxu1 %v3633_v23  ;;  %v3645_v23 = vld [vmem:[#allocation2 + $0xac0] sm:$0xff] }
 0x5d4   : > { %3784 = vmatprep.mubr.f32.mxu1 %v3636_v26  ;;  %v3648_v26 = vld [vmem:[#allocation2 + $0xad8] sm:$0xff] }
 0x5d7   : > { %3785 = vmatmul.mubr.f32.gmra.mxu1 %v3635_v20  ;;  %v3647_v20 = vld [vmem:[#allocation2 + $0xad0] sm:$0xff] }
 0x5d8   : > { %3789 = vmatprep.mubr.f32.mxu1 %v3638_v30  ;;  %v3650_v30 = vld [vmem:[#allocation2 + $0xae8] sm:$0xff] }
 0x5db   : > { %3790 = vmatmul.mubr.f32.gmra.mxu1 %v3637_v22  ;;  %v3649_v22 = vld [vmem:[#allocation2 + $0xae0] sm:$0xff] }
 0x5dc   : > { %3794 = vmatprep.mubr.f32.mxu1 %v3640_v11  ;;  %v3652_v11 = vld [vmem:[#allocation2 + $0xaf8] sm:$0xff] }
 0x5df   : > { %3795 = vmatmul.mubr.f32.gmra.mxu1 %v3639_v39  ;;  %v3651_v39 = vld [vmem:[#allocation2 + $0xaf0] sm:$0xff] }
 0x5e0   : > { %3799 = vmatprep.mubr.f32.mxu1 %v3642_v7  ;;  %v3654_v7 = vld [vmem:[#allocation2 + $0xb08] sm:$0xff] }
 0x5e3   : > { %3800 = vmatmul.mubr.f32.gmra.mxu1 %v3641_v32  ;;  %v3653_v32 = vld [vmem:[#allocation2 + $0xb00] sm:$0xff] }
 0x5e4   : > { %3804 = vmatprep.mubr.f32.mxu1 %v3644_v47  ;;  %v3656_v47 = vld [vmem:[#allocation2 + $0xb18] sm:$0xff] }
 0x5e7   : > { %3805 = vmatmul.mubr.f32.gmra.mxu1 %v3643_v56  ;;  %v10303_v56 = vld [vmem:[%s15463_s2 + $0x14] sm:$0xf] }
 0x5e8   : > { %3809 = vmatprep.mubr.f32.mxu1 %v3646_v45  ;;  %v3655_v45 = vld [vmem:[#allocation2 + $0xb10] sm:$0xff]  ;;  %11455 = vmatprep.subr.msk.mxu0 %vm1123_vm0, %v10303_v56 }
 0x5e9   : > { %11456 = vmatpush3.msk.msra.mxu0 %vm1123_vm0, %v10303_v56  ;;  %v3661_v56 = vld [vmem:[#allocation2 + $0xb40] sm:$0xff] }
 0x5ea   : > { %4333 = vmatprep.subr.mxu0 %v15526_v1 }
 0x5eb   : > { %3810 = vmatmul.mubr.f32.gmra.mxu1 %v3645_v23  ;;  %v3658_v23 = vld [vmem:[#allocation2 + $0xb28] sm:$0xff] }
 0x5ec   : > { %3814 = vmatprep.mubr.f32.mxu1 %v3648_v26 }
 0x5ef   : > { %3815 = vmatmul.mubr.f32.gmra.mxu1 %v3647_v20 }
 0x5f0   : > { %3819 = vmatprep.mubr.f32.mxu1 %v3650_v30  ;;  %v3657_v30 = vld [vmem:[#allocation2 + $0xb20] sm:$0xff] }
 0x5f3   : > { %3820 = vmatmul.mubr.f32.gmra.mxu1 %v3649_v22  ;;  %v3660_v22 = vld [vmem:[#allocation2 + $0xb38] sm:$0xff] }
 0x5f4   : > { %3824 = vmatprep.mubr.f32.mxu1 %v3652_v11  ;;  %v3659_v11 = vld [vmem:[#allocation2 + $0xb30] sm:$0xff] }
 0x5f7   : > { %3825 = vmatmul.mubr.f32.gmra.mxu1 %v3651_v39 }
 0x5f8   : > { %3829 = vmatprep.mubr.f32.mxu1 %v3654_v7  ;;  %v3662_v7 = vld [vmem:[#allocation2 + $0xb48] sm:$0xff] }
 0x5fb   : > { %3830 = vmatmul.mubr.f32.gmra.mxu1 %v3653_v32 }
 0x5fc   : > { %3834 = vmatprep.mubr.f32.mxu1 %v3656_v47 }
 0x5ff   : > { %v11409_v26 = vpop.f32.mrf.mxu1  ;;  %3835 = vmatmul.mubr.f32.gmra.mxu1 %v3655_v45  ;;  %v3664_v45 = vld [vmem:[#allocation2 + $0xb58] sm:$0xff] }
 0x600   : > { %v13911_v20 = vadd.f32 %v11409_v26, %v13634_v62  ;;  %3839 = vmatprep.mubr.f32.mxu1 %v3658_v23  ;;  %v3663_v62 = vld [vmem:[#allocation2 + $0xb50] sm:$0xff]  ;;  %v3666_v26 = vld [vmem:[#allocation2 + $0xb68] sm:$0xff] }
 0x601   : > { %v13913_v39 = vpop.f32.mrf.mxu1 }
 0x602   : > { %15559 = vst [vmem:[#allocation81_spill] sm:$0xff] %v13913_v39  ;;  %v3665_v39 = vld [vmem:[#allocation2 + $0xb60] sm:$0xff] }
 0x603   : > { %3840 = vmatmul.mubr.f32.gmra.mxu1 %v3657_v30 }
 0x604   : > { %3844 = vmatprep.mubr.f32.mxu1 %v3660_v22 }
 0x607   : > { %v11412_v32 = vpop.f32.mrf.mxu1  ;;  %3845 = vmatmul.mubr.f32.gmra.mxu1 %v3659_v11  ;;  %v3668_v11 = vld [vmem:[#allocation2 + $0xb78] sm:$0xff] }
 0x608   : > { %v13916_v47 = vadd.f32 %v11412_v32, %v13639_v21  ;;  %3849 = vmatprep.mubr.f32.mxu1 %v3662_v7  ;;  %v3667_v21 = vld [vmem:[#allocation2 + $0xb70] sm:$0xff]  ;;  %v3670_v32 = vld [vmem:[#allocation2 + $0xb88] sm:$0xff] }
 0x609   : > { %v13918_v23 = vpop.f32.mrf.mxu1 }
 0x60a   : > { %15560 = vst [vmem:[#allocation82_spill] sm:$0xff] %v13918_v23  ;;  %v3669_v23 = vld [vmem:[#allocation2 + $0xb80] sm:$0xff] }
 0x60b   : > { %3850 = vmatmul.mubr.f32.gmra.mxu1 %v3661_v56 }
 0x60c   : > { %3854 = vmatprep.mubr.f32.mxu1 %v3664_v45 }
 0x60f   : > { %v11415_v30 = vpop.f32.mrf.mxu1  ;;  %3855 = vmatmul.mubr.f32.gmra.mxu1 %v3663_v62  ;;  %v3672_v62 = vld [vmem:[#allocation2 + $0xb98] sm:$0xff] }
 0x610   : > { %v13921_v22 = vadd.f32 %v11415_v30, %v13644_v54  ;;  %3859 = vmatprep.mubr.f32.mxu1 %v3666_v26  ;;  %v3671_v54 = vld [vmem:[#allocation2 + $0xb90] sm:$0xff]  ;;  %v3674_v30 = vld [vmem:[#allocation2 + $0xba8] sm:$0xff] }
 0x611   : > { %v13923_v7 = vpop.f32.mrf.mxu1 }
 0x612   : > { %15561 = vst [vmem:[#allocation83_spill] sm:$0xff] %v13923_v7  ;;  %v3673_v7 = vld [vmem:[#allocation2 + $0xba0] sm:$0xff] }
 0x613   : > { %3860 = vmatmul.mubr.f32.gmra.mxu1 %v3665_v39 }
 0x614   : > { %3864 = vmatprep.mubr.f32.mxu1 %v3668_v11 }
 0x617   : > { %v11418_v56 = vpop.f32.mrf.mxu1  ;;  %3865 = vmatmul.mubr.f32.gmra.mxu1 %v3667_v21  ;;  %v3676_v21 = vld [vmem:[#allocation2 + $0xbb8] sm:$0xff] }
 0x618   : > { %v13926_v45 = vadd.f32 %v11418_v56, %v13649_v16  ;;  %3869 = vmatprep.mubr.f32.mxu1 %v3670_v32  ;;  %v3675_v16 = vld [vmem:[#allocation2 + $0xbb0] sm:$0xff]  ;;  %v3678_v56 = vld [vmem:[#allocation2 + $0xbc8] sm:$0xff] }
 0x619   : > { %v13928_v26 = vpop.f32.mrf.mxu1 }
 0x61a   : > { %15562 = vst [vmem:[#allocation84_spill] sm:$0xff] %v13928_v26  ;;  %v3677_v26 = vld [vmem:[#allocation2 + $0xbc0] sm:$0xff] }
 0x61b   : > { %3870 = vmatmul.mubr.f32.gmra.mxu1 %v3669_v23 }
 0x61c   : > { %3874 = vmatprep.mubr.f32.mxu1 %v3672_v62 }
 0x61f   : > { %v11421_v39 = vpop.f32.mrf.mxu1  ;;  %3875 = vmatmul.mubr.f32.gmra.mxu1 %v3671_v54  ;;  %v3680_v54 = vld [vmem:[#allocation2 + $0xbd8] sm:$0xff] }
 0x620   : > { %v13931_v11 = vadd.f32 %v11421_v39, %v13654_v53  ;;  %3879 = vmatprep.mubr.f32.mxu1 %v3674_v30  ;;  %v3679_v53 = vld [vmem:[#allocation2 + $0xbd0] sm:$0xff]  ;;  %v3682_v39 = vld [vmem:[#allocation2 + $0xbe8] sm:$0xff] }
 0x621   : > { %v13933_v32 = vpop.f32.mrf.mxu1 }
 0x622   : > { %15563 = vst [vmem:[#allocation85_spill] sm:$0xff] %v13933_v32  ;;  %v3681_v32 = vld [vmem:[#allocation2 + $0xbe0] sm:$0xff] }
 0x623   : > { %3880 = vmatmul.mubr.f32.gmra.mxu1 %v3673_v7 }
 0x624   : > { %3884 = vmatprep.mubr.f32.mxu1 %v3676_v21 }
 0x627   : > { %v11424_v23 = vpop.f32.mrf.mxu1  ;;  %3885 = vmatmul.mubr.f32.gmra.mxu1 %v3675_v16  ;;  %v3684_v16 = vld [vmem:[#allocation2 + $0xbf8] sm:$0xff] }
 0x628   : > { %v13936_v62 = vadd.f32 %v11424_v23, %v13659_v46  ;;  %3889 = vmatprep.mubr.f32.mxu1 %v3678_v56  ;;  %v3683_v46 = vld [vmem:[#allocation2 + $0xbf0] sm:$0xff] }
 0x629   : > { %v13938_v30 = vpop.f32.mrf.mxu1 }
 0x62a   : > { %15564 = vst [vmem:[#allocation86_spill] sm:$0xff] %v13938_v30 }
 0x62b   : > { %3890 = vmatmul.mubr.f32.gmra.mxu1 %v3677_v26 }
 0x62c   : > { %3894 = vmatprep.mubr.f32.mxu1 %v3680_v54 }
 0x62f   : > { %v11427_v7 = vpop.f32.mrf.mxu1  ;;  %3895 = vmatmul.mubr.f32.gmra.mxu1 %v3679_v53 }
 0x630   : > { %v13941_v21 = vadd.f32 %v11427_v7, %v13664_v37  ;;  %3899 = vmatprep.mubr.f32.mxu1 %v3682_v39 }
 0x631   : > { %v13943_v56 = vpop.f32.mrf.mxu1 }
 0x632   : > { %15565 = vst [vmem:[#allocation87_spill] sm:$0xff] %v13943_v56 }
 0x633   : > { %3900 = vmatmul.mubr.f32.gmra.mxu1 %v3681_v32 }
 0x634   : > { %3904 = vmatprep.mubr.f32.mxu1 %v3684_v16 }
 0x637   : > { %v11430_v23 = vpop.f32.mrf.mxu1  ;;  %3905 = vmatmul.mubr.f32.gmra.mxu1 %v3683_v46 }
 0x638   : > { %v13946_v26 = vadd.f32 %v11430_v23, %v13669_v5 }
 0x639   : > { %v13948_v54 = vpop.f32.mrf.mxu1 }
 0x63a   : > { %15566 = vst [vmem:[#allocation88_spill] sm:$0xff] %v13948_v54 }
 0x63f   : > { %v11433_v30 = vpop.f32.mrf.mxu1 }
 0x640   : > { %v13951_v53 = vadd.f32 %v11433_v30, %v13674_v49 }
 0x641   : > { %v13953_v37 = vpop.f32.mrf.mxu1 }
 0x642   : > { %15567 = vst [vmem:[#allocation89_spill] sm:$0xff] %v13953_v37 }
 0x647   : > { %v11436_v39 = vpop.f32.mrf.mxu1 }
 0x648   : > { %v13956_v32 = vadd.f32 %v11436_v39, %v13679_v60 }
 0x649   : > { %v13958_v7 = vpop.f32.mrf.mxu1 }
 0x64a   : > { %15568 = vst [vmem:[#allocation90_spill] sm:$0xff] %v13958_v7 }
 0x64f   : > { %v11439_v16 = vpop.f32.mrf.mxu1 }
 0x650   : > { %v13961_v46 = vadd.f32 %v11439_v16, %v13684_v24 }
 0x651   : > { %v13963_v5 = vpop.f32.mrf.mxu1 }
 0x652   : > { %15569 = vst [vmem:[#allocation91_spill] sm:$0xff] %v13963_v5 }
 0x657   : > { %v11442_v23 = vpop.f32.mrf.mxu1 }
 0x658   : > { %v13966_v54 = vadd.f32 %v11442_v23, %v13689_v0 }
 0x659   : > { %v13968_v49 = vpop.f32.mrf.mxu1 }
 0x65a   : > { %15570 = vst [vmem:[#allocation92_spill] sm:$0xff] %v13968_v49 }
 0x65f   : > { %v11445_v30 = vpop.f32.mrf.mxu1 }
 0x660   : > { %v13971_v37 = vadd.f32 %v11445_v30, %v13694_v10 }
 0x661   : > { %v13973_v60 = vpop.f32.mrf.mxu1 }
 0x662   : > { %15571 = vst [vmem:[#allocation93_spill] sm:$0xff] %v13973_v60 }
 0x667   : > { %v11448_v39 = vpop.f32.mrf.mxu1 }
 0x668   : > { %v13976_v7 = vadd.f32 %v11448_v39, %v13699_v36 }
 0x669   : > { %v13978_v24 = vpop.f32.mrf.mxu1 }
 0x66a   : > { %15572 = vst [vmem:[#allocation94_spill] sm:$0xff] %v13978_v24 }
 0x66f   : > { %v11451_v16 = vpop.f32.mrf.mxu1 }
 0x670   : > { %v13981_v5 = vadd.f32 %v11451_v16, %v13704_v50 }
 0x671   : > { %v13983_v0 = vpop.f32.mrf.mxu1 }
 0x672   : > { %15573 = vst [vmem:[#allocation95_spill] sm:$0xff] %v13983_v0 }
 0x677   : > { %v11454_v23 = vpop.f32.mrf.mxu1 }
 0x678   : > { %v13986_v49 = vadd.f32 %v11454_v23, %v13709_v9 }
 0x679   : > { %v13988_v10 = vpop.f32.mrf.mxu1 }
 0x67a   : > { %15574 = vst [vmem:[#allocation96_spill] sm:$0xff] %v13988_v10 }
 0x67b   : > { %v3751_v30 = vpop.f32.mrf.mxu1 }
 0x67c   : > { %11457 = vmatprep.mubr.msk.f32.mxu0 %vm1026_vm1, %v3751_v30 }
 0x67d   : > { %v3753_v60 = vpop.f32.mrf.mxu1 }
 0x67f   : > { %v3756_v36 = vpop.f32.mrf.mxu1 }
 0x680   : > { %11458 = vmatmul.mubr.msk.f32.vlgmr.msra.gmra.mxu0 %vm1026_vm1, %v3756_v36 }
 0x681   : > { %v3758_v39 = vpop.f32.mrf.mxu1  ;;  %4334 = vmatpush1.msra.mxu0 %v13716_v38 }
 0x682   : > { %4335 = vmatprep.subr.mxu0 %v15526_v1 }
 0x683   : > { %v3761_v50 = vpop.f32.mrf.mxu1  ;;  %4336 = vmatpush1.msra.mxu0 %v13721_v41 }
 0x684   : > { %11460 = vmatprep.mubr.msk.f32.mxu0 %vm1026_vm1, %v3761_v50  ;;  %4337 = vmatprep.subr.mxu0 %v15526_v1 }
 0x685   : > { %v3763_v9 = vpop.f32.mrf.mxu1  ;;  %4338 = vmatpush1.msra.mxu0 %v13727_v4 }
 0x686   : > { %4339 = vmatprep.subr.mxu0 %v15526_v1 }
 0x687   : > { %v3766_v60 = vpop.f32.mrf.mxu1  ;;  %4340 = vmatpush1.msra.mxu0 %v13732_v42 }
 0x688   : > { %11461 = vmatmul.mubr.msk.f32.gmra.mxu0 %vm1026_vm1, %v3766_v60  ;;  %4341 = vmatprep.subr.mxu0 %v15526_v1 }
 0x689   : > { %v3768_v38 = vpop.f32.mrf.mxu1  ;;  %4342 = vmatpush1.msra.mxu0 %v13738_v34 }
 0x68a   : > { %4343 = vmatprep.subr.mxu0 %v15526_v1 }
 0x68b   : > { %v3771_v41 = vpop.f32.mrf.mxu1  ;;  %4344 = vmatpush1.msra.mxu0 %v13743_v12 }
 0x68c   : > { %11463 = vmatprep.mubr.msk.f32.mxu0 %vm1026_vm1, %v3771_v41  ;;  %4345 = vmatprep.subr.mxu0 %v15526_v1 }
 0x68d   : > { %v3773_v4 = vpop.f32.mrf.mxu1  ;;  %4346 = vmatpush1.msra.mxu0 %v13749_v2 }
 0x68e   : > { %4347 = vmatprep.subr.mxu0 %v15526_v1 }
 0x68f   : > { %v3776_v42 = vpop.f32.mrf.mxu1  ;;  %4348 = vmatpush1.msra.mxu0 %v13754_v40 }
 0x690   : > { %11464 = vmatmul.mubr.msk.f32.gmra.mxu0 %vm1026_vm1, %v3776_v42  ;;  %4349 = vmatprep.subr.mxu0 %v15526_v1 }
 0x691   : > { %v3778_v34 = vpop.f32.mrf.mxu1  ;;  %4350 = vmatpush1.msra.mxu0 %v13760_v28 }
 0x692   : > { %4351 = vmatprep.subr.mxu0 %v15526_v1 }
 0x693   : > { %v3781_v12 = vpop.f32.mrf.mxu1  ;;  %4352 = vmatpush1.msra.mxu0 %v13765_v35 }
 0x694   : > { %11466 = vmatprep.mubr.msk.f32.mxu0 %vm1026_vm1, %v3781_v12  ;;  %4353 = vmatprep.subr.mxu0 %v15526_v1 }
 0x695   : > { %v3783_v2 = vpop.f32.mrf.mxu1  ;;  %4354 = vmatpush1.msra.mxu0 %v13771_v6 }
 0x696   : > { %4355 = vmatprep.subr.mxu0 %v15526_v1 }
 0x697   : > { %v3786_v40 = vpop.f32.mrf.mxu1  ;;  %4356 = vmatpush1.msra.mxu0 %v13776_v27 }
 0x698   : > { %11467 = vmatmul.mubr.msk.f32.gmra.mxu0 %vm1026_vm1, %v3786_v40  ;;  %4357 = vmatprep.subr.mxu0 %v15526_v1 }
 0x699   : > { %v3788_v28 = vpop.f32.mrf.mxu1  ;;  %4358 = vmatpush1.msra.mxu0 %v13782_v43 }
 0x69a   : > { %4359 = vmatprep.subr.mxu0 %v15526_v1 }
 0x69b   : > { %v3791_v35 = vpop.f32.mrf.mxu1  ;;  %4360 = vmatpush1.msra.mxu0 %v13787_v59 }
 0x69c   : > { %11469 = vmatprep.mubr.msk.f32.mxu0 %vm1026_vm1, %v3791_v35  ;;  %4361 = vmatprep.subr.mxu0 %v15526_v1 }
 0x69d   : > { %v3793_v6 = vpop.f32.mrf.mxu1  ;;  %4362 = vmatpush1.msra.mxu0 %v13793_v31 }
 0x69e   : > { %4363 = vmatprep.subr.mxu0 %v15526_v1 }
 0x69f   : > { %v3796_v27 = vpop.f32.mrf.mxu1  ;;  %4364 = vmatpush1.msra.mxu0 %v13798_v18 }
 0x6a0   : > { %11470 = vmatmul.mubr.msk.f32.gmra.mxu0 %vm1026_vm1, %v3796_v27  ;;  %4365 = vmatprep.subr.mxu0 %v15526_v1 }
 0x6a1   : > { %v3798_v43 = vpop.f32.mrf.mxu1  ;;  %4366 = vmatpush2.msra.mxu0 %v13804_v33 }
 0x6a2   : > { %4367 = vmatprep.subr.mxu0 %v15526_v1 }
 0x6a3   : > { %v3801_v59 = vpop.f32.mrf.mxu1  ;;  %4368 = vmatpush2.msra.mxu0 %v13809_v55 }
 0x6a4   : > { %11472 = vmatprep.mubr.msk.f32.mxu0 %vm1026_vm1, %v3801_v59  ;;  %4369 = vmatprep.subr.mxu0 %v15526_v1 }
 0x6a5   : > { %v3803_v31 = vpop.f32.mrf.mxu1  ;;  %4370 = vmatpush2.msra.mxu0 %v13815_v19 }
 0x6a6   : > { %4371 = vmatprep.subr.mxu0 %v15526_v1 }
 0x6a7   : > { %v3806_v18 = vpop.f32.mrf.mxu1  ;;  %4372 = vmatpush2.msra.mxu0 %v13820_v58 }
 0x6a8   : > { %11473 = vmatmul.mubr.msk.f32.gmra.mxu0 %vm1026_vm1, %v3806_v18  ;;  %4373 = vmatprep.subr.mxu0 %v15526_v1  ;;  %v4270_v18 = vld [vmem:[#allocation2 + $0xc08] sm:$0xff] }
 0x6a9   : > { %v3808_v33 = vpop.f32.mrf.mxu1  ;;  %4374 = vmatpush2.msra.mxu0 %v13826_v51 }
 0x6aa   : > { %4375 = vmatprep.subr.mxu0 %v15526_v1 }
 0x6ab   : > { %v3811_v55 = vpop.f32.mrf.mxu1  ;;  %4376 = vmatpush2.msra.mxu0 %v13831_v57 }
 0x6ac   : > { %11475 = vmatprep.mubr.msk.f32.mxu0 %vm1026_vm1, %v3811_v55  ;;  %4377 = vmatprep.subr.mxu0 %v15526_v1 }
 0x6ad   : > { %v3813_v19 = vpop.f32.mrf.mxu1  ;;  %4378 = vmatpush2.msra.mxu0 %v13837_v48 }
 0x6ae   : > { %4379 = vmatprep.subr.mxu0 %v15526_v1  ;;  %v4269_v19 = vld [vmem:[#allocation2 + $0xc00] sm:$0xff] }
 0x6af   : > { %v3816_v58 = vpop.f32.mrf.mxu1  ;;  %4380 = vmatpush2.msra.mxu0 %v13842_v29 }
 0x6b0   : > { %11476 = vmatmul.mubr.msk.f32.gmra.mxu0 %vm1026_vm1, %v3816_v58  ;;  %4381 = vmatprep.subr.mxu0 %v15526_v1  ;;  %v4272_v58 = vld [vmem:[#allocation2 + $0xc18] sm:$0xff] }
 0x6b1   : > { %v3818_v51 = vpop.f32.mrf.mxu1  ;;  %4382 = vmatpush2.msra.mxu0 %v13848_v52 }
 0x6b2   : > { %4383 = vmatprep.subr.mxu0 %v15526_v1  ;;  %v4271_v51 = vld [vmem:[#allocation2 + $0xc10] sm:$0xff] }
 0x6b3   : > { %v3821_v57 = vpop.f32.mrf.mxu1  ;;  %4384 = vmatpush2.msra.mxu0 %v13853_v25 }
 0x6b4   : > { %11478 = vmatprep.mubr.msk.f32.mxu0 %vm1026_vm1, %v3821_v57  ;;  %4385 = vmatprep.subr.mxu0 %v15526_v1  ;;  %v4274_v57 = vld [vmem:[#allocation2 + $0xc28] sm:$0xff] }
 0x6b5   : > { %v3823_v48 = vpop.f32.mrf.mxu1  ;;  %4386 = vmatpush2.msra.mxu0 %v13859_v8 }
 0x6b6   : > { %4387 = vmatprep.subr.mxu0 %v15526_v1  ;;  %v4273_v48 = vld [vmem:[#allocation2 + $0xc20] sm:$0xff] }
 0x6b7   : > { %v3826_v29 = vpop.f32.mrf.mxu1  ;;  %4388 = vmatpush2.msra.mxu0 %v13864_v15 }
 0x6b8   : > { %11479 = vmatmul.mubr.msk.f32.gmra.mxu0 %vm1026_vm1, %v3826_v29  ;;  %4389 = vmatprep.subr.mxu0 %v15526_v1  ;;  %v4276_v29 = vld [vmem:[#allocation2 + $0xc38] sm:$0xff] }
 0x6b9   : > { %v3828_v52 = vpop.f32.mrf.mxu1  ;;  %4390 = vmatpush2.msra.mxu0 %v13870_v44 }
 0x6ba   : > { %4391 = vmatprep.subr.mxu0 %v15526_v1  ;;  %v4275_v52 = vld [vmem:[#allocation2 + $0xc30] sm:$0xff] }
 0x6bb   : > { %v3831_v25 = vpop.f32.mrf.mxu1  ;;  %4392 = vmatpush2.msra.mxu0 %v13875_v3 }
 0x6bc   : > { %11481 = vmatprep.mubr.msk.f32.mxu0 %vm1026_vm1, %v3831_v25  ;;  %4393 = vmatprep.subr.mxu0 %v15526_v1  ;;  %v4278_v25 = vld [vmem:[#allocation2 + $0xc48] sm:$0xff] }
 0x6bd   : > { %v3833_v8 = vpop.f32.mrf.mxu1  ;;  %4394 = vmatpush2.msra.mxu0 %v13881_v61 }
 0x6be   : > { %4395 = vmatprep.subr.mxu0 %v15526_v1  ;;  %v4277_v8 = vld [vmem:[#allocation2 + $0xc40] sm:$0xff] }
 0x6bf   : > { %v3836_v15 = vpop.f32.mrf.mxu1  ;;  %4396 = vmatpush2.msra.mxu0 %v13886_v63 }
 0x6c0   : > { %11482 = vmatmul.mubr.msk.f32.gmra.mxu0 %vm1026_vm1, %v3836_v15  ;;  %v4280_v15 = vld [vmem:[#allocation2 + $0xc58] sm:$0xff] }
 0x6c1   : > { %v3838_v44 = vpop.f32.mrf.mxu1 }
 0x6c2   : > { %v4279_v44 = vld [vmem:[#allocation2 + $0xc50] sm:$0xff] }
 0x6c3   : > { %v3841_v16 = vpop.f32.mrf.mxu1 }
 0x6c4   : > { %11484 = vmatprep.mubr.msk.f32.mxu0 %vm1026_vm1, %v3841_v16  ;;  %v4282_v16 = vld [vmem:[#allocation2 + $0xc68] sm:$0xff] }
 0x6c5   : > { %v3843_v23 = vpop.f32.mrf.mxu1 }
 0x6c6   : > { %v4281_v23 = vld [vmem:[#allocation2 + $0xc60] sm:$0xff] }
 0x6c7   : > { %v3846_v3 = vpop.f32.mrf.mxu1 }
 0x6c8   : > { %11485 = vmatmul.mubr.msk.f32.gmra.mxu0 %vm1026_vm1, %v3846_v3  ;;  %v4284_v3 = vld [vmem:[#allocation2 + $0xc78] sm:$0xff] }
 0x6c9   : > { %v3848_v30 = vpop.f32.mrf.mxu1 }
 0x6ca   : > { %v4283_v30 = vld [vmem:[#allocation2 + $0xc70] sm:$0xff] }
 0x6cb   : > { %v3851_v36 = vpop.f32.mrf.mxu1 }
 0x6cc   : > { %11487 = vmatprep.mubr.msk.f32.mxu0 %vm1026_vm1, %v3851_v36  ;;  %v4286_v36 = vld [vmem:[#allocation2 + $0xc88] sm:$0xff] }
 0x6cd   : > { %v3853_v61 = vpop.f32.mrf.mxu1 }
 0x6ce   : > { %v4285_v61 = vld [vmem:[#allocation2 + $0xc80] sm:$0xff] }
 0x6cf   : > { %v3856_v39 = vpop.f32.mrf.mxu1 }
 0x6d0   : > { %11488 = vmatmul.mubr.msk.f32.gmra.mxu0 %vm1026_vm1, %v3856_v39  ;;  %v4288_v39 = vld [vmem:[#allocation2 + $0xc98] sm:$0xff] }
 0x6d1   : > { %v3858_v50 = vpop.f32.mrf.mxu1 }
 0x6d2   : > { %v4287_v50 = vld [vmem:[#allocation2 + $0xc90] sm:$0xff] }
 0x6d3   : > { %v3861_v63 = vpop.f32.mrf.mxu1 }
 0x6d4   : > { %11490 = vmatprep.mubr.msk.f32.mxu0 %vm1026_vm1, %v3861_v63  ;;  %v4290_v63 = vld [vmem:[#allocation2 + $0xca8] sm:$0xff] }
 0x6d5   : > { %v3863_v9 = vpop.f32.mrf.mxu1 }
 0x6d6   : > { %v4289_v9 = vld [vmem:[#allocation2 + $0xca0] sm:$0xff] }
 0x6d7   : > { %v3866_v60 = vpop.f32.mrf.mxu1 }
 0x6d8   : > { %11491 = vmatmul.mubr.msk.f32.gmra.mxu0 %vm1026_vm1, %v3866_v60  ;;  %v4292_v60 = vld [vmem:[#allocation2 + $0xcb8] sm:$0xff] }
 0x6d9   : > { %v3868_v38 = vpop.f32.mrf.mxu1 }
 0x6da   : > { %v4291_v38 = vld [vmem:[#allocation2 + $0xcb0] sm:$0xff] }
 0x6db   : > { %v3871_v41 = vpop.f32.mrf.mxu1 }
 0x6dc   : > { %11493 = vmatprep.mubr.msk.f32.mxu0 %vm1026_vm1, %v3871_v41  ;;  %v4294_v41 = vld [vmem:[#allocation2 + $0xcc8] sm:$0xff] }
 0x6dd   : > { %v3873_v4 = vpop.f32.mrf.mxu1 }
 0x6de   : > { %v4293_v4 = vld [vmem:[#allocation2 + $0xcc0] sm:$0xff] }
 0x6df   : > { %v3876_v42 = vpop.f32.mrf.mxu1 }
 0x6e0   : > { %11494 = vmatmul.mubr.msk.f32.gmra.mxu0 %vm1026_vm1, %v3876_v42  ;;  %v4296_v42 = vld [vmem:[#allocation2 + $0xcd8] sm:$0xff] }
 0x6e1   : > { %v3878_v34 = vpop.f32.mrf.mxu1 }
 0x6e2   : > { %v4295_v34 = vld [vmem:[#allocation2 + $0xcd0] sm:$0xff] }
 0x6e3   : > { %v3881_v12 = vpop.f32.mrf.mxu1 }
 0x6e4   : > { %11496 = vmatprep.mubr.msk.f32.mxu0 %vm1026_vm1, %v3881_v12  ;;  %v4298_v12 = vld [vmem:[#allocation2 + $0xce8] sm:$0xff] }
 0x6e5   : > { %v3883_v2 = vpop.f32.mrf.mxu1 }
 0x6e6   : > { %v4297_v2 = vld [vmem:[#allocation2 + $0xce0] sm:$0xff] }
 0x6e7   : > { %v3886_v40 = vpop.f32.mrf.mxu1 }
 0x6e8   : > { %11497 = vmatmul.mubr.msk.f32.gmra.mxu0 %vm1026_vm1, %v3886_v40  ;;  %v4300_v40 = vld [vmem:[#allocation2 + $0xcf8] sm:$0xff] }
 0x6e9   : > { %v3888_v28 = vpop.f32.mrf.mxu1 }
 0x6ea   : > { %v4299_v28 = vld [vmem:[#allocation2 + $0xcf0] sm:$0xff] }
 0x6eb   : > { %v3891_v35 = vpop.f32.mrf.mxu1 }
 0x6ec   : > { %11499 = vmatprep.mubr.msk.f32.mxu0 %vm1026_vm1, %v3891_v35  ;;  %v4302_v35 = vld [vmem:[#allocation2 + $0xd08] sm:$0xff] }
 0x6ed   : > { %v3893_v6 = vpop.f32.mrf.mxu1 }
 0x6ee   : > { %v4301_v6 = vld [vmem:[#allocation2 + $0xd00] sm:$0xff] }
 0x6ef   : > { %v3896_v27 = vpop.f32.mrf.mxu1 }
 0x6f0   : > { %11500 = vmatmul.mubr.msk.f32.gmra.mxu0 %vm1026_vm1, %v3896_v27  ;;  %v4304_v27 = vld [vmem:[#allocation2 + $0xd18] sm:$0xff] }
 0x6f1   : > { %v3898_v43 = vpop.f32.mrf.mxu1 }
 0x6f2   : > { %v10337_v43 = vld [vmem:[%s15463_s2 + $0x18] sm:$0xf] }
 0x6f3   : > { %v3901_v59 = vpop.f32.mrf.mxu1  ;;  %11505 = vmatprep.subr.msk.mxu1 %vm1123_vm0, %v10337_v43 }
 0x6f4   : > { %11502 = vmatprep.mubr.msk.f32.mxu0 %vm1026_vm1, %v3901_v59  ;;  %v4303_v59 = vld [vmem:[#allocation2 + $0xd10] sm:$0xff]  ;;  %11506 = vmatpush3.msk.msra.mxu1 %vm1123_vm0, %v10337_v43 }
 0x6f5   : > { %v3903_v31 = vpop.f32.mrf.mxu1  ;;  %4981 = vmatprep.subr.mxu1 %v15526_v1 }
 0x6f6   : > { %v4306_v31 = vld [vmem:[#allocation2 + $0xd28] sm:$0xff] }
 0x6f7   : > { %v3906_v33 = vpop.f32.mrf.mxu1 }
 0x6f8   : > { %11503 = vmatmul.mubr.msk.f32.gmra.mxu0 %vm1026_vm1, %v3906_v33 }
 0x6f9   : > { %v3908_v55 = vpop.f32.mrf.mxu1  ;;  %4397 = vmatprep.mubr.f32.mxu0 %v4270_v18 }
 0x6fa   : > { %v4305_v55 = vld [vmem:[#allocation2 + $0xd20] sm:$0xff] }
 0x6fc   : > { %4398 = vmatmul.mubr.f32.vlgmr.msra.gmra.mxu0 %v4269_v19  ;;  %v4308_v19 = vld [vmem:[#allocation2 + $0xd38] sm:$0xff] }
 0x6fd   : > { %4402 = vmatprep.mubr.f32.mxu0 %v4272_v58  ;;  %v4307_v58 = vld [vmem:[#allocation2 + $0xd30] sm:$0xff] }
 0x700   : > { %4403 = vmatmul.mubr.f32.gmra.mxu0 %v4271_v51 }
 0x701   : > { %4407 = vmatprep.mubr.f32.mxu0 %v4274_v57  ;;  %v4310_v57 = vld [vmem:[#allocation2 + $0xd48] sm:$0xff] }
 0x704   : > { %4408 = vmatmul.mubr.f32.gmra.mxu0 %v4273_v48 }
 0x705   : > { %4412 = vmatprep.mubr.f32.mxu0 %v4276_v29 }
 0x708   : > { %4413 = vmatmul.mubr.f32.gmra.mxu0 %v4275_v52  ;;  %v4309_v52 = vld [vmem:[#allocation2 + $0xd40] sm:$0xff] }
 0x709   : > { %4417 = vmatprep.mubr.f32.mxu0 %v4278_v25  ;;  %v4312_v25 = vld [vmem:[#allocation2 + $0xd58] sm:$0xff] }
 0x70c   : > { %4418 = vmatmul.mubr.f32.gmra.mxu0 %v4277_v8 }
 0x70d   : > { %4422 = vmatprep.mubr.f32.mxu0 %v4280_v15  ;;  %v4314_v15 = vld [vmem:[#allocation2 + $0xd68] sm:$0xff] }
 0x710   : > { %4423 = vmatmul.mubr.f32.gmra.mxu0 %v4279_v44 }
 0x711   : > { %4427 = vmatprep.mubr.f32.mxu0 %v4282_v16 }
 0x714   : > { %4428 = vmatmul.mubr.f32.gmra.mxu0 %v4281_v23  ;;  %v4313_v23 = vld [vmem:[#allocation2 + $0xd60] sm:$0xff] }
 0x715   : > { %4432 = vmatprep.mubr.f32.mxu0 %v4284_v3  ;;  %v4316_v3 = vld [vmem:[#allocation2 + $0xd78] sm:$0xff] }
 0x718   : > { %4433 = vmatmul.mubr.f32.gmra.mxu0 %v4283_v30 }
 0x719   : > { %4437 = vmatprep.mubr.f32.mxu0 %v4286_v36  ;;  %v4318_v36 = vld [vmem:[#allocation2 + $0xd88] sm:$0xff] }
 0x71c   : > { %4438 = vmatmul.mubr.f32.gmra.mxu0 %v4285_v61 }
 0x71d   : > { %4442 = vmatprep.mubr.f32.mxu0 %v4288_v39 }
 0x720   : > { %4443 = vmatmul.mubr.f32.gmra.mxu0 %v4287_v50  ;;  %v4317_v50 = vld [vmem:[#allocation2 + $0xd80] sm:$0xff] }
 0x721   : > { %4447 = vmatprep.mubr.f32.mxu0 %v4290_v63  ;;  %v4320_v63 = vld [vmem:[#allocation2 + $0xd98] sm:$0xff] }
 0x724   : > { %4448 = vmatmul.mubr.f32.gmra.mxu0 %v4289_v9 }
 0x725   : > { %4452 = vmatprep.mubr.f32.mxu0 %v4292_v60  ;;  %v4322_v60 = vld [vmem:[#allocation2 + $0xda8] sm:$0xff] }
 0x728   : > { %4453 = vmatmul.mubr.f32.gmra.mxu0 %v4291_v38 }
 0x729   : > { %4457 = vmatprep.mubr.f32.mxu0 %v4294_v41 }
 0x72c   : > { %4458 = vmatmul.mubr.f32.gmra.mxu0 %v4293_v4  ;;  %v4321_v4 = vld [vmem:[#allocation2 + $0xda0] sm:$0xff] }
 0x72d   : > { %4462 = vmatprep.mubr.f32.mxu0 %v4296_v42  ;;  %v4324_v42 = vld [vmem:[#allocation2 + $0xdb8] sm:$0xff] }
 0x730   : > { %4463 = vmatmul.mubr.f32.gmra.mxu0 %v4295_v34 }
 0x731   : > { %4467 = vmatprep.mubr.f32.mxu0 %v4298_v12  ;;  %v4326_v12 = vld [vmem:[#allocation2 + $0xdc8] sm:$0xff] }
 0x734   : > { %4468 = vmatmul.mubr.f32.gmra.mxu0 %v4297_v2 }
 0x735   : > { %4472 = vmatprep.mubr.f32.mxu0 %v4300_v40 }
 0x738   : > { %4473 = vmatmul.mubr.f32.gmra.mxu0 %v4299_v28  ;;  %v4325_v28 = vld [vmem:[#allocation2 + $0xdc0] sm:$0xff] }
 0x739   : > { %4477 = vmatprep.mubr.f32.mxu0 %v4302_v35  ;;  %v4328_v35 = vld [vmem:[#allocation2 + $0xdd8] sm:$0xff] }
 0x73c   : > { %4478 = vmatmul.mubr.f32.gmra.mxu0 %v4301_v6 }
 0x73d   : > { %4482 = vmatprep.mubr.f32.mxu0 %v4304_v27  ;;  %v4330_v27 = vld [vmem:[#allocation2 + $0xde8] sm:$0xff] }
 0x740   : > { %v11459_v18 = vpop.f32.mrf.mxu0  ;;  %4483 = vmatmul.mubr.f32.gmra.mxu0 %v4303_v59 }
 0x741   : > { %v14092_v33 = vadd.f32 %v11459_v18, %v13911_v20  ;;  %4487 = vmatprep.mubr.f32.mxu0 %v4306_v31  ;;  %v4311_v20 = vld [vmem:[#allocation2 + $0xd50] sm:$0xff]  ;;  %v4329_v31 = vld [vmem:[#allocation2 + $0xde0] sm:$0xff]  ;;  %v4332_v18 = vld [vmem:[#allocation2 + $0xdf8] sm:$0xff] }
 0x742   : > { %v14094_v51 = vpop.f32.mrf.mxu0 }
 0x743   : > { %15575 = vst [vmem:[#allocation97_spill] sm:$0xff] %v14094_v51 }
 0x744   : > { %4488 = vmatmul.mubr.f32.gmra.mxu0 %v4305_v55 }
 0x745   : > { %4492 = vmatprep.mubr.f32.mxu0 %v4308_v19 }
 0x748   : > { %v11462_v48 = vpop.f32.mrf.mxu0  ;;  %4493 = vmatmul.mubr.f32.gmra.mxu0 %v4307_v58 }
 0x749   : > { %v14097_v29 = vadd.f32 %v11462_v48, %v13916_v47  ;;  %4497 = vmatprep.mubr.f32.mxu0 %v4310_v57  ;;  %v4315_v47 = vld [vmem:[#allocation2 + $0xd70] sm:$0xff] }
 0x74a   : > { %v14099_v8 = vpop.f32.mrf.mxu0 }
 0x74b   : > { %15576 = vst [vmem:[#allocation98_spill] sm:$0xff] %v14099_v8 }
 0x74c   : > { %4498 = vmatmul.mubr.f32.gmra.mxu0 %v4309_v52 }
 0x74d   : > { %4502 = vmatprep.mubr.f32.mxu0 %v4312_v25 }
 0x750   : > { %v11465_v44 = vpop.f32.mrf.mxu0  ;;  %4503 = vmatmul.mubr.f32.gmra.mxu0 %v4311_v20 }
 0x751   : > { %v14102_v16 = vadd.f32 %v11465_v44, %v13921_v22  ;;  %4507 = vmatprep.mubr.f32.mxu0 %v4314_v15  ;;  %v4319_v22 = vld [vmem:[#allocation2 + $0xd90] sm:$0xff] }
 0x752   : > { %v14104_v30 = vpop.f32.mrf.mxu0 }
 0x753   : > { %15577 = vst [vmem:[#allocation99_spill] sm:$0xff] %v14104_v30 }
 0x754   : > { %4508 = vmatmul.mubr.f32.gmra.mxu0 %v4313_v23 }
 0x755   : > { %4512 = vmatprep.mubr.f32.mxu0 %v4316_v3 }
 0x758   : > { %v11468_v61 = vpop.f32.mrf.mxu0  ;;  %4513 = vmatmul.mubr.f32.gmra.mxu0 %v4315_v47 }
 0x759   : > { %v14107_v39 = vadd.f32 %v11468_v61, %v13926_v45  ;;  %4517 = vmatprep.mubr.f32.mxu0 %v4318_v36  ;;  %v4323_v45 = vld [vmem:[#allocation2 + $0xdb0] sm:$0xff] }
 0x75a   : > { %v14109_v9 = vpop.f32.mrf.mxu0 }
 0x75b   : > { %15578 = vst [vmem:[#allocation100_spill] sm:$0xff] %v14109_v9 }
 0x75c   : > { %4518 = vmatmul.mubr.f32.gmra.mxu0 %v4317_v50 }
 0x75d   : > { %4522 = vmatprep.mubr.f32.mxu0 %v4320_v63 }
 0x760   : > { %v11471_v38 = vpop.f32.mrf.mxu0  ;;  %4523 = vmatmul.mubr.f32.gmra.mxu0 %v4319_v22 }
 0x761   : > { %v14112_v41 = vadd.f32 %v11471_v38, %v13931_v11  ;;  %4527 = vmatprep.mubr.f32.mxu0 %v4322_v60  ;;  %v4327_v11 = vld [vmem:[#allocation2 + $0xdd0] sm:$0xff] }
 0x762   : > { %v14114_v34 = vpop.f32.mrf.mxu0 }
 0x763   : > { %15579 = vst [vmem:[#allocation101_spill] sm:$0xff] %v14114_v34 }
 0x764   : > { %4528 = vmatmul.mubr.f32.gmra.mxu0 %v4321_v4 }
 0x765   : > { %4532 = vmatprep.mubr.f32.mxu0 %v4324_v42 }
 0x768   : > { %v11474_v2 = vpop.f32.mrf.mxu0  ;;  %4533 = vmatmul.mubr.f32.gmra.mxu0 %v4323_v45 }
 0x769   : > { %v14117_v40 = vadd.f32 %v11474_v2, %v13936_v62  ;;  %4537 = vmatprep.mubr.f32.mxu0 %v4326_v12  ;;  %v4331_v62 = vld [vmem:[#allocation2 + $0xdf0] sm:$0xff] }
 0x76a   : > { %v14119_v6 = vpop.f32.mrf.mxu0  ;;  %v14179_v2 = vld [vmem:[%s12791_s22 + $0x70] sm:$0xff] }
 0x76b   : > { %15580 = vst [vmem:[#allocation102_spill] sm:$0xff] %v14119_v6  ;;  %v14344_v6 = vld [vmem:[%s12791_s22 + $0x80] sm:$0xff] }
 0x76c   : > { %4538 = vmatmul.mubr.f32.gmra.mxu0 %v4325_v28 }
 0x76d   : > { %4542 = vmatprep.mubr.f32.mxu0 %v4328_v35  ;;  %v14185_v35 = vld [vmem:[%s12791_s22 + $0x68] sm:$0xff] }
 0x770   : > { %v11477_v43 = vpop.f32.mrf.mxu0  ;;  %4543 = vmatmul.mubr.f32.gmra.mxu0 %v4327_v11 }
 0x771   : > { %v14122_v59 = vadd.f32 %v11477_v43, %v13941_v21  ;;  %4547 = vmatprep.mubr.f32.mxu0 %v4330_v27  ;;  %v14190_v27 = vld [vmem:[%s12791_s22 + $0x60] sm:$0xff] }
 0x772   : > { %v14124_v55 = vpop.f32.mrf.mxu0 }
 0x773   : > { %15581 = vst [vmem:[#allocation103_spill] sm:$0xff] %v14124_v55  ;;  %v14339_v55 = vld [vmem:[%s12791_s22 + $0x88] sm:$0xff] }
 0x774   : > { %4548 = vmatmul.mubr.f32.gmra.mxu0 %v4329_v31  ;;  %v14196_v31 = vld [vmem:[%s12791_s22 + $0x58] sm:$0xff] }
 0x775   : > { %4552 = vmatprep.mubr.f32.mxu0 %v4332_v18 }
 0x778   : > { %v11480_v19 = vpop.f32.mrf.mxu0  ;;  %4553 = vmatmul.mubr.f32.gmra.mxu0 %v4331_v62  ;;  %v14201_v62 = vld [vmem:[%s12791_s22 + $0x50] sm:$0xff] }
 0x779   : > { %v14127_v58 = vadd.f32 %v11480_v19, %v13946_v26 }
 0x77a   : > { %v14129_v57 = vpop.f32.mrf.mxu0 }
 0x77b   : > { %15582 = vst [vmem:[#allocation104_spill] sm:$0xff] %v14129_v57  ;;  %v14333_v57 = vld [vmem:[%s12791_s22 + $0x90] sm:$0xff] }
 0x780   : > { %v11483_v48 = vpop.f32.mrf.mxu0 }
 0x781   : > { %v14132_v52 = vadd.f32 %v11483_v48, %v13951_v53  ;;  %v14207_v48 = vld [vmem:[%s12791_s22 + $0x48] sm:$0xff] }
 0x782   : > { %v14134_v21 = vpop.f32.mrf.mxu0 }
 0x783   : > { %15583 = vst [vmem:[#allocation105_spill] sm:$0xff] %v14134_v21  ;;  %v14328_v21 = vld [vmem:[%s12791_s22 + $0x98] sm:$0xff] }
 0x788   : > { %v11486_v25 = vpop.f32.mrf.mxu0 }
 0x789   : > { %v14137_v20 = vadd.f32 %v11486_v25, %v13956_v32 }
 0x78a   : > { %v14139_v15 = vpop.f32.mrf.mxu0 }
 0x78b   : > { %15584 = vst [vmem:[#allocation106_spill] sm:$0xff] %v14139_v15  ;;  %v14322_v15 = vld [vmem:[%s12791_s22 + $0xa0] sm:$0xff] }
 0x790   : > { %v11489_v44 = vpop.f32.mrf.mxu0 }
 0x791   : > { %v14142_v23 = vadd.f32 %v11489_v44, %v13961_v46  ;;  %v14212_v44 = vld [vmem:[%s12791_s22 + $0x40] sm:$0xff] }
 0x792   : > { %v14144_v26 = vpop.f32.mrf.mxu0 }
 0x793   : > { %15585 = vst [vmem:[#allocation107_spill] sm:$0xff] %v14144_v26  ;;  %v14317_v26 = vld [vmem:[%s12791_s22 + $0xa8] sm:$0xff] }
 0x798   : > { %v11492_v3 = vpop.f32.mrf.mxu0 }
 0x799   : > { %v14147_v47 = vadd.f32 %v11492_v3, %v13966_v54 }
 0x79a   : > { %v14149_v53 = vpop.f32.mrf.mxu0 }
 0x79b   : > { %15586 = vst [vmem:[#allocation108_spill] sm:$0xff] %v14149_v53  ;;  %v14311_v53 = vld [vmem:[%s12791_s22 + $0xb0] sm:$0xff] }
 0x7a0   : > { %v11495_v36 = vpop.f32.mrf.mxu0 }
 0x7a1   : > { %v14152_v61 = vadd.f32 %v11495_v36, %v13971_v37  ;;  %v14218_v36 = vld [vmem:[%s12791_s22 + $0x38] sm:$0xff] }
 0x7a2   : > { %v14154_v32 = vpop.f32.mrf.mxu0 }
 0x7a3   : > { %15587 = vst [vmem:[#allocation109_spill] sm:$0xff] %v14154_v32  ;;  %v14306_v32 = vld [vmem:[%s12791_s22 + $0xb8] sm:$0xff] }
 0x7a8   : > { %v11498_v50 = vpop.f32.mrf.mxu0 }
 0x7a9   : > { %v14157_v63 = vadd.f32 %v11498_v50, %v13976_v7 }
 0x7aa   : > { %v14159_v46 = vpop.f32.mrf.mxu0 }
 0x7ab   : > { %15588 = vst [vmem:[#allocation110_spill] sm:$0xff] %v14159_v46  ;;  %v14300_v46 = vld [vmem:[%s12791_s22 + $0xc0] sm:$0xff] }
 0x7b0   : > { %v11501_v22 = vpop.f32.mrf.mxu0 }
 0x7b1   : > { %v14162_v54 = vadd.f32 %v11501_v22, %v13981_v5  ;;  %v14174_v5 = vld [vmem:[%s12791_s22 + $0x78] sm:$0xff]  ;;  %v14223_v22 = vld [vmem:[%s12791_s22 + $0x30] sm:$0xff] }
 0x7b2   : > { %v14164_v60 = vpop.f32.mrf.mxu0 }
 0x7b3   : > { %15589 = vst [vmem:[#allocation111_spill] sm:$0xff] %v14164_v60  ;;  %v14295_v60 = vld [vmem:[%s12791_s22 + $0xc8] sm:$0xff] }
 0x7b8   : > { %v11504_v38 = vpop.f32.mrf.mxu0 }
 0x7b9   : > { %v14167_v37 = vadd.f32 %v11504_v38, %v13986_v49 }
 0x7ba   : > { %v14169_v4 = vpop.f32.mrf.mxu0 }
 0x7bb   : > { %15590 = vst [vmem:[#allocation112_spill] sm:$0xff] %v14169_v4  ;;  %v14289_v4 = vld [vmem:[%s12791_s22 + $0xd0] sm:$0xff] }
 0x7bc   : > { %v4399_v42 = vpop.f32.mrf.mxu0 }
 0x7bd   : > { %11507 = vmatprep.mubr.msk.f32.mxu1 %vm1026_vm1, %v4399_v42  ;;  %v14229_v42 = vld [vmem:[%s12791_s22 + $0x28] sm:$0xff] }
 0x7be   : > { %v4401_v7 = vpop.f32.mrf.mxu0 }
 0x7c0   : > { %v4404_v45 = vpop.f32.mrf.mxu0 }
 0x7c1   : > { %11508 = vmatmul.mubr.msk.f32.vlgmr.msra.gmra.mxu1 %vm1026_vm1, %v4404_v45  ;;  %v14234_v45 = vld [vmem:[%s12791_s22 + $0x20] sm:$0xff] }
 0x7c2   : > { %v4406_v12 = vpop.f32.mrf.mxu0  ;;  %4982 = vmatpush1.msra.mxu1 %v14174_v5 }
 0x7c3   : > { %4983 = vmatprep.subr.mxu1 %v15526_v1 }
 0x7c4   : > { %v4409_v49 = vpop.f32.mrf.mxu0  ;;  %4984 = vmatpush1.msra.mxu1 %v14179_v2 }
 0x7c5   : > { %11510 = vmatprep.mubr.msk.f32.mxu1 %vm1026_vm1, %v4409_v49  ;;  %4985 = vmatprep.subr.mxu1 %v15526_v1  ;;  %v14240_v49 = vld [vmem:[%s12791_s22 + $0x18] sm:$0xff] }
 0x7c6   : > { %v4411_v28 = vpop.f32.mrf.mxu0  ;;  %4986 = vmatpush1.msra.mxu1 %v14185_v35 }
 0x7c7   : > { %4987 = vmatprep.subr.mxu1 %v15526_v1 }
 0x7c8   : > { %v4414_v11 = vpop.f32.mrf.mxu0  ;;  %4988 = vmatpush1.msra.mxu1 %v14190_v27 }
 0x7c9   : > { %11511 = vmatmul.mubr.msk.f32.gmra.mxu1 %vm1026_vm1, %v4414_v11  ;;  %4989 = vmatprep.subr.mxu1 %v15526_v1  ;;  %v14245_v11 = vld [vmem:[%s12791_s22 + $0x10] sm:$0xff] }
 0x7ca   : > { %v4416_v43 = vpop.f32.mrf.mxu0  ;;  %4990 = vmatpush1.msra.mxu1 %v14196_v31 }
 0x7cb   : > { %4991 = vmatprep.subr.mxu1 %v15526_v1 }
 0x7cc   : > { %v4419_v18 = vpop.f32.mrf.mxu0  ;;  %4992 = vmatpush1.msra.mxu1 %v14201_v62 }
 0x7cd   : > { %11513 = vmatprep.mubr.msk.f32.mxu1 %vm1026_vm1, %v4419_v18  ;;  %4993 = vmatprep.subr.mxu1 %v15526_v1  ;;  %v14251_v18 = vld [vmem:[%s12791_s22 + $0x8] sm:$0xff] }
 0x7ce   : > { %v4421_v19 = vpop.f32.mrf.mxu0  ;;  %4994 = vmatpush1.msra.mxu1 %v14207_v48 }
 0x7cf   : > { %4995 = vmatprep.subr.mxu1 %v15526_v1 }
 0x7d0   : > { %v4424_v25 = vpop.f32.mrf.mxu0  ;;  %4996 = vmatpush1.msra.mxu1 %v14212_v44 }
 0x7d1   : > { %11514 = vmatmul.mubr.msk.f32.gmra.mxu1 %vm1026_vm1, %v4424_v25  ;;  %4997 = vmatprep.subr.mxu1 %v15526_v1  ;;  %v14256_v25 = vld [vmem:[%s12791_s22] sm:$0xff] }
 0x7d2   : > { %v4426_v3 = vpop.f32.mrf.mxu0  ;;  %4998 = vmatpush1.msra.mxu1 %v14218_v36 }
 0x7d3   : > { %4999 = vmatprep.subr.mxu1 %v15526_v1 }
 0x7d4   : > { %v4429_v50 = vpop.f32.mrf.mxu0  ;;  %5000 = vmatpush1.msra.mxu1 %v14223_v22 }
 0x7d5   : > { %11516 = vmatprep.mubr.msk.f32.mxu1 %vm1026_vm1, %v4429_v50  ;;  %5001 = vmatprep.subr.mxu1 %v15526_v1  ;;  %v14262_v50 = vld [vmem:[%s12791_s22 + $0xf8] sm:$0xff] }
 0x7d6   : > { %v4431_v38 = vpop.f32.mrf.mxu0  ;;  %5002 = vmatpush1.msra.mxu1 %v14229_v42 }
 0x7d7   : > { %5003 = vmatprep.subr.mxu1 %v15526_v1 }
 0x7d8   : > { %v4434_v7 = vpop.f32.mrf.mxu0  ;;  %5004 = vmatpush1.msra.mxu1 %v14234_v45 }
 0x7d9   : > { %11517 = vmatmul.mubr.msk.f32.gmra.mxu1 %vm1026_vm1, %v4434_v7  ;;  %5005 = vmatprep.subr.mxu1 %v15526_v1  ;;  %v14267_v7 = vld [vmem:[%s12791_s22 + $0xf0] sm:$0xff] }
 0x7da   : > { %v4436_v12 = vpop.f32.mrf.mxu0  ;;  %5006 = vmatpush1.msra.mxu1 %v14240_v49 }
 0x7db   : > { %5007 = vmatprep.subr.mxu1 %v15526_v1 }
 0x7dc   : > { %v4439_v28 = vpop.f32.mrf.mxu0  ;;  %5008 = vmatpush1.msra.mxu1 %v14245_v11 }
 0x7dd   : > { %11519 = vmatprep.mubr.msk.f32.mxu1 %vm1026_vm1, %v4439_v28  ;;  %5009 = vmatprep.subr.mxu1 %v15526_v1  ;;  %v14273_v28 = vld [vmem:[%s12791_s22 + $0xe8] sm:$0xff] }
 0x7de   : > { %v4441_v43 = vpop.f32.mrf.mxu0  ;;  %5010 = vmatpush1.msra.mxu1 %v14251_v18 }
 0x7df   : > { %5011 = vmatprep.subr.mxu1 %v15526_v1 }
 0x7e0   : > { %v4444_v19 = vpop.f32.mrf.mxu0  ;;  %5012 = vmatpush1.msra.mxu1 %v14256_v25 }
 0x7e1   : > { %11520 = vmatmul.mubr.msk.f32.gmra.mxu1 %vm1026_vm1, %v4444_v19  ;;  %5013 = vmatprep.subr.mxu1 %v15526_v1  ;;  %v14278_v19 = vld [vmem:[%s12791_s22 + $0xe0] sm:$0xff] }
 0x7e2   : > { %v4446_v3 = vpop.f32.mrf.mxu0  ;;  %5014 = vmatpush2.msra.mxu1 %v14262_v50 }
 0x7e3   : > { %5015 = vmatprep.subr.mxu1 %v15526_v1 }
 0x7e4   : > { %v4449_v38 = vpop.f32.mrf.mxu0  ;;  %5016 = vmatpush2.msra.mxu1 %v14267_v7 }
 0x7e5   : > { %11522 = vmatprep.mubr.msk.f32.mxu1 %vm1026_vm1, %v4449_v38  ;;  %5017 = vmatprep.subr.mxu1 %v15526_v1  ;;  %v14284_v38 = vld [vmem:[%s12791_s22 + $0xd8] sm:$0xff]  ;;  %s406_s22 = scalar_lea.vmem [#allocation13], %s405_s27 }
 0x7e6   : > { %v4451_v12 = vpop.f32.mrf.mxu0  ;;  %5018 = vmatpush2.msra.mxu1 %v14273_v28  ;;  %s10001_s25 = sshll.u32 %s406_s22, 4  ;;  %s10002_s25 = int_to_ptr.vmem [resolvable:$true] %s10001_s25 }
 0x7e7   : > { %5019 = vmatprep.subr.mxu1 %v15526_v1  ;;  %s12503_s3 = scalar_lea.vmem %s10002_s25, 16  ;;  %p12510_p9 = scmp.lt.s32.totalorder %s10002_s25, %s12508_s18 }
 0x7e8   : > { %v4454_v43 = vpop.f32.mrf.mxu0  ;;  %5020 = vmatpush2.msra.mxu1 %v14278_v19  ;;  %p12504_p4 = scmp.ne.s32.totalorder %s10002_s25, %s12503_s3  ;;  %p12511_p13 = scmp.lt.s32.totalorder %s12509_s28, %s12503_s3 }
 0x7e9   : > { %11523 = vmatmul.mubr.msk.f32.gmra.mxu1 %vm1026_vm1, %v4454_v43  ;;  %5021 = vmatprep.subr.mxu1 %v15526_v1 }
 0x7ea   : > { %v4456_v3 = vpop.f32.mrf.mxu0  ;;  %5022 = vmatpush2.msra.mxu1 %v14284_v38  ;;  %p12505_p2 = pnand %p12504_p4, %p12682_p5  ;;  %p12512_p8 = por %p12511_p13, %p12510_p9 }
 0x7eb   : > { %5023 = vmatprep.subr.mxu1 %v15526_v1 }
 0x7ec   : > { %v4459_v12 = vpop.f32.mrf.mxu0  ;;  %5024 = vmatpush2.msra.mxu1 %v14289_v4  ;;  %p12506_p7 = pneg %p12505_p2 }
 0x7ed   : > { %11525 = vmatprep.mubr.msk.f32.mxu1 %vm1026_vm1, %v4459_v12  ;;  %5025 = vmatprep.subr.mxu1 %v15526_v1 }
 0x7ee   : > { %v4461_v43 = vpop.f32.mrf.mxu0  ;;  %5026 = vmatpush2.msra.mxu1 %v14295_v60  ;;  %p12513_p11 = pnand %p12512_p8, %p12506_p7 }
 0x7ef   : > { %5027 = vmatprep.subr.mxu1 %v15526_v1 }
 0x7f0   : > { %v4464_v3 = vpop.f32.mrf.mxu0  ;;  %5028 = vmatpush2.msra.mxu1 %v14300_v46 }
 0x7f1   : > { %11526 = vmatmul.mubr.msk.f32.gmra.mxu1 %vm1026_vm1, %v4464_v3  ;;  %5029 = vmatprep.subr.mxu1 %v15526_v1 }
 0x7f2   : > { %v4466_v12 = vpop.f32.mrf.mxu0  ;;  %5030 = vmatpush2.msra.mxu1 %v14306_v32 }
 0x7f3   : > { %5031 = vmatprep.subr.mxu1 %v15526_v1 }
 0x7f4   : > { %v4469_v43 = vpop.f32.mrf.mxu0  ;;  %5032 = vmatpush2.msra.mxu1 %v14311_v53 }
 0x7f5   : > { %11528 = vmatprep.mubr.msk.f32.mxu1 %vm1026_vm1, %v4469_v43  ;;  %5033 = vmatprep.subr.mxu1 %v15526_v1 }
 0x7f6   : > { %v4471_v3 = vpop.f32.mrf.mxu0  ;;  %5034 = vmatpush2.msra.mxu1 %v14317_v26 }
 0x7f7   : > { %5035 = vmatprep.subr.mxu1 %v15526_v1 }
 0x7f8   : > { %v4474_v12 = vpop.f32.mrf.mxu0  ;;  %5036 = vmatpush2.msra.mxu1 %v14322_v15 }
 0x7f9   : > { %11529 = vmatmul.mubr.msk.f32.gmra.mxu1 %vm1026_vm1, %v4474_v12  ;;  %5037 = vmatprep.subr.mxu1 %v15526_v1 }
 0x7fa   : > { %v4476_v43 = vpop.f32.mrf.mxu0  ;;  %5038 = vmatpush2.msra.mxu1 %v14328_v21 }
 0x7fb   : > { %5039 = vmatprep.subr.mxu1 %v15526_v1 }
 0x7fc   : > { %v4479_v3 = vpop.f32.mrf.mxu0  ;;  %5040 = vmatpush2.msra.mxu1 %v14333_v57 }
 0x7fd   : > { %11531 = vmatprep.mubr.msk.f32.mxu1 %vm1026_vm1, %v4479_v3  ;;  %5041 = vmatprep.subr.mxu1 %v15526_v1 }
 0x7fe   : > { %v4481_v12 = vpop.f32.mrf.mxu0  ;;  %5042 = vmatpush2.msra.mxu1 %v14339_v55 }
 0x7ff   : > { %5043 = vmatprep.subr.mxu1 %v15526_v1 }
 0x800   : > { %v4484_v43 = vpop.f32.mrf.mxu0  ;;  %5044 = vmatpush2.msra.mxu1 %v14344_v6 }
 0x801   : > { %11532 = vmatmul.mubr.msk.f32.gmra.mxu1 %vm1026_vm1, %v4484_v43 }
 0x802   : > { %v4486_v34 = vpop.f32.mrf.mxu0 }
 0x804   : > { %v4489_v9 = vpop.f32.mrf.mxu0 }
 0x805   : > { %11534 = vmatprep.mubr.msk.f32.mxu1 %vm1026_vm1, %v4489_v9 }
 0x806   : > { %v4491_v3 = vpop.f32.mrf.mxu0 }
 0x808   : > { %v4494_v30 = vpop.f32.mrf.mxu0 }
 0x809   : > { %11535 = vmatmul.mubr.msk.f32.gmra.mxu1 %vm1026_vm1, %v4494_v30 }
 0x80a   : > { %v4496_v12 = vpop.f32.mrf.mxu0 }
 0x80c   : > { %v4499_v8 = vpop.f32.mrf.mxu0 }
 0x80d   : > { %11537 = vmatprep.mubr.msk.f32.mxu1 %vm1026_vm1, %v4499_v8 }
 0x80e   : > { %v4501_v51 = vpop.f32.mrf.mxu0 }
 0x810   : > { %v4504_v10 = vpop.f32.mrf.mxu0 }
 0x811   : > { %11538 = vmatmul.mubr.msk.f32.gmra.mxu1 %vm1026_vm1, %v4504_v10 }
 0x812   : > { %v4506_v0 = vpop.f32.mrf.mxu0 }
 0x814   : > { %v4509_v24 = vpop.f32.mrf.mxu0 }
 0x815   : > { %11540 = vmatprep.mubr.msk.f32.mxu1 %vm1026_vm1, %v4509_v24 }
 0x816   : > { %v4511_v34 = vpop.f32.mrf.mxu0 }
 0x818   : > { %v4514_v43 = vpop.f32.mrf.mxu0 }
 0x819   : > { %11541 = vmatmul.mubr.msk.f32.gmra.mxu1 %vm1026_vm1, %v4514_v43 }
 0x81a   : > { %v4516_v9 = vpop.f32.mrf.mxu0 }
 0x81c   : > { %v4519_v3 = vpop.f32.mrf.mxu0 }
 0x81d   : > { %11543 = vmatprep.mubr.msk.f32.mxu1 %vm1026_vm1, %v4519_v3 }
 0x81e   : > { %v4521_v30 = vpop.f32.mrf.mxu0 }
 0x820   : > { %v4524_v12 = vpop.f32.mrf.mxu0 }
 0x821   : > { %11544 = vmatmul.mubr.msk.f32.gmra.mxu1 %vm1026_vm1, %v4524_v12 }
 0x822   : > { %v4526_v51 = vpop.f32.mrf.mxu0 }
 0x823   : > { %v4918_v51 = vld [vmem:[#allocation2 + $0xe08] sm:$0xff] }
 0x824   : > { %v4529_v8 = vpop.f32.mrf.mxu0 }
 0x825   : > { %11546 = vmatprep.mubr.msk.f32.mxu1 %vm1026_vm1, %v4529_v8 }
 0x826   : > { %v4531_v0 = vpop.f32.mrf.mxu0 }
 0x827   : > { %v4917_v0 = vld [vmem:[#allocation2 + $0xe00] sm:$0xff] }
 0x828   : > { %v4534_v10 = vpop.f32.mrf.mxu0 }
 0x829   : > { %11547 = vmatmul.mubr.msk.f32.gmra.mxu1 %vm1026_vm1, %v4534_v10  ;;  %v4920_v10 = vld [vmem:[#allocation2 + $0xe18] sm:$0xff] }
 0x82a   : > { %v4536_v24 = vpop.f32.mrf.mxu0 }
 0x82b   : > { %v4919_v24 = vld [vmem:[#allocation2 + $0xe10] sm:$0xff] }
 0x82c   : > { %v4539_v34 = vpop.f32.mrf.mxu0 }
 0x82d   : > { %11549 = vmatprep.mubr.msk.f32.mxu1 %vm1026_vm1, %v4539_v34  ;;  %v4922_v34 = vld [vmem:[#allocation2 + $0xe28] sm:$0xff] }
 0x82e   : > { %v4541_v43 = vpop.f32.mrf.mxu0 }
 0x82f   : > { %v4921_v43 = vld [vmem:[#allocation2 + $0xe20] sm:$0xff] }
 0x830   : > { %v4544_v9 = vpop.f32.mrf.mxu0 }
 0x831   : > { %11550 = vmatmul.mubr.msk.f32.gmra.mxu1 %vm1026_vm1, %v4544_v9  ;;  %v4924_v9 = vld [vmem:[#allocation2 + $0xe38] sm:$0xff] }
 0x832   : > { %v4546_v3 = vpop.f32.mrf.mxu0 }
 0x833   : > { %v4923_v3 = vld [vmem:[#allocation2 + $0xe30] sm:$0xff] }
 0x834   : > { %v4549_v30 = vpop.f32.mrf.mxu0 }
 0x835   : > { %11552 = vmatprep.mubr.msk.f32.mxu1 %vm1026_vm1, %v4549_v30  ;;  %v4926_v30 = vld [vmem:[#allocation2 + $0xe48] sm:$0xff] }
 0x836   : > { %v4551_v12 = vpop.f32.mrf.mxu0 }
 0x837   : > { %v4925_v12 = vld [vmem:[#allocation2 + $0xe40] sm:$0xff] }
 0x838   : > { %v4554_v56 = vpop.f32.mrf.mxu0 }
 0x839   : > { %11553 = vmatmul.mubr.msk.f32.gmra.mxu1 %vm1026_vm1, %v4554_v56  ;;  %v4928_v56 = vld [vmem:[#allocation2 + $0xe58] sm:$0xff] }
 0x83a   : > { %v4556_v8 = vpop.f32.mrf.mxu0  ;;  %5045 = vmatprep.mubr.f32.mxu1 %v4918_v51  ;;  %v4927_v51 = vld [vmem:[#allocation2 + $0xe50] sm:$0xff] }
 0x83b   : > { %v4930_v8 = vld [vmem:[#allocation2 + $0xe68] sm:$0xff] }
 0x83d   : > { %5046 = vmatmul.mubr.f32.vlgmr.msra.gmra.mxu1 %v4917_v0  ;;  %v4929_v0 = vld [vmem:[#allocation2 + $0xe60] sm:$0xff] }
 0x83e   : > { %5050 = vmatprep.mubr.f32.mxu1 %v4920_v10  ;;  %v4932_v10 = vld [vmem:[#allocation2 + $0xe78] sm:$0xff] }
 0x841   : > { %5051 = vmatmul.mubr.f32.gmra.mxu1 %v4919_v24  ;;  %v4931_v24 = vld [vmem:[#allocation2 + $0xe70] sm:$0xff] }
 0x842   : > { %5055 = vmatprep.mubr.f32.mxu1 %v4922_v34  ;;  %v4934_v34 = vld [vmem:[#allocation2 + $0xe88] sm:$0xff] }
 0x845   : > { %5056 = vmatmul.mubr.f32.gmra.mxu1 %v4921_v43  ;;  %v4933_v43 = vld [vmem:[#allocation2 + $0xe80] sm:$0xff] }
 0x846   : > { %5060 = vmatprep.mubr.f32.mxu1 %v4924_v9  ;;  %v4936_v9 = vld [vmem:[#allocation2 + $0xe98] sm:$0xff] }
 0x849   : > { %5061 = vmatmul.mubr.f32.gmra.mxu1 %v4923_v3  ;;  %v4935_v3 = vld [vmem:[#allocation2 + $0xe90] sm:$0xff] }
 0x84a   : > { %5065 = vmatprep.mubr.f32.mxu1 %v4926_v30  ;;  %v4938_v30 = vld [vmem:[#allocation2 + $0xea8] sm:$0xff] }
 0x84d   : > { %5066 = vmatmul.mubr.f32.gmra.mxu1 %v4925_v12  ;;  %v4937_v12 = vld [vmem:[#allocation2 + $0xea0] sm:$0xff] }
 0x84e   : > { %5070 = vmatprep.mubr.f32.mxu1 %v4928_v56  ;;  %v4940_v56 = vld [vmem:[#allocation2 + $0xeb8] sm:$0xff] }
 0x851   : > { %5071 = vmatmul.mubr.f32.gmra.mxu1 %v4927_v51  ;;  %v4939_v51 = vld [vmem:[#allocation2 + $0xeb0] sm:$0xff] }
 0x852   : > { %5075 = vmatprep.mubr.f32.mxu1 %v4930_v8  ;;  %v4942_v8 = vld [vmem:[#allocation2 + $0xec8] sm:$0xff] }
 0x855   : > { %5076 = vmatmul.mubr.f32.gmra.mxu1 %v4929_v0  ;;  %v4941_v0 = vld [vmem:[#allocation2 + $0xec0] sm:$0xff] }
 0x856   : > { %5080 = vmatprep.mubr.f32.mxu1 %v4932_v10  ;;  %v4944_v10 = vld [vmem:[#allocation2 + $0xed8] sm:$0xff] }
 0x859   : > { %5081 = vmatmul.mubr.f32.gmra.mxu1 %v4931_v24  ;;  %v4943_v24 = vld [vmem:[#allocation2 + $0xed0] sm:$0xff] }
 0x85a   : > { %5085 = vmatprep.mubr.f32.mxu1 %v4934_v34  ;;  %v4946_v34 = vld [vmem:[#allocation2 + $0xee8] sm:$0xff] }
 0x85d   : > { %5086 = vmatmul.mubr.f32.gmra.mxu1 %v4933_v43  ;;  %v4945_v43 = vld [vmem:[#allocation2 + $0xee0] sm:$0xff] }
 0x85e   : > { %5090 = vmatprep.mubr.f32.mxu1 %v4936_v9  ;;  %v4948_v9 = vld [vmem:[#allocation2 + $0xef8] sm:$0xff] }
 0x861   : > { %5091 = vmatmul.mubr.f32.gmra.mxu1 %v4935_v3  ;;  %v4947_v3 = vld [vmem:[#allocation2 + $0xef0] sm:$0xff] }
 0x862   : > { %5095 = vmatprep.mubr.f32.mxu1 %v4938_v30  ;;  %v4950_v30 = vld [vmem:[#allocation2 + $0xf08] sm:$0xff] }
 0x865   : > { %5096 = vmatmul.mubr.f32.gmra.mxu1 %v4937_v12  ;;  %v4949_v12 = vld [vmem:[#allocation2 + $0xf00] sm:$0xff] }
 0x866   : > { %5100 = vmatprep.mubr.f32.mxu1 %v4940_v56  ;;  %v4952_v56 = vld [vmem:[#allocation2 + $0xf18] sm:$0xff] }
 0x869   : > { %5101 = vmatmul.mubr.f32.gmra.mxu1 %v4939_v51  ;;  %v10371_v51 = vld [vmem:[%s15463_s2 + $0x1c] sm:$0xf] }
 0x86a   : > { %5105 = vmatprep.mubr.f32.mxu1 %v4942_v8  ;;  %v4951_v8 = vld [vmem:[#allocation2 + $0xf10] sm:$0xff]  ;;  %11555 = vmatprep.subr.msk.mxu0 %vm1123_vm0, %v10371_v51 }
 0x86b   : > { %11556 = vmatpush3.msk.msra.mxu0 %vm1123_vm0, %v10371_v51  ;;  %v4957_v51 = vld [vmem:[#allocation2 + $0xf40] sm:$0xff] }
 0x86c   : > { %5629 = vmatprep.subr.mxu0 %v15526_v1 }
 0x86d   : > { %5106 = vmatmul.mubr.f32.gmra.mxu1 %v4941_v0  ;;  %v4954_v0 = vld [vmem:[#allocation2 + $0xf28] sm:$0xff] }
 0x86e   : > { %5110 = vmatprep.mubr.f32.mxu1 %v4944_v10 }
 0x871   : > { %5111 = vmatmul.mubr.f32.gmra.mxu1 %v4943_v24 }
 0x872   : > { %5115 = vmatprep.mubr.f32.mxu1 %v4946_v34  ;;  %v4953_v34 = vld [vmem:[#allocation2 + $0xf20] sm:$0xff] }
 0x875   : > { %5116 = vmatmul.mubr.f32.gmra.mxu1 %v4945_v43  ;;  %v4956_v43 = vld [vmem:[#allocation2 + $0xf38] sm:$0xff] }
 0x876   : > { %5120 = vmatprep.mubr.f32.mxu1 %v4948_v9  ;;  %v4955_v9 = vld [vmem:[#allocation2 + $0xf30] sm:$0xff] }
 0x879   : > { %5121 = vmatmul.mubr.f32.gmra.mxu1 %v4947_v3 }
 0x87a   : > { %5125 = vmatprep.mubr.f32.mxu1 %v4950_v30  ;;  %v4958_v30 = vld [vmem:[#allocation2 + $0xf48] sm:$0xff] }
 0x87d   : > { %5126 = vmatmul.mubr.f32.gmra.mxu1 %v4949_v12 }
 0x87e   : > { %5130 = vmatprep.mubr.f32.mxu1 %v4952_v56 }
 0x881   : > { %v11509_v10 = vpop.f32.mrf.mxu1  ;;  %5131 = vmatmul.mubr.f32.gmra.mxu1 %v4951_v8  ;;  %v4960_v8 = vld [vmem:[#allocation2 + $0xf58] sm:$0xff] }
 0x882   : > { %v14369_v24 = vadd.f32 %v11509_v10, %v14092_v33  ;;  %5135 = vmatprep.mubr.f32.mxu1 %v4954_v0  ;;  %v4959_v33 = vld [vmem:[#allocation2 + $0xf50] sm:$0xff]  ;;  %v4962_v10 = vld [vmem:[#allocation2 + $0xf68] sm:$0xff] }
 0x883   : > { %v14371_v3 = vpop.f32.mrf.mxu1 }
 0x884   : > { %15591 = vst [vmem:[#allocation113_spill] sm:$0xff] %v14371_v3  ;;  %v4961_v3 = vld [vmem:[#allocation2 + $0xf60] sm:$0xff] }
 0x885   : > { %5136 = vmatmul.mubr.f32.gmra.mxu1 %v4953_v34 }
 0x886   : > { %5140 = vmatprep.mubr.f32.mxu1 %v4956_v43 }
 0x889   : > { %v11512_v12 = vpop.f32.mrf.mxu1  ;;  %5141 = vmatmul.mubr.f32.gmra.mxu1 %v4955_v9  ;;  %v4964_v9 = vld [vmem:[#allocation2 + $0xf78] sm:$0xff] }
 0x88a   : > { %v14374_v56 = vadd.f32 %v11512_v12, %v14097_v29  ;;  %5145 = vmatprep.mubr.f32.mxu1 %v4958_v30  ;;  %v4963_v29 = vld [vmem:[#allocation2 + $0xf70] sm:$0xff]  ;;  %v4966_v12 = vld [vmem:[#allocation2 + $0xf88] sm:$0xff] }
 0x88b   : > { %v14376_v0 = vpop.f32.mrf.mxu1 }
 0x88c   : > { %15592 = vst [vmem:[#allocation114_spill] sm:$0xff] %v14376_v0  ;;  %v4965_v0 = vld [vmem:[#allocation2 + $0xf80] sm:$0xff] }
 0x88d   : > { %5146 = vmatmul.mubr.f32.gmra.mxu1 %v4957_v51 }
 0x88e   : > { %5150 = vmatprep.mubr.f32.mxu1 %v4960_v8 }
 0x891   : > { %v11515_v34 = vpop.f32.mrf.mxu1  ;;  %5151 = vmatmul.mubr.f32.gmra.mxu1 %v4959_v33  ;;  %v4968_v33 = vld [vmem:[#allocation2 + $0xf98] sm:$0xff] }
 0x892   : > { %v14379_v43 = vadd.f32 %v11515_v34, %v14102_v16  ;;  %5155 = vmatprep.mubr.f32.mxu1 %v4962_v10  ;;  %v4967_v16 = vld [vmem:[#allocation2 + $0xf90] sm:$0xff]  ;;  %v4970_v34 = vld [vmem:[#allocation2 + $0xfa8] sm:$0xff] }
 0x893   : > { %v14381_v30 = vpop.f32.mrf.mxu1 }
 0x894   : > { %15593 = vst [vmem:[#allocation115_spill] sm:$0xff] %v14381_v30  ;;  %v4969_v30 = vld [vmem:[#allocation2 + $0xfa0] sm:$0xff] }
 0x895   : > { %5156 = vmatmul.mubr.f32.gmra.mxu1 %v4961_v3 }
 0x896   : > { %5160 = vmatprep.mubr.f32.mxu1 %v4964_v9 }
 0x899   : > { %v11518_v51 = vpop.f32.mrf.mxu1  ;;  %5161 = vmatmul.mubr.f32.gmra.mxu1 %v4963_v29  ;;  %v4972_v29 = vld [vmem:[#allocation2 + $0xfb8] sm:$0xff] }
 0x89a   : > { %v14384_v8 = vadd.f32 %v11518_v51, %v14107_v39  ;;  %5165 = vmatprep.mubr.f32.mxu1 %v4966_v12  ;;  %v4971_v39 = vld [vmem:[#allocation2 + $0xfb0] sm:$0xff]  ;;  %v4974_v51 = vld [vmem:[#allocation2 + $0xfc8] sm:$0xff] }
 0x89b   : > { %v14386_v10 = vpop.f32.mrf.mxu1 }
 0x89c   : > { %15594 = vst [vmem:[#allocation116_spill] sm:$0xff] %v14386_v10  ;;  %v4973_v10 = vld [vmem:[#allocation2 + $0xfc0] sm:$0xff] }
 0x89d   : > { %5166 = vmatmul.mubr.f32.gmra.mxu1 %v4965_v0 }
 0x89e   : > { %5170 = vmatprep.mubr.f32.mxu1 %v4968_v33 }
 0x8a1   : > { %v11521_v3 = vpop.f32.mrf.mxu1  ;;  %5171 = vmatmul.mubr.f32.gmra.mxu1 %v4967_v16  ;;  %v4976_v16 = vld [vmem:[#allocation2 + $0xfd8] sm:$0xff] }
 0x8a2   : > { %v14389_v9 = vadd.f32 %v11521_v3, %v14112_v41  ;;  %5175 = vmatprep.mubr.f32.mxu1 %v4970_v34  ;;  %v4975_v41 = vld [vmem:[#allocation2 + $0xfd0] sm:$0xff]  ;;  %v4978_v3 = vld [vmem:[#allocation2 + $0xfe8] sm:$0xff] }
 0x8a3   : > { %v14391_v12 = vpop.f32.mrf.mxu1 }
 0x8a4   : > { %15595 = vst [vmem:[#allocation117_spill] sm:$0xff] %v14391_v12  ;;  %v4977_v12 = vld [vmem:[#allocation2 + $0xfe0] sm:$0xff] }
 0x8a5   : > { %5176 = vmatmul.mubr.f32.gmra.mxu1 %v4969_v30 }
 0x8a6   : > { %5180 = vmatprep.mubr.f32.mxu1 %v4972_v29 }
 0x8a9   : > { %v11524_v0 = vpop.f32.mrf.mxu1  ;;  %5181 = vmatmul.mubr.f32.gmra.mxu1 %v4971_v39  ;;  %v4980_v39 = vld [vmem:[#allocation2 + $0xff8] sm:$0xff] }
 0x8aa   : > { %v14394_v33 = vadd.f32 %v11524_v0, %v14117_v40  ;;  %5185 = vmatprep.mubr.f32.mxu1 %v4974_v51  ;;  %v4979_v40 = vld [vmem:[#allocation2 + $0xff0] sm:$0xff] }
 0x8ab   : > { %v14396_v34 = vpop.f32.mrf.mxu1 }
 0x8ac   : > { %15596 = vst [vmem:[#allocation118_spill] sm:$0xff] %v14396_v34 }
 0x8ad   : > { %5186 = vmatmul.mubr.f32.gmra.mxu1 %v4973_v10 }
 0x8ae   : > { %5190 = vmatprep.mubr.f32.mxu1 %v4976_v16 }
 0x8b1   : > { %v11527_v30 = vpop.f32.mrf.mxu1  ;;  %5191 = vmatmul.mubr.f32.gmra.mxu1 %v4975_v41 }
 0x8b2   : > { %v14399_v29 = vadd.f32 %v11527_v30, %v14122_v59  ;;  %5195 = vmatprep.mubr.f32.mxu1 %v4978_v3 }
 0x8b3   : > { %v14401_v51 = vpop.f32.mrf.mxu1 }
 0x8b5   : > { %5196 = vmatmul.mubr.f32.gmra.mxu1 %v4977_v12 }
 0x8b6   : > { %5200 = vmatprep.mubr.f32.mxu1 %v4980_v39 }
 0x8b9   : > { %v11530_v0 = vpop.f32.mrf.mxu1  ;;  %5201 = vmatmul.mubr.f32.gmra.mxu1 %v4979_v40 }
 0x8ba   : > { %v14404_v10 = vadd.f32 %v11530_v0, %v14127_v58 }
 0x8bb   : > { %v14406_v16 = vpop.f32.mrf.mxu1 }
 0x8bc   : > { %15597 = vst [vmem:[#allocation119_spill] sm:$0xff] %v14406_v16 }
 0x8c1   : > { %v11533_v34 = vpop.f32.mrf.mxu1 }
 0x8c2   : > { %v14409_v41 = vadd.f32 %v11533_v34, %v14132_v52 }
 0x8c3   : > { %v14411_v59 = vpop.f32.mrf.mxu1 }
 0x8c4   : > { %15598 = vst [vmem:[#allocation120_spill] sm:$0xff] %v14411_v59 }
 0x8c9   : > { %v11536_v3 = vpop.f32.mrf.mxu1 }
 0x8ca   : > { %v14414_v12 = vadd.f32 %v11536_v3, %v14137_v20 }
 0x8cb   : > { %v14416_v30 = vpop.f32.mrf.mxu1 }
 0x8cc   : > { %15599 = vst [vmem:[#allocation121_spill] sm:$0xff] %v14416_v30 }
 0x8d1   : > { %v11539_v39 = vpop.f32.mrf.mxu1 }
 0x8d2   : > { %v14419_v40 = vadd.f32 %v11539_v39, %v14142_v23 }
 0x8d3   : > { %v14421_v58 = vpop.f32.mrf.mxu1 }
 0x8d4   : > { %15600 = vst [vmem:[#allocation122_spill] sm:$0xff] %v14421_v58 }
 0x8d9   : > { %v11542_v0 = vpop.f32.mrf.mxu1 }
 0x8da   : > { %v14424_v16 = vadd.f32 %v11542_v0, %v14147_v47 }
 0x8db   : > { %v14426_v52 = vpop.f32.mrf.mxu1 }
 0x8dc   : > { %15601 = vst [vmem:[#allocation123_spill] sm:$0xff] %v14426_v52 }
 0x8e1   : > { %v11545_v34 = vpop.f32.mrf.mxu1 }
 0x8e2   : > { %v14429_v59 = vadd.f32 %v11545_v34, %v14152_v61 }
 0x8e3   : > { %v14431_v20 = vpop.f32.mrf.mxu1 }
 0x8e4   : > { %15602 = vst [vmem:[#allocation124_spill] sm:$0xff] %v14431_v20 }
 0x8e9   : > { %v11548_v3 = vpop.f32.mrf.mxu1 }
 0x8ea   : > { %v14434_v30 = vadd.f32 %v11548_v3, %v14157_v63 }
 0x8eb   : > { %v14436_v23 = vpop.f32.mrf.mxu1 }
 0x8f1   : > { %v11551_v39 = vpop.f32.mrf.mxu1 }
 0x8f2   : > { %v14439_v58 = vadd.f32 %v11551_v39, %v14162_v54 }
 0x8f3   : > { %v14441_v47 = vpop.f32.mrf.mxu1 }
 0x8f9   : > { %v11554_v0 = vpop.f32.mrf.mxu1 }
 0x8fa   : > { %v14444_v52 = vadd.f32 %v11554_v0, %v14167_v37 }
 0x8fb   : > { %v14446_v61 = vpop.f32.mrf.mxu1 }
 0x8fd   : > { %v5047_v34 = vpop.f32.mrf.mxu1 }
 0x8fe   : > { %11557 = vmatprep.mubr.msk.f32.mxu0 %vm1026_vm1, %v5047_v34 }
 0x8ff   : > { %v5049_v20 = vpop.f32.mrf.mxu1 }
 0x901   : > { %v5052_v63 = vpop.f32.mrf.mxu1 }
 0x902   : > { %11558 = vmatmul.mubr.msk.f32.vlgmr.msra.gmra.mxu0 %vm1026_vm1, %v5052_v63 }
 0x903   : > { %v5054_v3 = vpop.f32.mrf.mxu1  ;;  %5630 = vmatpush1.msra.mxu0 %v14174_v5 }
 0x904   : > { %5631 = vmatprep.subr.mxu0 %v15526_v1 }
 0x905   : > { %v5057_v54 = vpop.f32.mrf.mxu1  ;;  %5632 = vmatpush1.msra.mxu0 %v14179_v2 }
 0x906   : > { %11560 = vmatprep.mubr.msk.f32.mxu0 %vm1026_vm1, %v5057_v54  ;;  %5633 = vmatprep.subr.mxu0 %v15526_v1 }
 0x907   : > { %v5059_v37 = vpop.f32.mrf.mxu1  ;;  %5634 = vmatpush1.msra.mxu0 %v14185_v35 }
 0x908   : > { %5635 = vmatprep.subr.mxu0 %v15526_v1 }
 0x909   : > { %v5062_v20 = vpop.f32.mrf.mxu1  ;;  %5636 = vmatpush1.msra.mxu0 %v14190_v27 }
 0x90a   : > { %11561 = vmatmul.mubr.msk.f32.gmra.mxu0 %vm1026_vm1, %v5062_v20  ;;  %5637 = vmatprep.subr.mxu0 %v15526_v1 }
 0x90b   : > { %v5064_v5 = vpop.f32.mrf.mxu1  ;;  %5638 = vmatpush1.msra.mxu0 %v14196_v31 }
 0x90c   : > { %5639 = vmatprep.subr.mxu0 %v15526_v1 }
 0x90d   : > { %v5067_v2 = vpop.f32.mrf.mxu1  ;;  %5640 = vmatpush1.msra.mxu0 %v14201_v62 }
 0x90e   : > { %11563 = vmatprep.mubr.msk.f32.mxu0 %vm1026_vm1, %v5067_v2  ;;  %5641 = vmatprep.subr.mxu0 %v15526_v1 }
 0x90f   : > { %v5069_v35 = vpop.f32.mrf.mxu1  ;;  %5642 = vmatpush1.msra.mxu0 %v14207_v48 }
 0x910   : > { %5643 = vmatprep.subr.mxu0 %v15526_v1 }
 0x911   : > { %v5072_v27 = vpop.f32.mrf.mxu1  ;;  %5644 = vmatpush1.msra.mxu0 %v14212_v44 }
 0x912   : > { %11564 = vmatmul.mubr.msk.f32.gmra.mxu0 %vm1026_vm1, %v5072_v27  ;;  %5645 = vmatprep.subr.mxu0 %v15526_v1 }
 0x913   : > { %v5074_v31 = vpop.f32.mrf.mxu1  ;;  %5646 = vmatpush1.msra.mxu0 %v14218_v36 }
 0x914   : > { %5647 = vmatprep.subr.mxu0 %v15526_v1 }
 0x915   : > { %v5077_v62 = vpop.f32.mrf.mxu1  ;;  %5648 = vmatpush1.msra.mxu0 %v14223_v22 }
 0x916   : > { %11566 = vmatprep.mubr.msk.f32.mxu0 %vm1026_vm1, %v5077_v62  ;;  %5649 = vmatprep.subr.mxu0 %v15526_v1 }
 0x917   : > { %v5079_v48 = vpop.f32.mrf.mxu1  ;;  %5650 = vmatpush1.msra.mxu0 %v14229_v42 }
 0x918   : > { %5651 = vmatprep.subr.mxu0 %v15526_v1 }
 0x919   : > { %v5082_v44 = vpop.f32.mrf.mxu1  ;;  %5652 = vmatpush1.msra.mxu0 %v14234_v45 }
 0x91a   : > { %11567 = vmatmul.mubr.msk.f32.gmra.mxu0 %vm1026_vm1, %v5082_v44  ;;  %5653 = vmatprep.subr.mxu0 %v15526_v1 }
 0x91b   : > { %v5084_v36 = vpop.f32.mrf.mxu1  ;;  %5654 = vmatpush1.msra.mxu0 %v14240_v49 }
 0x91c   : > { %5655 = vmatprep.subr.mxu0 %v15526_v1 }
 0x91d   : > { %v5087_v22 = vpop.f32.mrf.mxu1  ;;  %5656 = vmatpush1.msra.mxu0 %v14245_v11 }
 0x91e   : > { %11569 = vmatprep.mubr.msk.f32.mxu0 %vm1026_vm1, %v5087_v22  ;;  %5657 = vmatprep.subr.mxu0 %v15526_v1 }
 0x91f   : > { %v5089_v42 = vpop.f32.mrf.mxu1  ;;  %5658 = vmatpush1.msra.mxu0 %v14251_v18 }
 0x920   : > { %5659 = vmatprep.subr.mxu0 %v15526_v1 }
 0x921   : > { %v5092_v45 = vpop.f32.mrf.mxu1  ;;  %5660 = vmatpush1.msra.mxu0 %v14256_v25 }
 0x922   : > { %11570 = vmatmul.mubr.msk.f32.gmra.mxu0 %vm1026_vm1, %v5092_v45  ;;  %5661 = vmatprep.subr.mxu0 %v15526_v1 }
 0x923   : > { %v5094_v49 = vpop.f32.mrf.mxu1  ;;  %5662 = vmatpush2.msra.mxu0 %v14262_v50 }
 0x924   : > { %5663 = vmatprep.subr.mxu0 %v15526_v1 }
 0x925   : > { %v5097_v11 = vpop.f32.mrf.mxu1  ;;  %5664 = vmatpush2.msra.mxu0 %v14267_v7 }
 0x926   : > { %11572 = vmatprep.mubr.msk.f32.mxu0 %vm1026_vm1, %v5097_v11  ;;  %5665 = vmatprep.subr.mxu0 %v15526_v1 }
 0x927   : > { %v5099_v18 = vpop.f32.mrf.mxu1  ;;  %5666 = vmatpush2.msra.mxu0 %v14273_v28 }
 0x928   : > { %5667 = vmatprep.subr.mxu0 %v15526_v1 }
 0x929   : > { %v5102_v25 = vpop.f32.mrf.mxu1  ;;  %5668 = vmatpush2.msra.mxu0 %v14278_v19 }
 0x92a   : > { %11573 = vmatmul.mubr.msk.f32.gmra.mxu0 %vm1026_vm1, %v5102_v25  ;;  %5669 = vmatprep.subr.mxu0 %v15526_v1  ;;  %v5566_v25 = vld [vmem:[#allocation2 + $0x1008] sm:$0xff] }
 0x92b   : > { %v5104_v50 = vpop.f32.mrf.mxu1  ;;  %5670 = vmatpush2.msra.mxu0 %v14284_v38 }
 0x92c   : > { %5671 = vmatprep.subr.mxu0 %v15526_v1 }
 0x92d   : > { %v5107_v7 = vpop.f32.mrf.mxu1  ;;  %5672 = vmatpush2.msra.mxu0 %v14289_v4 }
 0x92e   : > { %11575 = vmatprep.mubr.msk.f32.mxu0 %vm1026_vm1, %v5107_v7  ;;  %5673 = vmatprep.subr.mxu0 %v15526_v1 }
 0x92f   : > { %v5109_v28 = vpop.f32.mrf.mxu1  ;;  %5674 = vmatpush2.msra.mxu0 %v14295_v60 }
 0x930   : > { %5675 = vmatprep.subr.mxu0 %v15526_v1  ;;  %v5565_v28 = vld [vmem:[#allocation2 + $0x1000] sm:$0xff] }
 0x931   : > { %v5112_v19 = vpop.f32.mrf.mxu1  ;;  %5676 = vmatpush2.msra.mxu0 %v14300_v46 }
 0x932   : > { %11576 = vmatmul.mubr.msk.f32.gmra.mxu0 %vm1026_vm1, %v5112_v19  ;;  %5677 = vmatprep.subr.mxu0 %v15526_v1  ;;  %v5568_v19 = vld [vmem:[#allocation2 + $0x1018] sm:$0xff] }
 0x933   : > { %v5114_v38 = vpop.f32.mrf.mxu1  ;;  %5678 = vmatpush2.msra.mxu0 %v14306_v32 }
 0x934   : > { %5679 = vmatprep.subr.mxu0 %v15526_v1  ;;  %v5567_v38 = vld [vmem:[#allocation2 + $0x1010] sm:$0xff] }
 0x935   : > { %v5117_v4 = vpop.f32.mrf.mxu1  ;;  %5680 = vmatpush2.msra.mxu0 %v14311_v53 }
 0x936   : > { %11578 = vmatprep.mubr.msk.f32.mxu0 %vm1026_vm1, %v5117_v4  ;;  %5681 = vmatprep.subr.mxu0 %v15526_v1  ;;  %v5570_v4 = vld [vmem:[#allocation2 + $0x1028] sm:$0xff] }
 0x937   : > { %v5119_v60 = vpop.f32.mrf.mxu1  ;;  %5682 = vmatpush2.msra.mxu0 %v14317_v26 }
 0x938   : > { %5683 = vmatprep.subr.mxu0 %v15526_v1  ;;  %v5569_v60 = vld [vmem:[#allocation2 + $0x1020] sm:$0xff] }
 0x939   : > { %v5122_v46 = vpop.f32.mrf.mxu1  ;;  %5684 = vmatpush2.msra.mxu0 %v14322_v15 }
 0x93a   : > { %11579 = vmatmul.mubr.msk.f32.gmra.mxu0 %vm1026_vm1, %v5122_v46  ;;  %5685 = vmatprep.subr.mxu0 %v15526_v1  ;;  %v5572_v46 = vld [vmem:[#allocation2 + $0x1038] sm:$0xff] }
 0x93b   : > { %v5124_v32 = vpop.f32.mrf.mxu1  ;;  %5686 = vmatpush2.msra.mxu0 %v14328_v21 }
 0x93c   : > { %5687 = vmatprep.subr.mxu0 %v15526_v1  ;;  %v5571_v32 = vld [vmem:[#allocation2 + $0x1030] sm:$0xff] }
 0x93d   : > { %v5127_v53 = vpop.f32.mrf.mxu1  ;;  %5688 = vmatpush2.msra.mxu0 %v14333_v57 }
 0x93e   : > { %11581 = vmatprep.mubr.msk.f32.mxu0 %vm1026_vm1, %v5127_v53  ;;  %5689 = vmatprep.subr.mxu0 %v15526_v1  ;;  %v5574_v53 = vld [vmem:[#allocation2 + $0x1048] sm:$0xff] }
 0x93f   : > { %v5129_v26 = vpop.f32.mrf.mxu1  ;;  %5690 = vmatpush2.msra.mxu0 %v14339_v55 }
 0x940   : > { %5691 = vmatprep.subr.mxu0 %v15526_v1  ;;  %v5573_v26 = vld [vmem:[#allocation2 + $0x1040] sm:$0xff]  ;;  %v15632_v1 = vld [vmem:[#allocation25_spill] sm:$0xff] }
 0x941   : > { %v5132_v15 = vpop.f32.mrf.mxu1  ;;  %5692 = vmatpush2.msra.mxu0 %v14344_v6 }
 0x942   : > { %11582 = vmatmul.mubr.msk.f32.gmra.mxu0 %vm1026_vm1, %v5132_v15  ;;  %v5576_v15 = vld [vmem:[#allocation2 + $0x1058] sm:$0xff] }
 0x943   : > { %v5134_v21 = vpop.f32.mrf.mxu1 }
 0x944   : > { %v5575_v21 = vld [vmem:[#allocation2 + $0x1050] sm:$0xff] }
 0x945   : > { %v5137_v39 = vpop.f32.mrf.mxu1 }
 0x946   : > { %11584 = vmatprep.mubr.msk.f32.mxu0 %vm1026_vm1, %v5137_v39  ;;  %v5578_v39 = vld [vmem:[#allocation2 + $0x1068] sm:$0xff] }
 0x947   : > { %v5139_v0 = vpop.f32.mrf.mxu1 }
 0x948   : > { %v5577_v0 = vld [vmem:[#allocation2 + $0x1060] sm:$0xff] }
 0x949   : > { %v5142_v57 = vpop.f32.mrf.mxu1 }
 0x94a   : > { %11585 = vmatmul.mubr.msk.f32.gmra.mxu0 %vm1026_vm1, %v5142_v57  ;;  %v5580_v57 = vld [vmem:[#allocation2 + $0x1078] sm:$0xff] }
 0x94b   : > { %v5144_v34 = vpop.f32.mrf.mxu1 }
 0x94c   : > { %v5579_v34 = vld [vmem:[#allocation2 + $0x1070] sm:$0xff] }
 0x94d   : > { %v5147_v63 = vpop.f32.mrf.mxu1 }
 0x94e   : > { %11587 = vmatprep.mubr.msk.f32.mxu0 %vm1026_vm1, %v5147_v63  ;;  %v5582_v63 = vld [vmem:[#allocation2 + $0x1088] sm:$0xff] }
 0x94f   : > { %v5149_v55 = vpop.f32.mrf.mxu1 }
 0x950   : > { %v5581_v55 = vld [vmem:[#allocation2 + $0x1080] sm:$0xff] }
 0x951   : > { %v5152_v3 = vpop.f32.mrf.mxu1 }
 0x952   : > { %11588 = vmatmul.mubr.msk.f32.gmra.mxu0 %vm1026_vm1, %v5152_v3  ;;  %v5584_v3 = vld [vmem:[#allocation2 + $0x1098] sm:$0xff] }
 0x953   : > { %v5154_v54 = vpop.f32.mrf.mxu1 }
 0x954   : > { %v5583_v54 = vld [vmem:[#allocation2 + $0x1090] sm:$0xff] }
 0x955   : > { %v5157_v6 = vpop.f32.mrf.mxu1 }
 0x956   : > { %11590 = vmatprep.mubr.msk.f32.mxu0 %vm1026_vm1, %v5157_v6  ;;  %v5586_v6 = vld [vmem:[#allocation2 + $0x10a8] sm:$0xff] }
 0x957   : > { %v5159_v37 = vpop.f32.mrf.mxu1 }
 0x958   : > { %v5585_v37 = vld [vmem:[#allocation2 + $0x10a0] sm:$0xff] }
 0x959   : > { %v5162_v20 = vpop.f32.mrf.mxu1 }
 0x95a   : > { %11591 = vmatmul.mubr.msk.f32.gmra.mxu0 %vm1026_vm1, %v5162_v20  ;;  %v5588_v20 = vld [vmem:[#allocation2 + $0x10b8] sm:$0xff] }
 0x95b   : > { %v5164_v5 = vpop.f32.mrf.mxu1 }
 0x95c   : > { %v5587_v5 = vld [vmem:[#allocation2 + $0x10b0] sm:$0xff] }
 0x95d   : > { %v5167_v2 = vpop.f32.mrf.mxu1 }
 0x95e   : > { %11593 = vmatprep.mubr.msk.f32.mxu0 %vm1026_vm1, %v5167_v2  ;;  %v5590_v2 = vld [vmem:[#allocation2 + $0x10c8] sm:$0xff] }
 0x95f   : > { %v5169_v35 = vpop.f32.mrf.mxu1 }
 0x960   : > { %v5589_v35 = vld [vmem:[#allocation2 + $0x10c0] sm:$0xff] }
 0x961   : > { %v5172_v27 = vpop.f32.mrf.mxu1 }
 0x962   : > { %11594 = vmatmul.mubr.msk.f32.gmra.mxu0 %vm1026_vm1, %v5172_v27  ;;  %v5592_v27 = vld [vmem:[#allocation2 + $0x10d8] sm:$0xff] }
 0x963   : > { %v5174_v31 = vpop.f32.mrf.mxu1 }
 0x964   : > { %v5591_v31 = vld [vmem:[#allocation2 + $0x10d0] sm:$0xff] }
 0x965   : > { %v5177_v62 = vpop.f32.mrf.mxu1 }
 0x966   : > { %11596 = vmatprep.mubr.msk.f32.mxu0 %vm1026_vm1, %v5177_v62  ;;  %v5594_v62 = vld [vmem:[#allocation2 + $0x10e8] sm:$0xff] }
 0x967   : > { %v5179_v48 = vpop.f32.mrf.mxu1 }
 0x968   : > { %v5593_v48 = vld [vmem:[#allocation2 + $0x10e0] sm:$0xff] }
 0x969   : > { %v5182_v44 = vpop.f32.mrf.mxu1 }
 0x96a   : > { %11597 = vmatmul.mubr.msk.f32.gmra.mxu0 %vm1026_vm1, %v5182_v44  ;;  %v5596_v44 = vld [vmem:[#allocation2 + $0x10f8] sm:$0xff] }
 0x96b   : > { %v5184_v36 = vpop.f32.mrf.mxu1 }
 0x96c   : > { %v5595_v36 = vld [vmem:[#allocation2 + $0x10f0] sm:$0xff] }
 0x96d   : > { %v5187_v22 = vpop.f32.mrf.mxu1 }
 0x96e   : > { %11599 = vmatprep.mubr.msk.f32.mxu0 %vm1026_vm1, %v5187_v22  ;;  %v5598_v22 = vld [vmem:[#allocation2 + $0x1108] sm:$0xff] }
 0x96f   : > { %v5189_v42 = vpop.f32.mrf.mxu1 }
 0x970   : > { %v5597_v42 = vld [vmem:[#allocation2 + $0x1100] sm:$0xff] }
 0x971   : > { %v5192_v45 = vpop.f32.mrf.mxu1 }
 0x972   : > { %11600 = vmatmul.mubr.msk.f32.gmra.mxu0 %vm1026_vm1, %v5192_v45  ;;  %v5600_v45 = vld [vmem:[#allocation2 + $0x1118] sm:$0xff] }
 0x973   : > { %v5194_v49 = vpop.f32.mrf.mxu1 }
 0x974   : > { %v10405_v49 = vld [vmem:[%s15463_s2 + $0x20] sm:$0xf] }
 0x975   : > { %v5197_v11 = vpop.f32.mrf.mxu1  ;;  %11605 = vmatprep.subr.msk.mxu1 %vm1123_vm0, %v10405_v49 }
 0x976   : > { %11602 = vmatprep.mubr.msk.f32.mxu0 %vm1026_vm1, %v5197_v11  ;;  %v5599_v11 = vld [vmem:[#allocation2 + $0x1110] sm:$0xff]  ;;  %11606 = vmatpush3.msk.msra.mxu1 %vm1123_vm0, %v10405_v49 }
 0x977   : > { %v5199_v18 = vpop.f32.mrf.mxu1 }
 0x978   : > { %v5602_v18 = vld [vmem:[#allocation2 + $0x1128] sm:$0xff] }
 0x979   : > { %v5202_v50 = vpop.f32.mrf.mxu1 }
 0x97a   : > { %11603 = vmatmul.mubr.msk.f32.gmra.mxu0 %vm1026_vm1, %v5202_v50 }
 0x97b   : > { %v5204_v7 = vpop.f32.mrf.mxu1  ;;  %5693 = vmatprep.mubr.f32.mxu0 %v5566_v25 }
 0x97c   : > { %v5601_v7 = vld [vmem:[#allocation2 + $0x1120] sm:$0xff] }
 0x97e   : > { %5694 = vmatmul.mubr.f32.vlgmr.msra.gmra.mxu0 %v5565_v28  ;;  %v5604_v28 = vld [vmem:[#allocation2 + $0x1138] sm:$0xff] }
 0x97f   : > { %5698 = vmatprep.mubr.f32.mxu0 %v5568_v19  ;;  %v5603_v19 = vld [vmem:[#allocation2 + $0x1130] sm:$0xff] }
 0x982   : > { %5699 = vmatmul.mubr.f32.gmra.mxu0 %v5567_v38 }
 0x983   : > { %5703 = vmatprep.mubr.f32.mxu0 %v5570_v4  ;;  %v5606_v4 = vld [vmem:[#allocation2 + $0x1148] sm:$0xff] }
 0x986   : > { %5704 = vmatmul.mubr.f32.gmra.mxu0 %v5569_v60 }
 0x987   : > { %5708 = vmatprep.mubr.f32.mxu0 %v5572_v46 }
 0x98a   : > { %5709 = vmatmul.mubr.f32.gmra.mxu0 %v5571_v32  ;;  %v5605_v32 = vld [vmem:[#allocation2 + $0x1140] sm:$0xff] }
 0x98b   : > { %5713 = vmatprep.mubr.f32.mxu0 %v5574_v53  ;;  %v5608_v53 = vld [vmem:[#allocation2 + $0x1158] sm:$0xff] }
 0x98e   : > { %5714 = vmatmul.mubr.f32.gmra.mxu0 %v5573_v26 }
 0x98f   : > { %5718 = vmatprep.mubr.f32.mxu0 %v5576_v15  ;;  %v5610_v15 = vld [vmem:[#allocation2 + $0x1168] sm:$0xff] }
 0x992   : > { %5719 = vmatmul.mubr.f32.gmra.mxu0 %v5575_v21 }
 0x993   : > { %5723 = vmatprep.mubr.f32.mxu0 %v5578_v39 }
 0x996   : > { %5724 = vmatmul.mubr.f32.gmra.mxu0 %v5577_v0  ;;  %v5609_v0 = vld [vmem:[#allocation2 + $0x1160] sm:$0xff] }
 0x997   : > { %5728 = vmatprep.mubr.f32.mxu0 %v5580_v57  ;;  %v5612_v57 = vld [vmem:[#allocation2 + $0x1178] sm:$0xff] }
 0x99a   : > { %5729 = vmatmul.mubr.f32.gmra.mxu0 %v5579_v34 }
 0x99b   : > { %5733 = vmatprep.mubr.f32.mxu0 %v5582_v63  ;;  %v5614_v63 = vld [vmem:[#allocation2 + $0x1188] sm:$0xff] }
 0x99e   : > { %5734 = vmatmul.mubr.f32.gmra.mxu0 %v5581_v55 }
 0x99f   : > { %5738 = vmatprep.mubr.f32.mxu0 %v5584_v3 }
 0x9a2   : > { %5739 = vmatmul.mubr.f32.gmra.mxu0 %v5583_v54  ;;  %v5613_v54 = vld [vmem:[#allocation2 + $0x1180] sm:$0xff] }
 0x9a3   : > { %5743 = vmatprep.mubr.f32.mxu0 %v5586_v6  ;;  %v5616_v6 = vld [vmem:[#allocation2 + $0x1198] sm:$0xff] }
 0x9a6   : > { %5744 = vmatmul.mubr.f32.gmra.mxu0 %v5585_v37 }
 0x9a7   : > { %5748 = vmatprep.mubr.f32.mxu0 %v5588_v20  ;;  %v5618_v20 = vld [vmem:[#allocation2 + $0x11a8] sm:$0xff] }
 0x9aa   : > { %5749 = vmatmul.mubr.f32.gmra.mxu0 %v5587_v5 }
 0x9ab   : > { %5753 = vmatprep.mubr.f32.mxu0 %v5590_v2 }
 0x9ae   : > { %5754 = vmatmul.mubr.f32.gmra.mxu0 %v5589_v35  ;;  %v5617_v35 = vld [vmem:[#allocation2 + $0x11a0] sm:$0xff] }
 0x9af   : > { %5758 = vmatprep.mubr.f32.mxu0 %v5592_v27  ;;  %v5620_v27 = vld [vmem:[#allocation2 + $0x11b8] sm:$0xff] }
 0x9b2   : > { %5759 = vmatmul.mubr.f32.gmra.mxu0 %v5591_v31 }
 0x9b3   : > { %5763 = vmatprep.mubr.f32.mxu0 %v5594_v62  ;;  %v5622_v62 = vld [vmem:[#allocation2 + $0x11c8] sm:$0xff] }
 0x9b6   : > { %5764 = vmatmul.mubr.f32.gmra.mxu0 %v5593_v48 }
 0x9b7   : > { %5768 = vmatprep.mubr.f32.mxu0 %v5596_v44 }
 0x9ba   : > { %5769 = vmatmul.mubr.f32.gmra.mxu0 %v5595_v36  ;;  %v5621_v36 = vld [vmem:[#allocation2 + $0x11c0] sm:$0xff] }
 0x9bb   : > { %5773 = vmatprep.mubr.f32.mxu0 %v5598_v22  ;;  %v5624_v22 = vld [vmem:[#allocation2 + $0x11d8] sm:$0xff] }
 0x9be   : > { %5774 = vmatmul.mubr.f32.gmra.mxu0 %v5597_v42 }
 0x9bf   : > { %5778 = vmatprep.mubr.f32.mxu0 %v5600_v45  ;;  %v5626_v45 = vld [vmem:[#allocation2 + $0x11e8] sm:$0xff] }
 0x9c2   : > { %v11559_v25 = vpop.f32.mrf.mxu0  ;;  %5779 = vmatmul.mubr.f32.gmra.mxu0 %v5599_v11 }
 0x9c3   : > { %v14549_v50 = vadd.f32 %v11559_v25, %v14369_v24  ;;  %5783 = vmatprep.mubr.f32.mxu0 %v5602_v18  ;;  %v5607_v24 = vld [vmem:[#allocation2 + $0x1150] sm:$0xff]  ;;  %v5625_v18 = vld [vmem:[#allocation2 + $0x11e0] sm:$0xff]  ;;  %v5628_v25 = vld [vmem:[#allocation2 + $0x11f8] sm:$0xff] }
 0x9c4   : > { %v14551_v38 = vpop.f32.mrf.mxu0 }
 0x9c5   : > { %15603 = vst [vmem:[#allocation125_spill] sm:$0xff] %v14551_v38  ;;  %v15635_v38 = vld [vmem:[#allocation28_spill] sm:$0xff] }
 0x9c6   : > { %5784 = vmatmul.mubr.f32.gmra.mxu0 %v5601_v7 }
 0x9c7   : > { %5788 = vmatprep.mubr.f32.mxu0 %v5604_v28 }
 0x9ca   : > { %v11562_v60 = vpop.f32.mrf.mxu0  ;;  %5789 = vmatmul.mubr.f32.gmra.mxu0 %v5603_v19 }
 0x9cb   : > { %v14554_v46 = vadd.f32 %v11562_v60, %v14374_v56  ;;  %5793 = vmatprep.mubr.f32.mxu0 %v5606_v4  ;;  %v5611_v56 = vld [vmem:[#allocation2 + $0x1170] sm:$0xff] }
 0x9cc   : > { %v14556_v26 = vpop.f32.mrf.mxu0 }
 0x9cd   : > { %15604 = vst [vmem:[#allocation126_spill] sm:$0xff] %v14556_v26  ;;  %v15646_v26 = vld [vmem:[#allocation39_spill] sm:$0xff] }
 0x9ce   : > { %5794 = vmatmul.mubr.f32.gmra.mxu0 %v5605_v32 }
 0x9cf   : > { %5798 = vmatprep.mubr.f32.mxu0 %v5608_v53 }
 0x9d2   : > { %v11565_v21 = vpop.f32.mrf.mxu0  ;;  %5799 = vmatmul.mubr.f32.gmra.mxu0 %v5607_v24 }
 0x9d3   : > { %v14559_v39 = vadd.f32 %v11565_v21, %v14379_v43  ;;  %5803 = vmatprep.mubr.f32.mxu0 %v5610_v15  ;;  %v5615_v43 = vld [vmem:[#allocation2 + $0x1190] sm:$0xff] }
 0x9d4   : > { %v14561_v34 = vpop.f32.mrf.mxu0 }
 0x9d6   : > { %5804 = vmatmul.mubr.f32.gmra.mxu0 %v5609_v0 }
 0x9d7   : > { %5808 = vmatprep.mubr.f32.mxu0 %v5612_v57 }
 0x9da   : > { %v11568_v55 = vpop.f32.mrf.mxu0  ;;  %5809 = vmatmul.mubr.f32.gmra.mxu0 %v5611_v56 }
 0x9db   : > { %v14564_v3 = vadd.f32 %v11568_v55, %v14384_v8  ;;  %5813 = vmatprep.mubr.f32.mxu0 %v5614_v63  ;;  %v5619_v8 = vld [vmem:[#allocation2 + $0x11b0] sm:$0xff] }
 0x9dc   : > { %v14566_v37 = vpop.f32.mrf.mxu0 }
 0x9de   : > { %5814 = vmatmul.mubr.f32.gmra.mxu0 %v5613_v54 }
 0x9df   : > { %5818 = vmatprep.mubr.f32.mxu0 %v5616_v6 }
 0x9e2   : > { %v11571_v5 = vpop.f32.mrf.mxu0  ;;  %5819 = vmatmul.mubr.f32.gmra.mxu0 %v5615_v43 }
 0x9e3   : > { %v14569_v2 = vadd.f32 %v11571_v5, %v14389_v9  ;;  %5823 = vmatprep.mubr.f32.mxu0 %v5618_v20  ;;  %v5623_v9 = vld [vmem:[#allocation2 + $0x11d0] sm:$0xff] }
 0x9e4   : > { %v14571_v31 = vpop.f32.mrf.mxu0 }
 0x9e5   : > { %15605 = vst [vmem:[#allocation127_spill] sm:$0xff] %v14571_v31  ;;  %v15637_v31 = vld [vmem:[#allocation30_spill] sm:$0xff] }
 0x9e6   : > { %5824 = vmatmul.mubr.f32.gmra.mxu0 %v5617_v35 }
 0x9e7   : > { %5828 = vmatprep.mubr.f32.mxu0 %v5620_v27 }
 0x9ea   : > { %v11574_v48 = vpop.f32.mrf.mxu0  ;;  %5829 = vmatmul.mubr.f32.gmra.mxu0 %v5619_v8 }
 0x9eb   : > { %v14574_v44 = vadd.f32 %v11574_v48, %v14394_v33  ;;  %5833 = vmatprep.mubr.f32.mxu0 %v5622_v62  ;;  %v5627_v33 = vld [vmem:[#allocation2 + $0x11f0] sm:$0xff] }
 0x9ec   : > { %v14576_v42 = vpop.f32.mrf.mxu0 }
 0x9ee   : > { %5834 = vmatmul.mubr.f32.gmra.mxu0 %v5621_v36 }
 0x9ef   : > { %5838 = vmatprep.mubr.f32.mxu0 %v5624_v22 }
 0x9f2   : > { %v11577_v49 = vpop.f32.mrf.mxu0  ;;  %5839 = vmatmul.mubr.f32.gmra.mxu0 %v5623_v9 }
 0x9f3   : > { %v14579_v11 = vadd.f32 %v11577_v49, %v14399_v29  ;;  %5843 = vmatprep.mubr.f32.mxu0 %v5626_v45 }
 0x9f4   : > { %v14581_v7 = vpop.f32.mrf.mxu0 }
 0x9f6   : > { %5844 = vmatmul.mubr.f32.gmra.mxu0 %v5625_v18 }
 0x9f7   : > { %5848 = vmatprep.mubr.f32.mxu0 %v5628_v25 }
 0x9fa   : > { %v11580_v28 = vpop.f32.mrf.mxu0  ;;  %5849 = vmatmul.mubr.f32.gmra.mxu0 %v5627_v33 }
 0x9fb   : > { %v14584_v19 = vadd.f32 %v11580_v28, %v14404_v10 }
 0x9fc   : > { %v14586_v4 = vpop.f32.mrf.mxu0 }
 0xa02   : > { %v11583_v60 = vpop.f32.mrf.mxu0 }
 0xa03   : > { %v14589_v32 = vadd.f32 %v11583_v60, %v14409_v41 }
 0xa04   : > { %v14591_v29 = vpop.f32.mrf.mxu0 }
 0xa05   : > { %15606 = vst [vmem:[#allocation128_spill] sm:$0xff] %v14591_v29  ;;  %v15636_v29 = vld [vmem:[#allocation29_spill] sm:$0xff] }
 0xa0a   : > { %v11586_v53 = vpop.f32.mrf.mxu0 }
 0xa0b   : > { %v14594_v24 = vadd.f32 %v11586_v53, %v14414_v12 }
 0xa0c   : > { %v14596_v15 = vpop.f32.mrf.mxu0 }
 0xa0d   : > { %15607 = vst [vmem:[#allocation129_spill] sm:$0xff] %v14596_v15  ;;  %v15652_v15 = vld [vmem:[#allocation45_spill] sm:$0xff] }
 0xa12   : > { %v11589_v21 = vpop.f32.mrf.mxu0 }
 0xa13   : > { %v14599_v0 = vadd.f32 %v11589_v21, %v14419_v40 }
 0xa14   : > { %v14601_v10 = vpop.f32.mrf.mxu0 }
 0xa1a   : > { %v11592_v57 = vpop.f32.mrf.mxu0 }
 0xa1b   : > { %v14604_v56 = vadd.f32 %v11592_v57, %v14424_v16 }
 0xa1c   : > { %v14606_v41 = vpop.f32.mrf.mxu0 }
 0xa1d   : > { %15608 = vst [vmem:[#allocation130_spill] sm:$0xff] %v14604_v56  ;;  %v15659_v56 = vld [vmem:[#allocation51_spill] sm:$0xff] }
 0xa22   : > { %v11595_v63 = vpop.f32.mrf.mxu0 }
 0xa23   : > { %v14609_v55 = vadd.f32 %v11595_v63, %v14429_v59 }
 0xa24   : > { %v14611_v12 = vpop.f32.mrf.mxu0 }
 0xa25   : > { %15609 = vst [vmem:[#allocation131_spill] sm:$0xff] %v14611_v12  ;;  %v15644_v12 = vld [vmem:[#allocation37_spill] sm:$0xff] }
 0xa2a   : > { %v11598_v54 = vpop.f32.mrf.mxu0 }
 0xa2b   : > { %v14614_v6 = vadd.f32 %v11598_v54, %v14434_v30 }
 0xa2c   : > { %v14616_v40 = vpop.f32.mrf.mxu0 }
 0xa2d   : > { %15610 = vst [vmem:[#allocation132_spill] sm:$0xff] %v14616_v40 }
 0xa32   : > { %v11601_v43 = vpop.f32.mrf.mxu0 }
 0xa33   : > { %v14619_v20 = vadd.f32 %v11601_v43, %v14439_v58 }
 0xa34   : > { %v14621_v16 = vpop.f32.mrf.mxu0 }
 0xa3a   : > { %v11604_v5 = vpop.f32.mrf.mxu0 }
 0xa3b   : > { %v14624_v35 = vadd.f32 %v11604_v5, %v14444_v52 }
 0xa3c   : > { %v14626_v59 = vpop.f32.mrf.mxu0 }
 0xa3d   : > { %15611 = vst [vmem:[#allocation133_spill] sm:$0xff] %v14624_v35  ;;  %15612 = vst [vmem:[#allocation134_spill] sm:$0xff] %v14626_v59  ;;  %v15654_v35 = vld [vmem:[#allocation47_spill] sm:$0xff] }
 0xa3e   : > { %v5695_v27 = vpop.f32.mrf.mxu0 }
 0xa3f   : > { %11607 = vmatprep.mubr.msk.f32.mxu1 %vm1026_vm1, %v5695_v27 }
 0xa40   : > { %v5697_v8 = vpop.f32.mrf.mxu0 }
 0xa42   : > { %v5700_v30 = vpop.f32.mrf.mxu0 }
 0xa43   : > { %11608 = vmatmul.mubr.msk.f32.vlgmr.msra.gmra.mxu1 %vm1026_vm1, %v5700_v30 }
 0xa44   : > { %v5702_v62 = vpop.f32.mrf.mxu0 }
 0xa46   : > { %v5705_v48 = vpop.f32.mrf.mxu0 }
 0xa47   : > { %11610 = vmatprep.mubr.msk.f32.mxu1 %vm1026_vm1, %v5705_v48 }
 0xa48   : > { %v5707_v58 = vpop.f32.mrf.mxu0 }
 0xa4a   : > { %v5710_v36 = vpop.f32.mrf.mxu0 }
 0xa4b   : > { %11611 = vmatmul.mubr.msk.f32.gmra.mxu1 %vm1026_vm1, %v5710_v36 }
 0xa4c   : > { %v5712_v22 = vpop.f32.mrf.mxu0 }
 0xa4e   : > { %v5715_v52 = vpop.f32.mrf.mxu0 }
 0xa4f   : > { %11613 = vmatprep.mubr.msk.f32.mxu1 %vm1026_vm1, %v5715_v52 }
 0xa50   : > { %v5717_v9 = vpop.f32.mrf.mxu0 }
 0xa52   : > { %v5720_v45 = vpop.f32.mrf.mxu0 }
 0xa53   : > { %11614 = vmatmul.mubr.msk.f32.gmra.mxu1 %vm1026_vm1, %v5720_v45 }
 0xa54   : > { %v5722_v49 = vpop.f32.mrf.mxu0 }
 0xa56   : > { %v5725_v18 = vpop.f32.mrf.mxu0 }
 0xa57   : > { %11616 = vmatprep.mubr.msk.f32.mxu1 %vm1026_vm1, %v5725_v18 }
 0xa58   : > { %v5727_v25 = vpop.f32.mrf.mxu0 }
 0xa5a   : > { %v5730_v33 = vpop.f32.mrf.mxu0 }
 0xa5b   : > { %11617 = vmatmul.mubr.msk.f32.gmra.mxu1 %vm1026_vm1, %v5730_v33 }
 0xa5c   : > { %v5732_v28 = vpop.f32.mrf.mxu0 }
 0xa5e   : > { %v5735_v60 = vpop.f32.mrf.mxu0 }
 0xa5f   : > { %11619 = vmatprep.mubr.msk.f32.mxu1 %vm1026_vm1, %v5735_v60 }
 0xa60   : > { %v5737_v53 = vpop.f32.mrf.mxu0 }
 0xa62   : > { %v5740_v21 = vpop.f32.mrf.mxu0 }
 0xa63   : > { %11620 = vmatmul.mubr.msk.f32.gmra.mxu1 %vm1026_vm1, %v5740_v21 }
 0xa64   : > { %v5742_v57 = vpop.f32.mrf.mxu0 }
 0xa66   : > { %v5745_v63 = vpop.f32.mrf.mxu0 }
 0xa67   : > { %11622 = vmatprep.mubr.msk.f32.mxu1 %vm1026_vm1, %v5745_v63 }
 0xa68   : > { %v5747_v54 = vpop.f32.mrf.mxu0 }
 0xa6a   : > { %v5750_v43 = vpop.f32.mrf.mxu0 }
 0xa6b   : > { %11623 = vmatmul.mubr.msk.f32.gmra.mxu1 %vm1026_vm1, %v5750_v43 }
 0xa6c   : > { %v5752_v5 = vpop.f32.mrf.mxu0 }
 0xa6e   : > { %v5755_v27 = vpop.f32.mrf.mxu0 }
 0xa6f   : > { %11625 = vmatprep.mubr.msk.f32.mxu1 %vm1026_vm1, %v5755_v27 }
 0xa70   : > { %v5757_v8 = vpop.f32.mrf.mxu0 }
 0xa72   : > { %v5760_v30 = vpop.f32.mrf.mxu0 }
 0xa73   : > { %11626 = vmatmul.mubr.msk.f32.gmra.mxu1 %vm1026_vm1, %v5760_v30 }
 0xa74   : > { %v5762_v62 = vpop.f32.mrf.mxu0 }
 0xa76   : > { %v5765_v48 = vpop.f32.mrf.mxu0 }
 0xa77   : > { %11628 = vmatprep.mubr.msk.f32.mxu1 %vm1026_vm1, %v5765_v48 }
 0xa78   : > { %v5767_v58 = vpop.f32.mrf.mxu0 }
 0xa7a   : > { %v5770_v36 = vpop.f32.mrf.mxu0 }
 0xa7b   : > { %11629 = vmatmul.mubr.msk.f32.gmra.mxu1 %vm1026_vm1, %v5770_v36 }
 0xa7c   : > { %v5772_v22 = vpop.f32.mrf.mxu0 }
 0xa7e   : > { %v5775_v52 = vpop.f32.mrf.mxu0 }
 0xa7f   : > { %11631 = vmatprep.mubr.msk.f32.mxu1 %vm1026_vm1, %v5775_v52 }
 0xa80   : > { %v5777_v9 = vpop.f32.mrf.mxu0 }
 0xa82   : > { %v5780_v45 = vpop.f32.mrf.mxu0 }
 0xa83   : > { %11632 = vmatmul.mubr.msk.f32.gmra.mxu1 %vm1026_vm1, %v5780_v45 }
 0xa84   : > { %v5782_v49 = vpop.f32.mrf.mxu0 }
 0xa86   : > { %v5785_v18 = vpop.f32.mrf.mxu0 }
 0xa87   : > { %11634 = vmatprep.mubr.msk.f32.mxu1 %vm1026_vm1, %v5785_v18 }
 0xa88   : > { %v5787_v25 = vpop.f32.mrf.mxu0 }
 0xa8a   : > { %v5790_v33 = vpop.f32.mrf.mxu0 }
 0xa8b   : > { %11635 = vmatmul.mubr.msk.f32.gmra.mxu1 %vm1026_vm1, %v5790_v33 }
 0xa8c   : > { %v5792_v28 = vpop.f32.mrf.mxu0 }
 0xa8e   : > { %v5795_v60 = vpop.f32.mrf.mxu0 }
 0xa8f   : > { %11637 = vmatprep.mubr.msk.f32.mxu1 %vm1026_vm1, %v5795_v60 }
 0xa90   : > { %v5797_v53 = vpop.f32.mrf.mxu0 }
 0xa92   : > { %v5800_v21 = vpop.f32.mrf.mxu0 }
 0xa93   : > { %11638 = vmatmul.mubr.msk.f32.gmra.mxu1 %vm1026_vm1, %v5800_v21 }
 0xa94   : > { %v5802_v57 = vpop.f32.mrf.mxu0 }
 0xa96   : > { %v5805_v63 = vpop.f32.mrf.mxu0 }
 0xa97   : > { %11640 = vmatprep.mubr.msk.f32.mxu1 %vm1026_vm1, %v5805_v63 }
 0xa98   : > { %v5807_v54 = vpop.f32.mrf.mxu0 }
 0xa99   : > { %v6259_v54 = vld [vmem:[#allocation7] sm:$0xff] }
 0xa9a   : > { %v5810_v43 = vpop.f32.mrf.mxu0 }
 0xa9b   : > { %11641 = vmatmul.mubr.msk.f32.gmra.mxu1 %vm1026_vm1, %v5810_v43 }
 0xa9c   : > { %v5812_v5 = vpop.f32.mrf.mxu0 }
 0xa9d   : > { %v6798_v5 = vld [vmem:[#allocation7 + $0x80] sm:$0xff] }
 0xa9e   : > { %v5815_v27 = vpop.f32.mrf.mxu0  ;;  %11755 = vmatprep.mubr.msk.f32.mxu0 %vm6267_vm2, %v6798_v5 }
 0xa9f   : > { %11643 = vmatprep.mubr.msk.f32.mxu1 %vm1026_vm1, %v5815_v27 }
 0xaa0   : > { %v5817_v8 = vpop.f32.mrf.mxu0 }
 0xaa2   : > { %v5820_v30 = vpop.f32.mrf.mxu0 }
 0xaa3   : > { %11644 = vmatmul.mubr.msk.f32.gmra.mxu1 %vm1026_vm1, %v5820_v30 }
 0xaa4   : > { %v5822_v62 = vpop.f32.mrf.mxu0 }
 0xaa6   : > { %v5825_v48 = vpop.f32.mrf.mxu0 }
 0xaa7   : > { %11646 = vmatprep.mubr.msk.f32.mxu1 %vm1026_vm1, %v5825_v48 }
 0xaa8   : > { %v5827_v58 = vpop.f32.mrf.mxu0 }
 0xaaa   : > { %v5830_v36 = vpop.f32.mrf.mxu0 }
 0xaab   : > { %11647 = vmatmul.mubr.msk.f32.gmra.mxu1 %vm1026_vm1, %v5830_v36 }
 0xaac   : > { %v5832_v22 = vpop.f32.mrf.mxu0 }
 0xaae   : > { %v5835_v52 = vpop.f32.mrf.mxu0 }
 0xaaf   : > { %11649 = vmatprep.mubr.msk.f32.mxu1 %vm1026_vm1, %v5835_v52  ;;  %v15631_v52 = vld [vmem:[#allocation24_spill] sm:$0xff] }
 0xab0   : > { %v5837_v9 = vpop.f32.mrf.mxu0 }
 0xab2   : > { %v5840_v45 = vpop.f32.mrf.mxu0 }
 0xab3   : > { %11650 = vmatmul.mubr.msk.f32.gmra.mxu1 %vm1026_vm1, %v5840_v45 }
 0xab4   : > { %v5842_v49 = vpop.f32.mrf.mxu0 }
 0xab6   : > { %v5845_v18 = vpop.f32.mrf.mxu0 }
 0xab7   : > { %11652 = vmatprep.mubr.msk.f32.mxu1 %vm1026_vm1, %v5845_v18  ;;  %v15630_v18 = vld [vmem:[#allocation23_spill] sm:$0xff] }
 0xab8   : > { %v5847_v25 = vpop.f32.mrf.mxu0 }
 0xaba   : > { %v5850_v33 = vpop.f32.mrf.mxu0 }
 0xabb   : > { %11653 = vmatmul.mubr.msk.f32.gmra.mxu1 %vm1026_vm1, %v5850_v33 }
 0xabc   : > { %v5852_v28 = vpop.f32.mrf.mxu0  ;;  %11671 = vmatprep.mubr.msk.f32.mxu1 %vm6267_vm2, %v6259_v54 }
 0xb03   : > { %v11609_v60 = vpop.f32.mrf.mxu1 }
 0xb04   : > { %v14661_v53 = vadd.f32 %v11609_v60, %v14549_v50 }
 0xb05   : > { %v14663_v21 = vpop.f32.mrf.mxu1 }
 0xb06   : > { %15613 = vst [vmem:[#allocation135_spill] sm:$0xff] %v14663_v21  ;;  %v15633_v21 = vld [vmem:[#allocation26_spill] sm:$0xff] }
 0xb0b   : > { %v11612_v57 = vpop.f32.mrf.mxu1 }
 0xb0c   : > { %v14666_v63 = vadd.f32 %v11612_v57, %v14554_v46  ;;  %v1548_v46 = vadd.f32 %v15631_v52, %v15630_v18  ;;  %v15645_v52 = vld [vmem:[#allocation38_spill] sm:$0xff] }
 0xb0d   : > { %v14668_v43 = vpop.f32.mrf.mxu1  ;;  %v1618_v18 = vadd.f32 %v15645_v52, %v15644_v12  ;;  %v15658_v12 = vld [vmem:[#allocation50_spill] sm:$0xff] }
 0xb0e   : > { %15614 = vst [vmem:[#allocation136_spill] sm:$0xff] %v14668_v43 }
 0xb13   : > { %v11615_v27 = vpop.f32.mrf.mxu1 }
 0xb14   : > { %v14691_v49 = vadd.f32 %v11615_v27, %v14559_v39 }
 0xb15   : > { %v14672_v8 = vpop.f32.mrf.mxu1 }
 0xb16   : > { %15615 = vst [vmem:[#allocation137_spill] sm:$0xff] %v14672_v8  ;;  %v15650_v8 = vld [vmem:[#allocation43_spill] sm:$0xff] }
 0xb1b   : > { %v11618_v50 = vpop.f32.mrf.mxu1 }
 0xb1d   : > { %v14674_v30 = vpop.f32.mrf.mxu1 }
 0xb1e   : > { %15616 = vst [vmem:[#allocation138_spill] sm:$0xff] %v14674_v30  ;;  %v15648_v30 = vld [vmem:[#allocation41_spill] sm:$0xff] }
 0xb23   : > { %v11621_v62 = vpop.f32.mrf.mxu1 }
 0xb24   : > { %v14677_v48 = vadd.f32 %v11621_v62, %v14569_v2 }
 0xb25   : > { %v14681_v58 = vpop.f32.mrf.mxu1 }
 0xb26   : > { %15617 = vst [vmem:[#allocation139_spill] sm:$0xff] %v14681_v58  ;;  %v15634_v58 = vld [vmem:[#allocation27_spill] sm:$0xff] }
 0xb27   : > { %v1568_v43 = vadd.f32 %v15635_v38, %v15634_v58  ;;  %v15649_v38 = vld [vmem:[#allocation42_spill] sm:$0xff] }
 0xb28   : > { %v1638_v58 = vadd.f32 %v15649_v38, %v15648_v30  ;;  %v15661_v30 = vld [vmem:[#allocation53_spill] sm:$0xff] }
 0xb2b   : > { %v11624_v36 = vpop.f32.mrf.mxu1 }
 0xb2c   : > { %v14684_v22 = vadd.f32 %v11624_v36, %v14574_v44  ;;  %v14701_v44 = vadd.f32 %v11618_v50, %v14564_v3  ;;  %v15627_v50 = vld [vmem:[#allocation20_spill] sm:$0xff] }
 0xb2d   : > { %v14688_v9 = vpop.f32.mrf.mxu1  ;;  %v1528_v36 = vadd.f32 %v15627_v50, %v13167_v17  ;;  %v15641_v17 = vld [vmem:[#allocation34_spill] sm:$0xff] }
 0xb2e   : > { %15618 = vst [vmem:[#allocation140_spill] sm:$0xff] %v14688_v9  ;;  %15620 = vst [vmem:[#allocation142_spill] sm:$0xff] %v14701_v44  ;;  %v15638_v44 = vld [vmem:[#allocation31_spill] sm:$0xff] }
 0xb2f   : > { %v15642_v9 = vld [vmem:[#allocation35_spill] sm:$0xff]  ;;  %v2294_v52 = vadd.f32 %v15658_v12, %v1528_v36 }
 0xb33   : > { %v11627_v45 = vpop.f32.mrf.mxu1 }
 0xb34   : > { %v14694_v2 = vadd.f32 %v11627_v45, %v14579_v11  ;;  %v15628_v45 = vld [vmem:[#allocation21_spill] sm:$0xff] }
 0xb35   : > { %v14698_v25 = vpop.f32.mrf.mxu1 }
 0xb36   : > { %15619 = vst [vmem:[#allocation141_spill] sm:$0xff] %v14698_v25 }
 0xb3b   : > { %v11630_v33 = vpop.f32.mrf.mxu1 }
 0xb3c   : > { %v14704_v28 = vadd.f32 %v11630_v33, %v14584_v19  ;;  %v1518_v19 = vadd.f32 %v13163_v14, %v13161_v13  ;;  %v15629_v33 = vld [vmem:[#allocation22_spill] sm:$0xff]  ;;  %v15639_v13 = vld [vmem:[#allocation32_spill] sm:$0xff] }
 0xb3d   : > { %v14708_v39 = vpop.f32.mrf.mxu1  ;;  %v1538_v60 = vadd.f32 %v15629_v33, %v15628_v45  ;;  %v1588_v14 = vadd.f32 %v15639_v13, %v15638_v44  ;;  %v15643_v45 = vld [vmem:[#allocation36_spill] sm:$0xff]  ;;  %v15653_v44 = vld [vmem:[#allocation46_spill] sm:$0xff] }
 0xb3e   : > { %15621 = vst [vmem:[#allocation143_spill] sm:$0xff] %v14704_v28  ;;  %15622 = vst [vmem:[#allocation144_spill] sm:$0xff] %v14708_v39  ;;  %v1578_v28 = vadd.f32 %v15637_v31, %v15636_v29  ;;  %v1608_v33 = vadd.f32 %v15643_v45, %v15642_v9  ;;  %v15651_v31 = vld [vmem:[#allocation44_spill] sm:$0xff]  ;;  %v1658_v13 = vadd.f32 %v15653_v44, %v15652_v15  ;;  %v15657_v9 = vld [vmem:[#allocation49_spill] sm:$0xff] }
 0xb3f   : > { %v1648_v29 = vadd.f32 %v15651_v31, %v15650_v8  ;;  %v2292_v45 = vadd.f32 %v15657_v9, %v1518_v19  ;;  %v15662_v39 = vld [vmem:[#allocation54_spill] sm:$0xff]  ;;  %v15663_v31 = vld [vmem:[#allocation55_spill] sm:$0xff]  ;;  %v15664_v15 = vld [vmem:[#allocation56_spill] sm:$0xff] }
 0xb40   : > { %v2302_v8 = vadd.f32 %v15662_v39, %v1568_v43  ;;  %v2304_v25 = vadd.f32 %v15663_v31, %v1578_v28  ;;  %v2306_v44 = vadd.f32 %v15664_v15, %v1588_v14  ;;  %v15670_v43 = vld [vmem:[#allocation62_spill] sm:$0xff]  ;;  %v15671_v28 = vld [vmem:[#allocation63_spill] sm:$0xff]  ;;  %v15672_v14 = vld [vmem:[#allocation64_spill] sm:$0xff] }
 0xb41   : > { %v2318_v39 = vadd.f32 %v15670_v43, %v1648_v29  ;;  %v15673_v31 = vld [vmem:[#allocation65_spill] sm:$0xff]  ;;  %v15680_v29 = vld [vmem:[#allocation72_spill] sm:$0xff] }
 0xb43   : > { %v11633_v57 = vpop.f32.mrf.mxu1 }
 0xb44   : > { %v6197_v19 = vadd.f32 %v11633_v57, %v14589_v32  ;;  %v15675_v32 = vld [vmem:[#allocation67_spill] sm:$0xff] }
 0xb45   : > { %v14710_v11 = vpop.f32.mrf.mxu1 }
 0xb46   : > { %15623 = vst [vmem:[#allocation145_spill] sm:$0xff] %v14710_v11  ;;  %v1558_v11 = vadd.f32 %v15633_v21, %v15632_v1  ;;  %v15647_v1 = vld [vmem:[#allocation40_spill] sm:$0xff] }
 0xb47   : > { %v1628_v21 = vadd.f32 %v15647_v1, %v15646_v26  ;;  %v2296_v26 = vadd.f32 %v15659_v56, %v1538_v60  ;;  %v15660_v1 = vld [vmem:[#allocation52_spill] sm:$0xff]  ;;  %v15667_v56 = vld [vmem:[#allocation59_spill] sm:$0xff] }
 0xb48   : > { %v2300_v38 = vadd.f32 %v15661_v30, %v1558_v11  ;;  %v2312_v60 = vadd.f32 %v15667_v56, %v1618_v18  ;;  %v15669_v11 = vld [vmem:[#allocation61_spill] sm:$0xff] }
 0xb49   : > { %v2316_v12 = vadd.f32 %v15669_v11, %v1638_v58  ;;  %v2944_v57 = vadd.f32 %v15675_v32, %v2296_v26  ;;  %v15677_v18 = vld [vmem:[#allocation69_spill] sm:$0xff]  ;;  %v15679_v58 = vld [vmem:[#allocation71_spill] sm:$0xff]  ;;  %v2954_v11 = vadd.f32 %v15680_v29, %v2306_v44  ;;  %v15689_v32 = vld [vmem:[#allocation80_spill] sm:$0xff] }
 0xb4a   : > { %v15684_v26 = vld [vmem:[#allocation75_spill] sm:$0xff] }
 0xb4b   : > { %v14712_v54 = vpop.f32.mrf.mxu1  ;;  %v2960_v43 = vadd.f32 %v15684_v26, %v2312_v60  ;;  %v15688_v44 = vld [vmem:[#allocation79_spill] sm:$0xff]  ;;  %v15698_v26 = vld [vmem:[#allocation89_spill] sm:$0xff] }
 0xb4d   : > { %v14714_v5 = vpop.f32.mrf.mxu1 }
 0xb4e   : > { %15624 = vst [vmem:[#allocation146_spill] sm:$0xff] %v14714_v5  ;;  %v15640_v5 = vld [vmem:[#allocation33_spill] sm:$0xff] }
 0xb4f   : > { %v1598_v50 = vadd.f32 %v15641_v17, %v15640_v5  ;;  %v15655_v5 = vld [vmem:[#allocation48_spill] sm:$0xff] }
 0xb50   : > { %v1668_v17 = vadd.f32 %v15655_v5, %v15654_v35  ;;  %v15665_v35 = vld [vmem:[#allocation57_spill] sm:$0xff] }
 0xb51   : > { %v2308_v5 = vadd.f32 %v15665_v35, %v1598_v50  ;;  %v2940_v50 = vadd.f32 %v15673_v31, %v2292_v45  ;;  %v2948_v35 = vadd.f32 %v15677_v18, %v2300_v38  ;;  %v15682_v45 = vld [vmem:[#allocation73_spill] sm:$0xff]  ;;  %v15692_v18 = vld [vmem:[#allocation83_spill] sm:$0xff] }
 0xb52   : > { %v2322_v30 = vadd.f32 %v15672_v14, %v1668_v17 }
 0xb53   : > { %v14716_v27 = vpop.f32.mrf.mxu1 }
 0xb55   : > { %v14718_v62 = vpop.f32.mrf.mxu1 }
 0xb56   : > { %15625 = vst [vmem:[#allocation147_spill] sm:$0xff] %v14718_v62  ;;  %v2298_v62 = vadd.f32 %v15660_v1, %v1548_v46  ;;  %v15668_v46 = vld [vmem:[#allocation60_spill] sm:$0xff]  ;;  %v2320_v1 = vadd.f32 %v15671_v28, %v1658_v13  ;;  %v15681_v13 = vmax.f32 %v14661_v53, %v14677_v48  ;;  %v2970_v53 = vadd.f32 %v15689_v32, %v2322_v30  ;;  %v15690_v48 = vld [vmem:[#allocation81_spill] sm:$0xff] }
 0xb57   : > { %v2314_v9 = vadd.f32 %v15668_v46, %v1628_v21  ;;  %v15678_v21 = vld [vmem:[#allocation70_spill] sm:$0xff]  ;;  %v2952_v46 = vadd.f32 %v15679_v58, %v2304_v25 }
 0xb58   : > { %v2950_v56 = vadd.f32 %v15678_v21, %v2302_v8  ;;  %v15686_v8 = vld [vmem:[#allocation77_spill] sm:$0xff]  ;;  %v15687_v25 = vld [vmem:[#allocation78_spill] sm:$0xff]  ;;  %v15693_v21 = vld [vmem:[#allocation84_spill] sm:$0xff] }
 0xb59   : > { %v2964_v14 = vadd.f32 %v15686_v8, %v2316_v12  ;;  %v2966_v31 = vadd.f32 %v15687_v25, %v2318_v39  ;;  %v6199_v12 = vadd.f32 %v14712_v54, %v14594_v24  ;;  %v15700_v8 = vld [vmem:[#allocation91_spill] sm:$0xff]  ;;  %v15701_v25 = vld [vmem:[#allocation92_spill] sm:$0xff] }
 0xb5a   : > { %v15704_v24 = vld [vmem:[#allocation95_spill] sm:$0xff] }
 0xb5b   : > { %v14720_v3 = vpop.f32.mrf.mxu1 }
 0xb5c   : > { %15626 = vst [vmem:[#allocation148_spill] sm:$0xff] %v14720_v3 }
 0xb5d   : > { %v14754_v3 = vpop.f32.mrf.mxu1 }
 0xb5e   : > { %15656 = vst [vmem:[#allocation20_spill] sm:$0xff] %v14754_v3  ;;  %v15666_v3 = vld [vmem:[#allocation58_spill] sm:$0xff] }
 0xb5f   : > { %v2310_v40 = vadd.f32 %v15666_v3, %v1608_v33  ;;  %v15674_v3 = vld [vmem:[#allocation66_spill] sm:$0xff] }
 0xb60   : > { %v2942_v33 = vadd.f32 %v15674_v3, %v2294_v52  ;;  %v15683_v52 = vld [vmem:[#allocation74_spill] sm:$0xff]  ;;  %v2968_v3 = vadd.f32 %v15688_v44, %v2320_v1  ;;  %v15696_v1 = vld [vmem:[#allocation87_spill] sm:$0xff] }
 0xb61   : > { %v3600_v30 = vadd.f32 %v15696_v1, %v2952_v46  ;;  %v15706_v46 = vld [vmem:[#allocation97_spill] sm:$0xff] }
 0xb62   : > { %v3616_v54 = vadd.f32 %v15704_v24, %v2968_v3  ;;  %v15713_v3 = vld [vmem:[#allocation103_spill] sm:$0xff] }
 0xb63   : > { %v11645_v59 = vpop.f32.mrf.mxu1  ;;  %v4248_v1 = vadd.f32 %v15713_v3, %v3600_v30 }
 0xb64   : > { %v6205_v36 = vadd.f32 %v11645_v59, %v14609_v55  ;;  %v15676_v55 = vld [vmem:[#allocation68_spill] sm:$0xff] }
 0xb65   : > { %v2946_v59 = vadd.f32 %v15676_v55, %v2298_v62  ;;  %v15685_v62 = vld [vmem:[#allocation76_spill] sm:$0xff]  ;;  %v14791_v38 = vpop.f32.mrf.mxu1  ;;  %v15691_v55 = vld [vmem:[#allocation82_spill] sm:$0xff] }
 0xb66   : > { %v6221_v15 = vmax.f32 %v6197_v19, %v6205_v36  ;;  %v2956_v19 = vadd.f32 %v15682_v45, %v2308_v5  ;;  %v2958_v36 = vadd.f32 %v15683_v52, %v2310_v40  ;;  %v2962_v28 = vadd.f32 %v15685_v62, %v2314_v9  ;;  %v15694_v9 = vld [vmem:[#allocation85_spill] sm:$0xff]  ;;  %v15697_v52 = vld [vmem:[#allocation88_spill] sm:$0xff]  ;;  %v15699_v62 = vld [vmem:[#allocation90_spill] sm:$0xff] }
 0xb67   : > { %v3590_v5 = vadd.f32 %v15691_v55, %v2942_v33  ;;  %v3592_v40 = vadd.f32 %v15692_v18, %v2944_v57  ;;  %v3594_v60 = vadd.f32 %v15693_v21, %v2946_v59  ;;  %v3596_v29 = vadd.f32 %v15694_v9, %v2948_v35  ;;  %v15702_v35 = vld [vmem:[#allocation93_spill] sm:$0xff] }
 0xb68   : > { %v14785_v17 = vmax.f32 %v15681_v13, %v6221_v15  ;;  %v3588_v15 = vadd.f32 %v15690_v48, %v2940_v50  ;;  %v15695_v13 = vld [vmem:[#allocation86_spill] sm:$0xff]  ;;  %v3602_v50 = vadd.f32 %v15697_v52, %v2954_v11  ;;  %v3604_v33 = vadd.f32 %v15698_v26, %v2956_v19  ;;  %v15708_v19 = vld [vmem:[#allocation99_spill] sm:$0xff]  ;;  %v15715_v26 = vld [vmem:[#allocation105_spill] sm:$0xff] }
 0xb69   : > { %v3598_v45 = vadd.f32 %v15695_v13, %v2950_v56  ;;  %v3606_v57 = vadd.f32 %v15699_v62, %v2958_v36  ;;  %v3608_v59 = vadd.f32 %v15700_v8, %v2960_v43  ;;  %v3610_v44 = vadd.f32 %v15701_v25, %v2962_v28  ;;  %v15703_v48 = vld [vmem:[#allocation94_spill] sm:$0xff]  ;;  %v15709_v36 = vld [vmem:[#allocation100_spill] sm:$0xff]  ;;  %v15717_v8 = vld [vmem:[#allocation107_spill] sm:$0xff] }
 0xb6a   : > { %v3612_v32 = vadd.f32 %v15702_v35, %v2964_v14  ;;  %v3614_v55 = vadd.f32 %v15703_v48, %v2966_v31  ;;  %v4236_v21 = vadd.f32 %v15706_v46, %v3588_v15  ;;  %v15707_v11 = vld [vmem:[#allocation98_spill] sm:$0xff]  ;;  %v4240_v9 = vadd.f32 %v15708_v19, %v3592_v40  ;;  %v15711_v14 = vld [vmem:[#allocation101_spill] sm:$0xff]  ;;  %v15718_v25 = vld [vmem:[#allocation108_spill] sm:$0xff] }
 0xb6b   : > { %v11648_v58 = vpop.f32.mrf.mxu1  ;;  %v4242_v13 = vadd.f32 %v15709_v36, %v3594_v60  ;;  %v15710_v43 = vmax.f32 %v14666_v63, %v14684_v22  ;;  %v15712_v31 = vld [vmem:[#allocation102_spill] sm:$0xff]  ;;  %v4256_v60 = vadd.f32 %v15717_v8, %v3608_v59  ;;  %v4258_v35 = vadd.f32 %v15718_v25, %v3610_v44  ;;  %v15719_v63 = vld [vmem:[#allocation109_spill] sm:$0xff]  ;;  %v15725_v44 = vld [vmem:[#allocation115_spill] sm:$0xff] }
 0xb6c   : > { %v6207_v39 = vadd.f32 %v11648_v58, %v14614_v6  ;;  %v15705_v6 = vld [vmem:[#allocation96_spill] sm:$0xff]  ;;  %v4238_v58 = vadd.f32 %v15707_v11, %v3590_v5  ;;  %v4252_v5 = vadd.f32 %v15715_v26, %v3604_v33  ;;  %v15716_v62 = vld [vmem:[#allocation106_spill] sm:$0xff]  ;;  %v4260_v22 = vadd.f32 %v15719_v63, %v3612_v32  ;;  %v15723_v46 = vld [vmem:[#allocation113_spill] sm:$0xff] }
 0xb6d   : > { %v3618_v18 = vadd.f32 %v15705_v6, %v2970_v53  ;;  %v15714_v53 = vld [vmem:[#allocation104_spill] sm:$0xff]  ;;  %v6151_v15 = vpop.f32.mrf.mxu1  ;;  %v4254_v40 = vadd.f32 %v15716_v62, %v3606_v57  ;;  %v15724_v11 = vld [vmem:[#allocation114_spill] sm:$0xff]  ;;  %v6201_v57 = vadd.f32 %v14716_v27, %v14599_v0  ;;  %v4888_v19 = vadd.f32 %v15725_v44, %v4240_v9  ;;  %v15731_v0 = vld [vmem:[#allocation121_spill] sm:$0xff] }
 0xb6e   : > { %v6223_v56 = vmax.f32 %v6199_v12, %v6207_v39  ;;  %v4244_v12 = vadd.f32 %v15711_v14, %v3596_v29  ;;  %v4246_v39 = vadd.f32 %v15712_v31, %v3598_v45  ;;  %v4250_v52 = vadd.f32 %v15714_v53, %v3602_v50  ;;  %v15721_v29 = vld [vmem:[#allocation111_spill] sm:$0xff]  ;;  %v15722_v45 = vld [vmem:[#allocation112_spill] sm:$0xff] }
 0xb6f   : > { %v4264_v24 = vadd.f32 %v15721_v29, %v3616_v54  ;;  %v4266_v6 = vadd.f32 %v15722_v45, %v3618_v18  ;;  %v14838_v50 = vadd.f32 %v15723_v46, %v4236_v21  ;;  %v4886_v33 = vadd.f32 %v15724_v11, %v4238_v58  ;;  %v15726_v32 = vld [vmem:[#allocation116_spill] sm:$0xff]  ;;  %v15728_v54 = vld [vmem:[#allocation118_spill] sm:$0xff]  ;;  %v15729_v31 = vld [vmem:[#allocation119_spill] sm:$0xff] }
 0xb70   : > { %v14823_v28 = vmax.f32 %v15710_v43, %v6223_v56  ;;  %v15720_v56 = vld [vmem:[#allocation110_spill] sm:$0xff]  ;;  %v4890_v36 = vadd.f32 %v15726_v32, %v4242_v13  ;;  %v4894_v14 = vadd.f32 %v15728_v54, %v4246_v39  ;;  %v4896_v18 = vadd.f32 %v14401_v51, %v4248_v1  ;;  %v15730_v53 = vld [vmem:[#allocation120_spill] sm:$0xff]  ;;  %v15733_v9 = vld [vmem:[#allocation123_spill] sm:$0xff] }
 0xb71   : > { %v4262_v48 = vadd.f32 %v15720_v56, %v3614_v55  ;;  %v15727_v55 = vld [vmem:[#allocation117_spill] sm:$0xff]  ;;  %v4898_v21 = vadd.f32 %v15729_v31, %v4250_v52  ;;  %v4912_v3 = vadd.f32 %v14441_v47, %v4264_v24  ;;  %v4900_v26 = vadd.f32 %v15730_v53, %v4252_v5  ;;  %v15734_v25 = vld [vmem:[#allocation124_spill] sm:$0xff]  ;;  %v15740_v45 = vld [vmem:[#allocation147_spill] sm:$0xff] }
 0xb72   : > { %v4892_v43 = vadd.f32 %v15727_v55, %v4244_v12  ;;  %v4902_v27 = vadd.f32 %v15731_v0, %v4254_v40  ;;  %v4906_v8 = vadd.f32 %v15733_v9, %v4258_v35  ;;  %v4908_v12 = vadd.f32 %v15734_v25, %v4260_v22  ;;  %v15736_v56 = vld [vmem:[#allocation132_spill] sm:$0xff]  ;;  %v15748_v31 = vld [vmem:[#allocation126_spill] sm:$0xff] }
 0xb73   : > { %v11651_v30 = vpop.f32.mrf.mxu1  ;;  %v4910_v39 = vadd.f32 %v14436_v23, %v4262_v48  ;;  %v5560_v51 = vadd.f32 %v14621_v16, %v4912_v3  ;;  %v15735_v1 = vmax.f32 %v14691_v49, %v14694_v2  ;;  %v4914_v52 = vadd.f32 %v14446_v61, %v4266_v6  ;;  %v15737_v2 = vld [vmem:[#allocation134_spill] sm:$0xff]  ;;  %v15738_v61 = vld [vmem:[#allocation141_spill] sm:$0xff]  ;;  %v15739_v24 = vld [vmem:[#allocation144_spill] sm:$0xff] }
 0xb74   : > { %v6209_v59 = vadd.f32 %v11651_v30, %v14619_v20  ;;  %v15732_v20 = vld [vmem:[#allocation122_spill] sm:$0xff]  ;;  %v5536_v5 = vadd.f32 %v14561_v34, %v4888_v19  ;;  %v5538_v40 = vadd.f32 %v14566_v37, %v4890_v36  ;;  %v5542_v35 = vadd.f32 %v14576_v42, %v4894_v14  ;;  %v15742_v42 = vld [vmem:[#allocation148_spill] sm:$0xff]  ;;  %v15749_v3 = vld [vmem:[#allocation131_spill] sm:$0xff] }
 0xb75   : > { %v4904_v62 = vadd.f32 %v15732_v20, %v4256_v60  ;;  %v6161_v13 = vpop.f32.mrf.mxu1  ;;  %v5544_v60 = vadd.f32 %v14581_v7, %v4896_v18  ;;  %v5546_v63 = vadd.f32 %v14586_v4, %v4898_v21  ;;  %v5554_v16 = vadd.f32 %v14606_v41, %v4906_v8  ;;  %v15741_v6 = vld [vmem:[#allocation130_spill] sm:$0xff]  ;;  %v15743_v4 = vld [vmem:[#allocation133_spill] sm:$0xff]  ;;  %v15747_v19 = vld [vmem:[#allocation20_spill] sm:$0xff] }
 0xb76   : > { %v6225_v58 = vmax.f32 %v6201_v57, %v6209_v59  ;;  %v6208_v22 = vadd.f32 %v6161_v13, %v5560_v51  ;;  %v5558_v49 = vadd.f32 %v15736_v56, %v4910_v39  ;;  %v5562_v48 = vadd.f32 %v15737_v2, %v4914_v52  ;;  %v15745_v57 = vld [vmem:[#allocation137_spill] sm:$0xff]  ;;  %v15746_v59 = vld [vmem:[#allocation138_spill] sm:$0xff]  ;;  %v15750_v53 = vld [vmem:[#allocation140_spill] sm:$0xff] }
 0xb77   : > { %v5552_v23 = vadd.f32 %v14601_v10, %v4904_v62  ;;  %v6192_v29 = vadd.f32 %v15738_v61, %v5544_v60  ;;  %v6194_v37 = vadd.f32 %v15739_v24, %v5546_v63  ;;  %v6203_v30 = vadd.f32 %v15742_v42, %v15741_v6  ;;  %v15744_v10 = vld [vmem:[#allocation129_spill] sm:$0xff]  ;;  %v15752_v8 = vld [vmem:[#allocation142_spill] sm:$0xff]  ;;  %v15753_v13 = vld [vmem:[#allocation143_spill] sm:$0xff] }
 0xb78   : > { %v6233_v47 = vmax.f32 %v15735_v1, %v6225_v58  ;;  %v5550_v11 = vadd.f32 %v15744_v10, %v4902_v27  ;;  %v6184_v41 = vadd.f32 %v15745_v57, %v5536_v5  ;;  %v6186_v44 = vadd.f32 %v15746_v59, %v5538_v40  ;;  %v15751_v27 = vld [vmem:[#allocation146_spill] sm:$0xff]  ;;  %v15755_v1 = vld [vmem:[#allocation127_spill] sm:$0xff]  ;;  %v15756_v52 = vld [vmem:[#allocation128_spill] sm:$0xff] }
 0xb79   : > { %v6200_v7 = vadd.f32 %v15740_v45, %v5552_v23  ;;  %v6202_v32 = vadd.f32 %v15747_v19, %v5554_v16  ;;  %v6206_v55 = vadd.f32 %v6151_v15, %v5558_v49  ;;  %v5534_v21 = vadd.f32 %v15748_v31, %v4886_v33  ;;  %v15757_v40 = vld [vmem:[#allocation136_spill] sm:$0xff]  ;;  %v10439_v33 = vld [vmem:[#allocation5] ss:$0 sm:$0xff]  ;;  %v15758_v16 = vld [vmem:[#allocation125_spill] sm:$0xff] }
 0xb7a   : > { %v5556_v58 = vadd.f32 %v15749_v3, %v4908_v12  ;;  %v6190_v0 = vadd.f32 %v15750_v53, %v5542_v35  ;;  %v6216_v20 = vmax.f32 %v6184_v41, %v6192_v29  ;;  %v6218_v62 = vmax.f32 %v6186_v44, %v6194_v37  ;;  %v15759_v49 = vld [vmem:[#allocation139_spill] sm:$0xff]  ;;  %v15760_v61 = vld [vmem:[#allocation145_spill] sm:$0xff] }
 0xb7b   : > { %v11654_v34 = vpop.f32.mrf.mxu1  ;;  %v6224_v54 = vmax.f32 %v6200_v7, %v6208_v22  ;;  %v6198_v9 = vadd.f32 %v15751_v27, %v5550_v11  ;;  %v15754_v25 = vmax.f32 %v15752_v8, %v15753_v13  ;;  %v5540_v15 = vadd.f32 %v15755_v1, %v4892_v43  ;;  %v15761_v24 = vld [vmem:[#allocation135_spill] sm:$0xff]  ;;  %v6261_v19 = vld [vmem:[#allocation7 + $0x10] sm:$0xff]  ;;  %v6266_v3 = vld [vmem:[#allocation7 + $0x38] sm:$0xff] }
 0xb7c   : > { %v6211_v46 = vadd.f32 %v11654_v34, %v15743_v4  ;;  %v5548_v5 = vadd.f32 %v15756_v52, %v4900_v26  ;;  %v6182_v60 = vadd.f32 %v15757_v40, %v5534_v21  ;;  %v6204_v12 = vadd.f32 %v14791_v38, %v5556_v58  ;;  %v6260_v59 = vld [vmem:[#allocation7 + $0x8] sm:$0xff]  ;;  %v6265_v21 = vld [vmem:[#allocation7 + $0x30] sm:$0xff]  ;;  %v6805_v53 = vld [vmem:[#allocation7 + $0xb8] sm:$0xff] }
 0xb7d   : > { %v6171_v36 = vpop.f32.mrf.mxu1  ;;  %v6222_v63 = vmax.f32 %v6198_v9, %v6206_v55  ;;  %v6232_v35 = vmax.f32 %v6216_v20, %v6224_v54  ;;  %v5532_v56 = vadd.f32 %v15758_v16, %v14838_v50  ;;  %v6188_v2 = vadd.f32 %v15759_v49, %v5540_v15  ;;  %v6799_v44 = vld [vmem:[#allocation7 + $0x88] sm:$0xff]  ;;  %v6801_v55 = vld [vmem:[#allocation7 + $0x98] sm:$0xff]  ;;  %v6263_v54 = vld [vmem:[#allocation7 + $0x20] sm:$0xff] }
 0xb7e   : > { %v6227_v14 = vmax.f32 %v6203_v30, %v6211_v46  ;;  %v6210_v18 = vadd.f32 %v6171_v36, %v5562_v48  ;;  %v6214_v48 = vmax.f32 %v6182_v60, %v6190_v0  ;;  %v6196_v29 = vadd.f32 %v15760_v61, %v5548_v5  ;;  %v6800_v36 = vld [vmem:[#allocation7 + $0x90] sm:$0xff]  ;;  %v6803_v31 = vld [vmem:[#allocation7 + $0xa8] sm:$0xff]  ;;  %v6399_v0 = vld [vmem:[#allocation7 + $0x40] sm:$0xff] }
 0xb7f   : > { %v6248_v43 = vadd.f32 %v10439_v33, %v6233_v47  ;;  %v6180_v37 = vadd.f32 %v15761_v24, %v5532_v56  ;;  %v6247_v7 = vadd.f32 %v10439_v33, %v6232_v35  ;;  %v6246_v47 = vadd.f32 %v10439_v33, %v14823_v28  ;;  %v6804_v58 = vld [vmem:[#allocation7 + $0xb0] sm:$0xff]  ;;  %v6400_v20 = vld [vmem:[#allocation7 + $0x48] sm:$0xff]  ;;  %v6402_v13 = vld [vmem:[#allocation7 + $0x58] sm:$0xff] }
 0xb80   : > { %v6235_v39 = vmax.f32 %v15754_v25, %v6227_v14  ;;  %v6226_v51 = vmax.f32 %v6202_v32, %v6210_v18  ;;  %v6220_v45 = vmax.f32 %v6196_v29, %v6204_v12  ;;  %v6230_v38 = vmax.f32 %v6214_v48, %v6222_v63  ;;  %v6262_v32 = vld [vmem:[#allocation7 + $0x18] sm:$0xff]  ;;  %v6264_v14 = vld [vmem:[#allocation7 + $0x28] sm:$0xff]  ;;  %v6802_v18 = vld [vmem:[#allocation7 + $0xa0] sm:$0xff] }
 0xb81   : > { %v6212_v50 = vmax.f32 %v6180_v37, %v6188_v2  ;;  %v14906_v42 = vmax.f32 %v6248_v43, 0.0  ;;  %v14912_v46 = vmax.f32 %v6247_v7, 0.0  ;;  %v6244_v28 = vadd.f32 %v10439_v33, %v14785_v17  ;;  %v7076_v27 = vld [vmem:[#allocation7 + $0xc8] sm:$0xff]  ;;  %v6401_v9 = vld [vmem:[#allocation7 + $0x50] sm:$0xff]  ;;  %v6403_v25 = vld [vmem:[#allocation7 + $0x60] sm:$0xff] }
 0xb82   : > { %v6250_v23 = vadd.f32 %v10439_v33, %v6235_v39  ;;  %v6234_v22 = vmax.f32 %v6218_v62, %v6226_v51  ;;  %v6245_v4 = vadd.f32 %v10439_v33, %v6230_v38  ;;  %v14919_v10 = vmax.f32 %v6246_v47, 0.0  ;;  %v7075_v62 = vld [vmem:[#allocation7 + $0xc0] sm:$0xff]  ;;  %v7077_v8 = vld [vmem:[#allocation7 + $0xd0] sm:$0xff]  ;;  %v7078_v39 = vld [vmem:[#allocation7 + $0xd8] sm:$0xff] }
 0xb83   : > { %v6228_v30 = vmax.f32 %v6212_v50, %v6220_v45  ;;  %v14931_v17 = vmax.f32 %v6244_v28, 0.0  ;;  %v7079_v51 = vld [vmem:[#allocation7 + $0xe0] sm:$0xff]  ;;  %v6404_v1 = vld [vmem:[#allocation7 + $0x68] sm:$0xff]  ;;  %v6405_v15 = vld [vmem:[#allocation7 + $0x70] sm:$0xff] }
 0xb84   : > { %v14896_v34 = vmax.f32 %v6250_v23, 0.0  ;;  %v6249_v26 = vadd.f32 %v10439_v33, %v6234_v22  ;;  %v14925_v57 = vmax.f32 %v6245_v4, 0.0  ;;  %v7080_v52 = vld [vmem:[#allocation7 + $0xe8] sm:$0xff]  ;;  %v7081_v5 = vld [vmem:[#allocation7 + $0xf0] sm:$0xff]  ;;  %v6406_v40 = vld [vmem:[#allocation7 + $0x78] sm:$0xff] }
 0xb85   : > { %v6243_v11 = vadd.f32 %v10439_v33, %v6228_v30  ;;  %v7082_v60 = vld [vmem:[#allocation7 + $0xf8] sm:$0xff]  ;;  %v7352_v33 = vld [vmem:[#allocation7 + $0x100] sm:$0xff]  ;;  %v7353_v12 = vld [vmem:[#allocation7 + $0x108] sm:$0xff] }
 0xb86   : > { %v14899_v6 = vmax.f32 %v6249_v26, 0.0  ;;  %11655 = vmatprep.subr.mxu1 %v14896_v34  ;;  %11739 = vmatprep.subr.mxu0 %v14896_v34  ;;  %v7354_v63 = vld [vmem:[#allocation7 + $0x110] sm:$0xff]  ;;  %v7355_v35 = vld [vmem:[#allocation7 + $0x118] sm:$0xff]  ;;  %v7356_v23 = vld [vmem:[#allocation7 + $0x120] sm:$0xff] }
 0xb87   : > { %11656 = vmatpush3.msra.mxu1 %v14896_v34  ;;  %11740 = vmatpush3.msra.mxu0 %v14896_v34  ;;  %v14937_v41 = vmax.f32 %v6243_v11, 0.0  ;;  %v7357_v22 = vld [vmem:[#allocation7 + $0x128] sm:$0xff]  ;;  %v7358_v16 = vld [vmem:[#allocation7 + $0x130] sm:$0xff]  ;;  %v7359_v56 = vld [vmem:[#allocation7 + $0x138] sm:$0xff] }
 0xb88   : > { %11657 = vmatprep.subr.mxu1 %v14899_v6  ;;  %11741 = vmatprep.subr.mxu0 %v14899_v6  ;;  %v7629_v49 = vld [vmem:[#allocation7 + $0x140] sm:$0xff]  ;;  %v7630_v2 = vld [vmem:[#allocation7 + $0x148] sm:$0xff]  ;;  %v7631_v48 = vld [vmem:[#allocation7 + $0x150] sm:$0xff] }
 0xb89   : > { %11658 = vmatpush3.msra.mxu1 %v14899_v6  ;;  %11742 = vmatpush3.msra.mxu0 %v14899_v6  ;;  %v7632_v61 = vld [vmem:[#allocation7 + $0x158] sm:$0xff]  ;;  %v7633_v29 = vld [vmem:[#allocation7 + $0x160] sm:$0xff]  ;;  %v7634_v43 = vld [vmem:[#allocation7 + $0x168] sm:$0xff] }
 0xb8a   : > { %11659 = vmatprep.subr.mxu1 %v14906_v42  ;;  %11743 = vmatprep.subr.mxu0 %v14906_v42  ;;  %v7635_v26 = vld [vmem:[#allocation7 + $0x170] sm:$0xff]  ;;  %v7636_v24 = vld [vmem:[#allocation7 + $0x178] sm:$0xff]  ;;  %v7906_v37 = vld [vmem:[#allocation7 + $0x180] sm:$0xff] }
 0xb8b   : > { %11660 = vmatpush3.msra.mxu1 %v14906_v42  ;;  %11744 = vmatpush3.msra.mxu0 %v14906_v42  ;;  %v7907_v45 = vld [vmem:[#allocation7 + $0x188] sm:$0xff]  ;;  %v7908_v38 = vld [vmem:[#allocation7 + $0x190] sm:$0xff]  ;;  %v7909_v7 = vld [vmem:[#allocation7 + $0x198] sm:$0xff] }
 0xb8c   : > { %11661 = vmatprep.subr.mxu1 %v14912_v46  ;;  %11745 = vmatprep.subr.mxu0 %v14912_v46  ;;  %v7910_v50 = vld [vmem:[#allocation7 + $0x1a0] sm:$0xff]  ;;  %v7911_v47 = vld [vmem:[#allocation7 + $0x1a8] sm:$0xff]  ;;  %v7912_v30 = vld [vmem:[#allocation7 + $0x1b0] sm:$0xff] }
 0xb8d   : > { %11662 = vmatpush3.msra.mxu1 %v14912_v46  ;;  %11746 = vmatpush3.msra.mxu0 %v14912_v46  ;;  %v7913_v4 = vld [vmem:[#allocation7 + $0x1b8] sm:$0xff]  ;;  %v8183_v28 = vld [vmem:[#allocation7 + $0x1c0] sm:$0xff]  ;;  %v8184_v11 = vld [vmem:[#allocation7 + $0x1c8] sm:$0xff] }
 0xb8e   : > { %11663 = vmatprep.subr.mxu1 %v14919_v10  ;;  %11747 = vmatprep.subr.mxu0 %v14919_v10 }
 0xb8f   : > { %11664 = vmatpush3.msra.mxu1 %v14919_v10  ;;  %11748 = vmatpush3.msra.mxu0 %v14919_v10 }
 0xb90   : > { %11665 = vmatprep.subr.mxu1 %v14925_v57  ;;  %11749 = vmatprep.subr.mxu0 %v14925_v57 }
 0xb91   : > { %11666 = vmatpush3.msra.mxu1 %v14925_v57  ;;  %11750 = vmatpush3.msra.mxu0 %v14925_v57 }
 0xb92   : > { %11667 = vmatprep.subr.mxu1 %v14931_v17  ;;  %11751 = vmatprep.subr.mxu0 %v14931_v17 }
 0xb93   : > { %11668 = vmatpush3.msra.mxu1 %v14931_v17  ;;  %11752 = vmatpush3.msra.mxu0 %v14931_v17 }
 0xb94   : > { %11669 = vmatprep.subr.mxu1 %v14937_v41  ;;  %11753 = vmatprep.subr.mxu0 %v14937_v41 }
 0xb95   : > { %11670 = vmatpush3.msra.mxu1 %v14937_v41  ;;  %11754 = vmatpush3.msra.mxu0 %v14937_v41 }
 0xb96   : > { %11672 = vmatmul.mubr.msk.f32.vlgmr.msra.gmra.mxu1 %vm6267_vm2, %v6260_v59  ;;  %11683 = vmatprep.subr.mxu1 %v14896_v34  ;;  %v8185_v59 = vld [vmem:[#allocation7 + $0x1d0] sm:$0xff] }
 0xb97   : > { %11781 = vmatprep.subr.mxu0 %v14896_v34  ;;  %11684 = vmatpush3.msra.mxu1 %v14896_v34 }
 0xb98   : > { %11756 = vmatmul.mubr.msk.f32.vlgmr.msra.gmra.mxu0 %vm6267_vm2, %v6799_v44  ;;  %11685 = vmatprep.subr.mxu1 %v14899_v6  ;;  %v6537_v44 = vld [vmem:[#allocation8 + $0x8] sm:$0xff] }
 0xb99   : > { %11782 = vmatpush3.msra.mxu0 %v14896_v34  ;;  %11674 = vmatprep.mubr.msk.f32.mxu1 %vm6267_vm2, %v6261_v19  ;;  %v8186_v19 = vld [vmem:[#allocation7 + $0x1d8] sm:$0xff] }
 0xb9a   : > { %11783 = vmatprep.subr.mxu0 %v14899_v6  ;;  %11686 = vmatpush3.msra.mxu1 %v14899_v6 }
 0xb9b   : > { %11784 = vmatpush3.msra.mxu0 %v14899_v6  ;;  %11675 = vmatmul.mubr.msk.f32.gmra.mxu1 %vm6267_vm2, %v6262_v32  ;;  %v8187_v32 = vld [vmem:[#allocation7 + $0x1e0] sm:$0xff] }
 0xb9c   : > { %11687 = vmatprep.subr.mxu1 %v14906_v42  ;;  %11758 = vmatprep.mubr.msk.f32.mxu0 %vm6267_vm2, %v6800_v36  ;;  %v8188_v36 = vld [vmem:[#allocation7 + $0x1e8] sm:$0xff] }
 0xb9d   : > { %11785 = vmatprep.subr.mxu0 %v14906_v42  ;;  %11688 = vmatpush3.msra.mxu1 %v14906_v42 }
 0xb9e   : > { %11759 = vmatmul.mubr.msk.f32.gmra.mxu0 %vm6267_vm2, %v6801_v55  ;;  %11689 = vmatprep.subr.mxu1 %v14912_v46  ;;  %v6397_v55 = vld [vmem:[#allocation8] sm:$0xff] }
 0xb9f   : > { %11786 = vmatpush3.msra.mxu0 %v14906_v42  ;;  %11677 = vmatprep.mubr.msk.f32.mxu1 %vm6267_vm2, %v6263_v54  ;;  %v15762_v54 = vmov 0.0  }
 0xba0   : > { %11787 = vmatprep.subr.mxu0 %v14912_v46  ;;  %11690 = vmatpush3.msra.mxu1 %v14912_v46 }
 0xba1   : > { %11788 = vmatpush3.msra.mxu0 %v14912_v46  ;;  %11678 = vmatmul.mubr.msk.f32.gmra.mxu1 %vm6267_vm2, %v6264_v14  ;;  %v8464_v14 = vld [vmem:[#allocation7 + $0x220] sm:$0xff] }
 0xba2   : > { %11691 = vmatprep.subr.mxu1 %v14919_v10  ;;  %11761 = vmatprep.mubr.msk.f32.mxu0 %vm6267_vm2, %v6802_v18  ;;  %v8466_v18 = vld [vmem:[#allocation7 + $0x230] sm:$0xff] }
 0xba3   : > { %11789 = vmatprep.subr.mxu0 %v14919_v10  ;;  %11692 = vmatpush3.msra.mxu1 %v14919_v10 }
 0xba4   : > { %11762 = vmatmul.mubr.msk.f32.gmra.mxu0 %vm6267_vm2, %v6803_v31  ;;  %11693 = vmatprep.subr.mxu1 %v14925_v57 }
 0xba5   : > { %11790 = vmatpush3.msra.mxu0 %v14919_v10  ;;  %11680 = vmatprep.mubr.msk.f32.mxu1 %vm6267_vm2, %v6265_v21 }
 0xba6   : > { %11791 = vmatprep.subr.mxu0 %v14925_v57  ;;  %11694 = vmatpush3.msra.mxu1 %v14925_v57 }
 0xba7   : > { %11792 = vmatpush3.msra.mxu0 %v14925_v57  ;;  %11681 = vmatmul.mubr.msk.f32.gmra.mxu1 %vm6267_vm2, %v6266_v3 }
 0xba8   : > { %11695 = vmatprep.subr.mxu1 %v14931_v17  ;;  %11764 = vmatprep.mubr.msk.f32.mxu0 %vm6267_vm2, %v6804_v58 }
 0xba9   : > { %11793 = vmatprep.subr.mxu0 %v14931_v17  ;;  %11696 = vmatpush3.msra.mxu1 %v14931_v17 }
 0xbaa   : > { %11765 = vmatmul.mubr.msk.f32.gmra.mxu0 %vm6267_vm2, %v6805_v53  ;;  %11697 = vmatprep.subr.mxu1 %v14937_v41 }
 0xbab   : > { %11794 = vmatpush3.msra.mxu0 %v14931_v17  ;;  %11698 = vmatpush3.msra.mxu1 %v14937_v41 }
 0xbac   : > { %11795 = vmatprep.subr.mxu0 %v14937_v41  ;;  %11699 = vmatprep.mubr.msk.f32.mxu1 %vm6267_vm2, %v6399_v0 }
 0xbad   : > { %11796 = vmatpush3.msra.mxu0 %v14937_v41  ;;  %11700 = vmatmul.mubr.msk.f32.vlgmr.msra.gmra.mxu1 %vm6267_vm2, %v6400_v20 }
 0xbae   : > { %11797 = vmatprep.mubr.msk.f32.mxu0 %vm6267_vm2, %v7075_v62  ;;  %11823 = vmatprep.subr.mxu0 %v14896_v34 }
 0xbaf   : > { %11798 = vmatmul.mubr.msk.f32.vlgmr.msra.gmra.mxu0 %vm6267_vm2, %v7076_v27  ;;  %11702 = vmatprep.mubr.msk.f32.mxu1 %vm6267_vm2, %v6401_v9 }
 0xbb0   : > { %11824 = vmatpush3.msra.mxu0 %v14896_v34  ;;  %11800 = vmatprep.mubr.msk.f32.mxu0 %vm6267_vm2, %v7077_v8 }
 0xbb1   : > { %11825 = vmatprep.subr.mxu0 %v14899_v6  ;;  %11703 = vmatmul.mubr.msk.f32.gmra.mxu1 %vm6267_vm2, %v6402_v13 }
 0xbb2   : > { %11826 = vmatpush3.msra.mxu0 %v14899_v6  ;;  %11705 = vmatprep.mubr.msk.f32.mxu1 %vm6267_vm2, %v6403_v25 }
 0xbb3   : > { %11827 = vmatprep.subr.mxu0 %v14906_v42  ;;  %11801 = vmatmul.mubr.msk.f32.gmra.mxu0 %vm6267_vm2, %v7078_v39 }
 0xbb4   : > { %11828 = vmatpush3.msra.mxu0 %v14906_v42  ;;  %11803 = vmatprep.mubr.msk.f32.mxu0 %vm6267_vm2, %v7079_v51 }
 0xbb5   : > { %11829 = vmatprep.subr.mxu0 %v14912_v46  ;;  %11706 = vmatmul.mubr.msk.f32.gmra.mxu1 %vm6267_vm2, %v6404_v1 }
 0xbb6   : > { %11830 = vmatpush3.msra.mxu0 %v14912_v46  ;;  %11708 = vmatprep.mubr.msk.f32.mxu1 %vm6267_vm2, %v6405_v15 }
 0xbb7   : > { %11831 = vmatprep.subr.mxu0 %v14919_v10  ;;  %11804 = vmatmul.mubr.msk.f32.gmra.mxu0 %vm6267_vm2, %v7080_v52 }
 0xbb8   : > { %11832 = vmatpush3.msra.mxu0 %v14919_v10  ;;  %11806 = vmatprep.mubr.msk.f32.mxu0 %vm6267_vm2, %v7081_v5 }
 0xbb9   : > { %11833 = vmatprep.subr.mxu0 %v14925_v57  ;;  %11709 = vmatmul.mubr.msk.f32.gmra.mxu1 %vm6267_vm2, %v6406_v40  ;;  %v6936_v40 = vld [vmem:[#allocation8 + $0x10] sm:$0xff] }
 0xbba   : > { %11834 = vmatpush3.msra.mxu0 %v14925_v57  ;;  %11711 = vmatprep.subr.mxu1 %v6537_v44 }
 0xbbb   : > { %11835 = vmatprep.subr.mxu0 %v14931_v17  ;;  %11807 = vmatmul.mubr.msk.f32.gmra.mxu0 %vm6267_vm2, %v7082_v60 }
 0xbbc   : > { %11836 = vmatpush3.msra.mxu0 %v14931_v17  ;;  %11839 = vmatprep.mubr.msk.f32.mxu0 %vm6267_vm2, %v7352_v33 }
 0xbbd   : > { %11837 = vmatprep.subr.mxu0 %v14937_v41  ;;  %11712 = vmatpush3.msra.mxu1 %v6537_v44 }
 0xbbe   : > { %11838 = vmatpush3.msra.mxu0 %v14937_v41  ;;  %11725 = vmatprep.subr.mxu1 %v6397_v55 }
 0xbbf   : > { %11865 = vmatprep.subr.mxu0 %v14896_v34  ;;  %11840 = vmatmul.mubr.msk.f32.vlgmr.msra.gmra.mxu0 %vm6267_vm2, %v7353_v12 }
 0xbc0   : > { %11866 = vmatpush3.msra.mxu0 %v14896_v34  ;;  %11842 = vmatprep.mubr.msk.f32.mxu0 %vm6267_vm2, %v7354_v63 }
 0xbc1   : > { %11867 = vmatprep.subr.mxu0 %v14899_v6 }
 0xbc2   : > { %11868 = vmatpush3.msra.mxu0 %v14899_v6 }
 0xbc3   : > { %11869 = vmatprep.subr.mxu0 %v14906_v42  ;;  %11843 = vmatmul.mubr.msk.f32.gmra.mxu0 %vm6267_vm2, %v7355_v35 }
 0xbc4   : > { %11870 = vmatpush3.msra.mxu0 %v14906_v42  ;;  %11845 = vmatprep.mubr.msk.f32.mxu0 %vm6267_vm2, %v7356_v23 }
 0xbc5   : > { %11871 = vmatprep.subr.mxu0 %v14912_v46 }
 0xbc6   : > { %11872 = vmatpush3.msra.mxu0 %v14912_v46 }
 0xbc7   : > { %11873 = vmatprep.subr.mxu0 %v14919_v10  ;;  %11846 = vmatmul.mubr.msk.f32.gmra.mxu0 %vm6267_vm2, %v7357_v22 }
 0xbc8   : > { %11874 = vmatpush3.msra.mxu0 %v14919_v10  ;;  %11848 = vmatprep.mubr.msk.f32.mxu0 %vm6267_vm2, %v7358_v16 }
 0xbc9   : > { %11875 = vmatprep.subr.mxu0 %v14925_v57 }
 0xbca   : > { %11876 = vmatpush3.msra.mxu0 %v14925_v57 }
 0xbcb   : > { %11877 = vmatprep.subr.mxu0 %v14931_v17  ;;  %11849 = vmatmul.mubr.msk.f32.gmra.mxu0 %vm6267_vm2, %v7359_v56 }
 0xbcc   : > { %11878 = vmatpush3.msra.mxu0 %v14931_v17  ;;  %11881 = vmatprep.mubr.msk.f32.mxu0 %vm6267_vm2, %v7629_v49 }
 0xbcd   : > { %11879 = vmatprep.subr.mxu0 %v14937_v41 }
 0xbce   : > { %11880 = vmatpush3.msra.mxu0 %v14937_v41 }
 0xbcf   : > { %11907 = vmatprep.subr.mxu0 %v14896_v34  ;;  %11882 = vmatmul.mubr.msk.f32.vlgmr.msra.gmra.mxu0 %vm6267_vm2, %v7630_v2 }
 0xbd0   : > { %11908 = vmatpush3.msra.mxu0 %v14896_v34  ;;  %11884 = vmatprep.mubr.msk.f32.mxu0 %vm6267_vm2, %v7631_v48 }
 0xbd1   : > { %11909 = vmatprep.subr.mxu0 %v14899_v6 }
 0xbd2   : > { %11910 = vmatpush3.msra.mxu0 %v14899_v6 }
 0xbd3   : > { %11911 = vmatprep.subr.mxu0 %v14906_v42  ;;  %11885 = vmatmul.mubr.msk.f32.gmra.mxu0 %vm6267_vm2, %v7632_v61 }
 0xbd4   : > { %11912 = vmatpush3.msra.mxu0 %v14906_v42  ;;  %11887 = vmatprep.mubr.msk.f32.mxu0 %vm6267_vm2, %v7633_v29 }
 0xbd5   : > { %11913 = vmatprep.subr.mxu0 %v14912_v46 }
 0xbd6   : > { %11914 = vmatpush3.msra.mxu0 %v14912_v46 }
 0xbd7   : > { %11915 = vmatprep.subr.mxu0 %v14919_v10  ;;  %11888 = vmatmul.mubr.msk.f32.gmra.mxu0 %vm6267_vm2, %v7634_v43  ;;  %v7213_v43 = vld [vmem:[#allocation8 + $0x18] sm:$0xff] }
 0xbd8   : > { %11916 = vmatpush3.msra.mxu0 %v14919_v10  ;;  %11890 = vmatprep.mubr.msk.f32.mxu0 %vm6267_vm2, %v7635_v26 }
 0xbd9   : > { %11917 = vmatprep.subr.mxu0 %v14925_v57 }
 0xbda   : > { %11918 = vmatpush3.msra.mxu0 %v14925_v57 }
 0xbdb   : > { %11919 = vmatprep.subr.mxu0 %v14931_v17  ;;  %11891 = vmatmul.mubr.msk.f32.gmra.mxu0 %vm6267_vm2, %v7636_v24 }
 0xbdc   : > { %11920 = vmatpush3.msra.mxu0 %v14931_v17  ;;  %11923 = vmatprep.mubr.msk.f32.mxu0 %vm6267_vm2, %v7906_v37 }
 0xbdd   : > { %11921 = vmatprep.subr.mxu0 %v14937_v41 }
 0xbde   : > { %11922 = vmatpush3.msra.mxu0 %v14937_v41 }
 0xbdf   : > { %11949 = vmatprep.subr.mxu0 %v14896_v34  ;;  %11924 = vmatmul.mubr.msk.f32.vlgmr.msra.gmra.mxu0 %vm6267_vm2, %v7907_v45 }
 0xbe0   : > { %11950 = vmatpush3.msra.mxu0 %v14896_v34  ;;  %11926 = vmatprep.mubr.msk.f32.mxu0 %vm6267_vm2, %v7908_v38 }
 0xbe1   : > { %11951 = vmatprep.subr.mxu0 %v14899_v6 }
 0xbe2   : > { %11952 = vmatpush3.msra.mxu0 %v14899_v6 }
 0xbe3   : > { %11953 = vmatprep.subr.mxu0 %v14906_v42  ;;  %11927 = vmatmul.mubr.msk.f32.gmra.mxu0 %vm6267_vm2, %v7909_v7 }
 0xbe4   : > { %11954 = vmatpush3.msra.mxu0 %v14906_v42  ;;  %11929 = vmatprep.mubr.msk.f32.mxu0 %vm6267_vm2, %v7910_v50 }
 0xbe5   : > { %11955 = vmatprep.subr.mxu0 %v14912_v46 }
 0xbe6   : > { %11956 = vmatpush3.msra.mxu0 %v14912_v46 }
 0xbe7   : > { %11957 = vmatprep.subr.mxu0 %v14919_v10  ;;  %11930 = vmatmul.mubr.msk.f32.gmra.mxu0 %vm6267_vm2, %v7911_v47 }
 0xbe8   : > { %11958 = vmatpush3.msra.mxu0 %v14919_v10  ;;  %11932 = vmatprep.mubr.msk.f32.mxu0 %vm6267_vm2, %v7912_v30  ;;  %v7490_v30 = vld [vmem:[#allocation8 + $0x20] sm:$0xff] }
 0xbe9   : > { %11959 = vmatprep.subr.mxu0 %v14925_v57 }
 0xbea   : > { %11960 = vmatpush3.msra.mxu0 %v14925_v57 }
 0xbeb   : > { %11961 = vmatprep.subr.mxu0 %v14931_v17  ;;  %11933 = vmatmul.mubr.msk.f32.gmra.mxu0 %vm6267_vm2, %v7913_v4 }
 0xbec   : > { %11962 = vmatpush3.msra.mxu0 %v14931_v17  ;;  %11965 = vmatprep.mubr.msk.f32.mxu0 %vm6267_vm2, %v8183_v28 }
 0xbed   : > { %11963 = vmatprep.subr.mxu0 %v14937_v41 }
 0xbee   : > { %11964 = vmatpush3.msra.mxu0 %v14937_v41 }
 0xbef   : > { %11991 = vmatprep.subr.mxu0 %v14896_v34  ;;  %11966 = vmatmul.mubr.msk.f32.vlgmr.msra.gmra.mxu0 %vm6267_vm2, %v8184_v11 }
 0xbf0   : > { %11992 = vmatpush3.msra.mxu0 %v14896_v34  ;;  %11968 = vmatprep.mubr.msk.f32.mxu0 %vm6267_vm2, %v8185_v59  ;;  %v8189_v34 = vld [vmem:[#allocation7 + $0x1f0] sm:$0xff] }
 0xbf1   : > { %11993 = vmatprep.subr.mxu0 %v14899_v6 }
 0xbf2   : > { %11994 = vmatpush3.msra.mxu0 %v14899_v6  ;;  %v8190_v6 = vld [vmem:[#allocation7 + $0x1f8] sm:$0xff] }
 0xbf3   : > { %11995 = vmatprep.subr.mxu0 %v14906_v42  ;;  %11969 = vmatmul.mubr.msk.f32.gmra.mxu0 %vm6267_vm2, %v8186_v19 }
 0xbf4   : > { %11996 = vmatpush3.msra.mxu0 %v14906_v42  ;;  %11971 = vmatprep.mubr.msk.f32.mxu0 %vm6267_vm2, %v8187_v32  ;;  %v8460_v42 = vld [vmem:[#allocation7 + $0x200] sm:$0xff] }
 0xbf5   : > { %11997 = vmatprep.subr.mxu0 %v14912_v46 }
 0xbf6   : > { %11998 = vmatpush3.msra.mxu0 %v14912_v46  ;;  %v8461_v46 = vld [vmem:[#allocation7 + $0x208] sm:$0xff] }
 0xbf7   : > { %11999 = vmatprep.subr.mxu0 %v14919_v10  ;;  %11972 = vmatmul.mubr.msk.f32.gmra.mxu0 %vm6267_vm2, %v8188_v36 }
 0xbf8   : > { %12000 = vmatpush3.msra.mxu0 %v14919_v10  ;;  %11974 = vmatprep.mubr.msk.f32.mxu0 %vm6267_vm2, %v8189_v34  ;;  %v8462_v10 = vld [vmem:[#allocation7 + $0x210] sm:$0xff]  ;;  %v7767_v34 = vld [vmem:[#allocation8 + $0x28] sm:$0xff] }
 0xbf9   : > { %12001 = vmatprep.subr.mxu0 %v14925_v57 }
 0xbfa   : > { %12002 = vmatpush3.msra.mxu0 %v14925_v57  ;;  %v8463_v57 = vld [vmem:[#allocation7 + $0x218] sm:$0xff] }
 0xbfb   : > { %12003 = vmatprep.subr.mxu0 %v14931_v17  ;;  %11975 = vmatmul.mubr.msk.f32.gmra.mxu0 %vm6267_vm2, %v8190_v6 }
 0xbfc   : > { %12004 = vmatpush3.msra.mxu0 %v14931_v17  ;;  %12007 = vmatprep.mubr.msk.f32.mxu0 %vm6267_vm2, %v8460_v42  ;;  %v8465_v17 = vld [vmem:[#allocation7 + $0x228] sm:$0xff] }
 0xbfd   : > { %12005 = vmatprep.subr.mxu0 %v14937_v41 }
 0xbfe   : > { %12006 = vmatpush3.msra.mxu0 %v14937_v41  ;;  %v8467_v41 = vld [vmem:[#allocation7 + $0x238] sm:$0xff] }
 0xbff   : > { %12008 = vmatmul.mubr.msk.f32.vlgmr.msra.gmra.mxu0 %vm6267_vm2, %v8461_v46  ;;  %12033 = vmatprep.subr.mxu0 %v15762_v54 }
 0xc00   : > { %12010 = vmatprep.mubr.msk.f32.mxu0 %vm6267_vm2, %v8462_v10 }
 0xc03   : > { %12011 = vmatmul.mubr.msk.f32.gmra.mxu0 %vm6267_vm2, %v8463_v57  ;;  %v8044_v57 = vld [vmem:[#allocation8 + $0x30] sm:$0xff] }
 0xc04   : > { %12013 = vmatprep.mubr.msk.f32.mxu0 %vm6267_vm2, %v8464_v14 }
 0xc07   : > { %12014 = vmatmul.mubr.msk.f32.gmra.mxu0 %vm6267_vm2, %v8465_v17 }
 0xc08   : > { %12016 = vmatprep.mubr.msk.f32.mxu0 %vm6267_vm2, %v8466_v18 }
 0xc0b   : > { %12017 = vmatmul.mubr.msk.f32.gmra.mxu0 %vm6267_vm2, %v8467_v41 }
 0xc0c   : > { %12037 = vmatprep.mubr.msk.f32.mxu0 %vm12592_vm4, %v15762_v54 }
 0xc56   : > { %v11673_v31 = vpop.f32.mrf.mxu1 }
 0xc58   : > { %v6358_v21 = vpop.f32.mrf.mxu1  ;;  %v15130_v3 = vpop.f32.mrf.mxu0 }
 0xc5a   : > { %v6896_v58 = vpop.f32.mrf.mxu0 }
 0xc5b   : > { %v11676_v53 = vpop.f32.mrf.mxu1 }
 0xc5d   : > { %v6368_v0 = vpop.f32.mrf.mxu1 }
 0xc5e   : > { %v15132_v20 = vpop.f32.mrf.mxu0 }
 0xc60   : > { %v6906_v62 = vpop.f32.mrf.mxu0 }
 0xc61   : > { %v11679_v27 = vpop.f32.mrf.mxu1 }
 0xc63   : > { %v6378_v9 = vpop.f32.mrf.mxu1 }
 0xc64   : > { %v15134_v8 = vpop.f32.mrf.mxu0 }
 0xc66   : > { %v15136_v13 = vpop.f32.mrf.mxu0 }
 0xc67   : > { %v11682_v25 = vpop.f32.mrf.mxu1 }
 0xc69   : > { %v6388_v39 = vpop.f32.mrf.mxu1 }
 0xc6a   : > { %v15138_v51 = vpop.f32.mrf.mxu0 }
 0xc6c   : > { %v15140_v1 = vpop.f32.mrf.mxu0 }
 0xc6d   : > { %v11701_v15 = vpop.f32.mrf.mxu1 }
 0xc6f   : > { %v6497_v52 = vpop.f32.mrf.mxu1  ;;  %v15142_v5 = vpop.f32.mrf.mxu0 }
 0xc70   : > { %11713 = vmatprep.mubr.msk.f32.mxu1 %vm6538_vm3, %v6497_v52 }
 0xc71   : > { %v11704_v60 = vpop.f32.mrf.mxu1  ;;  %11714 = vmatmul.mubr.msk.f32.vlgmr.msra.gmra.mxu1 %vm6538_vm3, %v11701_v15  ;;  %v7173_v33 = vpop.f32.mrf.mxu0 }
 0xc72   : > { %11726 = vmatpush3.msra.mxu1 %v6397_v55 }
 0xc73   : > { %v6507_v12 = vpop.f32.mrf.mxu1  ;;  %11767 = vmatprep.subr.mxu1 %v6936_v40  ;;  %v15146_v63 = vpop.f32.mrf.mxu0 }
 0xc74   : > { %11716 = vmatprep.mubr.msk.f32.mxu1 %vm6538_vm3, %v6507_v12 }
 0xc75   : > { %v11707_v35 = vpop.f32.mrf.mxu1  ;;  %11717 = vmatmul.mubr.msk.f32.gmra.mxu1 %vm6538_vm3, %v11704_v60  ;;  %v7183_v23 = vpop.f32.mrf.mxu0 }
 0xc77   : > { %v6517_v22 = vpop.f32.mrf.mxu1  ;;  %v11805_v16 = vpop.f32.mrf.mxu0 }
 0xc78   : > { %11719 = vmatprep.mubr.msk.f32.mxu1 %vm6538_vm3, %v6517_v22 }
 0xc79   : > { %v11710_v56 = vpop.f32.mrf.mxu1  ;;  %11720 = vmatmul.mubr.msk.f32.gmra.mxu1 %vm6538_vm3, %v11707_v35  ;;  %v7193_v49 = vpop.f32.mrf.mxu0 }
 0xc7b   : > { %v6527_v2 = vpop.f32.mrf.mxu1  ;;  %v11808_v48 = vpop.f32.mrf.mxu0 }
 0xc7c   : > { %11722 = vmatprep.mubr.msk.f32.mxu1 %vm6538_vm3, %v6527_v2 }
 0xc7d   : > { %11723 = vmatmul.mubr.msk.f32.gmra.mxu1 %vm6538_vm3, %v11710_v56  ;;  %v7203_v61 = vpop.f32.mrf.mxu0 }
 0xc7e   : > { %11727 = vmatprep.mubr.msk.f32.mxu1 %vm6538_vm3, %v6358_v21 }
 0xc7f   : > { %v11841_v29 = vpop.f32.mrf.mxu0 }
 0xc81   : > { %11728 = vmatmul.mubr.msk.f32.vlgmr.msra.gmra.mxu1 %vm6538_vm3, %v11673_v31  ;;  %v7450_v26 = vpop.f32.mrf.mxu0  ;;  %v8321_v31 = vld [vmem:[#allocation8 + $0x38] sm:$0xff] }
 0xc82   : > { %11730 = vmatprep.mubr.msk.f32.mxu1 %vm6538_vm3, %v6368_v0  ;;  %11768 = vmatpush3.msra.mxu1 %v6936_v40  ;;  %v8598_v0 = vld [vmem:[#allocation8 + $0x40] sm:$0xff] }
 0xc83   : > { %11809 = vmatprep.subr.mxu1 %v7213_v43  ;;  %v11844_v24 = vpop.f32.mrf.mxu0 }
 0xc85   : > { %11731 = vmatmul.mubr.msk.f32.gmra.mxu1 %vm6538_vm3, %v11676_v53  ;;  %v7460_v37 = vpop.f32.mrf.mxu0 }
 0xc86   : > { %11733 = vmatprep.mubr.msk.f32.mxu1 %vm6538_vm3, %v6378_v9 }
 0xc87   : > { %v11847_v45 = vpop.f32.mrf.mxu0 }
 0xc89   : > { %11734 = vmatmul.mubr.msk.f32.gmra.mxu1 %vm6538_vm3, %v11679_v27  ;;  %v7470_v38 = vpop.f32.mrf.mxu0 }
 0xc8a   : > { %11736 = vmatprep.mubr.msk.f32.mxu1 %vm6538_vm3, %v6388_v39 }
 0xc8b   : > { %v11850_v7 = vpop.f32.mrf.mxu0 }
 0xc8d   : > { %11737 = vmatmul.mubr.msk.f32.gmra.mxu1 %vm6538_vm3, %v11682_v25  ;;  %v7480_v50 = vpop.f32.mrf.mxu0 }
 0xc8e   : > { %11769 = vmatprep.mubr.msk.f32.mxu1 %vm6538_vm3, %v6896_v58 }
 0xc8f   : > { %v11883_v47 = vpop.f32.mrf.mxu0 }
 0xc91   : > { %11770 = vmatmul.mubr.msk.f32.vlgmr.msra.gmra.mxu1 %vm6538_vm3, %v15130_v3  ;;  %v7727_v4 = vpop.f32.mrf.mxu0 }
 0xc92   : > { %11772 = vmatprep.mubr.msk.f32.mxu1 %vm6538_vm3, %v6906_v62  ;;  %11810 = vmatpush3.msra.mxu1 %v7213_v43  ;;  %v10587_v43 = vld [vmem:[%s15468_s7 + $0x18] sm:$0xff] }
 0xc93   : > { %11851 = vmatprep.subr.mxu1 %v7490_v30  ;;  %v11886_v28 = vpop.f32.mrf.mxu0 }
 0xc95   : > { %11773 = vmatmul.mubr.msk.f32.gmra.mxu1 %vm6538_vm3, %v15132_v20  ;;  %v7737_v11 = vpop.f32.mrf.mxu0 }
 0xc96   : > { %11775 = vmatprep.mubr.msk.f32.mxu1 %vm6538_vm3, %v15136_v13 }
 0xc97   : > { %v11889_v59 = vpop.f32.mrf.mxu0 }
 0xc99   : > { %11776 = vmatmul.mubr.msk.f32.gmra.mxu1 %vm6538_vm3, %v15134_v8  ;;  %v7747_v44 = vpop.f32.mrf.mxu0 }
 0xc9a   : > { %11778 = vmatprep.mubr.msk.f32.mxu1 %vm6538_vm3, %v15140_v1 }
 0xc9b   : > { %v11892_v19 = vpop.f32.mrf.mxu0 }
 0xc9d   : > { %11779 = vmatmul.mubr.msk.f32.gmra.mxu1 %vm6538_vm3, %v15138_v51  ;;  %v7757_v32 = vpop.f32.mrf.mxu0 }
 0xc9e   : > { %11811 = vmatprep.mubr.msk.f32.mxu1 %vm6538_vm3, %v7173_v33 }
 0xc9f   : > { %v11925_v36 = vpop.f32.mrf.mxu0 }
 0xca1   : > { %11812 = vmatmul.mubr.msk.f32.vlgmr.msra.gmra.mxu1 %vm6538_vm3, %v15142_v5  ;;  %v8004_v6 = vpop.f32.mrf.mxu0 }
 0xca2   : > { %11814 = vmatprep.mubr.msk.f32.mxu1 %vm6538_vm3, %v7183_v23  ;;  %11852 = vmatpush3.msra.mxu1 %v7490_v30 }
 0xca3   : > { %11893 = vmatprep.subr.mxu1 %v7767_v34  ;;  %v11928_v42 = vpop.f32.mrf.mxu0 }
 0xca5   : > { %11815 = vmatmul.mubr.msk.f32.gmra.mxu1 %vm6538_vm3, %v15146_v63  ;;  %v8014_v46 = vpop.f32.mrf.mxu0 }
 0xca6   : > { %11817 = vmatprep.mubr.msk.f32.mxu1 %vm6538_vm3, %v7193_v49 }
 0xca7   : > { %v11931_v10 = vpop.f32.mrf.mxu0 }
 0xca9   : > { %11818 = vmatmul.mubr.msk.f32.gmra.mxu1 %vm6538_vm3, %v11805_v16  ;;  %v8024_v55 = vpop.f32.mrf.mxu0 }
 0xcaa   : > { %11820 = vmatprep.mubr.msk.f32.mxu1 %vm6538_vm3, %v7203_v61  ;;  %v8755_v61 = vld [vmem:[%s15468_s7 + $0x8] sm:$0xff] }
 0xcab   : > { %v11934_v14 = vpop.f32.mrf.mxu0  ;;  %12034 = vmatpush3.msra.mxu0 %v8755_v61 }
 0xcac   : > { %12035 = vmatprep.subr.mxu0 %v15762_v54 }
 0xcad   : > { %11821 = vmatmul.mubr.msk.f32.gmra.mxu1 %vm6538_vm3, %v11808_v48  ;;  %v8034_v17 = vpop.f32.mrf.mxu0 }
 0xcae   : > { %11853 = vmatprep.mubr.msk.f32.mxu1 %vm6538_vm3, %v7450_v26 }
 0xcaf   : > { %v11967_v18 = vpop.f32.mrf.mxu0 }
 0xcb1   : > { %11854 = vmatmul.mubr.msk.f32.vlgmr.msra.gmra.mxu1 %vm6538_vm3, %v11841_v29  ;;  %v8281_v41 = vpop.f32.mrf.mxu0  ;;  %v8754_v29 = vld [vmem:[%s15468_s7] sm:$0xff] }
 0xcb2   : > { %11856 = vmatprep.mubr.msk.f32.mxu1 %vm6538_vm3, %v7460_v37  ;;  %11894 = vmatpush3.msra.mxu1 %v7767_v34  ;;  %v10586_v37 = vld [vmem:[%s15468_s7 + $0x10] sm:$0xff] }
 0xcb3   : > { %11935 = vmatprep.subr.mxu1 %v8044_v57  ;;  %v11970_v21 = vpop.f32.mrf.mxu0  ;;  %12036 = vmatpush3.msra.mxu0 %v8754_v29 }
 0xcb4   : > { %12047 = vmatprep.subr.mxu0 %v15762_v54 }
 0xcb5   : > { %11857 = vmatmul.mubr.msk.f32.gmra.mxu1 %vm6538_vm3, %v11844_v24  ;;  %v8291_v3 = vpop.f32.mrf.mxu0 }
 0xcb6   : > { %11859 = vmatprep.mubr.msk.f32.mxu1 %vm6538_vm3, %v7470_v38 }
 0xcb7   : > { %v11973_v58 = vpop.f32.mrf.mxu0 }
 0xcb9   : > { %11860 = vmatmul.mubr.msk.f32.gmra.mxu1 %vm6538_vm3, %v11847_v45  ;;  %v8301_v53 = vpop.f32.mrf.mxu0 }
 0xcba   : > { %11862 = vmatprep.mubr.msk.f32.mxu1 %vm6538_vm3, %v7480_v50 }
 0xcbb   : > { %v11976_v20 = vpop.f32.mrf.mxu0 }
 0xcbd   : > { %11863 = vmatmul.mubr.msk.f32.gmra.mxu1 %vm6538_vm3, %v11850_v7  ;;  %v8311_v62 = vpop.f32.mrf.mxu0 }
 0xcbe   : > { %11895 = vmatprep.mubr.msk.f32.mxu1 %vm6538_vm3, %v7727_v4 }
 0xcbf   : > { %v12009_v27 = vpop.f32.mrf.mxu0 }
 0xcc1   : > { %11896 = vmatmul.mubr.msk.f32.vlgmr.msra.gmra.mxu1 %vm6538_vm3, %v11883_v47  ;;  %v8558_v9 = vpop.f32.mrf.mxu0 }
 0xcc2   : > { %11898 = vmatprep.mubr.msk.f32.mxu1 %vm6538_vm3, %v7737_v11  ;;  %11936 = vmatpush3.msra.mxu1 %v8044_v57 }
 0xcc3   : > { %11977 = vmatprep.subr.mxu1 %v8321_v31  ;;  %v12012_v8 = vpop.f32.mrf.mxu0 }
 0xcc5   : > { %11899 = vmatmul.mubr.msk.f32.gmra.mxu1 %vm6538_vm3, %v11886_v28  ;;  %v8568_v13 = vpop.f32.mrf.mxu0 }
 0xcc6   : > { %11901 = vmatprep.mubr.msk.f32.mxu1 %vm6538_vm3, %v7747_v44 }
 0xcc7   : > { %v12015_v25 = vpop.f32.mrf.mxu0 }
 0xcc9   : > { %11902 = vmatmul.mubr.msk.f32.gmra.mxu1 %vm6538_vm3, %v11889_v59  ;;  %v8578_v39 = vpop.f32.mrf.mxu0 }
 0xcca   : > { %11904 = vmatprep.mubr.msk.f32.mxu1 %vm6538_vm3, %v7757_v32 }
 0xccb   : > { %v12018_v51 = vpop.f32.mrf.mxu0 }
 0xccd   : > { %11905 = vmatmul.mubr.msk.f32.gmra.mxu1 %vm6538_vm3, %v11892_v19  ;;  %v8588_v1 = vpop.f32.mrf.mxu0 }
 0xcce   : > { %11937 = vmatprep.mubr.msk.f32.mxu1 %vm6538_vm3, %v8004_v6 }
 0xcd1   : > { %11938 = vmatmul.mubr.msk.f32.vlgmr.msra.gmra.mxu1 %vm6538_vm3, %v11925_v36 }
 0xcd2   : > { %11940 = vmatprep.mubr.msk.f32.mxu1 %vm6538_vm3, %v8014_v46  ;;  %11978 = vmatpush3.msra.mxu1 %v8321_v31 }
 0xcd3   : > { %12019 = vmatprep.subr.mxu1 %v8598_v0 }
 0xcd5   : > { %11941 = vmatmul.mubr.msk.f32.gmra.mxu1 %vm6538_vm3, %v11928_v42 }
 0xcd6   : > { %11943 = vmatprep.mubr.msk.f32.mxu1 %vm6538_vm3, %v8024_v55 }
 0xcd9   : > { %11944 = vmatmul.mubr.msk.f32.gmra.mxu1 %vm6538_vm3, %v11931_v10 }
 0xcda   : > { %11946 = vmatprep.mubr.msk.f32.mxu1 %vm6538_vm3, %v8034_v17 }
 0xcdd   : > { %11947 = vmatmul.mubr.msk.f32.gmra.mxu1 %vm6538_vm3, %v11934_v14 }
 0xcde   : > { %11979 = vmatprep.mubr.msk.f32.mxu1 %vm6538_vm3, %v8281_v41 }
 0xce1   : > { %11980 = vmatmul.mubr.msk.f32.vlgmr.msra.gmra.mxu1 %vm6538_vm3, %v11967_v18 }
 0xce2   : > { %11982 = vmatprep.mubr.msk.f32.mxu1 %vm6538_vm3, %v8291_v3  ;;  %12020 = vmatpush3.msra.mxu1 %v8598_v0 }
 0xce3   : > { %12040 = vmatprep.subr.mxu1 %v15762_v54 }
 0xce5   : > { %11983 = vmatmul.mubr.msk.f32.gmra.mxu1 %vm6538_vm3, %v11970_v21 }
 0xce6   : > { %11985 = vmatprep.mubr.msk.f32.mxu1 %vm6538_vm3, %v8301_v53 }
 0xce9   : > { %11986 = vmatmul.mubr.msk.f32.gmra.mxu1 %vm6538_vm3, %v11973_v58 }
 0xcea   : > { %11988 = vmatprep.mubr.msk.f32.mxu1 %vm6538_vm3, %v8311_v62 }
 0xced   : > { %11989 = vmatmul.mubr.msk.f32.gmra.mxu1 %vm6538_vm3, %v11976_v20 }
 0xcee   : > { %12021 = vmatprep.mubr.msk.f32.mxu1 %vm6538_vm3, %v8558_v9 }
 0xcf1   : > { %12022 = vmatmul.mubr.msk.f32.vlgmr.msra.gmra.mxu1 %vm6538_vm3, %v12009_v27 }
 0xcf2   : > { %12024 = vmatprep.mubr.msk.f32.mxu1 %vm6538_vm3, %v8568_v13  ;;  %12041 = vmatpush3.msra.mxu1 %v10587_v43 }
 0xcf3   : > { %12042 = vmatprep.subr.mxu1 %v15762_v54 }
 0xcf4   : > { %12043 = vmatpush3.msra.mxu1 %v10586_v37 }
 0xcf5   : > { %12025 = vmatmul.mubr.msk.f32.gmra.mxu1 %vm6538_vm3, %v12012_v8  ;;  %12054 = vmatprep.subr.mxu1 %v15762_v54 }
 0xcf6   : > { %12027 = vmatprep.mubr.msk.f32.mxu1 %vm6538_vm3, %v8578_v39 }
 0xcf9   : > { %12028 = vmatmul.mubr.msk.f32.gmra.mxu1 %vm6538_vm3, %v12015_v25 }
 0xcfa   : > { %12030 = vmatprep.mubr.msk.f32.mxu1 %vm6538_vm3, %v8588_v1 }
 0xcfd   : > { %12031 = vmatmul.mubr.msk.f32.gmra.mxu1 %vm6538_vm3, %v12018_v51 }
 0xcfe   : > { %12044 = vmatprep.mubr.msk.f32.mxu1 %vm12592_vm4, %v15762_v54 }
 0xd31   : > { %v11715_v15 = vpop.f32.mrf.mxu1 }
 0xd33   : > { %v6629_v52 = vpop.f32.mrf.mxu1 }
 0xd35   : > { %v11718_v5 = vpop.f32.mrf.mxu1 }
 0xd37   : > { %v6639_v40 = vpop.f32.mrf.mxu1 }
 0xd39   : > { %v11721_v60 = vpop.f32.mrf.mxu1 }
 0xd3b   : > { %v6649_v33 = vpop.f32.mrf.mxu1 }
 0xd3d   : > { %v11724_v12 = vpop.f32.mrf.mxu1 }
 0xd3f   : > { %v6659_v63 = vpop.f32.mrf.mxu1 }
 0xd41   : > { %v11729_v35 = vpop.f32.mrf.mxu1 }
 0xd42   : > { %v6764_v23 = vadd.f32 %v11729_v35, %v11715_v15 }
 0xd43   : > { %v6758_v22 = vpop.f32.mrf.mxu1 }
 0xd44   : > { %v6759_v16 = vadd.f32 %v6758_v22, %v6629_v52 }
 0xd45   : > { %v11732_v56 = vpop.f32.mrf.mxu1 }
 0xd46   : > { %v6774_v49 = vadd.f32 %v11732_v56, %v11718_v5 }
 0xd47   : > { %v6768_v2 = vpop.f32.mrf.mxu1 }
 0xd48   : > { %v6769_v48 = vadd.f32 %v6768_v2, %v6639_v40 }
 0xd49   : > { %v11735_v26 = vpop.f32.mrf.mxu1 }
 0xd4a   : > { %v6784_v24 = vadd.f32 %v11735_v26, %v11721_v60 }
 0xd4b   : > { %v6778_v45 = vpop.f32.mrf.mxu1 }
 0xd4c   : > { %v6779_v38 = vadd.f32 %v6778_v45, %v6649_v33 }
 0xd4d   : > { %v11738_v7 = vpop.f32.mrf.mxu1 }
 0xd4e   : > { %v6794_v50 = vadd.f32 %v11738_v7, %v11724_v12 }
 0xd4f   : > { %v6788_v47 = vpop.f32.mrf.mxu1 }
 0xd50   : > { %v6789_v30 = vadd.f32 %v6788_v47, %v6659_v63 }
 0xd51   : > { %v11771_v4 = vpop.f32.mrf.mxu1 }
 0xd52   : > { %v7067_v28 = vadd.f32 %v11771_v4, %v6764_v23 }
 0xd53   : > { %v7027_v11 = vpop.f32.mrf.mxu1 }
 0xd54   : > { %v7066_v59 = vadd.f32 %v7027_v11, %v6759_v16 }
 0xd55   : > { %v11774_v44 = vpop.f32.mrf.mxu1 }
 0xd56   : > { %v7069_v19 = vadd.f32 %v11774_v44, %v6774_v49 }
 0xd57   : > { %v7037_v32 = vpop.f32.mrf.mxu1 }
 0xd58   : > { %v7068_v36 = vadd.f32 %v7037_v32, %v6769_v48 }
 0xd59   : > { %v11777_v34 = vpop.f32.mrf.mxu1 }
 0xd5a   : > { %v7071_v6 = vadd.f32 %v11777_v34, %v6784_v24 }
 0xd5b   : > { %v7047_v42 = vpop.f32.mrf.mxu1 }
 0xd5c   : > { %v7070_v46 = vadd.f32 %v7047_v42, %v6779_v38 }
 0xd5d   : > { %v11780_v10 = vpop.f32.mrf.mxu1 }
 0xd5e   : > { %v7073_v55 = vadd.f32 %v11780_v10, %v6794_v50 }
 0xd5f   : > { %v7057_v57 = vpop.f32.mrf.mxu1 }
 0xd60   : > { %v7072_v14 = vadd.f32 %v7057_v57, %v6789_v30 }
 0xd61   : > { %v11813_v17 = vpop.f32.mrf.mxu1 }
 0xd62   : > { %v7344_v18 = vadd.f32 %v11813_v17, %v7067_v28 }
 0xd63   : > { %v7304_v41 = vpop.f32.mrf.mxu1 }
 0xd64   : > { %v7343_v31 = vadd.f32 %v7304_v41, %v7066_v59 }
 0xd65   : > { %v11816_v21 = vpop.f32.mrf.mxu1 }
 0xd66   : > { %v7346_v3 = vadd.f32 %v11816_v21, %v7069_v19 }
 0xd67   : > { %v7314_v58 = vpop.f32.mrf.mxu1 }
 0xd68   : > { %v7345_v53 = vadd.f32 %v7314_v58, %v7068_v36 }
 0xd69   : > { %v11819_v0 = vpop.f32.mrf.mxu1 }
 0xd6a   : > { %v7348_v20 = vadd.f32 %v11819_v0, %v7071_v6 }
 0xd6b   : > { %v7324_v62 = vpop.f32.mrf.mxu1 }
 0xd6c   : > { %v7347_v27 = vadd.f32 %v7324_v62, %v7070_v46 }
 0xd6d   : > { %v11822_v9 = vpop.f32.mrf.mxu1 }
 0xd6e   : > { %v7350_v8 = vadd.f32 %v11822_v9, %v7073_v55 }
 0xd6f   : > { %v7334_v13 = vpop.f32.mrf.mxu1 }
 0xd70   : > { %v7349_v25 = vadd.f32 %v7334_v13, %v7072_v14 }
 0xd71   : > { %v11855_v39 = vpop.f32.mrf.mxu1 }
 0xd72   : > { %v7621_v51 = vadd.f32 %v11855_v39, %v7344_v18 }
 0xd73   : > { %v7581_v1 = vpop.f32.mrf.mxu1 }
 0xd74   : > { %v7620_v15 = vadd.f32 %v7581_v1, %v7343_v31 }
 0xd75   : > { %v11858_v52 = vpop.f32.mrf.mxu1 }
 0xd76   : > { %v7623_v5 = vadd.f32 %v11858_v52, %v7346_v3 }
 0xd77   : > { %v7591_v40 = vpop.f32.mrf.mxu1 }
 0xd78   : > { %v7622_v60 = vadd.f32 %v7591_v40, %v7345_v53 }
 0xd79   : > { %v11861_v33 = vpop.f32.mrf.mxu1 }
 0xd7a   : > { %v7625_v12 = vadd.f32 %v11861_v33, %v7348_v20 }
 0xd7b   : > { %v7601_v63 = vpop.f32.mrf.mxu1 }
 0xd7c   : > { %v7624_v62 = vadd.f32 %v7601_v63, %v7347_v27 }
 0xd7d   : > { %v11864_v35 = vpop.f32.mrf.mxu1 }
 0xd7e   : > { %v7627_v23 = vadd.f32 %v11864_v35, %v7350_v8 }
 0xd7f   : > { %v7611_v22 = vpop.f32.mrf.mxu1 }
 0xd80   : > { %v7626_v8 = vadd.f32 %v7611_v22, %v7349_v25 }
 0xd81   : > { %v11897_v16 = vpop.f32.mrf.mxu1 }
 0xd82   : > { %v7898_v56 = vadd.f32 %v11897_v16, %v7621_v51 }
 0xd83   : > { %v7858_v49 = vpop.f32.mrf.mxu1 }
 0xd84   : > { %v7897_v55 = vadd.f32 %v7858_v49, %v7620_v15 }
 0xd85   : > { %v11900_v2 = vpop.f32.mrf.mxu1 }
 0xd86   : > { %v7900_v48 = vadd.f32 %v11900_v2, %v7623_v5 }
 0xd87   : > { %v7868_v61 = vpop.f32.mrf.mxu1 }
 0xd88   : > { %v7899_v57 = vadd.f32 %v7868_v61, %v7622_v60 }
 0xd89   : > { %v11903_v29 = vpop.f32.mrf.mxu1 }
 0xd8a   : > { %v7902_v43 = vadd.f32 %v11903_v29, %v7625_v12 }
 0xd8b   : > { %v7878_v26 = vpop.f32.mrf.mxu1 }
 0xd8c   : > { %v7901_v1 = vadd.f32 %v7878_v26, %v7624_v62  ;;  %v10620_v62 = vld [vmem:[%s15468_s7 + $0xc8] sm:$0xff] }
 0xd8d   : > { %v11906_v24 = vpop.f32.mrf.mxu1 }
 0xd8e   : > { %v7904_v37 = vadd.f32 %v11906_v24, %v7627_v23 }
 0xd8f   : > { %v7888_v45 = vpop.f32.mrf.mxu1 }
 0xd90   : > { %v7903_v52 = vadd.f32 %v7888_v45, %v7626_v8  ;;  %v10619_v8 = vld [vmem:[%s15468_s7 + $0xc0] sm:$0xff] }
 0xd91   : > { %v11939_v38 = vpop.f32.mrf.mxu1 }
 0xd92   : > { %v8175_v7 = vadd.f32 %v11939_v38, %v7898_v56  ;;  %v10590_v38 = vld [vmem:[%s15468_s7 + $0x28] sm:$0xff] }
 0xd93   : > { %v8135_v50 = vpop.f32.mrf.mxu1 }
 0xd94   : > { %v8174_v18 = vadd.f32 %v8135_v50, %v7897_v55  ;;  %v10589_v50 = vld [vmem:[%s15468_s7 + $0x20] sm:$0xff] }
 0xd95   : > { %v11942_v47 = vpop.f32.mrf.mxu1 }
 0xd96   : > { %v8177_v14 = vadd.f32 %v11942_v47, %v7900_v48  ;;  %v10593_v47 = vld [vmem:[%s15468_s7 + $0x38] sm:$0xff] }
 0xd97   : > { %v8145_v30 = vpop.f32.mrf.mxu1 }
 0xd98   : > { %v8176_v41 = vadd.f32 %v8145_v30, %v7899_v57  ;;  %v10608_v57 = vld [vmem:[%s15468_s7 + $0x88] sm:$0xff] }
 0xd99   : > { %v11945_v4 = vpop.f32.mrf.mxu1 }
 0xd9a   : > { %v8179_v5 = vadd.f32 %v11945_v4, %v7902_v43  ;;  %v10584_v43 = vld [vmem:[#allocation10] ss:$0 sm:$0xff]  ;;  %v10592_v4 = vld [vmem:[%s15468_s7 + $0x30] sm:$0xff] }
 0xd9b   : > { %v8155_v28 = vpop.f32.mrf.mxu1 }
 0xd9c   : > { %v8178_v12 = vadd.f32 %v8155_v28, %v7901_v1  ;;  %v10596_v28 = vld [vmem:[%s15468_s7 + $0x48] sm:$0xff] }
 0xd9d   : > { %v11948_v11 = vpop.f32.mrf.mxu1  ;;  %v10626_v1 = vld [vmem:[%s15468_s7 + $0xe8] sm:$0xff] }
 0xd9e   : > { %v8181_v40 = vadd.f32 %v11948_v11, %v7904_v37 }
 0xd9f   : > { %v8165_v59 = vpop.f32.mrf.mxu1 }
 0xda0   : > { %v8180_v35 = vadd.f32 %v8165_v59, %v7903_v52  ;;  %v10595_v59 = vld [vmem:[%s15468_s7 + $0x40] sm:$0xff] }
 0xda1   : > { %v11981_v44 = vpop.f32.mrf.mxu1  ;;  %v10625_v52 = vld [vmem:[%s15468_s7 + $0xe0] sm:$0xff] }
 0xda2   : > { %v8452_v31 = vadd.f32 %v11981_v44, %v8175_v7  ;;  %v10599_v44 = vld [vmem:[%s15468_s7 + $0x58] sm:$0xff] }
 0xda3   : > { %v8412_v19 = vpop.f32.mrf.mxu1 }
 0xda4   : > { %v8451_v58 = vadd.f32 %v8412_v19, %v8174_v18  ;;  %v10611_v18 = vld [vmem:[%s15468_s7 + $0x98] sm:$0xff] }
 0xda5   : > { %v11984_v32 = vpop.f32.mrf.mxu1 }
 0xda6   : > { %v8454_v21 = vadd.f32 %v11984_v32, %v8177_v14  ;;  %v10598_v32 = vld [vmem:[%s15468_s7 + $0x50] sm:$0xff] }
 0xda7   : > { %v8422_v36 = vpop.f32.mrf.mxu1 }
 0xda8   : > { %v8453_v53 = vadd.f32 %v8422_v36, %v8176_v41  ;;  %v10602_v36 = vld [vmem:[%s15468_s7 + $0x68] sm:$0xff] }
 0xda9   : > { %v11987_v34 = vpop.f32.mrf.mxu1 }
 0xdaa   : > { %v8456_v23 = vadd.f32 %v11987_v34, %v8179_v5  ;;  %v10629_v5 = vld [vmem:[%s15468_s7 + $0xf8] sm:$0xff] }
 0xdab   : > { %v8432_v6 = vpop.f32.mrf.mxu1 }
 0xdac   : > { %v8455_v49 = vadd.f32 %v8432_v6, %v8178_v12  ;;  %v10601_v6 = vld [vmem:[%s15468_s7 + $0x60] sm:$0xff]  ;;  %v8753_v12 = vld [vmem:[#allocation11] sm:$0x1] }
 0xdad   : > { %v11990_v42 = vpop.f32.mrf.mxu1 }
 0xdae   : > { %v8458_v16 = vadd.f32 %v11990_v42, %v8181_v40  ;;  %v10605_v42 = vld [vmem:[%s15468_s7 + $0x78] sm:$0xff] }
 0xdaf   : > { %v8442_v46 = vpop.f32.mrf.mxu1 }
 0xdb0   : > { %v8457_v2 = vadd.f32 %v8442_v46, %v8180_v35 }
 0xdb1   : > { %v12023_v10 = vpop.f32.mrf.mxu1 }
 0xdb2   : > { %v8729_v0 = vadd.f32 %v12023_v10, %v8452_v31  ;;  %v10604_v10 = vld [vmem:[%s15468_s7 + $0x70] sm:$0xff] }
 0xdb3   : > { %v8689_v17 = vpop.f32.mrf.mxu1  ;;  %v10610_v31 = vld [vmem:[%s15468_s7 + $0x90] sm:$0xff] }
 0xdb4   : > { %v8728_v13 = vadd.f32 %v8689_v17, %v8451_v58  ;;  %v10607_v17 = vld [vmem:[%s15468_s7 + $0x80] sm:$0xff] }
 0xdb5   : > { %v12026_v3 = vpop.f32.mrf.mxu1  ;;  %v10613_v58 = vld [vmem:[%s15468_s7 + $0xa0] sm:$0xff] }
 0xdb6   : > { %v8731_v20 = vadd.f32 %v12026_v3, %v8454_v21  ;;  %v10614_v21 = vld [vmem:[%s15468_s7 + $0xa8] sm:$0xff] }
 0xdb7   : > { %v8699_v9 = vpop.f32.mrf.mxu1 }
 0xdb8   : > { %v8737_v39 = vmax.f32 %v8729_v0, %v8731_v20  ;;  %v8730_v51 = vadd.f32 %v8699_v9, %v8453_v53  ;;  %v10617_v53 = vld [vmem:[%s15468_s7 + $0xb8] sm:$0xff]  ;;  %v10616_v20 = vld [vmem:[%s15468_s7 + $0xb0] sm:$0xff] }
 0xdb9   : > { %v12029_v15 = vpop.f32.mrf.mxu1 }
 0xdba   : > { %v8736_v60 = vmax.f32 %v8728_v13, %v8730_v51  ;;  %v8733_v27 = vadd.f32 %v12029_v15, %v8456_v23  ;;  %v10623_v13 = vld [vmem:[%s15468_s7 + $0xd8] sm:$0xff]  ;;  %v10622_v51 = vld [vmem:[%s15468_s7 + $0xd0] sm:$0xff] }
 0xdbb   : > { %v8709_v33 = vpop.f32.mrf.mxu1 }
 0xdbc   : > { %v8732_v22 = vadd.f32 %v8709_v33, %v8455_v49 }
 0xdbd   : > { %v12032_v56 = vpop.f32.mrf.mxu1 }
 0xdbe   : > { %v8735_v63 = vadd.f32 %v12032_v56, %v8458_v16 }
 0xdbf   : > { %v8719_v25 = vpop.f32.mrf.mxu1 }
 0xdc0   : > { %v8739_v48 = vmax.f32 %v8733_v27, %v8735_v63  ;;  %v8734_v61 = vadd.f32 %v8719_v25, %v8457_v2 }
 0xdc2   : > { %v8741_v29 = vmax.f32 %v8737_v39, %v8739_v48  ;;  %v8738_v26 = vmax.f32 %v8732_v22, %v8734_v61 }
 0xdc4   : > { %v8740_v24 = vmax.f32 %v8736_v60, %v8738_v26  ;;  %v8750_v55 = vadd.f32 %v10584_v43, %v8741_v29  ;;  %v10628_v60 = vld [vmem:[%s15468_s7 + $0xf0] sm:$0xff] }
 0xdc6   : > { %v8749_v37 = vadd.f32 %v10584_v43, %v8740_v24  ;;  %v15332_v41 = vmax.f32 %v8750_v55, 0.0 }
 0xdc8   : > { %v15247_v45 = vmax.f32 %v8749_v37, 0.0  ;;  %v9450_v3 = vrot.slane %v15332_v41, 1  ;;  %v9527_v0 = vrot.slane %v15332_v41, 2  ;;  %v9604_v9 = vrot.slane %v15332_v41, 3 }
 0xdc9   : > { %v9681_v39 = vrot.slane %v15332_v41, 4  ;;  %v9758_v15 = vrot.slane %v15332_v41, 5  ;;  %v9835_v40 = vrot.slane %v15332_v41, 6  ;;  %v9912_v33 = vrot.slane %v15332_v41, 7 }
 0xdca   : > { %12038 = vmatmul.mubr.msk.f32.vlgmr.msra.gmra.mxu0 %vm8756_vm5, %v15247_v45  ;;  %v8834_v7 = vrot.slane %v15247_v45, 1  ;;  %v8911_v30 = vrot.slane %v15247_v45, 2  ;;  %v8988_v11 = vrot.slane %v15247_v45, 3  ;;  %v9065_v19 = vrot.slane %v15247_v45, 4 }
 0xdcb   : > { %12048 = vmatpush3.msra.mxu0 %v10590_v38  ;;  %12051 = vmatprep.mubr.msk.f32.mxu0 %vm12592_vm4, %v15762_v54  ;;  %v9142_v34 = vrot.slane %v15247_v45, 5  ;;  %v9219_v46 = vrot.slane %v15247_v45, 6  ;;  %v9296_v14 = vrot.slane %v15247_v45, 7 }
 0xdcc   : > { %12045 = vmatmul.mubr.msk.f32.vlgmr.msra.gmra.mxu1 %vm8756_vm5, %v8834_v7  ;;  %12049 = vmatprep.subr.mxu0 %v15762_v54 }
 0xdcd   : > { %12050 = vmatpush3.msra.mxu0 %v10589_v50  ;;  %12055 = vmatpush3.msra.mxu1 %v10593_v47 }
 0xdce   : > { %12052 = vmatmul.mubr.msk.f32.vlgmr.msra.gmra.mxu0 %vm8756_vm5, %v8911_v30  ;;  %12056 = vmatprep.subr.mxu1 %v15762_v54 }
 0xdcf   : > { %12061 = vmatprep.subr.mxu0 %v15762_v54  ;;  %12057 = vmatpush3.msra.mxu1 %v10592_v4 }
 0xdd0   : > { %12058 = vmatprep.mubr.msk.f32.mxu1 %vm12592_vm4, %v15762_v54  ;;  %12062 = vmatpush3.msra.mxu0 %v10596_v28 }
 0xdd1   : > { %12059 = vmatmul.mubr.msk.f32.vlgmr.msra.gmra.mxu1 %vm8756_vm5, %v8988_v11  ;;  %12063 = vmatprep.subr.mxu0 %v15762_v54 }
 0xdd2   : > { %12068 = vmatprep.subr.mxu1 %v15762_v54  ;;  %12064 = vmatpush3.msra.mxu0 %v10595_v59 }
 0xdd3   : > { %12065 = vmatprep.mubr.msk.f32.mxu0 %vm12592_vm4, %v15762_v54  ;;  %12069 = vmatpush3.msra.mxu1 %v10599_v44 }
 0xdd4   : > { %12066 = vmatmul.mubr.msk.f32.vlgmr.msra.gmra.mxu0 %vm8756_vm5, %v9065_v19  ;;  %12070 = vmatprep.subr.mxu1 %v15762_v54 }
 0xdd5   : > { %12075 = vmatprep.subr.mxu0 %v15762_v54  ;;  %12071 = vmatpush3.msra.mxu1 %v10598_v32 }
 0xdd6   : > { %12072 = vmatprep.mubr.msk.f32.mxu1 %vm12592_vm4, %v15762_v54  ;;  %12076 = vmatpush3.msra.mxu0 %v10602_v36 }
 0xdd7   : > { %12073 = vmatmul.mubr.msk.f32.vlgmr.msra.gmra.mxu1 %vm8756_vm5, %v9142_v34  ;;  %12077 = vmatprep.subr.mxu0 %v15762_v54 }
 0xdd8   : > { %12082 = vmatprep.subr.mxu1 %v15762_v54  ;;  %12078 = vmatpush3.msra.mxu0 %v10601_v6 }
 0xdd9   : > { %12079 = vmatprep.mubr.msk.f32.mxu0 %vm12592_vm4, %v15762_v54  ;;  %12083 = vmatpush3.msra.mxu1 %v10605_v42 }
 0xdda   : > { %12080 = vmatmul.mubr.msk.f32.vlgmr.msra.gmra.mxu0 %vm8756_vm5, %v9219_v46  ;;  %12084 = vmatprep.subr.mxu1 %v15762_v54 }
 0xddb   : > { %12089 = vmatprep.subr.mxu0 %v15762_v54  ;;  %12085 = vmatpush3.msra.mxu1 %v10604_v10 }
 0xddc   : > { %12086 = vmatprep.mubr.msk.f32.mxu1 %vm12592_vm4, %v15762_v54  ;;  %12090 = vmatpush3.msra.mxu0 %v10608_v57 }
 0xddd   : > { %12087 = vmatmul.mubr.msk.f32.vlgmr.msra.gmra.mxu1 %vm8756_vm5, %v9296_v14  ;;  %12091 = vmatprep.subr.mxu0 %v15762_v54 }
 0xdde   : > { %12096 = vmatprep.subr.mxu1 %v15762_v54  ;;  %12092 = vmatpush3.msra.mxu0 %v10607_v17 }
 0xddf   : > { %12093 = vmatprep.mubr.msk.f32.mxu0 %vm12592_vm4, %v15762_v54  ;;  %12097 = vmatpush3.msra.mxu1 %v10611_v18 }
 0xde0   : > { %12094 = vmatmul.mubr.msk.f32.vlgmr.msra.gmra.mxu0 %vm8756_vm5, %v15332_v41  ;;  %12098 = vmatprep.subr.mxu1 %v15762_v54 }
 0xde1   : > { %12103 = vmatprep.subr.mxu0 %v15762_v54  ;;  %12099 = vmatpush3.msra.mxu1 %v10610_v31 }
 0xde2   : > { %12100 = vmatprep.mubr.msk.f32.mxu1 %vm12592_vm4, %v15762_v54  ;;  %12104 = vmatpush3.msra.mxu0 %v10614_v21 }
 0xde3   : > { %12101 = vmatmul.mubr.msk.f32.vlgmr.msra.gmra.mxu1 %vm8756_vm5, %v9450_v3  ;;  %12105 = vmatprep.subr.mxu0 %v15762_v54 }
 0xde4   : > { %12110 = vmatprep.subr.mxu1 %v15762_v54  ;;  %12106 = vmatpush3.msra.mxu0 %v10613_v58 }
 0xde5   : > { %12107 = vmatprep.mubr.msk.f32.mxu0 %vm12592_vm4, %v15762_v54  ;;  %12111 = vmatpush3.msra.mxu1 %v10617_v53 }
 0xde6   : > { %12108 = vmatmul.mubr.msk.f32.vlgmr.msra.gmra.mxu0 %vm8756_vm5, %v9527_v0  ;;  %12112 = vmatprep.subr.mxu1 %v15762_v54 }
 0xde7   : > { %12117 = vmatprep.subr.mxu0 %v15762_v54  ;;  %12113 = vmatpush3.msra.mxu1 %v10616_v20 }
 0xde8   : > { %12114 = vmatprep.mubr.msk.f32.mxu1 %vm12592_vm4, %v15762_v54  ;;  %12118 = vmatpush3.msra.mxu0 %v10620_v62 }
 0xde9   : > { %12115 = vmatmul.mubr.msk.f32.vlgmr.msra.gmra.mxu1 %vm8756_vm5, %v9604_v9  ;;  %12119 = vmatprep.subr.mxu0 %v15762_v54 }
 0xdea   : > { %12124 = vmatprep.subr.mxu1 %v15762_v54  ;;  %12120 = vmatpush3.msra.mxu0 %v10619_v8 }
 0xdeb   : > { %12121 = vmatprep.mubr.msk.f32.mxu0 %vm12592_vm4, %v15762_v54  ;;  %12125 = vmatpush3.msra.mxu1 %v10623_v13 }
 0xdec   : > { %12122 = vmatmul.mubr.msk.f32.vlgmr.msra.gmra.mxu0 %vm8756_vm5, %v9681_v39  ;;  %12126 = vmatprep.subr.mxu1 %v15762_v54 }
 0xded   : > { %12131 = vmatprep.subr.mxu0 %v15762_v54  ;;  %12127 = vmatpush3.msra.mxu1 %v10622_v51 }
 0xdee   : > { %12128 = vmatprep.mubr.msk.f32.mxu1 %vm12592_vm4, %v15762_v54  ;;  %12132 = vmatpush3.msra.mxu0 %v10626_v1 }
 0xdef   : > { %12129 = vmatmul.mubr.msk.f32.vlgmr.msra.gmra.mxu1 %vm8756_vm5, %v9758_v15  ;;  %12133 = vmatprep.subr.mxu0 %v15762_v54 }
 0xdf0   : > { %12138 = vmatprep.subr.mxu1 %v15762_v54  ;;  %12134 = vmatpush3.msra.mxu0 %v10625_v52 }
 0xdf1   : > { %12135 = vmatprep.mubr.msk.f32.mxu0 %vm12592_vm4, %v15762_v54  ;;  %12139 = vmatpush3.msra.mxu1 %v10629_v5 }
 0xdf2   : > { %12136 = vmatmul.mubr.msk.f32.vlgmr.msra.gmra.mxu0 %vm8756_vm5, %v9835_v40  ;;  %12140 = vmatprep.subr.mxu1 %v15762_v54 }
 0xdf3   : > { %12141 = vmatpush3.msra.mxu1 %v10628_v60  ;;  %12142 = vmatprep.mubr.msk.f32.mxu1 %vm12592_vm4, %v15762_v54 }
 0xdf4   : > { %12143 = vmatmul.mubr.msk.f32.vlgmr.msra.gmra.mxu1 %vm8756_vm5, %v9912_v33 }
 0xe8a   : > { %v8826_v35 = vpop.f32.mrf.mxu0 }
 0xe8b   : > { %v8830_v23 = vadd.f32 %v8826_v35, %v8753_v12 }
 0xe8c   : > { %v12039_v16 = vpop.f32.mrf.mxu0  ;;  %v8903_v56 = vpop.f32.mrf.mxu1 }
 0xe8d   : > { %v8907_v49 = vadd.f32 %v8903_v56, %v8830_v23 }
 0xe8e   : > { %v12046_v2 = vpop.f32.mrf.mxu1  ;;  %v8980_v27 = vpop.f32.mrf.mxu0 }
 0xe8f   : > { %v8984_v63 = vadd.f32 %v8980_v27, %v8907_v49 }
 0xe90   : > { %v12053_v25 = vpop.f32.mrf.mxu0 }
 0xe91   : > { %v9057_v22 = vpop.f32.mrf.mxu1 }
 0xe92   : > { %v9061_v48 = vadd.f32 %v9057_v22, %v8984_v63 }
 0xe93   : > { %v12060_v61 = vpop.f32.mrf.mxu1 }
 0xe94   : > { %v9134_v29 = vpop.f32.mrf.mxu0 }
 0xe95   : > { %v9138_v26 = vadd.f32 %v9134_v29, %v9061_v48 }
 0xe96   : > { %v12067_v24 = vpop.f32.mrf.mxu0 }
 0xe97   : > { %v9211_v43 = vpop.f32.mrf.mxu1 }
 0xe98   : > { %v9215_v54 = vadd.f32 %v9211_v43, %v9138_v26 }
 0xe99   : > { %v12074_v37 = vpop.f32.mrf.mxu1 }
 0xe9a   : > { %v9288_v45 = vpop.f32.mrf.mxu0 }
 0xe9b   : > { %v9292_v38 = vadd.f32 %v9288_v45, %v9215_v54 }
 0xe9c   : > { %v12081_v7 = vpop.f32.mrf.mxu0 }
 0xe9d   : > { %v9365_v50 = vpop.f32.mrf.mxu1 }
 0xe9e   : > { %v9369_v47 = vadd.f32 %v9365_v50, %v9292_v38 }
 0xe9f   : > { %v12088_v30 = vpop.f32.mrf.mxu1 }
 0xea0   : > { %v9442_v4 = vpop.f32.mrf.mxu0 }
 0xea1   : > { %v9446_v28 = vadd.f32 %v9442_v4, %v9369_v47 }
 0xea2   : > { %v12095_v11 = vpop.f32.mrf.mxu0 }
 0xea3   : > { %v9519_v59 = vpop.f32.mrf.mxu1 }
 0xea4   : > { %v9523_v44 = vadd.f32 %v9519_v59, %v9446_v28 }
 0xea5   : > { %v12102_v19 = vpop.f32.mrf.mxu1 }
 0xea6   : > { %v9596_v32 = vpop.f32.mrf.mxu0 }
 0xea7   : > { %v9600_v36 = vadd.f32 %v9596_v32, %v9523_v44 }
 0xea8   : > { %v12109_v34 = vpop.f32.mrf.mxu0 }
 0xea9   : > { %v9673_v6 = vpop.f32.mrf.mxu1 }
 0xeaa   : > { %v9677_v42 = vadd.f32 %v9673_v6, %v9600_v36 }
 0xeab   : > { %v12116_v46 = vpop.f32.mrf.mxu1 }
 0xeac   : > { %v9750_v10 = vpop.f32.mrf.mxu0 }
 0xead   : > { %v9754_v55 = vadd.f32 %v9750_v10, %v9677_v42 }
 0xeae   : > { %v12123_v57 = vpop.f32.mrf.mxu0 }
 0xeaf   : > { %v9827_v14 = vpop.f32.mrf.mxu1 }
 0xeb0   : > { %v9831_v17 = vadd.f32 %v9827_v14, %v9754_v55 }
 0xeb1   : > { %v12130_v18 = vpop.f32.mrf.mxu1 }
 0xeb2   : > { %v9904_v41 = vpop.f32.mrf.mxu0 }
 0xeb3   : > { %v9908_v31 = vadd.f32 %v9904_v41, %v9831_v17 }
 0xeb4   : > { %v12137_v21 = vpop.f32.mrf.mxu0  ;;  %v9981_v3 = vpop.f32.mrf.mxu1 }
 0xeb5   : > { %v9985_v58 = vadd.f32 %v9981_v3, %v9908_v31 }
 0xeb6   : > { %v12144_v53 = vpop.f32.mrf.mxu1 }
 0xeb7   : > { %9987 = vst.msk [vmem:[%s406_s22] sm:$0x1] %vm9986_vm6, %v9985_v58 }
 0xeb8   : > { %12516 = shalt.err (!%p12513_p11)
}
 0xeb9   : > { %s12517_s21 = scalar_lea.hbm %s15426_s16, 16  ;;  %s12521_s27 = scalar_lea.hbm %s15470_s9, 32 }
 0xeba   : > { %p12518_p0 = scmp.ne.s32.totalorder %s15426_s16, %s12517_s21  ;;  %p12522_p1 = scmp.lt.s32.totalorder %s15426_s16, %s15470_s9 }
 0xebb   : > { %p12523_p3 = scmp.lt.s32.totalorder %s12521_s27, %s12517_s21 }
 0xebc   : > { %p12519_p12 = pnand %p12518_p0, %p12682_p5 }
 0xebd   : > { %p12524_p4 = por %p12523_p3, %p12522_p1 }
 0xebe   : > { %p12520_p10 = pneg %p12519_p12 }
 0xec0   : > { %p12525_p2 = pnand %p12524_p4, %p12520_p10 }
 0xec2   : > { %12528 = shalt.err (!%p12525_p2)
}
 0xec3   : > { %12169 = dma.vmem_to_hbm [thread:$0]  (%p12682_p5), %s10002_s25, 16, %s15426_s16, %s9989_s17  }
 0xec4 PF: > { %p12206_p7 = scmp.ge.s32.totalorder %s12579_s12, 2  ;;  %s10013_s26 = sand.u32 1, %s12567_s30  }
 0xec5   : > { %s10014_s23 = scalar_lea.sflag [#allocation4], %s10013_s26 }
 0xec6   : > { %p12191_p9 = pnand %p12206_p7, %p12686_p6 }
 0xec8   : > { %p12192_p13 = pneg %p12191_p9 }
 0xeca   : > { %12562 = dma.done.wait (%p12192_p13), %s10014_s23, 16  }
 0xecb   : > { %12564 = vsyncadd (%p12192_p13), %s10014_s23, 4294967280  ;;  %s15763_s3 = sld [smem:[#allocation19_spill]]  ;;  %p23_p8 = scmp.ge.s32.totalorder %s12669_s15, 4  }
 0xecc   : > { %s15764_s30 = smov %s12571_s10  ;;  %s15765_s10 = smov %s12575_s11 }
 0xecd   : > { %s15767_s12 = smov %s12669_s15  ;;  %25 = sbr.rel (!%p23_p8) target bundleno = 9 (0x9), region = 163 }
 0xed1   : > { %s15766_s11 = smov %s15763_s3 }
 0xed2   :  { %10018 = vsyncpa [#allocation3], 1 }
 0xed3   :  { %10020 = vsyncpa [#allocation3 + $0x1], 1 }
 0xed4   :  { %10021 = vsyncpa [#allocation6], 1 }
 0xed5   :  { %10022 = vsyncpa [#allocation9], 1 }
 0xed6   :  { %10023 = vsyncpa [#allocation12], 1 }
 0xed7   :  { %10024 = vsyncpa [#allocation4], 1 }
 0xed8   :  { %10026 = vsyncpa [#allocation4 + $0x1], 1 }

</bundles_post_ra>
